<compile_context>
chip_gen: v5e
topology: v5e:2x2
jax: 0.10.0
libtpu: 0.0.40
codegen_flags: <defaults>
</compile_context>

<pallas_src>
import jax
import jax.numpy as jnp
from jax import lax
from jax.experimental import pallas as pl
from jax.experimental.pallas import tpu as pltpu

KERNEL_SIZE = 3
POOL = 2
BN_EPS = 1e-5
VMEM_LIMIT = 32 * 1024 * 1024


def _elu(v):
    # ELU(alpha=1). The negative branch needs expm1-level accuracy near 0;
    # emulate expm1 with a cubic Taylor branch (|v| <= 1/16) + exp(v)-1 elsewhere
    # so we only rely on exp (guaranteed Mosaic lowering). VPU ops are free here.
    v2 = v * v
    em1_near0 = v + 0.5 * v2 + (1.0 / 6.0) * v2 * v
    em1 = jnp.where(v > -0.0625, em1_near0, jnp.exp(v) - 1.0)
    return jnp.where(v > 0.0, v, em1)


def _fused_block_kernel(xe0_ref, xo0_ref, xe1_ref, xo1_ref, w_ref, b_ref,
                        g_ref, beta_ref, o_ref):
    """Conv1d(k=3, valid) + bias + ELU + MaxPool1d(2) + BatchNorm1d (batch stats).

    Channel-major layout with the batch folded into the lane axis:
      x*_ref   : (Cin,  N*Lp)  conv taps (see wrapper)
      w_ref    : (Cout, 3*Cin) flattened weight, w[o, k*Cin + c] = W[o, c, k]
      b/g/beta : (Cout, 1)     conv bias / BN gamma / BN beta
      o_ref    : (Cout, N*Lp)  normalized output
    """
    nlp = xe0_ref.shape[1]  # static: N * Lp

    # im2col stacks. Even pool branch conv[2j] uses taps x[2j], x[2j+1], x[2j+2]
    # = xe0, xo0, xe1; odd branch conv[2j+1] uses x[2j+1], x[2j+2], x[2j+3]
    # = xo0, xe1, xo1. Row concat is sublane-aligned (Cin multiple of 8 here),
    # column concat boundary is N*Lp (multiple of 128): cheap aligned placement.
    stack = jnp.concatenate(
        [jnp.concatenate([xe0_ref[...], xo0_ref[...], xe1_ref[...]], axis=0),
         jnp.concatenate([xo0_ref[...], xe1_ref[...], xo1_ref[...]], axis=0)],
        axis=1)                                              # (3*Cin, 2*N*Lp)

    # One long streaming matmul for both pool branches and the whole batch.
    # Precision is per-op (no global config side effect); see header comment.
    acc = jnp.dot(w_ref[...], stack,
                  preferred_element_type=jnp.float32,
                  precision=lax.Precision.HIGHEST) + b_ref[...]  # (Cout, 2*N*Lp)

    # MaxPool1d(kernel=2, stride=2): max of the two aligned lane halves.
    # ELU is monotonic, so pooling before ELU is exact and halves exp() work.
    pooled = _elu(jnp.maximum(acc[:, :nlp], acc[:, nlp:]))   # (Cout, N*Lp)

    # BatchNorm1d, training-mode batch statistics (biased variance), two-pass.
    mean = jnp.mean(pooled, axis=1, keepdims=True)           # (Cout, 1)
    centered = pooled - mean
    var = jnp.mean(centered * centered, axis=1, keepdims=True)
    scale = g_ref[...] * lax.rsqrt(var + BN_EPS)
    o_ref[...] = centered * scale + beta_ref[...]


@jax.jit
def base_conv_block(x_ncl, w_oik, bias, gamma, beta):
    """x_ncl: (N, Cin, L) PyTorch layout. Returns (N, Cout, (L-2)//2), NCL layout."""
    n, c_in, l_in = x_ncl.shape
    c_out, c_in_w, k = w_oik.shape
    assert k == KERNEL_SIZE and c_in_w == c_in
    l_out = l_in - (KERNEL_SIZE - 1)            # stride=1, padding=0, dilation=1
    l_pool = l_out // POOL                      # MaxPool1d drops a trailing odd elem
    assert l_pool >= 1
    nlp = n * l_pool

    x = x_ncl.astype(jnp.float32)
    # Channel-major (Cin, N, L) so the batch folds into the lane axis, then the
    # four conv taps as exactly-Lp-wide (lane-dense) strided slices:
    #   tap(off)[c, i*Lp + j] = x[i, c, 2j + off],  off in {0,1,2,3}
    # (2*(Lp-1)+3 <= L-1 always, so all taps are in bounds.)
    xt = jnp.transpose(x, (1, 0, 2))            # (Cin, N, L) -- layout plumbing

    def tap(off):
        return xt[:, :, off::2][:, :, :l_pool].reshape(c_in, nlp)

    xe0, xo0, xe1, xo1 = tap(0), tap(1), tap(2), tap(3)

    # w_flat[o, k*Cin + c] = W[o, c, k]  (matches the row order of `stack`)
    w_flat = jnp.transpose(w_oik.astype(jnp.float32), (0, 2, 1)).reshape(
        c_out, KERNEL_SIZE * c_in)
    b2 = bias.astype(jnp.float32).reshape(c_out, 1)
    g2 = gamma.astype(jnp.float32).reshape(c_out, 1)
    beta2 = beta.astype(jnp.float32).reshape(c_out, 1)

    cost = pl.CostEstimate(
        flops=2 * c_out * KERNEL_SIZE * c_in * 2 * nlp + 12 * c_out * nlp,
        transcendentals=c_out * nlp,
        bytes_accessed=4 * (4 * c_in * nlp + c_out * nlp
                            + c_out * (KERNEL_SIZE * c_in + 3)),
    )

    out2d = pl.pallas_call(
        _fused_block_kernel,
        grid=(1,),
        in_specs=[
            pl.BlockSpec((c_in, nlp), lambda i: (0, 0)),
            pl.BlockSpec((c_in, nlp), lambda i: (0, 0)),
            pl.BlockSpec((c_in, nlp), lambda i: (0, 0)),
            pl.BlockSpec((c_in, nlp), lambda i: (0, 0)),
            pl.BlockSpec((c_out, KERNEL_SIZE * c_in), lambda i: (0, 0)),
            pl.BlockSpec((c_out, 1), lambda i: (0, 0)),
            pl.BlockSpec((c_out, 1), lambda i: (0, 0)),
            pl.BlockSpec((c_out, 1), lambda i: (0, 0)),
        ],
        out_specs=pl.BlockSpec((c_out, nlp), lambda i: (0, 0)),
        out_shape=jax.ShapeDtypeStruct((c_out, nlp), jnp.float32),
        compiler_params=pltpu.CompilerParams(
            dimension_semantics=("arbitrary",),
            vmem_limit_bytes=VMEM_LIMIT),
        cost_estimate=cost,
    )(xe0, xo0, xe1, xo1, w_flat, b2, g2, beta2)

    # Back to PyTorch NCL layout: (Cout, N*Lp) -> (N, Cout, Lp).
    return jnp.transpose(out2d.reshape(c_out, n, l_pool), (1, 0, 2))


def _reference(x_ncl, w_oik, bias, gamma, beta):
    """Plain-JAX/XLA reference with identical forward semantics."""
    out = lax.conv_general_dilated(
        x_ncl, w_oik, window_strides=(1,), padding="VALID",
        dimension_numbers=("NCH", "OIH", "NCH"),
        precision=lax.Precision.HIGHEST)
    out = out + bias[None, :, None]
    out = jnp.where(out > 0.0, out, jnp.expm1(out))                    # ELU
    n, c, l_out = out.shape
    lp = l_out // POOL
    out = out[:, :, :lp * POOL].reshape(n, c, lp, POOL).max(axis=-1)   # MaxPool1d(2)
    mean = out.mean(axis=(0, 2), keepdims=True)
    var = ((out - mean) ** 2).mean(axis=(0, 2), keepdims=True)         # biased
    return ((out - mean) * lax.rsqrt(var + BN_EPS) * gamma[None, :, None]
            + beta[None, :, None])


if __name__ == "__main__":
    # Module defaults: channels_in = channels_out = 32, kernel_size = 3.
    # L = 258 -> conv length 256 -> pooled length 128 (lane-dense output).
    N, C_IN, C_OUT, L = 8, 32, 32, 258

    key = jax.random.PRNGKey(0)
    kx, kw, kb, kg, kbt = jax.random.split(key, 5)

    x = jax.random.normal(kx, (N, C_IN, L), dtype=jnp.float32)
    w = 0.1 * jax.random.normal(kw, (C_OUT, C_IN, KERNEL_SIZE), dtype=jnp.float32)
    b = 0.1 * jax.random.normal(kb, (C_OUT,), dtype=jnp.float32)
    gamma = 1.0 + 0.1 * jax.random.normal(kg, (C_OUT,), dtype=jnp.float32)
    beta = 0.1 * jax.random.normal(kbt, (C_OUT,), dtype=jnp.float32)

    out = base_conv_block(x, w, b, gamma, beta)
    jax.block_until_ready(out)

    ref = _reference(x, w, b, gamma, beta)
    lp = (L - (KERNEL_SIZE - 1)) // POOL
    assert out.shape == (N, C_OUT, lp), out.shape
    max_err = float(jnp.max(jnp.abs(out - ref)))
    assert jnp.allclose(out, ref, atol=1e-3, rtol=1e-3), max_err

    print("KERNEL_OK")
</pallas_src>

<mosaic_0001>
module attributes {stable_mosaic.version = 11 : i64} {
  func.func @_fused_block_kernel(%arg0: i32, %arg1: memref<32x1024xf32, #tpu.memory_space<vmem>>, %arg2: memref<32x1024xf32, #tpu.memory_space<vmem>>, %arg3: memref<32x1024xf32, #tpu.memory_space<vmem>>, %arg4: memref<32x1024xf32, #tpu.memory_space<vmem>>, %arg5: memref<32x96xf32, #tpu.memory_space<vmem>>, %arg6: memref<32x1xf32, #tpu.memory_space<vmem>>, %arg7: memref<32x1xf32, #tpu.memory_space<vmem>>, %arg8: memref<32x1xf32, #tpu.memory_space<vmem>>, %arg9: memref<32x1024xf32, #tpu.memory_space<vmem>>) attributes {dimension_semantics = [#tpu.dimension_semantics<arbitrary>], iteration_bounds = array<i64: 1>, scalar_prefetch = 0 : i64, scratch_operands = 0 : i64, tpu.core_type = #tpu.core_type<tc>, window_params = [{pipeline_mode = #tpu.pipeline_mode<synchronous>, transform_indices = @transform_0, window_bounds = array<i64: 32, 1024>}, {pipeline_mode = #tpu.pipeline_mode<synchronous>, transform_indices = @transform_1, window_bounds = array<i64: 32, 1024>}, {pipeline_mode = #tpu.pipeline_mode<synchronous>, transform_indices = @transform_2, window_bounds = array<i64: 32, 1024>}, {pipeline_mode = #tpu.pipeline_mode<synchronous>, transform_indices = @transform_3, window_bounds = array<i64: 32, 1024>}, {pipeline_mode = #tpu.pipeline_mode<synchronous>, transform_indices = @transform_4, window_bounds = array<i64: 32, 96>}, {pipeline_mode = #tpu.pipeline_mode<synchronous>, transform_indices = @transform_5, window_bounds = array<i64: 32, 1>}, {pipeline_mode = #tpu.pipeline_mode<synchronous>, transform_indices = @transform_6, window_bounds = array<i64: 32, 1>}, {pipeline_mode = #tpu.pipeline_mode<synchronous>, transform_indices = @transform_7, window_bounds = array<i64: 32, 1>}, {pipeline_mode = #tpu.pipeline_mode<synchronous>, transform_indices = @transform_8, window_bounds = array<i64: 32, 1024>}]} {
    %c0 = arith.constant 0 : index
    %c0_0 = arith.constant 0 : index
    %0 = vector.load %arg1[%c0, %c0_0] : memref<32x1024xf32, #tpu.memory_space<vmem>>, vector<32x1024xf32>
    %c0_1 = arith.constant 0 : index
    %c0_2 = arith.constant 0 : index
    %1 = vector.load %arg2[%c0_1, %c0_2] : memref<32x1024xf32, #tpu.memory_space<vmem>>, vector<32x1024xf32>
    %c0_3 = arith.constant 0 : index
    %c0_4 = arith.constant 0 : index
    %2 = vector.load %arg3[%c0_3, %c0_4] : memref<32x1024xf32, #tpu.memory_space<vmem>>, vector<32x1024xf32>
    %3 = tpu.concatenate %0, %1, %2 in 0 : vector<32x1024xf32>, vector<32x1024xf32>, vector<32x1024xf32> -> vector<96x1024xf32>
    %c0_5 = arith.constant 0 : index
    %c0_6 = arith.constant 0 : index
    %4 = vector.load %arg2[%c0_5, %c0_6] : memref<32x1024xf32, #tpu.memory_space<vmem>>, vector<32x1024xf32>
    %c0_7 = arith.constant 0 : index
    %c0_8 = arith.constant 0 : index
    %5 = vector.load %arg3[%c0_7, %c0_8] : memref<32x1024xf32, #tpu.memory_space<vmem>>, vector<32x1024xf32>
    %c0_9 = arith.constant 0 : index
    %c0_10 = arith.constant 0 : index
    %6 = vector.load %arg4[%c0_9, %c0_10] : memref<32x1024xf32, #tpu.memory_space<vmem>>, vector<32x1024xf32>
    %7 = tpu.concatenate %4, %5, %6 in 0 : vector<32x1024xf32>, vector<32x1024xf32>, vector<32x1024xf32> -> vector<96x1024xf32>
    %8 = tpu.concatenate %3, %7 in 1 : vector<96x1024xf32>, vector<96x1024xf32> -> vector<96x2048xf32>
    %c0_11 = arith.constant 0 : index
    %c0_12 = arith.constant 0 : index
    %9 = vector.load %arg5[%c0_11, %c0_12] : memref<32x96xf32, #tpu.memory_space<vmem>>, vector<32x96xf32>
    %cst = arith.constant dense<0.000000e+00> : vector<32x2048xf32>
    %10 = tpu.matmul %9, %8, %cst {dimension_numbers = #tpu.dot_dimension_numbers<[1], [0], [0], [1], [0, 0, 1, 1], [], []>, precision = #tpu.contract_precision<fp32>} : vector<32x96xf32>, vector<96x2048xf32>, vector<32x2048xf32> -> vector<32x2048xf32>
    %c0_13 = arith.constant 0 : index
    %c0_14 = arith.constant 0 : index
    %11 = vector.load %arg6[%c0_13, %c0_14] : memref<32x1xf32, #tpu.memory_space<vmem>>, vector<32x1xf32>
    %12 = vector.broadcast %11 : vector<32x1xf32> to vector<32x2048xf32>
    %13 = arith.addf %10, %12 : vector<32x2048xf32>
    %14 = vector.extract_strided_slice %13 {offsets = [0, 0], sizes = [32, 1024], strides = [1, 1]} : vector<32x2048xf32> to vector<32x1024xf32>
    %15 = vector.extract_strided_slice %13 {offsets = [0, 1024], sizes = [32, 1024], strides = [1, 1]} : vector<32x2048xf32> to vector<32x1024xf32>
    %16 = arith.maximumf %14, %15 : vector<32x1024xf32>
    %17 = arith.mulf %16, %16 : vector<32x1024xf32>
    %cst_15 = arith.constant 5.000000e-01 : f32
    %18 = vector.broadcast %cst_15 : f32 to vector<32x1024xf32>
    %19 = arith.mulf %18, %17 : vector<32x1024xf32>
    %20 = arith.addf %16, %19 : vector<32x1024xf32>
    %cst_16 = arith.constant 0.166666672 : f32
    %21 = vector.broadcast %cst_16 : f32 to vector<32x1024xf32>
    %22 = arith.mulf %21, %17 : vector<32x1024xf32>
    %23 = arith.mulf %22, %16 : vector<32x1024xf32>
    %24 = arith.addf %20, %23 : vector<32x1024xf32>
    %cst_17 = arith.constant -6.250000e-02 : f32
    %25 = vector.broadcast %cst_17 : f32 to vector<32x1024xf32>
    %26 = arith.cmpf ogt, %16, %25 : vector<32x1024xf32>
    %27 = math.exp %16 : vector<32x1024xf32>
    %cst_18 = arith.constant 1.000000e+00 : f32
    %28 = vector.broadcast %cst_18 : f32 to vector<32x1024xf32>
    %29 = arith.subf %27, %28 : vector<32x1024xf32>
    %30 = arith.select %26, %24, %29 : vector<32x1024xi1>, vector<32x1024xf32>
    %cst_19 = arith.constant 0.000000e+00 : f32
    %31 = vector.broadcast %cst_19 : f32 to vector<32x1024xf32>
    %32 = arith.cmpf ogt, %16, %31 : vector<32x1024xf32>
    %33 = arith.select %32, %16, %30 : vector<32x1024xi1>, vector<32x1024xf32>
    %cst_20 = arith.constant dense<0.000000e+00> : vector<32xf32>
    %34 = vector.multi_reduction <add>, %33, %cst_20 [1] : vector<32x1024xf32> to vector<32xf32>
    %35 = vector.shape_cast %34 : vector<32xf32> to vector<32x1xf32>
    %cst_21 = arith.constant 1.024000e+03 : f32
    %36 = vector.broadcast %cst_21 : f32 to vector<32x1xf32>
    %37 = arith.divf %35, %36 : vector<32x1xf32>
    %38 = vector.broadcast %37 : vector<32x1xf32> to vector<32x1024xf32>
    %39 = arith.subf %33, %38 : vector<32x1024xf32>
    %40 = arith.mulf %39, %39 : vector<32x1024xf32>
    %cst_22 = arith.constant dense<0.000000e+00> : vector<32xf32>
    %41 = vector.multi_reduction <add>, %40, %cst_22 [1] : vector<32x1024xf32> to vector<32xf32>
    %42 = vector.shape_cast %41 : vector<32xf32> to vector<32x1xf32>
    %cst_23 = arith.constant 1.024000e+03 : f32
    %43 = vector.broadcast %cst_23 : f32 to vector<32x1xf32>
    %44 = arith.divf %42, %43 : vector<32x1xf32>
    %c0_24 = arith.constant 0 : index
    %c0_25 = arith.constant 0 : index
    %45 = vector.load %arg7[%c0_24, %c0_25] : memref<32x1xf32, #tpu.memory_space<vmem>>, vector<32x1xf32>
    %cst_26 = arith.constant 9.99999974E-6 : f32
    %46 = vector.broadcast %cst_26 : f32 to vector<32x1xf32>
    %47 = arith.addf %44, %46 : vector<32x1xf32>
    %48 = math.rsqrt %47 : vector<32x1xf32>
    %49 = arith.mulf %45, %48 : vector<32x1xf32>
    %50 = vector.broadcast %49 : vector<32x1xf32> to vector<32x1024xf32>
    %51 = arith.mulf %39, %50 : vector<32x1024xf32>
    %c0_27 = arith.constant 0 : index
    %c0_28 = arith.constant 0 : index
    %52 = vector.load %arg8[%c0_27, %c0_28] : memref<32x1xf32, #tpu.memory_space<vmem>>, vector<32x1xf32>
    %53 = vector.broadcast %52 : vector<32x1xf32> to vector<32x1024xf32>
    %54 = arith.addf %51, %53 : vector<32x1024xf32>
    %c0_29 = arith.constant 0 : index
    %c0_30 = arith.constant 0 : index
    %55 = vector.load %arg9[%c0_29, %c0_30] : memref<32x1024xf32, #tpu.memory_space<vmem>>, vector<32x1024xf32>
    tpu.vector_store %arg9[%c0_29, %c0_30], %54 {strides = array<i32>} : memref<32x1024xf32, #tpu.memory_space<vmem>>, vector<32x1024xf32>,
    return
  }
  func.func @transform_0(%arg0: i32) -> (i32, i32) {
    %c0_i32 = arith.constant 0 : i32
    %c0_i32_0 = arith.constant 0 : i32
    %c0_i32_1 = arith.constant 0 : i32
    return %c0_i32, %c0_i32_0 : i32, i32
  }
  func.func @transform_1(%arg0: i32) -> (i32, i32) {
    %c0_i32 = arith.constant 0 : i32
    %c0_i32_0 = arith.constant 0 : i32
    %c0_i32_1 = arith.constant 0 : i32
    return %c0_i32, %c0_i32_0 : i32, i32
  }
  func.func @transform_2(%arg0: i32) -> (i32, i32) {
    %c0_i32 = arith.constant 0 : i32
    %c0_i32_0 = arith.constant 0 : i32
    %c0_i32_1 = arith.constant 0 : i32
    return %c0_i32, %c0_i32_0 : i32, i32
  }
  func.func @transform_3(%arg0: i32) -> (i32, i32) {
    %c0_i32 = arith.constant 0 : i32
    %c0_i32_0 = arith.constant 0 : i32
    %c0_i32_1 = arith.constant 0 : i32
    return %c0_i32, %c0_i32_0 : i32, i32
  }
  func.func @transform_4(%arg0: i32) -> (i32, i32) {
    %c0_i32 = arith.constant 0 : i32
    %c0_i32_0 = arith.constant 0 : i32
    %c0_i32_1 = arith.constant 0 : i32
    return %c0_i32, %c0_i32_0 : i32, i32
  }
  func.func @transform_5(%arg0: i32) -> (i32, i32) {
    %c0_i32 = arith.constant 0 : i32
    %c0_i32_0 = arith.constant 0 : i32
    %c0_i32_1 = arith.constant 0 : i32
    return %c0_i32, %c0_i32_0 : i32, i32
  }
  func.func @transform_6(%arg0: i32) -> (i32, i32) {
    %c0_i32 = arith.constant 0 : i32
    %c0_i32_0 = arith.constant 0 : i32
    %c0_i32_1 = arith.constant 0 : i32
    return %c0_i32, %c0_i32_0 : i32, i32
  }
  func.func @transform_7(%arg0: i32) -> (i32, i32) {
    %c0_i32 = arith.constant 0 : i32
    %c0_i32_0 = arith.constant 0 : i32
    %c0_i32_1 = arith.constant 0 : i32
    return %c0_i32, %c0_i32_0 : i32, i32
  }
  func.func @transform_8(%arg0: i32) -> (i32, i32) {
    %c0_i32 = arith.constant 0 : i32
    %c0_i32_0 = arith.constant 0 : i32
    %c0_i32_1 = arith.constant 0 : i32
    return %c0_i32, %c0_i32_0 : i32, i32
  }
}

</mosaic_0001>

<bundles_post_ra>
// kernel: base_conv_block.1
= control target key start
LH: loop header
LB: loop body
LE: loop exit
PB: predicated region body
PF: predicated region fallthrough
CT: control target
= control target key end

     0   :  { %vm185_vm0 = vcmask 785408   ;;  %s11885_s2 = inlined_call_operand.vmem [shape: f32[32,1024], index: 2, kind: input, shape index: {}]   ;;  %s11886_s1 = inlined_call_operand.vmem [shape: f32[32,1024], index: 1, kind: input, shape index: {}]   ;;  %s11887_s0 = inlined_call_operand.vmem [shape: f32[32,1024], index: 0, kind: input, shape index: {}]   ;;  %s11888_s4 = inlined_call_operand.vmem [shape: f32[32,96], index: 4, kind: input, shape index: {}]   ;;  %s11889_s5 = inlined_call_operand.vmem [shape: f32[32,1], index: 5, kind: input, shape index: {}]   ;;  %s11890_s3 = inlined_call_operand.vmem [shape: f32[32,1024], index: 3, kind: input, shape index: {}]   ;;  %s11891_s7 = inlined_call_operand.vmem [shape: f32[32,1], index: 7, kind: input, shape index: {}]   ;;  %s11892_s6 = inlined_call_operand.vmem [shape: f32[32,1], index: 6, kind: input, shape index: {}]   ;;  %s11893_s8 = inlined_call_operand.vmem [shape: f32[32,1024], index: 8, kind: output, shape index: {}]  }
   0x1   :  { %v117_v0 = vld [vmem:[%s11885_s2 + $0xc0] sm:$0xff]  ;;  %v118_v48 = vld [vmem:[%s11885_s2 + $0xc8] sm:$0xff] }
   0x2   :  { %v109_v1 = vld [vmem:[%s11885_s2 + $0x80] sm:$0xff]  ;;  %v7272_v3 = vand.u32 4294901760, %v117_v0  ;;  %v110_v56 = vld [vmem:[%s11885_s2 + $0x88] sm:$0xff]  ;;  %v7431_v59 = vand.u32 4294901760, %v118_v48 }
   0x3   :  { %v101_v2 = vld [vmem:[%s11885_s2 + $0x40] sm:$0xff]  ;;  %v7274_v4 = vand.u32 4294901760, %v109_v1  ;;  %v158_v60 = vld [vmem:[%s11888_s4 + $0x8] sm:$0xff] }
   0x4   :  { %12315 = vst [vmem:[#allocation2_spill] sm:$0xff] %v7272_v3  ;;  %v7276_v5 = vand.u32 4294901760, %v101_v2  ;;  %v93_v6 = vld [vmem:[%s11885_s2] sm:$0xff]  ;;  %203 = vmatpush.msra.mxu0 %v7272_v3  ;;  %v7301_v14 = vsub.f32 %v117_v0, %v7272_v3  ;;  %418 = vmatpush.msra.mxu3 %v7272_v3 }
   0x5   :  { %12316 = vst [vmem:[#allocation3_spill] sm:$0xff] %v7274_v4  ;;  %v85_v7 = vld [vmem:[%s11886_s1 + $0xc0] sm:$0xff]  ;;  %v7287_v9 = vand.u32 4294901760, %v93_v6  ;;  %v7304_v15 = vsub.f32 %v109_v1, %v7274_v4 }
   0x6   :  { %12317 = vst [vmem:[#allocation4_spill] sm:$0xff] %v7276_v5  ;;  %v77_v8 = vld [vmem:[%s11886_s1 + $0x80] sm:$0xff]  ;;  %v7289_v10 = vand.u32 4294901760, %v85_v7  ;;  %v7308_v16 = vsub.f32 %v101_v2, %v7276_v5  ;;  %205 = vmatpush.msra.mxu0 %v7274_v4  ;;  %358 = vmatpush.msra.mxu2 %v7301_v14  ;;  %v7329_v23 = vand.u32 4294901760, %v7301_v14  ;;  %v7453_v2 = vsub.f32 %v118_v48, %v7431_v59  ;;  %v159_v48 = vld [vmem:[%s11888_s4 + $0x10] sm:$0xff] }
   0x7   :  { %12318 = vst [vmem:[#allocation5_spill] sm:$0xff] %v7287_v9  ;;  %v7291_v11 = vand.u32 4294901760, %v77_v8  ;;  %v69_v12 = vld [vmem:[%s11886_s1 + $0x40] sm:$0xff]  ;;  %v7316_v19 = vsub.f32 %v93_v6, %v7287_v9  ;;  %v7332_v24 = vand.u32 4294901760, %v7304_v15  ;;  %420 = vmatpush.msra.mxu3 %v7274_v4  ;;  %v7455_v6 = vand.u32 4294901760, %v110_v56 }
   0x8   :  { %12319 = vst [vmem:[#allocation6_spill] sm:$0xff] %v7289_v10  ;;  %v61_v13 = vld [vmem:[%s11886_s1] sm:$0xff]  ;;  %v7310_v17 = vand.u32 4294901760, %v69_v12  ;;  %v7319_v20 = vsub.f32 %v85_v7, %v7289_v10  ;;  %v7335_v25 = vand.u32 4294901760, %v7308_v16  ;;  %207 = vmatpush.msra.mxu0 %v7276_v5  ;;  %361 = vmatpush.msra.mxu2 %v7304_v15  ;;  %v266_v30 = vsub.f32 %v7301_v14, %v7329_v23  ;;  %v102_v7 = vld [vmem:[%s11885_s2 + $0x48] sm:$0xff] }
   0x9   :  { %12320 = vst [vmem:[#allocation7_spill] sm:$0xff] %v7291_v11  ;;  %v53_v18 = vld [vmem:[%s11887_s0 + $0xc0] sm:$0xff]  ;;  %v7321_v21 = vand.u32 4294901760, %v61_v13  ;;  %v7324_v22 = vsub.f32 %v77_v8, %v7291_v11  ;;  %v7339_v26 = vand.u32 4294901760, %v7316_v19  ;;  %v272_v31 = vsub.f32 %v7304_v15, %v7332_v24  ;;  %422 = vmatpush.msra.mxu3 %v7276_v5 }
   0xa   :  { %12321 = vst [vmem:[#allocation8_spill] sm:$0xff] %v7301_v14  ;;  %v7341_v27 = vand.u32 4294901760, %v53_v18  ;;  %v7344_v28 = vsub.f32 %v69_v12, %v7310_v17  ;;  %v45_v29 = vld [vmem:[%s11887_s0 + $0x80] sm:$0xff]  ;;  %v278_v32 = vsub.f32 %v7308_v16, %v7335_v25  ;;  %v7358_v33 = vand.u32 4294901760, %v7319_v20  ;;  %209 = vmatpush.msra.mxu0 %v7287_v9  ;;  %364 = vmatpush.msra.mxu2 %v7308_v16 }
   0xb   :  { %12322 = vst [vmem:[#allocation9_spill] sm:$0xff] %v7304_v15  ;;  %v7362_v34 = vand.u32 4294901760, %v7324_v22  ;;  %v7365_v35 = vsub.f32 %v61_v13, %v7321_v21  ;;  %v37_v36 = vld [vmem:[%s11887_s0 + $0x40] sm:$0xff]  ;;  %v7371_v37 = vand.u32 4294901760, %v266_v30  ;;  %v7374_v38 = vand.u32 4294901760, %v272_v31  ;;  %424 = vmatpush.msra.mxu3 %v7287_v9 }
   0xc   :  { %12323 = vst [vmem:[#allocation10_spill] sm:$0xff] %v7308_v16  ;;  %v284_v39 = vsub.f32 %v7316_v19, %v7339_v26  ;;  %v7378_v40 = vand.u32 4294901760, %v45_v29  ;;  %v157_v41 = vld [vmem:[%s11888_s4] sm:$0xff]  ;;  %v7385_v42 = vand.u32 4294901760, %v7344_v28  ;;  %v7388_v43 = vsub.f32 %v53_v18, %v7341_v27  ;;  %211 = vmatpush.msra.mxu0 %v7289_v10  ;;  %367 = vmatpush.msra.mxu2 %v7316_v19 }
   0xd   :  { %12324 = vst [vmem:[#allocation11_spill] sm:$0xff] %v7310_v17  ;;  %v29_v44 = vld [vmem:[%s11887_s0] sm:$0xff]  ;;  %268 = vmatpush.msra.mxu1 %v7371_v37  ;;  %v7395_v45 = vand.u32 4294901760, %v278_v32  ;;  %v290_v46 = vsub.f32 %v7319_v20, %v7358_v33  ;;  %v7399_v47 = vand.u32 4294901760, %v37_v36  ;;  %426 = vmatpush.msra.mxu3 %v7289_v10  ;;  %v296_v49 = vsub.f32 %v7324_v22, %v7362_v34 }
   0xe   :  { %12325 = vst [vmem:[#allocation12_spill] sm:$0xff] %v7316_v19  ;;  %v7409_v50 = vand.u32 4294901760, %v7365_v35  ;;  %v187_v51 = vsel %vm185_vm0, %v157_v41, 0  ;;  %213 = vmatpush.msra.mxu0 %v7291_v11  ;;  %v7414_v52 = vand.u32 4294901760, %v284_v39  ;;  %v7416_v53 = vand.u32 4294901760, %v29_v44  ;;  %370 = vmatpush.msra.mxu2 %v7319_v20 }
   0xf   :  { %12326 = vst [vmem:[#allocation13_spill] sm:$0xff] %v7319_v20  ;;  %274 = vmatpush.msra.mxu1 %v7374_v38  ;;  %v7419_v54 = vsub.f32 %v45_v29, %v7378_v40  ;;  %v7421_v55 = vand.u32 4294901760, %v187_v51  ;;  %428 = vmatpush.msra.mxu3 %v7291_v11  ;;  %v302_v57 = vsub.f32 %v7344_v28, %v7385_v42  ;;  %v11894_v58 = vand.u32 4294901760, %v7388_v43  ;;  %v94_v29 = vld [vmem:[%s11885_s2 + $0x8] sm:$0xff] }
  0x10   :  { %12327 = vst [vmem:[#allocation14_spill] sm:$0xff] %v7321_v21  ;;  %215 = vmatpush.msra.mxu0 %v7310_v17  ;;  %v7438_v61 = vand.u32 4294901760, %v290_v46  ;;  %v7444_v63 = vsub.f32 %v37_v36, %v7399_v47  ;;  %373 = vmatpush.msra.mxu2 %v7324_v22  ;;  %v7447_v0 = vand.u32 4294901760, %v296_v49  ;;  %v308_v1 = vsub.f32 %v7365_v35, %v7409_v50 }
  0x11   :  { %12328 = vst [vmem:[#allocation15_spill] sm:$0xff] %v7324_v22  ;;  %280 = vmatpush.msra.mxu1 %v7395_v45  ;;  %v7441_v62 = vsub.f32 %v187_v51, %v7421_v55  ;;  %430 = vmatpush.msra.mxu3 %v7310_v17  ;;  %v11895_v12 = vand.u32 4294901760, %v7419_v54  ;;  %v7467_v13 = vsub.f32 %v29_v44, %v7416_v53  ;;  %v190_v18 = vsel %vm185_vm0, %v158_v60, 0 }
  0x12   :  { %12329 = vst [vmem:[#allocation16_spill] sm:$0xff] %v7329_v23  ;;  %217 = vmatpush.msra.mxu0 %v7321_v21  ;;  %376 = vmatpush.msra.mxu2 %v7344_v28  ;;  %v7474_v30 = vand.u32 4294901760, %v302_v57  ;;  %v314_v31 = vsub.f32 %v7388_v43, %v11894_v58  ;;  %v7480_v32 = vand.u32 4294901760, %v190_v18  ;;  %v7483_v36 = vsub.f32 %v110_v56, %v7455_v6 }
  0x13   :  { %12330 = vst [vmem:[#allocation17_spill] sm:$0xff] %v7332_v24  ;;  %286 = vmatpush.msra.mxu1 %v7414_v52  ;;  %v7463_v8 = vand.u32 4294901760, %v7441_v62  ;;  %432 = vmatpush.msra.mxu3 %v7321_v21  ;;  %v7491_v44 = vand.u32 4294901760, %v7453_v2  ;;  %v7493_v46 = vand.u32 4294901760, %v102_v7  ;;  %v7499_v49 = vand.u32 4294901760, %v308_v1 }
  0x14   :  { %12331 = vst [vmem:[#allocation18_spill] sm:$0xff] %v7335_v25  ;;  %219 = vmatpush.msra.mxu0 %v7341_v27  ;;  %379 = vmatpush.msra.mxu2 %v7365_v35  ;;  %v7503_v51 = vsub.f32 %v190_v18, %v7480_v32  ;;  %v7505_v56 = vand.u32 4294901760, %v94_v29  ;;  %v320_v57 = vsub.f32 %v7419_v54, %v11895_v12  ;;  %v7514_v1 = vand.u32 4294901760, %v7483_v36  ;;  %v86_v18 = vld [vmem:[%s11886_s1 + $0xc8] sm:$0xff] }
  0x15   :  { %12332 = vst [vmem:[#allocation19_spill] sm:$0xff] %v7339_v26  ;;  %292 = vmatpush.msra.mxu1 %v7438_v61  ;;  %v229_v39 = vsub.f32 %v7441_v62, %v7463_v8  ;;  %434 = vmatpush.msra.mxu3 %v7341_v27  ;;  %v7517_v58 = vsub.f32 %v102_v7, %v7493_v46  ;;  %v193_v60 = vsel %vm185_vm0, %v159_v48, 0  ;;  %v315_v7 = vand.u32 4294901760, %v314_v31 }
  0x16   :  { %12333 = vst [vmem:[#allocation20_spill] sm:$0xff] %v7344_v28  ;;  %221 = vmatpush.msra.mxu0 %v7378_v40  ;;  %382 = vmatpush.msra.mxu2 %v7388_v43  ;;  %v7527_v12 = vand.u32 4294901760, %v7503_v51  ;;  %v7537_v28 = vand.u32 4294901760, %v193_v60  ;;  %v7548_v31 = vsub.f32 %v94_v29, %v7505_v56  ;;  %v12365_v22 = vand.u32 4294901760, %v7467_v13 }
  0x17   :  { %12334 = vst [vmem:[#allocation21_spill] sm:$0xff] %v7358_v33  ;;  %298 = vmatpush.msra.mxu1 %v7447_v0  ;;  %v7523_v41 = vand.u32 4294901760, %v229_v39  ;;  %436 = vmatpush.msra.mxu3 %v7378_v40  ;;  %v648_v39 = vsub.f32 %v7453_v2, %v7491_v44  ;;  %v7545_v48 = vand.u32 4294901760, %v7517_v58  ;;  %v654_v20 = vsub.f32 %v7483_v36, %v7514_v1 }
  0x18   :  { %12335 = vst [vmem:[#allocation22_spill] sm:$0xff] %v7362_v34  ;;  %223 = vmatpush.msra.mxu0 %v7399_v47  ;;  %385 = vmatpush.msra.mxu2 %v7419_v54  ;;  %v237_v29 = vsub.f32 %v7503_v51, %v7527_v12  ;;  %v7582_v16 = vand.u32 4294901760, %v7548_v31 }
  0x19   :  { %12336 = vst [vmem:[#allocation23_spill] sm:$0xff] %v7365_v35  ;;  %304 = vmatpush.msra.mxu1 %v7474_v30  ;;  %v12361_v35 = vand.u32 4294901760, %v7444_v63  ;;  %438 = vmatpush.msra.mxu3 %v7399_v47 }
  0x1a   :  { %12337 = vst [vmem:[#allocation24_spill] sm:$0xff] %v7371_v37  ;;  %225 = vmatpush.msra.mxu0 %v7416_v53  ;;  %388 = vmatpush.msra.mxu2 %v7444_v63  ;;  %v7595_v14 = vand.u32 4294901760, %v237_v29  ;;  %v54_v29 = vld [vmem:[%s11887_s0 + $0xc8] sm:$0xff] }
  0x1b   :  { %12338 = vst [vmem:[#allocation25_spill] sm:$0xff] %v7374_v38  ;;  %310 = vmatpush.msra.mxu1 %v7499_v49  ;;  %231 = vmatmul.f32.vlgmr.msra.gmra.mxu0 %v7523_v41  ;;  %v7575_v38 = vand.u32 4294901760, %v648_v39  ;;  %v7589_v39 = vand.u32 4294901760, %v654_v20 }
  0x1c   :  { %12339 = vst [vmem:[#allocation26_spill] sm:$0xff] %v7385_v42  ;;  %440 = vmatpush.msra.mxu3 %v7416_v53  ;;  %391 = vmatpush.msra.mxu2 %v7467_v13 }
  0x1d   :  { %12340 = vst [vmem:[#allocation27_spill] sm:$0xff] %v7395_v45  ;;  %v160_v45 = vld [vmem:[%s11888_s4 + $0x18] sm:$0xff]  ;;  %316 = vmatpush.msra.mxu1 %v315_v7  ;;  %444 = vmatmul.f32.vlgmr.msra.gmra.mxu3 %v7463_v8 }
  0x1e   :  { %12341 = vst [vmem:[#allocation28_spill] sm:$0xff] %v7409_v50  ;;  %v196_v7 = vsel %vm185_vm0, %v160_v45, 0  ;;  %394 = vmatmul.f32.vlgmr.msra.gmra.mxu2 %v7441_v62  ;;  %473 = vmatpush.msrb.mxu0 %v7329_v23  ;;  %v62_v45 = vld [vmem:[%s11886_s1 + $0x8] sm:$0xff] }
  0x1f   :  { %12342 = vst [vmem:[#allocation29_spill] sm:$0xff] %v7414_v52  ;;  %v332_v52 = vsub.f32 %v7467_v13, %v12365_v22  ;;  %v70_v22 = vld [vmem:[%s11886_s1 + $0x48] sm:$0xff]  ;;  %585 = vmatpush.msrb.mxu2 %v7431_v59  ;;  %v7606_v20 = vand.u32 4294901760, %v196_v7  ;;  %650 = vmatpush.msrb.mxu3 %v7575_v38 }
  0x20   :  { %12343 = vst [vmem:[#allocation30_spill] sm:$0xff] %v7431_v59  ;;  %v7591_v15 = vand.u32 4294901760, %v70_v22  ;;  %477 = vmatpush.msrb.mxu0 %v7332_v24 }
  0x21   :  { %12344 = vst [vmem:[#allocation31_spill] sm:$0xff] %v7438_v61  ;;  %v78_v61 = vld [vmem:[%s11886_s1 + $0x88] sm:$0xff]  ;;  %587 = vmatpush.msrb.mxu2 %v7455_v6  ;;  %656 = vmatpush.msrb.mxu3 %v7589_v39  ;;  %v7635_v23 = vsub.f32 %v196_v7, %v7606_v20 }
  0x22   :  { %12345 = vst [vmem:[#allocation32_spill] sm:$0xff] %v7441_v62  ;;  %481 = vmatpush.msrb.mxu0 %v7335_v25 }
  0x23   :  { %12346 = vst [vmem:[#allocation33_spill] sm:$0xff] %v7447_v0  ;;  %v326_v0 = vsub.f32 %v7444_v63, %v12361_v35  ;;  %v7550_v35 = vand.u32 4294901760, %v86_v18  ;;  %239 = vmatmul.f32.gmra.mxu0 %v7595_v14  ;;  %589 = vmatpush.msrb.mxu2 %v7493_v46  ;;  %v7665_v25 = vand.u32 4294901760, %v7635_v23 }
  0x24   :  { %12347 = vst [vmem:[#allocation34_spill] sm:$0xff] %v7453_v2  ;;  %485 = vmatpush.msrb.mxu0 %v7339_v26  ;;  %v11934_v26 = vmov 0  }
  0x25   :  { %12348 = vst [vmem:[#allocation35_spill] sm:$0xff] %v7455_v6  ;;  %v327_v19 = vand.u32 4294901760, %v326_v0  ;;  %v7585_v37 = vsub.f32 %v86_v18, %v7550_v35  ;;  %v333_v0 = vand.u32 4294901760, %v332_v52  ;;  %591 = vmatpush.msrb.mxu2 %v7505_v56  ;;  %450 = vmatmul.f32.gmra.mxu3 %v7527_v12 }
  0x26   :  { %12349 = vst [vmem:[#allocation36_spill] sm:$0xff] %v7463_v8  ;;  %399 = vmatmul.f32.gmra.mxu2 %v7503_v51  ;;  %7139 = vset.pattern.permute.xlu0 %v11934_v26  ;;  %v253_v26 = vsub.f32 %v7635_v23, %v7665_v25 }
  0x27   :  { %12350 = vst [vmem:[#allocation37_spill] sm:$0xff] %v7474_v30  ;;  %v321_v30 = vand.u32 4294901760, %v320_v57  ;;  %v7567_v57 = vsub.f32 %v193_v60, %v7537_v28  ;;  %v660_v60 = vsub.f32 %v7517_v58, %v7545_v48  ;;  %593 = vmatpush.msrb.mxu2 %v7550_v35  ;;  %489 = vmatpush.msrb.mxu0 %v7358_v33 }
  0x28   :  { %12351 = vst [vmem:[#allocation38_spill] sm:$0xff] %v7483_v36 }
  0x29   :  { %12352 = vst [vmem:[#allocation39_spill] sm:$0xff] %v7491_v44  ;;  %322 = vmatpush.msra.mxu1 %v321_v30  ;;  %v7598_v8 = vand.u32 4294901760, %v7567_v57  ;;  %v7611_v52 = vand.u32 4294901760, %v660_v60  ;;  %v666_v30 = vsub.f32 %v7548_v31, %v7582_v16  ;;  %493 = vmatpush.msrb.mxu0 %v7362_v34 }
  0x2a   :  { %12353 = vst [vmem:[#allocation40_spill] sm:$0xff] %v7493_v46 }
  0x2b   :  { %12354 = vst [vmem:[#allocation41_spill] sm:$0xff] %v7499_v49  ;;  %v7569_v49 = vand.u32 4294901760, %v78_v61  ;;  %328 = vmatpush.msra.mxu1 %v327_v19  ;;  %v7623_v19 = vsub.f32 %v70_v22, %v7591_v15  ;;  %v245_v60 = vsub.f32 %v7567_v57, %v7598_v8  ;;  %v7639_v22 = vand.u32 4294901760, %v54_v29  ;;  %662 = vmatpush.msrb.mxu3 %v7611_v52 }
  0x2c   :  { %12355 = vst [vmem:[#allocation42_spill] sm:$0xff] %v7503_v51  ;;  %497 = vmatpush.msrb.mxu0 %v7385_v42 }
  0x2d   :  { %12356 = vst [vmem:[#allocation43_spill] sm:$0xff] %v7505_v56  ;;  %v7601_v18 = vsub.f32 %v78_v61, %v7569_v49  ;;  %v7616_v61 = vand.u32 4294901760, %v7585_v37  ;;  %334 = vmatpush.msra.mxu1 %v333_v0  ;;  %v46_v0 = vld [vmem:[%s11887_s0 + $0x88] sm:$0xff]  ;;  %595 = vmatpush.msrb.mxu2 %v7569_v49 }
  0x2e   :  { %12357 = vst [vmem:[#allocation44_spill] sm:$0xff] %v7514_v1  ;;  %336 = vmatmul.f32.vlgmr.msra.gmra.mxu1 %v7421_v55  ;;  %404 = vmatmul.f32.gmra.mxu2 %v7567_v57 }
  0x2f   :  { %12358 = vst [vmem:[#allocation45_spill] sm:$0xff] %v7517_v58  ;;  %v7632_v24 = vand.u32 4294901760, %v7601_v18  ;;  %540 = vmatpush.msrb.mxu1 %v7272_v3  ;;  %v672_v7 = vsub.f32 %v7585_v37, %v7616_v61  ;;  %v7653_v3 = vand.u32 4294901760, %v7623_v19  ;;  %597 = vmatpush.msrb.mxu2 %v7591_v15 }
  0x30   :  { %12359 = vst [vmem:[#allocation46_spill] sm:$0xff] %v7523_v41  ;;  %456 = vmatmul.f32.gmra.mxu3 %v7598_v8  ;;  %501 = vmatpush.msrb.mxu0 %v7409_v50  ;;  %v12392_v50 = vand.u32 4294901760, %v7419_v54 }
  0x31   :  { %12360 = vst [vmem:[#allocation47_spill] sm:$0xff] %v7527_v12  ;;  %542 = vmatpush.msrb.mxu1 %v7274_v4  ;;  %v7667_v4 = vand.u32 4294901760, %v46_v0  ;;  %v161_v12 = vld [vmem:[%s11889_s5] sm:$0xff]  ;;  %v7682_v51 = vand.u32 4294901760, %v672_v7 }
  0x32   :  { %12362 = vst [vmem:[#allocation48_spill] sm:$0xff] %v7545_v48  ;;  %167 = vperm.xlu0 %7139, %v161_v12   ;;  %v7719_v12 = vand.u32 4294901760, %v253_v26  ;;  %v162_v26 = vld [vmem:[%s11889_s5 + $0x8] sm:$0xff] }
  0x33   :  { %12363 = vst [vmem:[#allocation49_spill] sm:$0xff] %v7548_v31  ;;  %544 = vmatpush.msrb.mxu1 %v7276_v5 }
  0x34   :  { %12364 = vst [vmem:[#allocation50_spill] sm:$0xff] %v7550_v35 }
  0x35   :  { %12366 = vst [vmem:[#allocation51_spill] sm:$0xff] %v7569_v49  ;;  %546 = vmatpush.msrb.mxu1 %v7287_v9  ;;  %v7701_v9 = vsub.f32 %v46_v0, %v7667_v4 }
  0x36   :  { %12367 = vst [vmem:[#allocation52_spill] sm:$0xff] %v7575_v38  ;;  %v7625_v38 = vand.u32 4294901760, %v62_v45  ;;  %340 = vmatmul.f32.gmra.mxu1 %v7480_v32  ;;  %409 = vmatmul.f32.gmra.mxu2 %v7635_v23 }
  0x37   :  { %12368 = vst [vmem:[#allocation53_spill] sm:$0xff] %v7582_v16  ;;  %548 = vmatpush.msrb.mxu1 %v7289_v10 }
  0x38   :  { %12369 = vst [vmem:[#allocation54_spill] sm:$0xff] %v7585_v37  ;;  %v7656_v62 = vsub.f32 %v62_v45, %v7625_v38  ;;  %v7672_v45 = vsub.f32 %v54_v29, %v7639_v22  ;;  %v684_v29 = vsub.f32 %v7623_v19, %v7653_v3  ;;  %599 = vmatpush.msrb.mxu2 %v7625_v38 }
  0x39   :  { %12370 = vst [vmem:[#allocation55_spill] sm:$0xff] %v7589_v39  ;;  %v7646_v39 = vand.u32 4294901760, %v666_v30  ;;  %v678_v30 = vsub.f32 %v7601_v18, %v7632_v24  ;;  %550 = vmatpush.msrb.mxu1 %v7291_v11  ;;  %462 = vmatmul.f32.gmra.mxu3 %v7665_v25 }
  0x3a   :  { %12371 = vst [vmem:[#allocation56_spill] sm:$0xff] %v7591_v15  ;;  %v7689_v5 = vand.u32 4294901760, %v7656_v62  ;;  %172 = vperm.xlu0 %7139, %v162_v26   ;;  %601 = vmatpush.msrb.mxu2 %v7639_v22 }
  0x3b   :  { %12372 = vst [vmem:[#allocation57_spill] sm:$0xff] %v7601_v18  ;;  %668 = vmatpush.msrb.mxu3 %v7646_v39  ;;  %v7696_v7 = vand.u32 4294901760, %v678_v30  ;;  %v7713_v30 = vand.u32 4294901760, %v684_v29  ;;  %v12388_v29 = vand.u32 4294901760, %v7672_v45  ;;  %552 = vmatpush.msrb.mxu1 %v7310_v17 }
  0x3c   :  { %12373 = vst [vmem:[#allocation58_spill] sm:$0xff] %v7606_v20  ;;  %v690_v0 = vsub.f32 %v7656_v62, %v7689_v5  ;;  %603 = vmatpush.msrb.mxu2 %v7667_v4 }
  0x3d   :  { %12374 = vst [vmem:[#allocation59_spill] sm:$0xff] %v7611_v52  ;;  %v7660_v52 = vand.u32 4294901760, %v245_v60  ;;  %v38_v60 = vld [vmem:[%s11887_s0 + $0x48] sm:$0xff]  ;;  %674 = vmatpush.msrb.mxu3 %v7682_v51  ;;  %v696_v34 = vsub.f32 %v7672_v45, %v12388_v29  ;;  %v12390_v29 = vand.u32 4294901760, %v7701_v9  ;;  %554 = vmatpush.msrb.mxu1 %v7321_v21 }
  0x3e   :  { %12375 = vst [vmem:[#allocation60_spill] sm:$0xff] %v7616_v61  ;;  %344 = vmatmul.f32.gmra.mxu1 %v7537_v28 }
  0x3f   :  { %12376 = vst [vmem:[#allocation61_spill] sm:$0xff] %v7623_v19  ;;  %247 = vmatmul.f32.gmra.mxu0 %v7660_v52  ;;  %v7703_v19 = vand.u32 4294901760, %v38_v60  ;;  %680 = vmatpush.msrb.mxu3 %v7696_v7 }
  0x40   :  { %12377 = vst [vmem:[#allocation62_spill] sm:$0xff] %v7625_v38  ;;  %556 = vmatpush.msrb.mxu1 %v7341_v27  ;;  %v164_v27 = vld [vmem:[%s11889_s5 + $0x18] sm:$0xff] }
  0x41   :  { %12378 = vst [vmem:[#allocation63_spill] sm:$0xff] %v7632_v24  ;;  %686 = vmatpush.msrb.mxu3 %v7713_v30  ;;  %605 = vmatpush.msrb.mxu2 %v7703_v19 }
  0x42   :  { %12379 = vst [vmem:[#allocation64_spill] sm:$0xff] %v7635_v23  ;;  %558 = vmatpush.msrb.mxu1 %v7378_v40  ;;  %v119_v40 = vld [vmem:[%s11885_s2 + $0xd0] sm:$0xff] }
  0x43   :  { %12380 = vst [vmem:[#allocation65_spill] sm:$0xff] %v7646_v39  ;;  %v30_v39 = vld [vmem:[%s11887_s0 + $0x8] sm:$0xff] }
  0x44   :  { %12381 = vst [vmem:[#allocation66_spill] sm:$0xff] %v7653_v3  ;;  %560 = vmatpush.msrb.mxu1 %v7399_v47 }
  0x45   :  { %12382 = vst [vmem:[#allocation67_spill] sm:$0xff] %v7656_v62 }
  0x46   :  { %12383 = vst [vmem:[#allocation68_spill] sm:$0xff] %v7660_v52  ;;  %v7709_v52 = vand.u32 4294901760, %v30_v39  ;;  %348 = vmatmul.f32.gmra.mxu1 %v7606_v20 }
  0x47   :  { %12384 = vst [vmem:[#allocation69_spill] sm:$0xff] %v7682_v51  ;;  %v7723_v51 = vsub.f32 %v38_v60, %v7703_v19  ;;  %v7740_v60 = vand.u32 4294901760, %v690_v0  ;;  %255 = vmatmul.f32.gmra.mxu0 %v7719_v12  ;;  %562 = vmatpush.msrb.mxu1 %v7416_v53  ;;  %v7821_v53 = vand.u32 4294901760, %v119_v40 }
  0x48   :  { %12385 = vst [vmem:[#allocation70_spill] sm:$0xff] %v7689_v5  ;;  %v7736_v3 = vsub.f32 %v30_v39, %v7709_v52  ;;  %v697_v39 = vand.u32 4294901760, %v696_v34  ;;  %607 = vmatpush.msrb.mxu2 %v7709_v52 }
  0x49   :  { %12386 = vst [vmem:[#allocation71_spill] sm:$0xff] %v7696_v7  ;;  %v702_v7 = vsub.f32 %v7701_v9, %v12390_v29  ;;  %v11951_v42 = vand.u32 4294901760, %v7723_v51  ;;  %692 = vmatpush.msrb.mxu3 %v7740_v60  ;;  %613 = vmatmul.f32.vlgmr.msrb.gmra.mxu2 %v7523_v41 }
  0x4a   :  { %12387 = vst [vmem:[#allocation72_spill] sm:$0xff] %v7713_v30  ;;  %v12391_v30 = vand.u32 4294901760, %v7388_v43  ;;  %v11950_v0 = vand.u32 4294901760, %v7736_v3  ;;  %v12393_v43 = vand.u32 4294901760, %v7444_v63  ;;  %v12395_v63 = vmov 0   ;;  %855 = vmatpush.msra.mxu2 %v7491_v44  ;;  %800 = vmatpush.msra.mxu1 %v7431_v59 }
  0x4b   :  { %12389 = vst [vmem:[#allocation73_spill] sm:$0xff] %v7740_v60  ;;  %v703_v29 = vand.u32 4294901760, %v702_v7  ;;  %v708_v34 = vsub.f32 %v7723_v51, %v11951_v42  ;;  %698 = vmatpush.msrb.mxu3 %v697_v39  ;;  %v163_v7 = vld [vmem:[%s11889_s5 + $0x10] sm:$0xff]  ;;  %7140 = vset.pattern.permute.xlu1 %v12395_v63  ;;  %v12398_v39 = vld [vmem:[#allocation66_spill] sm:$0xff]  ;;  %v104_v60 = vld [vmem:[%s11885_s2 + $0x58] sm:$0xff] }
  0x4c   :  { %505 = vmatpush.msrb.mxu0 %v12391_v30  ;;  %v714_v54 = vsub.f32 %v7736_v3, %v11950_v0  ;;  %177 = vperm.xlu1 %7140, %v163_v7   ;;  %v87_v0 = vld [vmem:[%s11886_s1 + $0xd0] sm:$0xff] }
  0x4d   :  { %704 = vmatpush.msrb.mxu3 %v703_v29  ;;  %v709_v30 = vand.u32 4294901760, %v708_v34  ;;  %859 = vmatpush.msra.mxu2 %v7514_v1  ;;  %v12396_v47 = vld [vmem:[#allocation68_spill] sm:$0xff]  ;;  %v12399_v29 = vld [vmem:[#allocation61_spill] sm:$0xff]  ;;  %v7880_v42 = vand.u32 4294901760, %v87_v0 }
  0x4e   :  { %509 = vmatpush.msrb.mxu0 %v12392_v50  ;;  %v12394_v50 = vand.u32 4294901760, %v7467_v13  ;;  %v715_v26 = vand.u32 4294901760, %v714_v54  ;;  %564 = vmatmul.f32.vlgmr.msrb.gmra.mxu1 %v7421_v55  ;;  %12397 = vst [vmem:[#allocation68_spill] sm:$0xff] %v7821_v53  ;;  %v111_v13 = vld [vmem:[%s11885_s2 + $0x90] sm:$0xff]  ;;  %v7840_v54 = vsub.f32 %v119_v40, %v7821_v53 }
  0x4f   :  { %710 = vmatpush.msrb.mxu3 %v709_v30  ;;  %863 = vmatpush.msra.mxu2 %v7545_v48  ;;  %v7832_v34 = vand.u32 4294901760, %v111_v13  ;;  %v12403_v30 = vand.u32 4294901760, %v7672_v45  ;;  %12410 = vst [vmem:[#allocation82_spill] sm:$0xff] %v7880_v42  ;;  %v12413_v63 = vld [vmem:[#allocation32_spill] sm:$0xff] }
  0x50   :  { %513 = vmatpush.msrb.mxu0 %v12393_v43  ;;  %802 = vmatpush.msra.mxu1 %v7455_v6  ;;  %v103_v43 = vld [vmem:[%s11885_s2 + $0x50] sm:$0xff]  ;;  %12401 = vst [vmem:[#allocation75_spill] sm:$0xff] %v7840_v54 }
  0x51   :  { %716 = vmatpush.msrb.mxu3 %v715_v26  ;;  %621 = vmatmul.f32.gmra.mxu2 %v7595_v14  ;;  %12400 = vst [vmem:[#allocation74_spill] sm:$0xff] %v7832_v34  ;;  %v7849_v7 = vand.u32 4294901760, %v103_v43  ;;  %v7855_v26 = vsub.f32 %v111_v13, %v7832_v34 }
  0x52   :  { %517 = vmatpush.msrb.mxu0 %v12394_v50  ;;  %718 = vmatmul.f32.vlgmr.msrb.gmra.mxu3 %v7421_v55  ;;  %v95_v50 = vld [vmem:[%s11885_s2 + $0x10] sm:$0xff] }
  0x53   :  { %519 = vmatmul.f32.vlgmr.msrb.gmra.mxu0 %v7421_v55  ;;  %922 = vmatpush.msra.mxu3 %v7431_v59  ;;  %12402 = vst [vmem:[#allocation76_spill] sm:$0xff] %v7849_v7  ;;  %v7862_v40 = vand.u32 4294901760, %v95_v50  ;;  %v7873_v13 = vsub.f32 %v103_v43, %v7849_v7 }
  0x54   :  { %740 = vmatpush.msra.mxu0 %v7453_v2  ;;  %182 = vperm.xlu1 %7140, %v164_v27   ;;  %12404 = vst [vmem:[#allocation77_spill] sm:$0xff] %v7855_v26  ;;  %v7860_v27 = vand.u32 4294901760, %v7840_v54 }
  0x55   :  { %924 = vmatpush.msra.mxu3 %v7455_v6  ;;  %867 = vmatpush.msra.mxu2 %v7582_v16  ;;  %12406 = vst [vmem:[#allocation79_spill] sm:$0xff] %v7862_v40 }
  0x56   :  { %743 = vmatpush.msra.mxu0 %v7483_v36  ;;  %804 = vmatpush.msra.mxu1 %v7493_v46  ;;  %12405 = vst [vmem:[#allocation78_spill] sm:$0xff] %v7860_v27  ;;  %v1030_v43 = vsub.f32 %v7840_v54, %v7860_v27 }
  0x57   :  { %926 = vmatpush.msra.mxu3 %v7493_v46  ;;  %871 = vmatpush.msra.mxu2 %v7616_v61  ;;  %12408 = vst [vmem:[#allocation80_spill] sm:$0xff] %v7873_v13 }
  0x58   :  { %746 = vmatpush.msra.mxu0 %v7517_v58  ;;  %568 = vmatmul.f32.gmra.mxu1 %v7480_v32 }
  0x59   :  { %928 = vmatpush.msra.mxu3 %v7505_v56  ;;  %806 = vmatpush.msra.mxu1 %v7505_v56  ;;  %v88_v56 = vld [vmem:[%s11886_s1 + $0xd8] sm:$0xff] }
  0x5a   :  { %722 = vmatmul.f32.gmra.mxu3 %v7480_v32  ;;  %749 = vmatpush.msra.mxu0 %v7548_v31  ;;  %v8115_v6 = vand.u32 4294901760, %v88_v56 }
  0x5b   :  { %523 = vmatmul.f32.gmra.mxu0 %v7480_v32  ;;  %930 = vmatpush.msra.mxu3 %v7550_v35 }
  0x5c   :  { %752 = vmatpush.msra.mxu0 %v7585_v37  ;;  %875 = vmatpush.msra.mxu2 %v7632_v24  ;;  %12452 = vst [vmem:[#allocation114_spill] sm:$0xff] %v8115_v6  ;;  %v8139_v11 = vsub.f32 %v88_v56, %v8115_v6 }
  0x5d   :  { %808 = vmatpush.msra.mxu1 %v7550_v35  ;;  %629 = vmatmul.f32.gmra.mxu2 %v12396_v47 }
  0x5e   :  { %755 = vmatpush.msra.mxu0 %v7601_v18  ;;  %932 = vmatpush.msra.mxu3 %v7569_v49  ;;  %v12427_v18 = vld [vmem:[#allocation36_spill] sm:$0xff]  ;;  %12456 = vst [vmem:[#allocation118_spill] sm:$0xff] %v8139_v11 }
  0x5f   :  { %879 = vmatpush.msra.mxu2 %v12398_v39  ;;  %810 = vmatpush.msra.mxu1 %v7569_v49 }
  0x60   :  { %758 = vmatpush.msra.mxu0 %v12399_v29  ;;  %934 = vmatpush.msra.mxu3 %v7591_v15 }
  0x61   :  { %883 = vmatpush.msra.mxu2 %v7689_v5  ;;  %572 = vmatmul.f32.gmra.mxu1 %v7537_v28  ;;  %v71_v5 = vld [vmem:[%s11886_s1 + $0x50] sm:$0xff] }
  0x62   :  { %726 = vmatmul.f32.gmra.mxu3 %v7537_v28  ;;  %761 = vmatpush.msra.mxu0 %v7656_v62  ;;  %v7911_v62 = vsub.f32 %v87_v0, %v7880_v42  ;;  %v7920_v24 = vand.u32 4294901760, %v71_v5 }
  0x63   :  { %527 = vmatmul.f32.gmra.mxu0 %v7537_v28  ;;  %812 = vmatpush.msra.mxu1 %v7591_v15 }
  0x64   :  { %764 = vmatpush.msra.mxu0 %v7672_v45  ;;  %936 = vmatpush.msra.mxu3 %v7625_v38  ;;  %v12407_v45 = vand.u32 4294901760, %v7701_v9  ;;  %12417 = vst [vmem:[#allocation86_spill] sm:$0xff] %v7911_v62 }
  0x65   :  { %887 = vmatpush.msra.mxu2 %v12403_v30  ;;  %814 = vmatpush.msra.mxu1 %v7625_v38  ;;  %v7878_v30 = vand.u32 4294901760, %v7855_v26  ;;  %12420 = vst [vmem:[#allocation89_spill] sm:$0xff] %v7920_v24 }
  0x66   :  { %767 = vmatpush.msra.mxu0 %v7701_v9  ;;  %637 = vmatmul.f32.gmra.mxu2 %v7719_v12  ;;  %v79_v9 = vld [vmem:[%s11886_s1 + $0x90] sm:$0xff] }
  0x67   :  { %891 = vmatpush.msra.mxu2 %v12407_v45  ;;  %938 = vmatpush.msra.mxu3 %v7639_v22  ;;  %12409 = vst [vmem:[#allocation81_spill] sm:$0xff] %v7878_v30  ;;  %v12411_v45 = vand.u32 4294901760, %v7723_v51  ;;  %v1036_v39 = vsub.f32 %v7855_v26, %v7878_v30 }
  0x68   :  { %770 = vmatpush.msra.mxu0 %v7723_v51  ;;  %816 = vmatpush.msra.mxu1 %v7639_v22  ;;  %v7891_v22 = vsub.f32 %v95_v50, %v7862_v40  ;;  %v7901_v51 = vand.u32 4294901760, %v7873_v13  ;;  %v12416_v50 = vand.u32 4294901760, %v7736_v3 }
  0x69   :  { %940 = vmatpush.msra.mxu3 %v7667_v4  ;;  %895 = vmatpush.msra.mxu2 %v12411_v45  ;;  %v7903_v45 = vand.u32 4294901760, %v79_v9 }
  0x6a   :  { %730 = vmatmul.f32.gmra.mxu3 %v7606_v20  ;;  %773 = vmatpush.msra.mxu0 %v7736_v3  ;;  %12412 = vst [vmem:[#allocation83_spill] sm:$0xff] %v7891_v22  ;;  %v7918_v29 = vand.u32 4294901760, %v7891_v22  ;;  %v63_v3 = vld [vmem:[%s11886_s1 + $0x10] sm:$0xff] }
  0x6b   :  { %531 = vmatmul.f32.gmra.mxu0 %v7606_v20  ;;  %576 = vmatmul.f32.gmra.mxu1 %v7606_v20  ;;  %12414 = vst [vmem:[#allocation84_spill] sm:$0xff] %v7901_v51  ;;  %v7932_v0 = vsub.f32 %v79_v9, %v7903_v45  ;;  %v7948_v9 = vsub.f32 %v71_v5, %v7920_v24 }
  0x6c   :  { %818 = vmatpush.msra.mxu1 %v7667_v4  ;;  %942 = vmatpush.msra.mxu3 %v7703_v19  ;;  %12415 = vst [vmem:[#allocation85_spill] sm:$0xff] %v7903_v45  ;;  %v7915_v4 = vand.u32 4294901760, %v1030_v43  ;;  %v7936_v43 = vand.u32 4294901760, %v1036_v39  ;;  %v55_v39 = vld [vmem:[%s11887_s0 + $0xd0] sm:$0xff] }
  0x6d   :  { %899 = vmatpush.msra.mxu2 %v12416_v50  ;;  %967 = vmatpush.msrb.mxu0 %v7821_v53  ;;  %12419 = vst [vmem:[#allocation88_spill] sm:$0xff] %v7918_v29  ;;  %v7939_v50 = vand.u32 4294901760, %v7911_v62  ;;  %v7960_v61 = vand.u32 4294901760, %v7932_v0  ;;  %v7969_v16 = vand.u32 4294901760, %v55_v39 }
  0x6e   :  { %820 = vmatpush.msra.mxu1 %v7703_v19  ;;  %901 = vmatmul.f32.vlgmr.msra.gmra.mxu2 %v7421_v55  ;;  %12418 = vst [vmem:[#allocation87_spill] sm:$0xff] %v7915_v4  ;;  %v1042_v19 = vsub.f32 %v7873_v13, %v7901_v51 }
  0x6f   :  { %944 = vmatpush.msra.mxu3 %v7709_v52  ;;  %1122 = vmatpush.msrb.mxu2 %v7840_v54  ;;  %12421 = vst [vmem:[#allocation90_spill] sm:$0xff] %v7932_v0  ;;  %v7941_v54 = vand.u32 4294901760, %v63_v3  ;;  %v1054_v5 = vsub.f32 %v7911_v62, %v7939_v50  ;;  %v1060_v31 = vsub.f32 %v7932_v0, %v7960_v61 }
  0x70   :  { %822 = vmatpush.msra.mxu1 %v7709_v52  ;;  %12422 = vst [vmem:[#allocation91_spill] sm:$0xff] %v7936_v43  ;;  %969 = vmatpush.msrb.mxu0 %v7832_v34  ;;  %v1048_v52 = vsub.f32 %v7891_v22, %v7918_v29  ;;  %v7997_v58 = vsub.f32 %v55_v39, %v7969_v16  ;;  %v120_v39 = vld [vmem:[%s11885_s2 + $0xd8] sm:$0xff] }
  0x71   :  { %1182 = vmatpush.msrb.mxu3 %v7821_v53  ;;  %1125 = vmatpush.msrb.mxu2 %v7855_v26  ;;  %12423 = vst [vmem:[#allocation92_spill] sm:$0xff] %v7939_v50  ;;  %v12426_v26 = vld [vmem:[#allocation42_spill] sm:$0xff]  ;;  %v7967_v37 = vsub.f32 %v63_v3, %v7941_v54  ;;  %v39_v3 = vld [vmem:[%s11887_s0 + $0x50] sm:$0xff]  ;;  %v8030_v38 = vand.u32 4294901760, %v120_v39 }
  0x72   :  { %946 = vmatmul.f32.vlgmr.msra.gmra.mxu3 %v7421_v55  ;;  %12424 = vst [vmem:[#allocation93_spill] sm:$0xff] %v7941_v54  ;;  %1032 = vmatpush.msrb.mxu1 %v7915_v4  ;;  %v7957_v4 = vand.u32 4294901760, %v1042_v19  ;;  %v47_v19 = vld [vmem:[%s11887_s0 + $0x90] sm:$0xff] }
  0x73   :  { %776 = vmatmul.f32.vlgmr.msra.gmra.mxu0 %v12413_v63  ;;  %12425 = vst [vmem:[#allocation94_spill] sm:$0xff] %v7948_v9  ;;  %826 = vmatmul.f32.vlgmr.msra.gmra.mxu1 %v12427_v18  ;;  %v8000_v48 = vand.u32 4294901760, %v7967_v37  ;;  %v8063_v35 = vsub.f32 %v120_v39, %v8030_v38 }
  0x74   :  { %1184 = vmatpush.msrb.mxu3 %v7832_v34  ;;  %1128 = vmatpush.msrb.mxu2 %v7873_v13  ;;  %12428 = vst [vmem:[#allocation95_spill] sm:$0xff] %v7957_v4  ;;  %v7976_v13 = vand.u32 4294901760, %v1048_v52  ;;  %v7990_v52 = vand.u32 4294901760, %v47_v19 }
  0x75   :  { %12429 = vst [vmem:[#allocation96_spill] sm:$0xff] %v7960_v61  ;;  %1038 = vmatpush.msrb.mxu1 %v7936_v43  ;;  %971 = vmatpush.msrb.mxu0 %v7849_v7  ;;  %v7979_v43 = vand.u32 4294901760, %v7948_v9  ;;  %v1072_v44 = vsub.f32 %v7967_v37, %v8000_v48 }
  0x76   :  { %12430 = vst [vmem:[#allocation97_spill] sm:$0xff] %v7967_v37  ;;  %905 = vmatmul.f32.gmra.mxu2 %v7480_v32  ;;  %1186 = vmatpush.msrb.mxu3 %v7849_v7  ;;  %v8021_v1 = vsub.f32 %v47_v19, %v7990_v52 }
  0x77   :  { %12431 = vst [vmem:[#allocation98_spill] sm:$0xff] %v7976_v13  ;;  %1131 = vmatpush.msrb.mxu2 %v7891_v22  ;;  %973 = vmatpush.msrb.mxu0 %v7862_v40  ;;  %v7994_v22 = vand.u32 4294901760, %v1054_v5  ;;  %v1066_v36 = vsub.f32 %v7948_v9, %v7979_v43  ;;  %v12435_v5 = vld [vmem:[#allocation47_spill] sm:$0xff] }
  0x78   :  { %12432 = vst [vmem:[#allocation99_spill] sm:$0xff] %v7979_v43  ;;  %1044 = vmatpush.msrb.mxu1 %v7957_v4  ;;  %1188 = vmatpush.msrb.mxu3 %v7862_v40  ;;  %v31_v4 = vld [vmem:[%s11887_s0 + $0x10] sm:$0xff] }
  0x79   :  { %1134 = vmatpush.msrb.mxu2 %v7911_v62  ;;  %12433 = vst [vmem:[#allocation100_spill] sm:$0xff] %v7994_v22  ;;  %975 = vmatpush.msrb.mxu0 %v7880_v42  ;;  %v8009_v62 = vand.u32 4294901760, %v39_v3  ;;  %v8023_v2 = vand.u32 4294901760, %v31_v4  ;;  %v8037_v19 = vand.u32 4294901760, %v1066_v36 }
  0x7a   :  { %950 = vmatmul.f32.gmra.mxu3 %v7480_v32  ;;  %12434 = vst [vmem:[#allocation101_spill] sm:$0xff] %v8000_v48  ;;  %1050 = vmatpush.msrb.mxu1 %v7976_v13  ;;  %v8018_v13 = vand.u32 4294901760, %v1060_v31  ;;  %v112_v31 = vld [vmem:[%s11885_s2 + $0x98] sm:$0xff] }
  0x7b   :  { %781 = vmatmul.f32.gmra.mxu0 %v12426_v26  ;;  %832 = vmatmul.f32.gmra.mxu1 %v12435_v5  ;;  %12437 = vst [vmem:[#allocation103_spill] sm:$0xff] %v8030_v38  ;;  %v8051_v36 = vsub.f32 %v31_v4, %v8023_v2  ;;  %v8053_v15 = vand.u32 4294901760, %v112_v31 }
  0x7c   :  { %1190 = vmatpush.msrb.mxu3 %v7880_v42  ;;  %1137 = vmatpush.msrb.mxu2 %v7932_v0  ;;  %12436 = vst [vmem:[#allocation102_spill] sm:$0xff] %v8018_v13  ;;  %v8040_v0 = vsub.f32 %v39_v3, %v8009_v62  ;;  %v8057_v3 = vand.u32 4294901760, %v1072_v44  ;;  %v96_v44 = vld [vmem:[%s11885_s2 + $0x18] sm:$0xff] }
  0x7d   :  { %977 = vmatpush.msrb.mxu0 %v7903_v45  ;;  %1056 = vmatpush.msrb.mxu1 %v7994_v22  ;;  %12438 = vst [vmem:[#allocation104_spill] sm:$0xff] %v8037_v19  ;;  %v8068_v22 = vand.u32 4294901760, %v104_v60  ;;  %v8089_v33 = vand.u32 4294901760, %v96_v44  ;;  %v12450_v46 = vand.u32 4294901760, %v8051_v36 }
  0x7e   :  { %909 = vmatmul.f32.gmra.mxu2 %v7537_v28  ;;  %1192 = vmatpush.msrb.mxu3 %v7903_v45  ;;  %12439 = vst [vmem:[#allocation105_spill] sm:$0xff] %v8053_v15 }
  0x7f   :  { %1140 = vmatpush.msrb.mxu2 %v7948_v9  ;;  %979 = vmatpush.msrb.mxu0 %v7920_v24  ;;  %12440 = vst [vmem:[#allocation106_spill] sm:$0xff] %v8057_v3  ;;  %v12441_v9 = vand.u32 4294901760, %v7997_v58  ;;  %v8100_v4 = vsub.f32 %v104_v60, %v8068_v22  ;;  %v8121_v21 = vsub.f32 %v96_v44, %v8089_v33 }
  0x80   :  { %1062 = vmatpush.msrb.mxu1 %v8018_v13  ;;  %1194 = vmatpush.msrb.mxu3 %v7920_v24  ;;  %12442 = vst [vmem:[#allocation107_spill] sm:$0xff] %v8063_v35  ;;  %v8087_v13 = vand.u32 4294901760, %v8063_v35 }
  0x81   :  { %981 = vmatpush.msrb.mxu0 %v7941_v54  ;;  %v1078_v49 = vsub.f32 %v7997_v58, %v12441_v9  ;;  %1143 = vmatpush.msrb.mxu2 %v7967_v37  ;;  %12443 = vst [vmem:[#allocation108_spill] sm:$0xff] %v8068_v22  ;;  %v12444_v9 = vand.u32 4294901760, %v8021_v1 }
  0x82   :  { %954 = vmatmul.f32.gmra.mxu3 %v7537_v28  ;;  %1068 = vmatpush.msrb.mxu1 %v8037_v19  ;;  %v8082_v19 = vsub.f32 %v112_v31, %v8053_v15  ;;  %12446 = vst [vmem:[#allocation110_spill] sm:$0xff] %v8087_v13  ;;  %v12448_v31 = vand.u32 4294901760, %v8040_v0  ;;  %v1412_v59 = vsub.f32 %v8063_v35, %v8087_v13  ;;  %v8146_v13 = vand.u32 4294901760, %v8121_v21 }
  0x83   :  { %786 = vmatmul.f32.gmra.mxu0 %v7567_v57  ;;  %838 = vmatmul.f32.gmra.mxu1 %v7598_v8  ;;  %v1084_v39 = vsub.f32 %v8021_v1, %v12444_v9  ;;  %v1079_v37 = vand.u32 4294901760, %v1078_v49  ;;  %12447 = vst [vmem:[#allocation111_spill] sm:$0xff] %v8089_v33  ;;  %v80_v49 = vld [vmem:[%s11886_s1 + $0x98] sm:$0xff] }
  0x84   :  { %983 = vmatpush.msrb.mxu0 %v7969_v16  ;;  %1196 = vmatpush.msrb.mxu3 %v7941_v54  ;;  %12445 = vst [vmem:[#allocation109_spill] sm:$0xff] %v8082_v19  ;;  %v1090_v9 = vsub.f32 %v8040_v0, %v12448_v31  ;;  %v1096_v31 = vsub.f32 %v8051_v36, %v12450_v46  ;;  %v8113_v60 = vand.u32 4294901760, %v8082_v19  ;;  %v8126_v46 = vand.u32 4294901760, %v8100_v4 }
  0x85   :  { %1146 = vmatpush.msrb.mxu2 %v7997_v58  ;;  %1074 = vmatpush.msrb.mxu1 %v8057_v3  ;;  %12449 = vst [vmem:[#allocation112_spill] sm:$0xff] %v8100_v4  ;;  %v1085_v3 = vand.u32 4294901760, %v1084_v39  ;;  %v8128_v17 = vand.u32 4294901760, %v80_v49  ;;  %v8143_v10 = vand.u32 4294901760, %v1412_v59 }
  0x86   :  { %985 = vmatpush.msrb.mxu0 %v7990_v52  ;;  %913 = vmatmul.f32.gmra.mxu2 %v7606_v20  ;;  %12451 = vst [vmem:[#allocation113_spill] sm:$0xff] %v8113_v60  ;;  %v1091_v39 = vand.u32 4294901760, %v1090_v9  ;;  %v1097_v44 = vand.u32 4294901760, %v1096_v31  ;;  %v1418_v9 = vsub.f32 %v8082_v19, %v8113_v60  ;;  %v1424_v56 = vsub.f32 %v8100_v4, %v8126_v46 }
  0x87   :  { %1149 = vmatpush.msrb.mxu2 %v8021_v1  ;;  %1198 = vmatpush.msrb.mxu3 %v7969_v16  ;;  %12453 = vst [vmem:[#allocation115_spill] sm:$0xff] %v8121_v21  ;;  %v8157_v31 = vsub.f32 %v80_v49, %v8128_v17  ;;  %v1430_v49 = vsub.f32 %v8121_v21, %v8146_v13 }
  0x88   :  { %987 = vmatpush.msrb.mxu0 %v8009_v62  ;;  %1080 = vmatpush.msrb.mxu1 %v1079_v37  ;;  %12454 = vst [vmem:[#allocation116_spill] sm:$0xff] %v8126_v46  ;;  %v72_v37 = vld [vmem:[%s11886_s1 + $0x58] sm:$0xff]  ;;  %v8162_v59 = vand.u32 4294901760, %v1418_v9  ;;  %v8181_v9 = vand.u32 4294901760, %v1424_v56 }
  0x89   :  { %1200 = vmatpush.msrb.mxu3 %v7990_v52  ;;  %1152 = vmatpush.msrb.mxu2 %v8040_v0  ;;  %12455 = vst [vmem:[#allocation117_spill] sm:$0xff] %v8128_v17 }
  0x8a   :  { %958 = vmatmul.f32.gmra.mxu3 %v7606_v20  ;;  %989 = vmatpush.msrb.mxu0 %v8023_v2  ;;  %12457 = vst [vmem:[#allocation119_spill] sm:$0xff] %v8143_v10 }
  0x8b   :  { %791 = vmatmul.f32.gmra.mxu0 %v7635_v23  ;;  %844 = vmatmul.f32.gmra.mxu1 %v7665_v25  ;;  %12458 = vst [vmem:[#allocation120_spill] sm:$0xff] %v8146_v13 }
  0x8c   :  { %1086 = vmatpush.msrb.mxu1 %v1085_v3  ;;  %1202 = vmatpush.msrb.mxu3 %v8009_v62  ;;  %v64_v3 = vld [vmem:[%s11886_s1 + $0x18] sm:$0xff]  ;;  %12460 = vst [vmem:[#allocation122_spill] sm:$0xff] %v8157_v31 }
  0x8d   :  { %1155 = vmatpush.msrb.mxu2 %v8051_v36  ;;  %1237 = vmatpush.msra.mxu0 %v7860_v27  ;;  %12461 = vst [vmem:[#allocation123_spill] sm:$0xff] %v8162_v59  ;;  %v8165_v27 = vand.u32 4294901760, %v8139_v11 }
  0x8e   :  { %1092 = vmatpush.msrb.mxu1 %v1091_v39  ;;  %1158 = vmatmul.f32.vlgmr.msrb.gmra.mxu2 %v12413_v63  ;;  %v8167_v39 = vand.u32 4294901760, %v64_v3  ;;  %v56_v63 = vld [vmem:[%s11887_s0 + $0xd8] sm:$0xff]  ;;  %12465 = vst [vmem:[#allocation127_spill] sm:$0xff] %v8181_v9 }
  0x8f   :  { %1204 = vmatpush.msrb.mxu3 %v8023_v2  ;;  %1349 = vmatpush.msra.mxu2 %v8030_v38  ;;  %12462 = vst [vmem:[#allocation124_spill] sm:$0xff] %v8165_v27  ;;  %v8191_v21 = vand.u32 4294901760, %v56_v63 }
  0x90   :  { %1098 = vmatpush.msrb.mxu1 %v1097_v44  ;;  %12463 = vst [vmem:[#allocation125_spill] sm:$0xff] %v8167_v39  ;;  %1241 = vmatpush.msra.mxu0 %v7878_v30  ;;  %v8198_v56 = vsub.f32 %v64_v3, %v8167_v39  ;;  %v8202_v30 = vand.u32 4294901760, %v1430_v49 }
  0x91   :  { %1414 = vmatpush.msra.mxu3 %v8143_v10  ;;  %1351 = vmatpush.msra.mxu2 %v8053_v15  ;;  %v48_v10 = vld [vmem:[%s11887_s0 + $0x98] sm:$0xff]  ;;  %v8219_v49 = vsub.f32 %v56_v63, %v8191_v21 }
  0x92   :  { %1208 = vmatmul.f32.vlgmr.msrb.gmra.mxu3 %v12427_v18  ;;  %1304 = vmatpush.msra.mxu1 %v7821_v53  ;;  %v8184_v18 = vand.u32 4294901760, %v8157_v31  ;;  %12467 = vst [vmem:[#allocation129_spill] sm:$0xff] %v8198_v56  ;;  %v8207_v13 = vand.u32 4294901760, %v48_v10 }
  0x93   :  { %995 = vmatmul.f32.vlgmr.msrb.gmra.mxu0 %v7523_v41  ;;  %v8148_v41 = vand.u32 4294901760, %v72_v37  ;;  %1100 = vmatmul.f32.vlgmr.msrb.gmra.mxu1 %v7421_v55  ;;  %12468 = vst [vmem:[#allocation130_spill] sm:$0xff] %v8202_v30 }
  0x94   :  { %12466 = vst [vmem:[#allocation128_spill] sm:$0xff] %v8184_v18  ;;  %1420 = vmatpush.msra.mxu3 %v8162_v59  ;;  %1353 = vmatpush.msra.mxu2 %v8068_v22  ;;  %v40_v59 = vld [vmem:[%s11887_s0 + $0x58] sm:$0xff]  ;;  %v1442_v3 = vsub.f32 %v8157_v31, %v8184_v18 }
  0x95   :  { %12459 = vst [vmem:[#allocation121_spill] sm:$0xff] %v8148_v41  ;;  %v8177_v44 = vsub.f32 %v72_v37, %v8148_v41  ;;  %v1436_v37 = vsub.f32 %v8139_v11, %v8165_v27  ;;  %1306 = vmatpush.msra.mxu1 %v7832_v34  ;;  %1245 = vmatpush.msra.mxu0 %v7901_v51  ;;  %v8226_v34 = vand.u32 4294901760, %v8198_v56 }
  0x96   :  { %1163 = vmatmul.f32.gmra.mxu2 %v12426_v26  ;;  %1426 = vmatpush.msra.mxu3 %v8181_v9  ;;  %v8228_v9 = vand.u32 4294901760, %v40_v59  ;;  %v32_v26 = vld [vmem:[%s11887_s0 + $0x18] sm:$0xff] }
  0x97   :  { %12464 = vst [vmem:[#allocation126_spill] sm:$0xff] %v8177_v44  ;;  %v8205_v53 = vand.u32 4294901760, %v8177_v44  ;;  %1355 = vmatpush.msra.mxu2 %v8089_v33  ;;  %1249 = vmatpush.msra.mxu0 %v7918_v29  ;;  %v8223_v51 = vand.u32 4294901760, %v1436_v37  ;;  %v8238_v29 = vsub.f32 %v48_v10, %v8207_v13  ;;  %v8242_v37 = vand.u32 4294901760, %v1442_v3 }
  0x98   :  { %1308 = vmatpush.msra.mxu1 %v7849_v7  ;;  %12471 = vst [vmem:[#allocation133_spill] sm:$0xff] %v8226_v34  ;;  %1432 = vmatpush.msra.mxu3 %v8202_v30  ;;  %v8247_v7 = vand.u32 4294901760, %v32_v26  ;;  %v1454_v10 = vsub.f32 %v8198_v56, %v8226_v34 }
  0x99   :  { %12469 = vst [vmem:[#allocation131_spill] sm:$0xff] %v8205_v53  ;;  %1357 = vmatpush.msra.mxu2 %v8115_v6  ;;  %v1448_v63 = vsub.f32 %v8177_v44, %v8205_v53  ;;  %1253 = vmatpush.msra.mxu0 %v7939_v50  ;;  %v12478_v50 = vand.u32 4294901760, %v8021_v1  ;;  %v12480_v1 = vand.u32 4294901760, %v8051_v36  ;;  %v12482_v36 = vld [vmem:[#allocation46_spill] sm:$0xff] }
  0x9a   :  { %1214 = vmatmul.f32.gmra.mxu3 %v12435_v5  ;;  %12470 = vst [vmem:[#allocation132_spill] sm:$0xff] %v8223_v51  ;;  %1310 = vmatpush.msra.mxu1 %v7862_v40  ;;  %v8254_v40 = vsub.f32 %v40_v59, %v8228_v9 }
  0x9b   :  { %1003 = vmatmul.f32.gmra.mxu0 %v7595_v14  ;;  %12472 = vst [vmem:[#allocation134_spill] sm:$0xff] %v8242_v37  ;;  %1104 = vmatmul.f32.gmra.mxu1 %v7480_v32  ;;  %v8258_v3 = vand.u32 4294901760, %v1448_v63  ;;  %v8273_v63 = vand.u32 4294901760, %v1454_v10  ;;  %v12477_v10 = vand.u32 4294901760, %v7997_v58 }
  0x9c   :  { %1438 = vmatpush.msra.mxu3 %v8223_v51  ;;  %1359 = vmatpush.msra.mxu2 %v8128_v17  ;;  %v12474_v51 = vand.u32 4294901760, %v8219_v49  ;;  %v12043_v30 = vand.u32 4294901760, %v8254_v40 }
  0x9d   :  { %1257 = vmatpush.msra.mxu0 %v7960_v61  ;;  %1312 = vmatpush.msra.mxu1 %v7880_v42  ;;  %12473 = vst [vmem:[#allocation135_spill] sm:$0xff] %v8258_v3  ;;  %v8269_v61 = vsub.f32 %v32_v26, %v8247_v7  ;;  %v90_v42 = vld [vmem:[%s11886_s1 + $0xe8] sm:$0xff] }
  0x9e   :  { %1168 = vmatmul.f32.gmra.mxu2 %v7567_v57  ;;  %1444 = vmatpush.msra.mxu3 %v8242_v37  ;;  %v1460_v59 = vsub.f32 %v8219_v49, %v12474_v51  ;;  %12475 = vst [vmem:[#allocation136_spill] sm:$0xff] %v8273_v63  ;;  %v12476_v37 = vand.u32 4294901760, %v8238_v29 }
  0x9f   :  { %1361 = vmatpush.msra.mxu2 %v8148_v41  ;;  %1261 = vmatpush.msra.mxu0 %v7979_v43  ;;  %v12042_v51 = vand.u32 4294901760, %v8269_v61 }
  0xa0   :  { %1314 = vmatpush.msra.mxu1 %v7903_v45  ;;  %1450 = vmatpush.msra.mxu3 %v8258_v3  ;;  %v1466_v43 = vsub.f32 %v8238_v29, %v12476_v37  ;;  %v1461_v26 = vand.u32 4294901760, %v1460_v59  ;;  %v1472_v37 = vsub.f32 %v8254_v40, %v12043_v30  ;;  %v232_v3 = vpop.f32.mrf.mxu0  ;;  %v12479_v59 = vand.u32 4294901760, %v8040_v0 }
  0xa1   :  { %1265 = vmatpush.msra.mxu0 %v8000_v48  ;;  %1363 = vmatpush.msra.mxu2 %v8167_v39  ;;  %v1478_v58 = vsub.f32 %v8269_v61, %v12042_v51 }
  0xa2   :  { %1220 = vmatmul.f32.gmra.mxu3 %v7598_v8  ;;  %1316 = vmatpush.msra.mxu1 %v7920_v24  ;;  %v1467_v48 = vand.u32 4294901760, %v1466_v43 }
  0xa3   :  { %1011 = vmatmul.f32.gmra.mxu0 %v12396_v47  ;;  %1108 = vmatmul.f32.gmra.mxu1 %v7537_v28 }
  0xa4   :  { %1269 = vmatpush.msra.mxu0 %v12477_v10  ;;  %1456 = vmatpush.msra.mxu3 %v8273_v63  ;;  %v1473_v10 = vand.u32 4294901760, %v1472_v37  ;;  %v8310_v43 = vpop.permute.xlu0 %167  ;;  %v395_v37 = vpop.f32.mrf.mxu2 }
  0xa5   :  { %1365 = vmatpush.msra.mxu2 %v8191_v21  ;;  %1318 = vmatpush.msra.mxu1 %v7941_v54  ;;  %12481 = vst [vmem:[#allocation137_spill] sm:$0xff] %v8310_v43  ;;  %v233_v0 = vadd.f32 %v232_v3, %v8310_v43 }
  0xa6   :  { %1273 = vmatpush.msra.mxu0 %v12478_v50  ;;  %1173 = vmatmul.f32.gmra.mxu2 %v7635_v23  ;;  %v1479_v50 = vand.u32 4294901760, %v1478_v58  ;;  %v12483_v58 = vld [vmem:[#allocation110_spill] sm:$0xff] }
  0xa7   :  { %1367 = vmatpush.msra.mxu2 %v8207_v13  ;;  %1462 = vmatpush.msra.mxu3 %v1461_v26 }
  0xa8   :  { %1277 = vmatpush.msra.mxu0 %v12479_v59  ;;  %1320 = vmatpush.msra.mxu1 %v7969_v16  ;;  %v240_v16 = vpop.f32.mrf.mxu0  ;;  %v445_v59 = vpop.f32.mrf.mxu3 }
  0xa9   :  { %1468 = vmatpush.msra.mxu3 %v1467_v48  ;;  %1369 = vmatpush.msra.mxu2 %v8228_v9 }
  0xaa   :  { %1226 = vmatmul.f32.gmra.mxu3 %v7665_v25  ;;  %1281 = vmatpush.msra.mxu0 %v12480_v1 }
  0xab   :  { %1019 = vmatmul.f32.gmra.mxu0 %v7719_v12  ;;  %1112 = vmatmul.f32.gmra.mxu1 %v7606_v20  ;;  %v337_v48 = vpop.f32.mrf.mxu1 }
  0xac   :  { %1322 = vmatpush.msra.mxu1 %v7990_v52  ;;  %1474 = vmatpush.msra.mxu3 %v1473_v10  ;;  %v338_v26 = vadd.f32 %v337_v48, %v233_v0  ;;  %v8329_v3 = vpop.permute.xlu0 %172  ;;  %v400_v0 = vpop.f32.mrf.mxu2  ;;  %v12486_v48 = vld [vmem:[#allocation120_spill] sm:$0xff] }
  0xad   :  { %1371 = vmatpush.msra.mxu2 %v8247_v7  ;;  %1504 = vmatpush.msrb.mxu0 %v8063_v35  ;;  %12485 = vst [vmem:[#allocation139_spill] sm:$0xff] %v8329_v3 }
  0xae   :  { %1324 = vmatpush.msra.mxu1 %v8009_v62  ;;  %1377 = vmatmul.f32.vlgmr.msra.gmra.mxu2 %v12482_v36  ;;  %v396_v52 = vadd.f32 %v395_v37, %v338_v26  ;;  %v12487_v26 = vld [vmem:[#allocation115_spill] sm:$0xff] }
  0xaf   :  { %1480 = vmatpush.msra.mxu3 %v1479_v50  ;;  %1619 = vmatpush.msrb.mxu2 %v12483_v58  ;;  %v41_v58 = vld [vmem:[%s11887_s0 + $0x60] sm:$0xff] }
  0xb0   :  { %1326 = vmatpush.msra.mxu1 %v8023_v2  ;;  %v8324_v62 = vadd.f32 %v445_v59, %v396_v52  ;;  %1507 = vmatpush.msrb.mxu0 %v8082_v19  ;;  %v241_v2 = vadd.f32 %v240_v16, %v8329_v3  ;;  %v451_v37 = vpop.f32.mrf.mxu3  ;;  %v121_v52 = vld [vmem:[%s11885_s2 + $0xe0] sm:$0xff] }
  0xb1   :  { %1686 = vmatpush.msrb.mxu3 %v8030_v38  ;;  %1623 = vmatpush.msrb.mxu2 %v8113_v60 }
  0xb2   :  { %1482 = vmatmul.f32.vlgmr.msra.gmra.mxu3 %v7421_v55  ;;  %1564 = vmatpush.msrb.mxu1 %v8030_v38  ;;  %12484 = vst [vmem:[#allocation138_spill] sm:$0xff] %v8324_v62  ;;  %v105_v62 = vld [vmem:[%s11885_s2 + $0x60] sm:$0xff] }
  0xb3   :  { %1283 = vmatmul.f32.vlgmr.msra.gmra.mxu0 %v7421_v55  ;;  %1328 = vmatmul.f32.vlgmr.msra.gmra.mxu1 %v7421_v55  ;;  %v341_v1 = vpop.f32.mrf.mxu1 }
  0xb4   :  { %1688 = vmatpush.msrb.mxu3 %v8053_v15  ;;  %1627 = vmatpush.msrb.mxu2 %v8126_v46  ;;  %v342_v50 = vadd.f32 %v341_v1, %v241_v2  ;;  %v405_v51 = vpop.f32.mrf.mxu2 }
  0xb5   :  { %1566 = vmatpush.msrb.mxu1 %v8053_v15  ;;  %1510 = vmatpush.msrb.mxu0 %v8100_v4 }
  0xb6   :  { %1385 = vmatmul.f32.gmra.mxu2 %v7595_v14  ;;  %1690 = vmatpush.msrb.mxu3 %v8068_v22  ;;  %v401_v16 = vadd.f32 %v400_v0, %v342_v50 }
  0xb7   :  { %1631 = vmatpush.msrb.mxu2 %v12486_v48  ;;  %1513 = vmatpush.msrb.mxu0 %v12487_v26 }
  0xb8   :  { %1568 = vmatpush.msrb.mxu1 %v8068_v22  ;;  %1692 = vmatpush.msrb.mxu3 %v8089_v33  ;;  %v8345_v59 = vadd.f32 %v451_v37, %v401_v16  ;;  %v8362_v37 = vand.u32 4294901760, %v121_v52  ;;  %v113_v16 = vld [vmem:[%s11885_s2 + $0xa0] sm:$0xff] }
  0xb9   :  { %1635 = vmatpush.msrb.mxu2 %v8165_v27  ;;  %1516 = vmatpush.msrb.mxu0 %v8139_v11  ;;  %v12507_v11 = vld [vmem:[#allocation32_spill] sm:$0xff] }
  0xba   :  { %1486 = vmatmul.f32.gmra.mxu3 %v7480_v32  ;;  %1570 = vmatpush.msrb.mxu1 %v8089_v33  ;;  %12488 = vst [vmem:[#allocation140_spill] sm:$0xff] %v8345_v59  ;;  %v8373_v59 = vand.u32 4294901760, %v113_v16 }
  0xbb   :  { %1287 = vmatmul.f32.gmra.mxu0 %v7480_v32  ;;  %1332 = vmatmul.f32.gmra.mxu1 %v7480_v32  ;;  %v345_v0 = vpop.f32.mrf.mxu1  ;;  %12490 = vst [vmem:[#allocation142_spill] sm:$0xff] %v8362_v37 }
  0xbc   :  { %v248_v10 = vpop.f32.mrf.mxu0  ;;  %1694 = vmatpush.msrb.mxu3 %v8115_v6  ;;  %1639 = vmatpush.msrb.mxu2 %v8184_v18  ;;  %12491 = vst [vmem:[#allocation143_spill] sm:$0xff] %v8373_v59 }
  0xbd   :  { %1519 = vmatpush.msrb.mxu0 %v8157_v31  ;;  %1572 = vmatpush.msrb.mxu1 %v8115_v6 }
  0xbe   :  { %v8355_v2 = vpop.permute.xlu1 %177  ;;  %1393 = vmatmul.f32.gmra.mxu2 %v12396_v47  ;;  %1696 = vmatpush.msrb.mxu3 %v8128_v17 }
  0xbf   :  { %12489 = vst [vmem:[#allocation141_spill] sm:$0xff] %v8355_v2  ;;  %v249_v50 = vadd.f32 %v248_v10, %v8355_v2  ;;  %1643 = vmatpush.msrb.mxu2 %v8205_v53  ;;  %1522 = vmatpush.msrb.mxu0 %v8177_v44  ;;  %v457_v10 = vpop.f32.mrf.mxu3 }
  0xc0   :  { %1574 = vmatpush.msrb.mxu1 %v8128_v17  ;;  %1698 = vmatpush.msrb.mxu3 %v8148_v41 }
  0xc1   :  { %v346_v30 = vadd.f32 %v345_v0, %v249_v50  ;;  %1525 = vmatpush.msrb.mxu0 %v8198_v56  ;;  %1647 = vmatpush.msrb.mxu2 %v8226_v34  ;;  %v8381_v50 = vsub.f32 %v121_v52, %v8362_v37  ;;  %v97_v0 = vld [vmem:[%s11885_s2 + $0x20] sm:$0xff]  ;;  %v8400_v34 = vsub.f32 %v113_v16, %v8373_v59 }
  0xc2   :  { %1490 = vmatmul.f32.gmra.mxu3 %v7537_v28  ;;  %1576 = vmatpush.msrb.mxu1 %v8148_v41 }
  0xc3   :  { %1291 = vmatmul.f32.gmra.mxu0 %v7537_v28  ;;  %v406_v53 = vadd.f32 %v405_v51, %v346_v30  ;;  %12492 = vst [vmem:[#allocation144_spill] sm:$0xff] %v8381_v50  ;;  %1336 = vmatmul.f32.gmra.mxu1 %v7537_v28  ;;  %v8392_v30 = vand.u32 4294901760, %v105_v62  ;;  %v12495_v51 = vand.u32 4294901760, %v8219_v49  ;;  %v349_v16 = vpop.f32.mrf.mxu1 }
  0xc4   :  { %v256_v1 = vpop.f32.mrf.mxu0  ;;  %1528 = vmatpush.msrb.mxu0 %v8219_v49  ;;  %1700 = vmatpush.msrb.mxu3 %v8167_v39  ;;  %12497 = vst [vmem:[#allocation148_spill] sm:$0xff] %v8400_v34  ;;  %v89_v49 = vld [vmem:[%s11886_s1 + $0xe0] sm:$0xff] }
  0xc5   :  { %v8388_v56 = vadd.f32 %v457_v10, %v406_v53  ;;  %12494 = vst [vmem:[#allocation146_spill] sm:$0xff] %v8392_v30  ;;  %1651 = vmatpush.msrb.mxu2 %v12495_v51  ;;  %1578 = vmatpush.msrb.mxu1 %v8167_v39  ;;  %v8406_v10 = vand.u32 4294901760, %v8381_v50  ;;  %v12500_v51 = vand.u32 4294901760, %v8238_v29  ;;  %v8421_v31 = vsub.f32 %v105_v62, %v8392_v30 }
  0xc6   :  { %v8396_v52 = vpop.permute.xlu1 %182  ;;  %1531 = vmatpush.msrb.mxu0 %v8238_v29  ;;  %1401 = vmatmul.f32.gmra.mxu2 %v7719_v12  ;;  %v8426_v29 = vand.u32 4294901760, %v8400_v34 }
  0xc7   :  { %12493 = vst [vmem:[#allocation145_spill] sm:$0xff] %v8388_v56  ;;  %v257_v53 = vadd.f32 %v256_v1, %v8396_v52  ;;  %v8408_v56 = vand.u32 4294901760, %v97_v0  ;;  %1655 = vmatpush.msrb.mxu2 %v12500_v51  ;;  %1702 = vmatpush.msrb.mxu3 %v8191_v21  ;;  %v410_v1 = vpop.f32.mrf.mxu2  ;;  %v8428_v51 = vand.u32 4294901760, %v89_v49  ;;  %v463_v62 = vpop.f32.mrf.mxu3 }
  0xc8   :  { %12496 = vst [vmem:[#allocation147_spill] sm:$0xff] %v8396_v52  ;;  %1534 = vmatpush.msrb.mxu0 %v8254_v40  ;;  %1580 = vmatpush.msrb.mxu1 %v8191_v21  ;;  %v1794_v21 = vsub.f32 %v8381_v50, %v8406_v10  ;;  %v1800_v48 = vsub.f32 %v8400_v34, %v8426_v29 }
  0xc9   :  { %12498 = vst [vmem:[#allocation149_spill] sm:$0xff] %v8406_v10  ;;  %v350_v18 = vadd.f32 %v349_v16, %v257_v53  ;;  %1704 = vmatpush.msrb.mxu3 %v8207_v13  ;;  %v81_v53 = vld [vmem:[%s11886_s1 + $0xa0] sm:$0xff]  ;;  %v8439_v27 = vsub.f32 %v97_v0, %v8408_v56  ;;  %v12511_v0 = vand.u32 4294901760, %v8269_v61  ;;  %v8461_v26 = vsub.f32 %v89_v49, %v8428_v51 }
  0xca   :  { %12499 = vst [vmem:[#allocation150_spill] sm:$0xff] %v8408_v56  ;;  %1494 = vmatmul.f32.gmra.mxu3 %v7606_v20  ;;  %1537 = vmatpush.msrb.mxu0 %v8269_v61  ;;  %v65_v61 = vld [vmem:[%s11886_s1 + $0x20] sm:$0xff] }
  0xcb   :  { %1295 = vmatmul.f32.gmra.mxu0 %v7606_v20  ;;  %12502 = vst [vmem:[#allocation152_spill] sm:$0xff] %v8421_v31  ;;  %v411_v16 = vadd.f32 %v410_v1, %v350_v18  ;;  %1340 = vmatmul.f32.gmra.mxu1 %v7606_v20  ;;  %v73_v18 = vld [vmem:[%s11886_s1 + $0x60] sm:$0xff] }
  0xcc   :  { %12503 = vst [vmem:[#allocation153_spill] sm:$0xff] %v8426_v29  ;;  %1582 = vmatpush.msrb.mxu1 %v8207_v13  ;;  %1706 = vmatpush.msrb.mxu3 %v8228_v9  ;;  %v8465_v13 = vand.u32 4294901760, %v1794_v21 }
  0xcd   :  { %12504 = vst [vmem:[#allocation154_spill] sm:$0xff] %v8428_v51  ;;  %v8447_v1 = vadd.f32 %v463_v62, %v411_v16  ;;  %1731 = vmatpush.msra.mxu0 %v8362_v37  ;;  %v8468_v16 = vand.u32 4294901760, %v8439_v27  ;;  %v8470_v62 = vand.u32 4294901760, %v73_v18 }
  0xce   :  { %12506 = vst [vmem:[#allocation155_spill] sm:$0xff] %v8439_v27  ;;  %1584 = vmatpush.msrb.mxu1 %v8228_v9  ;;  %1708 = vmatpush.msrb.mxu3 %v8247_v7  ;;  %v8479_v9 = vpop.f32.mrf.mxu1 }
  0xcf   :  { %12508 = vst [vmem:[#allocation156_spill] sm:$0xff] %v8447_v1  ;;  %v614_v21 = vpop.f32.mrf.mxu2  ;;  %1733 = vmatpush.msra.mxu0 %v8373_v59  ;;  %v8503_v46 = vsub.f32 %v73_v18, %v8470_v62 }
  0xd0   :  { %v8416_v44 = vpop.f32.mrf.mxu0  ;;  %12512 = vst [vmem:[#allocation159_spill] sm:$0xff] %v8461_v26  ;;  %1586 = vmatpush.msrb.mxu1 %v8247_v7  ;;  %1946 = vmatpush.msra.mxu3 %v8362_v37  ;;  %v615_v4 = vadd.f32 %v614_v21, %v8310_v43  ;;  %v8496_v7 = vand.u32 4294901760, %v65_v61  ;;  %v12523_v21 = vld [vmem:[#allocation42_spill] sm:$0xff] }
  0xd1   :  { %12501 = vst [vmem:[#allocation151_spill] sm:$0xff] %v8416_v44  ;;  %v12505_v44 = vand.u32 4294901760, %v8254_v40  ;;  %v8451_v40 = vand.u32 4294901760, %v8421_v31  ;;  %1735 = vmatpush.msra.mxu0 %v8392_v30 }
  0xd2   :  { %12513 = vst [vmem:[#allocation160_spill] sm:$0xff] %v8465_v13  ;;  %1710 = vmatmul.f32.vlgmr.msrb.gmra.mxu3 %v7421_v55  ;;  %1796 = vmatpush.msra.mxu1 %v8465_v13  ;;  %v8524_v35 = vsub.f32 %v65_v61, %v8496_v7 }
  0xd3   :  { %1659 = vmatpush.msrb.mxu2 %v12505_v44  ;;  %1540 = vmatmul.f32.vlgmr.msrb.gmra.mxu0 %v12507_v11  ;;  %12509 = vst [vmem:[#allocation157_spill] sm:$0xff] %v8451_v40  ;;  %v8453_v44 = vand.u32 4294901760, %v81_v53 }
  0xd4   :  { %12514 = vst [vmem:[#allocation161_spill] sm:$0xff] %v8468_v16  ;;  %1948 = vmatpush.msra.mxu3 %v8373_v59  ;;  %1737 = vmatpush.msra.mxu0 %v8408_v56  ;;  %v8562_v41 = vand.u32 4294901760, %v8524_v35 }
  0xd5   :  { %12510 = vst [vmem:[#allocation158_spill] sm:$0xff] %v8453_v44  ;;  %1663 = vmatpush.msrb.mxu2 %v12511_v0  ;;  %v1806_v0 = vsub.f32 %v8421_v31, %v8451_v40  ;;  %v8486_v1 = vsub.f32 %v81_v53, %v8453_v44  ;;  %v1812_v53 = vsub.f32 %v8439_v27, %v8468_v16 }
  0xd6   :  { %1665 = vmatmul.f32.vlgmr.msrb.gmra.mxu2 %v7421_v55  ;;  %12515 = vst [vmem:[#allocation162_spill] sm:$0xff] %v8470_v62  ;;  %1950 = vmatpush.msra.mxu3 %v8392_v30  ;;  %v8541_v61 = vpop.f32.mrf.mxu1  ;;  %v1836_v22 = vsub.f32 %v8524_v35, %v8562_v41 }
  0xd7   :  { %1886 = vmatpush.msra.mxu2 %v8381_v50  ;;  %12517 = vst [vmem:[#allocation164_spill] sm:$0xff] %v8479_v9  ;;  %v8491_v50 = vand.u32 4294901760, %v1800_v48  ;;  %v719_v9 = vpop.f32.mrf.mxu3  ;;  %v57_v48 = vld [vmem:[%s11887_s0 + $0xe0] sm:$0xff]  ;;  %v8514_v13 = vand.u32 4294901760, %v1806_v0  ;;  %v8517_v60 = vand.u32 4294901760, %v8486_v1  ;;  %v8533_v0 = vand.u32 4294901760, %v1812_v53  ;;  %v622_v53 = vpop.f32.mrf.mxu2  ;;  %1739 = vmatpush.msra.mxu0 %v8428_v51 }
  0xd8   :  { %v8477_v49 = vpop.f32.mrf.mxu0  ;;  %12518 = vst [vmem:[#allocation165_spill] sm:$0xff] %v8486_v1  ;;  %v8510_v19 = vadd.f32 %v719_v9, %v615_v4  ;;  %v8526_v4 = vand.u32 4294901760, %v57_v48  ;;  %v49_v9 = vld [vmem:[%s11887_s0 + $0xa0] sm:$0xff]  ;;  %1952 = vmatpush.msra.mxu3 %v8408_v56  ;;  %v8625_v38 = vand.u32 4294901760, %v1836_v22  ;;  %v98_v22 = vld [vmem:[%s11885_s2 + $0x28] sm:$0xff] }
  0xd9   :  { %12516 = vst [vmem:[#allocation163_spill] sm:$0xff] %v8477_v49  ;;  %1889 = vmatpush.msra.mxu2 %v8400_v34  ;;  %v8494_v49 = vand.u32 4294901760, %v8461_v26  ;;  %v12524_v34 = vld [vmem:[#allocation36_spill] sm:$0xff]  ;;  %1802 = vmatpush.msra.mxu1 %v8491_v50  ;;  %v1824_v63 = vsub.f32 %v8486_v1, %v8517_v60  ;;  %v8551_v39 = vand.u32 4294901760, %v49_v9 }
  0xda   :  { %12519 = vst [vmem:[#allocation166_spill] sm:$0xff] %v8491_v50  ;;  %1590 = vmatmul.f32.vlgmr.msrb.gmra.mxu1 %v12524_v34  ;;  %v8536_v50 = vand.u32 4294901760, %v8503_v46  ;;  %1714 = vmatmul.f32.gmra.mxu3 %v7480_v32 }
  0xdb   :  { %12520 = vst [vmem:[#allocation167_spill] sm:$0xff] %v8494_v49  ;;  %1545 = vmatmul.f32.gmra.mxu0 %v12523_v21  ;;  %1892 = vmatpush.msra.mxu2 %v8421_v31  ;;  %v1818_v18 = vsub.f32 %v8461_v26, %v8494_v49  ;;  %v8585_v6 = vsub.f32 %v49_v9, %v8551_v39 }
  0xdc   :  { %12521 = vst [vmem:[#allocation168_spill] sm:$0xff] %v8496_v7  ;;  %1808 = vmatpush.msra.mxu1 %v8514_v13  ;;  %1954 = vmatpush.msra.mxu3 %v8428_v51 }
  0xdd   :  { %12522 = vst [vmem:[#allocation169_spill] sm:$0xff] %v8503_v46  ;;  %1895 = vmatpush.msra.mxu2 %v8439_v27  ;;  %v623_v27 = vadd.f32 %v622_v53, %v8329_v3  ;;  %v1830_v53 = vsub.f32 %v8503_v46, %v8536_v50  ;;  %1741 = vmatpush.msra.mxu0 %v8453_v44 }
  0xde   :  { %12525 = vst [vmem:[#allocation42_spill] sm:$0xff] %v8514_v13  ;;  %1669 = vmatmul.f32.gmra.mxu2 %v7480_v32  ;;  %v33_v13 = vld [vmem:[%s11887_s0 + $0x20] sm:$0xff]  ;;  %1814 = vmatpush.msra.mxu1 %v8533_v0  ;;  %v8613_v15 = vpop.f32.mrf.mxu1 }
  0xdf   :  { %12526 = vst [vmem:[#allocation170_spill] sm:$0xff] %v8517_v60  ;;  %1898 = vmatpush.msra.mxu2 %v8461_v26  ;;  %v8571_v26 = vand.u32 4294901760, %v41_v58  ;;  %v8587_v33 = vand.u32 4294901760, %v33_v13  ;;  %1956 = vmatpush.msra.mxu3 %v8453_v44  ;;  %v8601_v9 = vand.u32 4294901760, %v1830_v53 }
  0xe0   :  { %12527 = vst [vmem:[#allocation171_spill] sm:$0xff] %v8524_v35  ;;  %v8539_v31 = vpop.f32.mrf.mxu0  ;;  %1743 = vmatpush.msra.mxu0 %v8470_v62 }
  0xe1   :  { %12528 = vst [vmem:[#allocation172_spill] sm:$0xff] %v8526_v4  ;;  %1901 = vmatpush.msra.mxu2 %v8486_v1  ;;  %v8604_v1 = vsub.f32 %v41_v58, %v8571_v26  ;;  %v8619_v58 = vsub.f32 %v33_v13, %v8587_v33  ;;  %1958 = vmatpush.msra.mxu3 %v8470_v62 }
  0xe2   :  { %12529 = vst [vmem:[#allocation173_spill] sm:$0xff] %v8533_v0  ;;  %1596 = vmatmul.f32.gmra.mxu1 %v12435_v5  ;;  %v8582_v0 = vand.u32 4294901760, %v1824_v63  ;;  %v114_v63 = vld [vmem:[%s11885_s2 + $0xa8] sm:$0xff]  ;;  %1718 = vmatmul.f32.gmra.mxu3 %v7537_v28 }
  0xe3   :  { %12530 = vst [vmem:[#allocation174_spill] sm:$0xff] %v8536_v50  ;;  %1550 = vmatmul.f32.gmra.mxu0 %v7567_v57  ;;  %1904 = vmatpush.msra.mxu2 %v8503_v46  ;;  %v8621_v46 = vand.u32 4294901760, %v114_v63 }
  0xe4   :  { %12531 = vst [vmem:[#allocation175_spill] sm:$0xff] %v8539_v31  ;;  %v8556_v31 = vand.u32 4294901760, %v1818_v18  ;;  %v723_v18 = vpop.f32.mrf.mxu3  ;;  %1745 = vmatpush.msra.mxu0 %v8496_v7  ;;  %1960 = vmatpush.msra.mxu3 %v8496_v7 }
  0xe5   :  { %12532 = vst [vmem:[#allocation176_spill] sm:$0xff] %v8541_v61  ;;  %v8559_v61 = vsub.f32 %v57_v48, %v8526_v4  ;;  %v122_v48 = vld [vmem:[%s11885_s2 + $0xe8] sm:$0xff]  ;;  %v8578_v17 = vadd.f32 %v723_v18, %v623_v27  ;;  %1907 = vmatpush.msra.mxu2 %v8524_v35  ;;  %v8653_v35 = vsub.f32 %v114_v63, %v8621_v46  ;;  %v12551_v63 = vand.u32 4294901760, %v8604_v1 }
  0xe6   :  { %12533 = vst [vmem:[#allocation177_spill] sm:$0xff] %v8551_v39  ;;  %1820 = vmatpush.msra.mxu1 %v8556_v31  ;;  %v8594_v18 = vand.u32 4294901760, %v122_v48  ;;  %1673 = vmatmul.f32.gmra.mxu2 %v7537_v28  ;;  %v106_v27 = vld [vmem:[%s11885_s2 + $0x68] sm:$0xff] }
  0xe7   :  { %12534 = vst [vmem:[#allocation178_spill] sm:$0xff] %v8556_v31  ;;  %v8637_v24 = vand.u32 4294901760, %v106_v27  ;;  %1747 = vmatpush.msra.mxu0 %v8526_v4  ;;  %1910 = vmatpush.msra.mxu2 %v8559_v61  ;;  %v8686_v43 = vand.u32 4294901760, %v8653_v35 }
  0xe8   :  { %12535 = vst [vmem:[#allocation179_spill] sm:$0xff] %v8562_v41  ;;  %v8607_v31 = vpop.f32.mrf.mxu0  ;;  %1826 = vmatpush.msra.mxu1 %v8582_v0  ;;  %1962 = vmatpush.msra.mxu3 %v8526_v4  ;;  %v8688_v4 = vand.u32 4294901760, %v90_v42 }
  0xe9   :  { %12536 = vst [vmem:[#allocation180_spill] sm:$0xff] %v8582_v0  ;;  %v8631_v0 = vsub.f32 %v122_v48, %v8594_v18  ;;  %1749 = vmatpush.msra.mxu0 %v8551_v39  ;;  %1913 = vmatpush.msra.mxu2 %v8585_v6 }
  0xea   :  { %12537 = vst [vmem:[#allocation181_spill] sm:$0xff] %v8585_v6  ;;  %1832 = vmatpush.msra.mxu1 %v8601_v9  ;;  %1722 = vmatmul.f32.gmra.mxu3 %v7606_v20 }
  0xeb   :  { %12538 = vst [vmem:[#allocation182_spill] sm:$0xff] %v8594_v18  ;;  %1555 = vmatmul.f32.gmra.mxu0 %v7635_v23  ;;  %1602 = vmatmul.f32.gmra.mxu1 %v7598_v8 }
  0xec   :  { %12539 = vst [vmem:[#allocation183_spill] sm:$0xff] %v8601_v9  ;;  %1838 = vmatpush.msra.mxu1 %v8625_v38  ;;  %v8671_v9 = vsub.f32 %v106_v27, %v8637_v24  ;;  %1751 = vmatpush.msra.mxu0 %v8571_v26 }
  0xed   :  { %12540 = vst [vmem:[#allocation184_spill] sm:$0xff] %v8607_v31  ;;  %v630_v31 = vpop.f32.mrf.mxu2  ;;  %1964 = vmatpush.msra.mxu3 %v8551_v39  ;;  %1916 = vmatpush.msra.mxu2 %v8604_v1  ;;  %v74_v39 = vld [vmem:[%s11886_s1 + $0x68] sm:$0xff] }
  0xee   :  { %12541 = vst [vmem:[#allocation185_spill] sm:$0xff] %v8613_v15  ;;  %v12544_v15 = vand.u32 4294901760, %v8559_v61  ;;  %v631_v53 = vadd.f32 %v630_v31, %v8355_v2  ;;  %v12547_v31 = vand.u32 4294901760, %v8585_v6  ;;  %1677 = vmatmul.f32.gmra.mxu2 %v7606_v20  ;;  %1753 = vmatpush.msra.mxu0 %v8587_v33  ;;  %v8700_v20 = vand.u32 4294901760, %v8671_v9 }
  0xef   :  { %12542 = vst [vmem:[#allocation186_spill] sm:$0xff] %v8621_v46  ;;  %1966 = vmatpush.msra.mxu3 %v8571_v26  ;;  %1919 = vmatpush.msra.mxu2 %v8619_v58 }
  0xf0   :  { %12543 = vst [vmem:[#allocation187_spill] sm:$0xff] %v8625_v38  ;;  %v1842_v54 = vsub.f32 %v8559_v61, %v12544_v15  ;;  %v727_v15 = vpop.f32.mrf.mxu3  ;;  %v1848_v13 = vsub.f32 %v8585_v6, %v12547_v31  ;;  %v1854_v31 = vsub.f32 %v8604_v1, %v12551_v63  ;;  %v8678_v38 = vpop.f32.mrf.mxu1  ;;  %v12554_v63 = vand.u32 4294901760, %v8619_v58  ;;  %2001 = vmatpush.msrb.mxu0 %v8406_v10 }
  0xf1   :  { %12545 = vst [vmem:[#allocation188_spill] sm:$0xff] %v8631_v0  ;;  %v8644_v48 = vadd.f32 %v727_v15, %v631_v53  ;;  %v8658_v53 = vand.u32 4294901760, %v8631_v0  ;;  %v8660_v15 = vand.u32 4294901760, %v98_v22  ;;  %v777_v2 = vpop.f32.mrf.mxu0  ;;  %1968 = vmatpush.msra.mxu3 %v8587_v33  ;;  %2113 = vmatpush.msrb.mxu2 %v8594_v18 }
  0xf2   :  { %12546 = vst [vmem:[#allocation189_spill] sm:$0xff] %v8637_v24  ;;  %v1843_v45 = vand.u32 4294901760, %v1842_v54  ;;  %v82_v54 = vld [vmem:[%s11886_s1 + $0xa8] sm:$0xff]  ;;  %v1849_v3 = vand.u32 4294901760, %v1848_v13  ;;  %v1860_v27 = vsub.f32 %v8619_v58, %v12554_v63  ;;  %v1855_v63 = vand.u32 4294901760, %v1854_v31  ;;  %1972 = vmatmul.f32.vlgmr.msra.gmra.mxu3 %v12524_v34  ;;  %2005 = vmatpush.msrb.mxu0 %v8426_v29 }
  0xf3   :  { %12548 = vst [vmem:[#allocation190_spill] sm:$0xff] %v8653_v35  ;;  %v8694_v6 = vsub.f32 %v98_v22, %v8660_v15  ;;  %1608 = vmatmul.f32.gmra.mxu1 %v7665_v25  ;;  %1759 = vmatmul.f32.vlgmr.msra.gmra.mxu0 %v12482_v36 }
  0xf4   :  { %12549 = vst [vmem:[#allocation191_spill] sm:$0xff] %v8658_v53  ;;  %1844 = vmatpush.msra.mxu1 %v1843_v45  ;;  %v8702_v45 = vand.u32 4294901760, %v82_v54  ;;  %v1861_v31 = vand.u32 4294901760, %v1860_v27  ;;  %v66_v27 = vld [vmem:[%s11886_s1 + $0x28] sm:$0xff]  ;;  %2115 = vmatpush.msrb.mxu2 %v8621_v46 }
  0xf5   :  { %12550 = vst [vmem:[#allocation192_spill] sm:$0xff] %v8660_v15  ;;  %v638_v23 = vpop.f32.mrf.mxu2  ;;  %v8722_v36 = vand.u32 4294901760, %v8694_v6  ;;  %2009 = vmatpush.msrb.mxu0 %v8451_v40 }
  0xf6   :  { %12552 = vst [vmem:[#allocation193_spill] sm:$0xff] %v8671_v9  ;;  %v639_v13 = vadd.f32 %v638_v23, %v8396_v52  ;;  %1850 = vmatpush.msra.mxu1 %v1849_v3  ;;  %v2182_v52 = vsub.f32 %v8653_v35, %v8686_v43  ;;  %v8724_v3 = vand.u32 4294901760, %v74_v39  ;;  %1922 = vmatmul.f32.vlgmr.msra.gmra.mxu2 %v12507_v11 }
  0xf7   :  { %12553 = vst [vmem:[#allocation194_spill] sm:$0xff] %v8678_v38  ;;  %v2176_v38 = vsub.f32 %v8631_v0, %v8658_v53  ;;  %v8715_v53 = vsub.f32 %v90_v42, %v8688_v4  ;;  %v2188_v42 = vsub.f32 %v8671_v9, %v8700_v20  ;;  %v8744_v9 = vand.u32 4294901760, %v66_v27  ;;  %2117 = vmatpush.msrb.mxu2 %v8637_v24 }
  0xf8   :  { %12555 = vst [vmem:[#allocation195_spill] sm:$0xff] %v8686_v43  ;;  %v731_v22 = vpop.f32.mrf.mxu3  ;;  %1856 = vmatpush.msra.mxu1 %v1855_v63  ;;  %v827_v10 = vpop.f32.mrf.mxu1  ;;  %v8739_v63 = vand.u32 4294901760, %v2182_v52  ;;  %v8754_v52 = vsub.f32 %v74_v39, %v8724_v3  ;;  %2013 = vmatpush.msrb.mxu0 %v8468_v16 }
  0xf9   :  { %12556 = vst [vmem:[#allocation196_spill] sm:$0xff] %v8688_v4  ;;  %v8709_v23 = vadd.f32 %v731_v22, %v639_v13  ;;  %v8719_v0 = vand.u32 4294901760, %v2176_v38  ;;  %v8733_v13 = vsub.f32 %v82_v54, %v8702_v45  ;;  %v778_v38 = vadd.f32 %v777_v2, %v8510_v19  ;;  %v782_v22 = vpop.f32.mrf.mxu0  ;;  %v58_v19 = vld [vmem:[%s11887_s0 + $0xe8] sm:$0xff]  ;;  %2119 = vmatpush.msrb.mxu2 %v8660_v15 }
  0xfa   :  { %12557 = vst [vmem:[#allocation197_spill] sm:$0xff] %v8694_v6  ;;  %1862 = vmatpush.msra.mxu1 %v1861_v31  ;;  %v8742_v11 = vand.u32 4294901760, %v8715_v53  ;;  %v2194_v31 = vsub.f32 %v8694_v6, %v8722_v36  ;;  %v8758_v34 = vand.u32 4294901760, %v2188_v42  ;;  %v8775_v29 = vsub.f32 %v66_v27, %v8744_v9  ;;  %1978 = vmatmul.f32.gmra.mxu3 %v12435_v5 }
  0xfb   :  { %12558 = vst [vmem:[#allocation198_spill] sm:$0xff] %v8700_v20  ;;  %v828_v2 = vadd.f32 %v827_v10, %v778_v38  ;;  %2178 = vmatpush.msrb.mxu3 %v8719_v0  ;;  %v8761_v20 = vand.u32 4294901760, %v8733_v13  ;;  %v50_v10 = vld [vmem:[%s11887_s0 + $0xa8] sm:$0xff]  ;;  %1767 = vmatmul.f32.gmra.mxu0 %v7595_v14 }
  0xfc   :  { %12559 = vst [vmem:[#allocation199_spill] sm:$0xff] %v8702_v45  ;;  %2068 = vmatpush.msrb.mxu1 %v8362_v37  ;;  %v2200_v42 = vsub.f32 %v8715_v53, %v8742_v11  ;;  %2121 = vmatpush.msrb.mxu2 %v8688_v4 }
  0xfd   :  { %12560 = vst [vmem:[#allocation200_spill] sm:$0xff] %v8715_v53  ;;  %v902_v54 = vpop.f32.mrf.mxu2  ;;  %1864 = vmatmul.f32.vlgmr.msra.gmra.mxu1 %v7421_v55  ;;  %2184 = vmatpush.msrb.mxu3 %v8739_v63  ;;  %v42_v53 = vld [vmem:[%s11887_s0 + $0x68] sm:$0xff]  ;;  %v2206_v27 = vsub.f32 %v8733_v13, %v8761_v20 }
  0xfe   :  { %12561 = vst [vmem:[#allocation201_spill] sm:$0xff] %v8719_v0  ;;  %v903_v38 = vadd.f32 %v902_v54, %v828_v2  ;;  %v8768_v0 = vand.u32 4294901760, %v58_v19  ;;  %2070 = vmatpush.msrb.mxu1 %v8373_v59  ;;  %v8781_v2 = vand.u32 4294901760, %v2194_v31  ;;  %v8784_v54 = vand.u32 4294901760, %v8754_v52  ;;  %1927 = vmatmul.f32.gmra.mxu2 %v12523_v21 }
  0xff   :  { %12562 = vst [vmem:[#allocation202_spill] sm:$0xff] %v8722_v36  ;;  %2190 = vmatpush.msrb.mxu3 %v8758_v34  ;;  %v8808_v59 = vand.u32 4294901760, %v42_v53  ;;  %2017 = vmatpush.msrb.mxu0 %v8494_v49  ;;  %v12649_v49 = vld [vmem:[#allocation47_spill] sm:$0xff] }
 0x100   :  { %12563 = vst [vmem:[#allocation203_spill] sm:$0xff] %v8724_v3  ;;  %v947_v39 = vpop.f32.mrf.mxu3  ;;  %v8799_v31 = vsub.f32 %v58_v19, %v8768_v0  ;;  %v833_v40 = vpop.f32.mrf.mxu1  ;;  %2072 = vmatpush.msrb.mxu1 %v8392_v30  ;;  %v2212_v16 = vsub.f32 %v8754_v52, %v8784_v54  ;;  %v8822_v30 = vand.u32 4294901760, %v2206_v27  ;;  %2123 = vmatpush.msrb.mxu2 %v8702_v45 }
 0x101   :  { %12564 = vst [vmem:[#allocation204_spill] sm:$0xff] %v8733_v13  ;;  %v8777_v37 = vadd.f32 %v947_v39, %v903_v38  ;;  %v783_v38 = vadd.f32 %v782_v22, %v8578_v17  ;;  %v787_v39 = vpop.f32.mrf.mxu0  ;;  %v34_v17 = vld [vmem:[%s11887_s0 + $0x28] sm:$0xff]  ;;  %2196 = vmatpush.msrb.mxu3 %v8781_v2  ;;  %v8834_v27 = vsub.f32 %v42_v53, %v8808_v59 }
 0x102   :  { %12565 = vst [vmem:[#allocation205_spill] sm:$0xff] %v8739_v63  ;;  %v8786_v63 = vand.u32 4294901760, %v50_v10  ;;  %2074 = vmatpush.msrb.mxu1 %v8408_v56  ;;  %2021 = vmatpush.msrb.mxu0 %v8517_v60  ;;  %v92_v56 = vld [vmem:[%s11886_s1 + $0xf8] sm:$0xff] }
 0x103   :  { %12566 = vst [vmem:[#allocation206_spill] sm:$0xff] %v8742_v11  ;;  %v834_v22 = vadd.f32 %v833_v40, %v783_v38  ;;  %1775 = vmatmul.f32.gmra.mxu0 %v12396_v47  ;;  %2125 = vmatpush.msrb.mxu2 %v8724_v3 }
 0x104   :  { %12567 = vst [vmem:[#allocation207_spill] sm:$0xff] %v8744_v9  ;;  %2076 = vmatpush.msrb.mxu1 %v8428_v51  ;;  %2025 = vmatpush.msrb.mxu0 %v8536_v50 }
 0x105   :  { %12568 = vst [vmem:[#allocation208_spill] sm:$0xff] %v8754_v52  ;;  %v906_v19 = vpop.f32.mrf.mxu2  ;;  %1868 = vmatmul.f32.gmra.mxu1 %v7480_v32  ;;  %1984 = vmatmul.f32.gmra.mxu3 %v7598_v8 }
 0x106   :  { %12569 = vst [vmem:[#allocation209_spill] sm:$0xff] %v8758_v34  ;;  %v8806_v34 = vand.u32 4294901760, %v8775_v29  ;;  %v907_v5 = vadd.f32 %v906_v19, %v834_v22  ;;  %v8840_v19 = vand.u32 4294901760, %v2212_v16  ;;  %1932 = vmatmul.f32.gmra.mxu2 %v7567_v57  ;;  %2078 = vmatpush.msrb.mxu1 %v8453_v44 }
 0x107   :  { %12570 = vst [vmem:[#allocation210_spill] sm:$0xff] %v8761_v20  ;;  %2029 = vmatpush.msrb.mxu0 %v8562_v41  ;;  %2127 = vmatpush.msrb.mxu2 %v8744_v9 }
 0x108   :  { %12571 = vst [vmem:[#allocation211_spill] sm:$0xff] %v8775_v29  ;;  %v951_v40 = vpop.f32.mrf.mxu3  ;;  %v839_v60 = vpop.f32.mrf.mxu1  ;;  %2080 = vmatpush.msrb.mxu1 %v8470_v62 }
 0x109   :  { %12572 = vst [vmem:[#allocation212_spill] sm:$0xff] %v8777_v37  ;;  %v8803_v37 = vand.u32 4294901760, %v2200_v42  ;;  %v8818_v42 = vsub.f32 %v50_v10, %v8786_v63  ;;  %v2218_v10 = vsub.f32 %v8775_v29, %v8806_v34  ;;  %v8836_v22 = vadd.f32 %v951_v40, %v907_v5  ;;  %v792_v16 = vpop.f32.mrf.mxu0  ;;  %2129 = vmatpush.msrb.mxu2 %v8768_v0 }
 0x10a   :  { %12573 = vst [vmem:[#allocation213_spill] sm:$0xff] %v8781_v2  ;;  %v8827_v2 = vand.u32 4294901760, %v34_v17  ;;  %v12580_v5 = vand.u32 4294901760, %v8799_v31  ;;  %2082 = vmatpush.msrb.mxu1 %v8496_v7 }
 0x10b   :  { %12574 = vst [vmem:[#allocation214_spill] sm:$0xff] %v8784_v54  ;;  %2202 = vmatpush.msrb.mxu3 %v8803_v37  ;;  %v8856_v38 = vand.u32 4294901760, %v2218_v10  ;;  %1783 = vmatmul.f32.gmra.mxu0 %v7719_v12 }
 0x10c   :  { %12575 = vst [vmem:[#allocation215_spill] sm:$0xff] %v8803_v37  ;;  %v788_v37 = vadd.f32 %v787_v39, %v8644_v48  ;;  %v2224_v53 = vsub.f32 %v8799_v31, %v12580_v5  ;;  %v8852_v40 = vsub.f32 %v34_v17, %v8827_v2  ;;  %v12582_v5 = vand.u32 4294901760, %v8818_v42  ;;  %2131 = vmatpush.msrb.mxu2 %v8786_v63 }
 0x10d   :  { %12576 = vst [vmem:[#allocation216_spill] sm:$0xff] %v8806_v34  ;;  %2208 = vmatpush.msrb.mxu3 %v8822_v30  ;;  %1872 = vmatmul.f32.gmra.mxu1 %v7537_v28  ;;  %v12583_v48 = vand.u32 4294901760, %v8559_v61  ;;  %v793_v61 = vadd.f32 %v792_v16, %v8709_v23  ;;  %v12592_v16 = vand.u32 4294901760, %v8619_v58  ;;  %v12597_v58 = vld [vmem:[#allocation188_spill] sm:$0xff] }
 0x10e   :  { %12577 = vst [vmem:[#allocation217_spill] sm:$0xff] %v8822_v30  ;;  %v840_v39 = vadd.f32 %v839_v60, %v788_v37  ;;  %v910_v30 = vpop.f32.mrf.mxu2  ;;  %v2230_v17 = vsub.f32 %v8818_v42, %v12582_v5  ;;  %v2225_v60 = vand.u32 4294901760, %v2224_v53  ;;  %v12584_v5 = vand.u32 4294901760, %v8834_v27  ;;  %v12588_v37 = vld [vmem:[#allocation64_spill] sm:$0xff]  ;;  %1990 = vmatmul.f32.gmra.mxu3 %v7665_v25  ;;  %2133 = vmatpush.msrb.mxu2 %v8808_v59 }
 0x10f   :  { %12578 = vst [vmem:[#allocation218_spill] sm:$0xff] %v8836_v22  ;;  %2214 = vmatpush.msrb.mxu3 %v8840_v19  ;;  %2033 = vmatpush.msrb.mxu0 %v12583_v48  ;;  %v12589_v48 = vand.u32 4294901760, %v8852_v40 }
 0x110   :  { %12579 = vst [vmem:[#allocation219_spill] sm:$0xff] %v8840_v19  ;;  %v911_v50 = vadd.f32 %v910_v30, %v840_v39  ;;  %v955_v10 = vpop.f32.mrf.mxu3  ;;  %v2236_v19 = vsub.f32 %v8834_v27, %v12584_v5  ;;  %v2231_v30 = vand.u32 4294901760, %v2230_v17  ;;  %v12586_v39 = vld [vmem:[#allocation181_spill] sm:$0xff]  ;;  %1937 = vmatmul.f32.gmra.mxu2 %v12588_v37 }
 0x111   :  { %12581 = vst [vmem:[#allocation220_spill] sm:$0xff] %v8856_v38  ;;  %2220 = vmatpush.msrb.mxu3 %v8856_v38  ;;  %v12587_v53 = vand.u32 4294901760, %v12586_v39  ;;  %v996_v5 = vpop.f32.mrf.mxu0  ;;  %v12590_v38 = vand.u32 4294901760, %v8604_v1  ;;  %2135 = vmatpush.msrb.mxu2 %v8827_v2 }
 0x112   :  { %v8875_v41 = vadd.f32 %v955_v10, %v911_v50  ;;  %v2242_v50 = vsub.f32 %v8852_v40, %v12589_v48  ;;  %v845_v10 = vpop.f32.mrf.mxu1  ;;  %v2237_v17 = vand.u32 4294901760, %v2236_v19  ;;  %v12593_v48 = vld [vmem:[#allocation58_spill] sm:$0xff]  ;;  %v12595_v19 = vld [vmem:[#allocation137_spill] sm:$0xff] }
 0x113   :  { %2037 = vmatpush.msrb.mxu0 %v12587_v53  ;;  %2226 = vmatpush.msrb.mxu3 %v2225_v60  ;;  %v846_v39 = vadd.f32 %v845_v10, %v793_v61  ;;  %v12591_v53 = vld [vmem:[#allocation172_spill] sm:$0xff]  ;;  %v997_v61 = vadd.f32 %v996_v5, %v12595_v19 }
 0x114   :  { %12585 = vst [vmem:[#allocation221_spill] sm:$0xff] %v8875_v41  ;;  %2084 = vmatpush.msrb.mxu1 %v12591_v53  ;;  %v12594_v41 = vld [vmem:[#allocation177_spill] sm:$0xff] }
 0x115   :  { %2041 = vmatpush.msrb.mxu0 %v12590_v38  ;;  %2232 = vmatpush.msrb.mxu3 %v2231_v30  ;;  %v2243_v38 = vand.u32 4294901760, %v2242_v50  ;;  %v12598_v30 = vld [vmem:[#allocation46_spill] sm:$0xff] }
 0x116   :  { %v914_v23 = vpop.f32.mrf.mxu2  ;;  %1876 = vmatmul.f32.gmra.mxu1 %v12593_v48 }
 0x117   :  { %2045 = vmatpush.msrb.mxu0 %v12592_v16  ;;  %v915_v60 = vadd.f32 %v914_v23, %v846_v39  ;;  %2086 = vmatpush.msrb.mxu1 %v12594_v41  ;;  %v12599_v39 = vld [vmem:[#allocation191_spill] sm:$0xff] }
 0x118   :  { %2047 = vmatmul.f32.vlgmr.msrb.gmra.mxu0 %v7421_v55  ;;  %v959_v1 = vpop.f32.mrf.mxu3  ;;  %2238 = vmatpush.msrb.mxu3 %v2237_v17  ;;  %v12601_v23 = vld [vmem:[#allocation139_spill] sm:$0xff] }
 0x119   :  { %v8898_v10 = vadd.f32 %v959_v1, %v915_v60  ;;  %2268 = vmatpush.msra.mxu0 %v12597_v58  ;;  %2088 = vmatpush.msrb.mxu1 %v8571_v26  ;;  %v1004_v53 = vpop.f32.mrf.mxu0  ;;  %v12603_v1 = vld [vmem:[#allocation193_spill] sm:$0xff] }
 0x11a   :  { %2141 = vmatmul.f32.vlgmr.msrb.gmra.mxu2 %v12598_v30  ;;  %2244 = vmatpush.msrb.mxu3 %v2243_v38  ;;  %v1101_v50 = vpop.f32.mrf.mxu1  ;;  %v1005_v16 = vadd.f32 %v1004_v53, %v12601_v23 }
 0x11b   :  { %12596 = vst [vmem:[#allocation181_spill] sm:$0xff] %v8898_v10  ;;  %2383 = vmatpush.msra.mxu2 %v12599_v39  ;;  %2090 = vmatpush.msrb.mxu1 %v8587_v33  ;;  %v1102_v41 = vadd.f32 %v1101_v50, %v997_v61  ;;  %v12600_v33 = vld [vmem:[#allocation198_spill] sm:$0xff] }
 0x11c   :  { %2246 = vmatmul.f32.vlgmr.msrb.gmra.mxu3 %v7421_v55  ;;  %2271 = vmatpush.msra.mxu0 %v8653_v35 }
 0x11d   :  { %2450 = vmatpush.msra.mxu3 %v8594_v18  ;;  %2387 = vmatpush.msra.mxu2 %v8686_v43 }
 0x11e   :  { %v1159_v5 = vpop.f32.mrf.mxu2  ;;  %2328 = vmatpush.msra.mxu1 %v8594_v18  ;;  %2274 = vmatpush.msra.mxu0 %v12603_v1 }
 0x11f   :  { %v1160_v26 = vadd.f32 %v1159_v5, %v1102_v41  ;;  %2092 = vmatmul.f32.vlgmr.msrb.gmra.mxu1 %v7421_v55  ;;  %2452 = vmatpush.msra.mxu3 %v8621_v46  ;;  %v12604_v41 = vld [vmem:[#allocation200_spill] sm:$0xff] }
 0x120   :  { %2051 = vmatmul.f32.gmra.mxu0 %v7480_v32  ;;  %v1209_v17 = vpop.f32.mrf.mxu3  ;;  %2391 = vmatpush.msra.mxu2 %v12600_v33  ;;  %v75_v33 = vld [vmem:[%s11886_s1 + $0x70] sm:$0xff] }
 0x121   :  { %v8916_v60 = vadd.f32 %v1209_v17, %v1160_v26  ;;  %2330 = vmatpush.msra.mxu1 %v8621_v46  ;;  %2454 = vmatpush.msra.mxu3 %v8637_v24  ;;  %v1012_v38 = vpop.f32.mrf.mxu0  ;;  %v123_v17 = vld [vmem:[%s11885_s2 + $0xf0] sm:$0xff] }
 0x122   :  { %2149 = vmatmul.f32.gmra.mxu2 %v7595_v14  ;;  %2277 = vmatpush.msra.mxu0 %v8694_v6  ;;  %v1105_v61 = vpop.f32.mrf.mxu1  ;;  %v12622_v6 = vld [vmem:[#allocation32_spill] sm:$0xff] }
 0x123   :  { %12602 = vst [vmem:[#allocation172_spill] sm:$0xff] %v8916_v60  ;;  %2395 = vmatpush.msra.mxu2 %v8722_v36  ;;  %2332 = vmatpush.msra.mxu1 %v8637_v24  ;;  %v1106_v53 = vadd.f32 %v1105_v61, %v1005_v16  ;;  %v12605_v16 = vld [vmem:[#allocation141_spill] sm:$0xff] }
 0x124   :  { %2250 = vmatmul.f32.gmra.mxu3 %v7480_v32  ;;  %2280 = vmatpush.msra.mxu0 %v12604_v41  ;;  %v1013_v61 = vadd.f32 %v1012_v38, %v12605_v16 }
 0x125   :  { %2456 = vmatpush.msra.mxu3 %v8660_v15  ;;  %2399 = vmatpush.msra.mxu2 %v8742_v11 }
 0x126   :  { %v1164_v50 = vpop.f32.mrf.mxu2  ;;  %2334 = vmatpush.msra.mxu1 %v8660_v15  ;;  %2283 = vmatpush.msra.mxu0 %v8733_v13 }
 0x127   :  { %v1165_v5 = vadd.f32 %v1164_v50, %v1106_v53  ;;  %2096 = vmatmul.f32.gmra.mxu1 %v7480_v32  ;;  %2458 = vmatpush.msra.mxu3 %v8688_v4  ;;  %v8944_v53 = vand.u32 4294901760, %v123_v17  ;;  %v115_v50 = vld [vmem:[%s11885_s2 + $0xb0] sm:$0xff] }
 0x128   :  { %2055 = vmatmul.f32.gmra.mxu0 %v7537_v28  ;;  %v1215_v26 = vpop.f32.mrf.mxu3  ;;  %2403 = vmatpush.msra.mxu2 %v8761_v20  ;;  %v8955_v20 = vand.u32 4294901760, %v115_v50 }
 0x129   :  { %v8938_v60 = vadd.f32 %v1215_v26, %v1165_v5  ;;  %2336 = vmatpush.msra.mxu1 %v8688_v4  ;;  %2460 = vmatpush.msra.mxu3 %v8702_v45  ;;  %12607 = vst [vmem:[#allocation222_spill] sm:$0xff] %v8944_v53  ;;  %v1020_v38 = vpop.f32.mrf.mxu0 }
 0x12a   :  { %2157 = vmatmul.f32.gmra.mxu2 %v12396_v47  ;;  %2286 = vmatpush.msra.mxu0 %v8754_v52  ;;  %v1109_v5 = vpop.f32.mrf.mxu1  ;;  %12608 = vst [vmem:[#allocation223_spill] sm:$0xff] %v8955_v20  ;;  %v8963_v52 = vsub.f32 %v123_v17, %v8944_v53 }
 0x12b   :  { %12606 = vst [vmem:[#allocation177_spill] sm:$0xff] %v8938_v60  ;;  %2407 = vmatpush.msra.mxu2 %v8784_v54  ;;  %2338 = vmatpush.msra.mxu1 %v8702_v45  ;;  %v1110_v26 = vadd.f32 %v1109_v5, %v1013_v61  ;;  %v107_v54 = vld [vmem:[%s11885_s2 + $0x70] sm:$0xff] }
 0x12c   :  { %2254 = vmatmul.f32.gmra.mxu3 %v7537_v28  ;;  %2289 = vmatpush.msra.mxu0 %v8775_v29  ;;  %12609 = vst [vmem:[#allocation224_spill] sm:$0xff] %v8963_v52  ;;  %v99_v5 = vld [vmem:[%s11885_s2 + $0x30] sm:$0xff]  ;;  %v12611_v29 = vld [vmem:[#allocation147_spill] sm:$0xff]  ;;  %v8986_v41 = vand.u32 4294901760, %v8963_v52 }
 0x12d   :  { %2462 = vmatpush.msra.mxu3 %v8724_v3  ;;  %2411 = vmatpush.msra.mxu2 %v8806_v34  ;;  %v8972_v34 = vand.u32 4294901760, %v107_v54  ;;  %v1021_v11 = vadd.f32 %v1020_v38, %v12611_v29  ;;  %v8988_v36 = vand.u32 4294901760, %v99_v5 }
 0x12e   :  { %v1169_v60 = vpop.f32.mrf.mxu2  ;;  %2340 = vmatpush.msra.mxu1 %v8724_v3  ;;  %2292 = vmatpush.msra.mxu0 %v8799_v31  ;;  %12615 = vst [vmem:[#allocation228_spill] sm:$0xff] %v8986_v41 }
 0x12f   :  { %v1170_v13 = vadd.f32 %v1169_v60, %v1110_v26  ;;  %2100 = vmatmul.f32.gmra.mxu1 %v7537_v28  ;;  %2464 = vmatpush.msra.mxu3 %v8744_v9  ;;  %12610 = vst [vmem:[#allocation225_spill] sm:$0xff] %v8972_v34  ;;  %v12613_v60 = vand.u32 4294901760, %v8799_v31  ;;  %v8981_v26 = vsub.f32 %v115_v50, %v8955_v20  ;;  %v12616_v31 = vand.u32 4294901760, %v8818_v42 }
 0x130   :  { %2059 = vmatmul.f32.gmra.mxu0 %v12593_v48  ;;  %v1221_v61 = vpop.f32.mrf.mxu3  ;;  %2342 = vmatpush.msra.mxu1 %v8744_v9 }
 0x131   :  { %v8975_v17 = vadd.f32 %v1221_v61, %v1170_v13  ;;  %2415 = vmatpush.msra.mxu2 %v12613_v60  ;;  %12614 = vst [vmem:[#allocation227_spill] sm:$0xff] %v8981_v26  ;;  %2295 = vmatpush.msra.mxu0 %v8818_v42  ;;  %v91_v13 = vld [vmem:[%s11886_s1 + $0xf0] sm:$0xff]  ;;  %v8996_v38 = vpop.f32.mrf.mxu0  ;;  %v9001_v61 = vsub.f32 %v107_v54, %v8972_v34  ;;  %v9006_v42 = vand.u32 4294901760, %v8981_v26  ;;  %v12620_v54 = vand.u32 4294901760, %v8834_v27 }
 0x132   :  { %2165 = vmatmul.f32.gmra.mxu2 %v7719_v12  ;;  %2466 = vmatpush.msra.mxu3 %v8768_v0  ;;  %v1113_v50 = vpop.f32.mrf.mxu1  ;;  %12617 = vst [vmem:[#allocation229_spill] sm:$0xff] %v8996_v38  ;;  %v83_v38 = vld [vmem:[%s11886_s1 + $0xb0] sm:$0xff] }
 0x133   :  { %12612 = vst [vmem:[#allocation226_spill] sm:$0xff] %v8975_v17  ;;  %2419 = vmatpush.msra.mxu2 %v12616_v31  ;;  %2298 = vmatpush.msra.mxu0 %v8834_v27  ;;  %v1114_v60 = vadd.f32 %v1113_v50, %v1021_v11  ;;  %v9008_v31 = vand.u32 4294901760, %v91_v13  ;;  %v2558_v11 = vsub.f32 %v8963_v52, %v8986_v41  ;;  %v9029_v27 = vand.u32 4294901760, %v9001_v61 }
 0x134   :  { %2258 = vmatmul.f32.gmra.mxu3 %v12593_v48  ;;  %12618 = vst [vmem:[#allocation230_spill] sm:$0xff] %v9001_v61  ;;  %2344 = vmatpush.msra.mxu1 %v8768_v0  ;;  %v9019_v0 = vsub.f32 %v99_v5, %v8988_v36 }
 0x135   :  { %2468 = vmatpush.msra.mxu3 %v8786_v63  ;;  %12619 = vst [vmem:[#allocation231_spill] sm:$0xff] %v9006_v42  ;;  %2301 = vmatpush.msra.mxu0 %v8852_v40  ;;  %v9041_v35 = vsub.f32 %v91_v13, %v9008_v31 }
 0x136   :  { %v1174_v17 = vpop.f32.mrf.mxu2  ;;  %2423 = vmatpush.msra.mxu2 %v12620_v54  ;;  %12621 = vst [vmem:[#allocation232_spill] sm:$0xff] %v9019_v0  ;;  %2346 = vmatpush.msra.mxu1 %v8786_v63  ;;  %v9031_v54 = vand.u32 4294901760, %v83_v38  ;;  %v9045_v63 = vand.u32 4294901760, %v2558_v11  ;;  %v2570_v11 = vsub.f32 %v9001_v61, %v9029_v27 }
 0x137   :  { %v1175_v50 = vadd.f32 %v1174_v17, %v1114_v60  ;;  %2104 = vmatmul.f32.gmra.mxu1 %v12593_v48  ;;  %2470 = vmatpush.msra.mxu3 %v8808_v59  ;;  %12623 = vst [vmem:[#allocation233_spill] sm:$0xff] %v9029_v27  ;;  %v12625_v17 = vand.u32 4294901760, %v8852_v40  ;;  %v2564_v60 = vsub.f32 %v8981_v26, %v9006_v42  ;;  %v67_v40 = vld [vmem:[%s11886_s1 + $0x30] sm:$0xff] }
 0x138   :  { %2304 = vmatmul.f32.vlgmr.msra.gmra.mxu0 %v12622_v6  ;;  %v1227_v1 = vpop.f32.mrf.mxu3  ;;  %12626 = vst [vmem:[#allocation235_spill] sm:$0xff] %v9041_v35  ;;  %2348 = vmatpush.msra.mxu1 %v8808_v59 }
 0x139   :  { %v9033_v5 = vadd.f32 %v1227_v1, %v1175_v50  ;;  %2427 = vmatpush.msra.mxu2 %v12625_v17  ;;  %2495 = vmatpush.msrb.mxu0 %v8944_v53  ;;  %12627 = vst [vmem:[#allocation236_spill] sm:$0xff] %v9045_v63  ;;  %v9048_v1 = vand.u32 4294901760, %v9019_v0  ;;  %v9050_v50 = vand.u32 4294901760, %v75_v33  ;;  %v9057_v13 = vpop.f32.mrf.mxu0  ;;  %v9066_v17 = vsub.f32 %v83_v38, %v9031_v54 }
 0x13a   :  { %2429 = vmatmul.f32.vlgmr.msra.gmra.mxu2 %v7421_v55  ;;  %2472 = vmatpush.msra.mxu3 %v8827_v2  ;;  %12630 = vst [vmem:[#allocation239_spill] sm:$0xff] %v9057_v13  ;;  %v9059_v59 = vpop.f32.mrf.mxu1  ;;  %v9073_v13 = vand.u32 4294901760, %v9041_v35 }
 0x13b   :  { %12624 = vst [vmem:[#allocation234_spill] sm:$0xff] %v9033_v5  ;;  %2650 = vmatpush.msrb.mxu2 %v8963_v52  ;;  %2350 = vmatpush.msra.mxu1 %v8827_v2  ;;  %v9070_v52 = vand.u32 4294901760, %v2564_v60  ;;  %v2576_v38 = vsub.f32 %v9019_v0, %v9048_v1  ;;  %v9083_v43 = vsub.f32 %v75_v33, %v9050_v50  ;;  %v59_v60 = vld [vmem:[%s11887_s0 + $0xf0] sm:$0xff]  ;;  %v9097_v33 = vand.u32 4294901760, %v9066_v17 }
 0x13c   :  { %12628 = vst [vmem:[#allocation237_spill] sm:$0xff] %v9048_v1  ;;  %2474 = vmatmul.f32.vlgmr.msra.gmra.mxu3 %v7421_v55  ;;  %2497 = vmatpush.msrb.mxu0 %v8955_v20  ;;  %v2582_v39 = vsub.f32 %v9041_v35, %v9073_v13 }
 0x13d   :  { %12629 = vst [vmem:[#allocation238_spill] sm:$0xff] %v9050_v50  ;;  %2710 = vmatpush.msrb.mxu3 %v8944_v53  ;;  %2653 = vmatpush.msrb.mxu2 %v8981_v26  ;;  %v12637_v26 = vld [vmem:[#allocation36_spill] sm:$0xff] }
 0x13e   :  { %12631 = vst [vmem:[#allocation240_spill] sm:$0xff] %v9059_v59  ;;  %v1378_v5 = vpop.f32.mrf.mxu2  ;;  %v9075_v59 = vand.u32 4294901760, %v67_v40  ;;  %2560 = vmatpush.msrb.mxu1 %v9045_v63  ;;  %v9094_v63 = vand.u32 4294901760, %v2570_v11  ;;  %2499 = vmatpush.msrb.mxu0 %v8972_v34  ;;  %v51_v11 = vld [vmem:[%s11887_s0 + $0xb0] sm:$0xff]  ;;  %v9135_v45 = vand.u32 4294901760, %v2582_v39 }
 0x13f   :  { %12632 = vst [vmem:[#allocation241_spill] sm:$0xff] %v9066_v17  ;;  %v1379_v2 = vadd.f32 %v1378_v5, %v12595_v19  ;;  %2354 = vmatmul.f32.vlgmr.msra.gmra.mxu1 %v12637_v26  ;;  %2712 = vmatpush.msrb.mxu3 %v8955_v20  ;;  %v9131_v3 = vand.u32 4294901760, %v51_v11 }
 0x140   :  { %12633 = vst [vmem:[#allocation242_spill] sm:$0xff] %v9070_v52  ;;  %2309 = vmatmul.f32.gmra.mxu0 %v12523_v21  ;;  %v1483_v58 = vpop.f32.mrf.mxu3  ;;  %2656 = vmatpush.msrb.mxu2 %v9001_v61  ;;  %v9104_v10 = vsub.f32 %v67_v40, %v9075_v59  ;;  %v43_v40 = vld [vmem:[%s11887_s0 + $0x70] sm:$0xff] }
 0x141   :  { %12634 = vst [vmem:[#allocation243_spill] sm:$0xff] %v9073_v13  ;;  %v9090_v5 = vadd.f32 %v1483_v58, %v1379_v2  ;;  %2566 = vmatpush.msrb.mxu1 %v9070_v52  ;;  %v9106_v58 = vand.u32 4294901760, %v59_v60  ;;  %2714 = vmatpush.msrb.mxu3 %v8972_v34  ;;  %v9113_v2 = vand.u32 4294901760, %v2576_v38  ;;  %v9116_v52 = vand.u32 4294901760, %v9083_v43  ;;  %v9123_v61 = vpop.f32.mrf.mxu0 }
 0x142   :  { %12635 = vst [vmem:[#allocation244_spill] sm:$0xff] %v9075_v59  ;;  %2433 = vmatmul.f32.gmra.mxu2 %v7480_v32  ;;  %2501 = vmatpush.msrb.mxu0 %v8988_v36  ;;  %v9125_v9 = vpop.f32.mrf.mxu1  ;;  %v2588_v38 = vsub.f32 %v9066_v17, %v9097_v33 }
 0x143   :  { %12636 = vst [vmem:[#allocation245_spill] sm:$0xff] %v9083_v43  ;;  %2659 = vmatpush.msrb.mxu2 %v9019_v0  ;;  %2572 = vmatpush.msrb.mxu1 %v9094_v63  ;;  %v2594_v39 = vsub.f32 %v9083_v43, %v9116_v52 }
 0x144   :  { %12638 = vst [vmem:[#allocation246_spill] sm:$0xff] %v9094_v63  ;;  %2478 = vmatmul.f32.gmra.mxu3 %v7480_v32  ;;  %v35_v63 = vld [vmem:[%s11887_s0 + $0x30] sm:$0xff]  ;;  %2503 = vmatpush.msrb.mxu0 %v9008_v31 }
 0x145   :  { %12639 = vst [vmem:[#allocation247_spill] sm:$0xff] %v9097_v33  ;;  %2716 = vmatpush.msrb.mxu3 %v8988_v36  ;;  %2662 = vmatpush.msrb.mxu2 %v9041_v35  ;;  %v9151_v35 = vand.u32 4294901760, %v43_v40  ;;  %v9167_v22 = vand.u32 4294901760, %v35_v63 }
 0x146   :  { %12640 = vst [vmem:[#allocation248_spill] sm:$0xff] %v9104_v10  ;;  %v1386_v0 = vpop.f32.mrf.mxu2  ;;  %2578 = vmatpush.msrb.mxu1 %v9113_v2  ;;  %2505 = vmatpush.msrb.mxu0 %v9031_v54 }
 0x147   :  { %12641 = vst [vmem:[#allocation249_spill] sm:$0xff] %v9106_v58  ;;  %v1387_v4 = vadd.f32 %v1386_v0, %v12601_v23  ;;  %2360 = vmatmul.f32.gmra.mxu1 %v12649_v49  ;;  %2718 = vmatpush.msrb.mxu3 %v9008_v31  ;;  %v9162_v0 = vand.u32 4294901760, %v2588_v38  ;;  %v116_v38 = vld [vmem:[%s11885_s2 + $0xb8] sm:$0xff] }
 0x148   :  { %12642 = vst [vmem:[#allocation250_spill] sm:$0xff] %v9113_v2  ;;  %2314 = vmatmul.f32.gmra.mxu0 %v7567_v57  ;;  %v1487_v15 = vpop.f32.mrf.mxu3  ;;  %2665 = vmatpush.msrb.mxu2 %v9066_v17  ;;  %v9165_v2 = vsub.f32 %v51_v11, %v9131_v3  ;;  %v9181_v11 = vand.u32 4294901760, %v2594_v39  ;;  %v9184_v17 = vsub.f32 %v43_v40, %v9151_v35 }
 0x149   :  { %12643 = vst [vmem:[#allocation251_spill] sm:$0xff] %v9116_v52  ;;  %v9158_v24 = vadd.f32 %v1487_v15, %v1387_v4  ;;  %2584 = vmatpush.msrb.mxu1 %v9135_v45  ;;  %2720 = vmatpush.msrb.mxu3 %v9031_v54  ;;  %v108_v4 = vld [vmem:[%s11885_s2 + $0x78] sm:$0xff]  ;;  %v9199_v40 = vsub.f32 %v35_v63, %v9167_v22 }
 0x14a   :  { %12644 = vst [vmem:[#allocation252_spill] sm:$0xff] %v9123_v61  ;;  %v9138_v61 = vsub.f32 %v59_v60, %v9106_v58  ;;  %v124_v60 = vld [vmem:[%s11885_s2 + $0xf8] sm:$0xff]  ;;  %2437 = vmatmul.f32.gmra.mxu2 %v7537_v28  ;;  %2507 = vmatpush.msrb.mxu0 %v9050_v50  ;;  %v9193_v18 = vpop.f32.mrf.mxu1  ;;  %v9217_v44 = vand.u32 4294901760, %v108_v4 }
 0x14b   :  { %12645 = vst [vmem:[#allocation253_spill] sm:$0xff] %v9125_v9  ;;  %v9141_v9 = vand.u32 4294901760, %v9104_v10  ;;  %v9174_v15 = vand.u32 4294901760, %v124_v60  ;;  %2668 = vmatpush.msrb.mxu2 %v9083_v43  ;;  %2590 = vmatpush.msrb.mxu1 %v9162_v0  ;;  %v9201_v43 = vand.u32 4294901760, %v116_v38 }
 0x14c   :  { %12646 = vst [vmem:[#allocation254_spill] sm:$0xff] %v9131_v3  ;;  %2482 = vmatmul.f32.gmra.mxu3 %v7537_v28  ;;  %2509 = vmatpush.msrb.mxu0 %v9075_v59 }
 0x14d   :  { %12647 = vst [vmem:[#allocation255_spill] sm:$0xff] %v9135_v45  ;;  %v2600_v46 = vsub.f32 %v9104_v10, %v9141_v9  ;;  %v9191_v45 = vpop.f32.mrf.mxu0  ;;  %2722 = vmatpush.msrb.mxu3 %v9050_v50  ;;  %2671 = vmatpush.msrb.mxu2 %v9104_v10  ;;  %v9233_v10 = vsub.f32 %v116_v38, %v9201_v43  ;;  %v12665_v38 = vand.u32 4294901760, %v9184_v17 }
 0x14e   :  { %12648 = vst [vmem:[#allocation256_spill] sm:$0xff] %v9141_v9  ;;  %v1394_v7 = vpop.f32.mrf.mxu2  ;;  %2596 = vmatpush.msrb.mxu1 %v9181_v11  ;;  %2511 = vmatpush.msrb.mxu0 %v9106_v58 }
 0x14f   :  { %12650 = vst [vmem:[#allocation257_spill] sm:$0xff] %v9162_v0  ;;  %v9205_v62 = vand.u32 4294901760, %v2600_v46  ;;  %v9211_v0 = vsub.f32 %v124_v60, %v9174_v15  ;;  %v1395_v39 = vadd.f32 %v1394_v7, %v12605_v16  ;;  %v100_v46 = vld [vmem:[%s11885_s2 + $0x38] sm:$0xff]  ;;  %2366 = vmatmul.f32.gmra.mxu1 %v7598_v8  ;;  %2724 = vmatpush.msrb.mxu3 %v9075_v59  ;;  %v12661_v7 = vand.u32 4294901760, %v9165_v2 }
 0x150   :  { %12651 = vst [vmem:[#allocation258_spill] sm:$0xff] %v9165_v2  ;;  %2319 = vmatmul.f32.gmra.mxu0 %v12588_v37  ;;  %2674 = vmatpush.msrb.mxu2 %v9138_v61  ;;  %v9266_v19 = vand.u32 4294901760, %v9233_v10 }
 0x151   :  { %12652 = vst [vmem:[#allocation259_spill] sm:$0xff] %v9174_v15  ;;  %v2612_v63 = vsub.f32 %v9165_v2, %v12661_v7  ;;  %2602 = vmatpush.msrb.mxu1 %v9205_v62  ;;  %2513 = vmatpush.msrb.mxu0 %v9131_v3  ;;  %v2618_v7 = vsub.f32 %v9184_v17, %v12665_v38  ;;  %v12668_v38 = vand.u32 4294901760, %v9199_v40 }
 0x152   :  { %12653 = vst [vmem:[#allocation260_spill] sm:$0xff] %v9181_v11  ;;  %2441 = vmatmul.f32.gmra.mxu2 %v12593_v48  ;;  %v9251_v11 = vsub.f32 %v108_v4, %v9217_v44  ;;  %2726 = vmatpush.msrb.mxu3 %v9106_v58  ;;  %v9268_v58 = vand.u32 4294901760, %v92_v56 }
 0x153   :  { %12654 = vst [vmem:[#allocation261_spill] sm:$0xff] %v9191_v45  ;;  %v12658_v45 = vand.u32 4294901760, %v9138_v61  ;;  %2677 = vmatpush.msrb.mxu2 %v9165_v2  ;;  %2515 = vmatpush.msrb.mxu0 %v9151_v35  ;;  %v2613_v23 = vand.u32 4294901760, %v2612_v63  ;;  %v2624_v4 = vsub.f32 %v9199_v40, %v12668_v38  ;;  %v2619_v38 = vand.u32 4294901760, %v2618_v7 }
 0x154   :  { %12655 = vst [vmem:[#allocation262_spill] sm:$0xff] %v9193_v18  ;;  %2486 = vmatmul.f32.gmra.mxu3 %v12593_v48  ;;  %v9280_v48 = vand.u32 4294901760, %v9251_v11 }
 0x155   :  { %12656 = vst [vmem:[#allocation263_spill] sm:$0xff] %v9201_v43  ;;  %v2606_v18 = vsub.f32 %v9138_v61, %v12658_v45  ;;  %v1491_v45 = vpop.f32.mrf.mxu3  ;;  %v1541_v16 = vpop.f32.mrf.mxu0  ;;  %2728 = vmatpush.msrb.mxu3 %v9131_v3  ;;  %2517 = vmatpush.msrb.mxu0 %v9167_v22  ;;  %v76_v3 = vld [vmem:[%s11886_s1 + $0x78] sm:$0xff]  ;;  %v2625_v7 = vand.u32 4294901760, %v2624_v4 }
 0x156   :  { %12657 = vst [vmem:[#allocation264_spill] sm:$0xff] %v9205_v62  ;;  %v9224_v60 = vadd.f32 %v1491_v45, %v1395_v39  ;;  %v9238_v39 = vand.u32 4294901760, %v9211_v0  ;;  %v9240_v45 = vand.u32 4294901760, %v100_v46  ;;  %v9258_v62 = vpop.f32.mrf.mxu1  ;;  %v1402_v37 = vpop.f32.mrf.mxu2  ;;  %2680 = vmatpush.msrb.mxu2 %v9184_v17  ;;  %v68_v4 = vld [vmem:[%s11886_s1 + $0x38] sm:$0xff] }
 0x157   :  { %12659 = vst [vmem:[#allocation265_spill] sm:$0xff] %v9211_v0  ;;  %v2607_v51 = vand.u32 4294901760, %v2606_v18  ;;  %v84_v18 = vld [vmem:[%s11886_s1 + $0xb8] sm:$0xff]  ;;  %v1403_v63 = vadd.f32 %v1402_v37, %v12611_v29  ;;  %2372 = vmatmul.f32.gmra.mxu1 %v7665_v25  ;;  %2730 = vmatpush.msrb.mxu3 %v9151_v35  ;;  %v2946_v29 = vsub.f32 %v9233_v10, %v9266_v19 }
 0x158   :  { %12660 = vst [vmem:[#allocation266_spill] sm:$0xff] %v9217_v44  ;;  %v9274_v2 = vsub.f32 %v100_v46, %v9240_v45  ;;  %2523 = vmatmul.f32.vlgmr.msrb.gmra.mxu0 %v12598_v30  ;;  %2683 = vmatpush.msrb.mxu2 %v9199_v40 }
 0x159   :  { %12662 = vst [vmem:[#allocation267_spill] sm:$0xff] %v9233_v10  ;;  %2608 = vmatpush.msrb.mxu1 %v2607_v51  ;;  %v9282_v51 = vand.u32 4294901760, %v84_v18  ;;  %2765 = vmatpush.msra.mxu0 %v8986_v41 }
 0x15a   :  { %12663 = vst [vmem:[#allocation268_spill] sm:$0xff] %v9238_v39  ;;  %v9302_v30 = vand.u32 4294901760, %v9274_v2  ;;  %2686 = vmatmul.f32.vlgmr.msrb.gmra.mxu2 %v12622_v6  ;;  %2732 = vmatpush.msrb.mxu3 %v9167_v22 }
 0x15b   :  { %12664 = vst [vmem:[#allocation269_spill] sm:$0xff] %v9240_v45  ;;  %2614 = vmatpush.msrb.mxu1 %v2613_v23  ;;  %v9304_v23 = vand.u32 4294901760, %v76_v3  ;;  %2877 = vmatpush.msra.mxu2 %v9174_v15 }
 0x15c   :  { %12666 = vst [vmem:[#allocation270_spill] sm:$0xff] %v9251_v11  ;;  %2736 = vmatmul.f32.vlgmr.msrb.gmra.mxu3 %v12637_v26  ;;  %2769 = vmatpush.msra.mxu0 %v9006_v42 }
 0x15d   :  { %12667 = vst [vmem:[#allocation271_spill] sm:$0xff] %v9258_v62  ;;  %v2940_v62 = vsub.f32 %v9211_v0, %v9238_v39  ;;  %v1495_v46 = vpop.f32.mrf.mxu3  ;;  %v9295_v39 = vsub.f32 %v92_v56, %v9268_v58  ;;  %2620 = vmatpush.msrb.mxu1 %v2619_v38  ;;  %v2952_v56 = vsub.f32 %v9251_v11, %v9280_v48  ;;  %v9319_v38 = vand.u32 4294901760, %v2946_v29 }
 0x15e   :  { %12669 = vst [vmem:[#allocation272_spill] sm:$0xff] %v9266_v19  ;;  %v9289_v37 = vadd.f32 %v1495_v46, %v1403_v63  ;;  %v9313_v63 = vsub.f32 %v84_v18, %v9282_v51  ;;  %v1546_v46 = vpop.f32.mrf.mxu0  ;;  %v1591_v41 = vpop.f32.mrf.mxu1  ;;  %v9324_v11 = vand.u32 4294901760, %v68_v4  ;;  %2879 = vmatpush.msra.mxu2 %v9201_v43  ;;  %v9334_v29 = vsub.f32 %v76_v3, %v9304_v23 }
 0x15f   :  { %12670 = vst [vmem:[#allocation273_spill] sm:$0xff] %v9268_v58  ;;  %v9299_v0 = vand.u32 4294901760, %v2940_v62  ;;  %v1542_v62 = vadd.f32 %v1541_v16, %v9090_v5  ;;  %2626 = vmatpush.msrb.mxu1 %v2625_v7  ;;  %v9322_v6 = vand.u32 4294901760, %v9295_v39  ;;  %v60_v16 = vld [vmem:[%s11887_s0 + $0xf8] sm:$0xff]  ;;  %v1666_v18 = vpop.f32.mrf.mxu2  ;;  %v2958_v7 = vsub.f32 %v9274_v2, %v9302_v30  ;;  %2773 = vmatpush.msra.mxu0 %v9029_v27 }
 0x160   :  { %12671 = vst [vmem:[#allocation274_spill] sm:$0xff] %v9274_v2  ;;  %v9338_v26 = vand.u32 4294901760, %v2952_v56  ;;  %2531 = vmatmul.f32.gmra.mxu0 %v7595_v14  ;;  %2628 = vmatmul.f32.vlgmr.msrb.gmra.mxu1 %v7421_v55  ;;  %v9355_v42 = vsub.f32 %v68_v4, %v9324_v11 }
 0x161   :  { %12672 = vst [vmem:[#allocation275_spill] sm:$0xff] %v9280_v48  ;;  %v1592_v5 = vadd.f32 %v1591_v41, %v1542_v62  ;;  %2942 = vmatpush.msra.mxu3 %v9299_v0  ;;  %2832 = vmatpush.msra.mxu1 %v8944_v53  ;;  %v9341_v48 = vand.u32 4294901760, %v9313_v63  ;;  %v52_v41 = vld [vmem:[%s11887_s0 + $0xb8] sm:$0xff]  ;;  %v2964_v56 = vsub.f32 %v9295_v39, %v9322_v6 }
 0x162   :  { %12673 = vst [vmem:[#allocation276_spill] sm:$0xff] %v9282_v51  ;;  %2881 = vmatpush.msra.mxu2 %v9217_v44  ;;  %2777 = vmatpush.msra.mxu0 %v9048_v1 }
 0x163   :  { %12674 = vst [vmem:[#allocation277_spill] sm:$0xff] %v9295_v39  ;;  %v1667_v62 = vadd.f32 %v1666_v18, %v1592_v5  ;;  %2948 = vmatpush.msra.mxu3 %v9319_v38  ;;  %2834 = vmatpush.msra.mxu1 %v8955_v20  ;;  %v9361_v5 = vand.u32 4294901760, %v2958_v7  ;;  %v9364_v18 = vand.u32 4294901760, %v9334_v29  ;;  %v44_v39 = vld [vmem:[%s11887_s0 + $0x78] sm:$0xff]  ;;  %v2970_v4 = vsub.f32 %v9313_v63, %v9341_v48 }
 0x164   :  { %12675 = vst [vmem:[#allocation278_spill] sm:$0xff] %v9299_v0  ;;  %v9348_v0 = vand.u32 4294901760, %v60_v16  ;;  %2691 = vmatmul.f32.gmra.mxu2 %v12523_v21  ;;  %2742 = vmatmul.f32.gmra.mxu3 %v12649_v49  ;;  %v9388_v20 = vand.u32 4294901760, %v44_v39 }
 0x165   :  { %12676 = vst [vmem:[#allocation279_spill] sm:$0xff] %v9302_v30  ;;  %v1711_v3 = vpop.f32.mrf.mxu3  ;;  %2954 = vmatpush.msra.mxu3 %v9338_v26  ;;  %2883 = vmatpush.msra.mxu2 %v9240_v45  ;;  %v2976_v1 = vsub.f32 %v9334_v29, %v9364_v18 }
 0x166   :  { %12677 = vst [vmem:[#allocation280_spill] sm:$0xff] %v9304_v23  ;;  %v9357_v53 = vadd.f32 %v1711_v3, %v1667_v62  ;;  %v1547_v62 = vadd.f32 %v1546_v46, %v9158_v24  ;;  %v9379_v7 = vsub.f32 %v60_v16, %v9348_v0  ;;  %v1551_v3 = vpop.f32.mrf.mxu0  ;;  %v1597_v27 = vpop.f32.mrf.mxu1  ;;  %2836 = vmatpush.msra.mxu1 %v8972_v34  ;;  %v36_v24 = vld [vmem:[%s11887_s0 + $0x38] sm:$0xff]  ;;  %v9402_v34 = vand.u32 4294901760, %v2970_v4 }
 0x167   :  { %12678 = vst [vmem:[#allocation281_spill] sm:$0xff] %v9313_v63  ;;  %2960 = vmatpush.msra.mxu3 %v9361_v5  ;;  %v1670_v16 = vpop.f32.mrf.mxu2  ;;  %2885 = vmatpush.msra.mxu2 %v9268_v58  ;;  %v9414_v4 = vsub.f32 %v44_v39, %v9388_v20 }
 0x168   :  { %12679 = vst [vmem:[#allocation282_spill] sm:$0xff] %v9319_v38  ;;  %v9366_v38 = vand.u32 4294901760, %v52_v41  ;;  %v1598_v46 = vadd.f32 %v1597_v27, %v1547_v62  ;;  %2838 = vmatpush.msra.mxu1 %v8988_v36  ;;  %2781 = vmatpush.msra.mxu0 %v9073_v13 }
 0x169   :  { %12680 = vst [vmem:[#allocation283_spill] sm:$0xff] %v9322_v6  ;;  %2539 = vmatmul.f32.gmra.mxu0 %v12396_v47  ;;  %2632 = vmatmul.f32.gmra.mxu1 %v7480_v32 }
 0x16a   :  { %12681 = vst [vmem:[#allocation284_spill] sm:$0xff] %v9324_v11  ;;  %v1671_v49 = vadd.f32 %v1670_v16, %v1598_v46  ;;  %2887 = vmatpush.msra.mxu2 %v9282_v51  ;;  %2785 = vmatpush.msra.mxu0 %v9097_v33  ;;  %v9420_v16 = vand.u32 4294901760, %v2976_v1 }
 0x16b   :  { %12682 = vst [vmem:[#allocation285_spill] sm:$0xff] %v9334_v29  ;;  %2840 = vmatpush.msra.mxu1 %v9008_v31 }
 0x16c   :  { %12683 = vst [vmem:[#allocation286_spill] sm:$0xff] %v9338_v26  ;;  %v9386_v26 = vand.u32 4294901760, %v9355_v42  ;;  %2696 = vmatmul.f32.gmra.mxu2 %v7567_v57  ;;  %2789 = vmatpush.msra.mxu0 %v9116_v52 }
 0x16d   :  { %12684 = vst [vmem:[#allocation287_spill] sm:$0xff] %v9341_v48  ;;  %v1715_v27 = vpop.f32.mrf.mxu3  ;;  %2889 = vmatpush.msra.mxu2 %v9304_v23  ;;  %2748 = vmatmul.f32.gmra.mxu3 %v7598_v8 }
 0x16e   :  { %12685 = vst [vmem:[#allocation288_spill] sm:$0xff] %v9355_v42  ;;  %v9416_v46 = vadd.f32 %v1715_v27, %v1671_v49  ;;  %v12694_v49 = vand.u32 4294901760, %v9379_v7  ;;  %v1556_v1 = vpop.f32.mrf.mxu0  ;;  %v1603_v33 = vpop.f32.mrf.mxu1  ;;  %2842 = vmatpush.msra.mxu1 %v9031_v54  ;;  %2793 = vmatpush.msra.mxu0 %v9141_v9 }
 0x16f   :  { %12686 = vst [vmem:[#allocation289_spill] sm:$0xff] %v9357_v53  ;;  %v9383_v53 = vand.u32 4294901760, %v2964_v56  ;;  %v9398_v56 = vsub.f32 %v52_v41, %v9366_v38  ;;  %v2982_v41 = vsub.f32 %v9355_v42, %v9386_v26  ;;  %2891 = vmatpush.msra.mxu2 %v9324_v11 }
 0x170   :  { %12687 = vst [vmem:[#allocation290_spill] sm:$0xff] %v9361_v5  ;;  %v9407_v5 = vand.u32 4294901760, %v36_v24  ;;  %v2988_v39 = vsub.f32 %v9379_v7, %v12694_v49  ;;  %2844 = vmatpush.msra.mxu1 %v9050_v50 }
 0x171   :  { %12688 = vst [vmem:[#allocation291_spill] sm:$0xff] %v9364_v18  ;;  %2966 = vmatpush.msra.mxu3 %v9383_v53  ;;  %v9436_v62 = vand.u32 4294901760, %v2982_v41  ;;  %v12696_v49 = vand.u32 4294901760, %v9398_v56  ;;  %2547 = vmatmul.f32.gmra.mxu0 %v7719_v12 }
 0x172   :  { %12689 = vst [vmem:[#allocation292_spill] sm:$0xff] %v9383_v53  ;;  %v1552_v53 = vadd.f32 %v1551_v3, %v9224_v60  ;;  %v9432_v27 = vsub.f32 %v36_v24, %v9407_v5  ;;  %2636 = vmatmul.f32.gmra.mxu1 %v7537_v28  ;;  %v12697_v60 = vand.u32 4294901760, %v9138_v61  ;;  %2893 = vmatpush.msra.mxu2 %v9348_v0 }
 0x173   :  { %12690 = vst [vmem:[#allocation293_spill] sm:$0xff] %v9386_v26  ;;  %2972 = vmatpush.msra.mxu3 %v9402_v34  ;;  %v2994_v24 = vsub.f32 %v9398_v56, %v12696_v49  ;;  %v12698_v49 = vand.u32 4294901760, %v9414_v4  ;;  %2846 = vmatpush.msra.mxu1 %v9075_v59  ;;  %v1557_v61 = vadd.f32 %v1556_v1, %v9289_v37  ;;  %v12706_v1 = vand.u32 4294901760, %v9199_v40  ;;  %v12711_v40 = vld [vmem:[#allocation265_spill] sm:$0xff] }
 0x174   :  { %12691 = vst [vmem:[#allocation294_spill] sm:$0xff] %v9402_v34  ;;  %v1604_v3 = vadd.f32 %v1603_v33, %v1552_v53  ;;  %v1674_v34 = vpop.f32.mrf.mxu2  ;;  %v2989_v53 = vand.u32 4294901760, %v2988_v39  ;;  %2797 = vmatpush.msra.mxu0 %v12697_v60  ;;  %v12702_v33 = vld [vmem:[#allocation64_spill] sm:$0xff]  ;;  %2895 = vmatpush.msra.mxu2 %v9366_v38  ;;  %v12703_v60 = vand.u32 4294901760, %v9432_v27  ;;  %v12765_v59 = vld [vmem:[#allocation37_spill] sm:$0xff] }
 0x175   :  { %12692 = vst [vmem:[#allocation295_spill] sm:$0xff] %v9416_v46  ;;  %2978 = vmatpush.msra.mxu3 %v9420_v16  ;;  %v1719_v41 = vpop.f32.mrf.mxu3  ;;  %2701 = vmatmul.f32.gmra.mxu2 %v12702_v33  ;;  %v12761_v46 = vld [vmem:[#allocation33_spill] sm:$0xff] }
 0x176   :  { %12693 = vst [vmem:[#allocation296_spill] sm:$0xff] %v9420_v16  ;;  %v1675_v52 = vadd.f32 %v1674_v34, %v1604_v3  ;;  %v3000_v16 = vsub.f32 %v9414_v4, %v12698_v49  ;;  %v2995_v34 = vand.u32 4294901760, %v2994_v24  ;;  %v12700_v3 = vld [vmem:[#allocation258_spill] sm:$0xff]  ;;  %v1760_v49 = vpop.f32.mrf.mxu0  ;;  %2754 = vmatmul.f32.gmra.mxu3 %v7665_v25  ;;  %2897 = vmatpush.msra.mxu2 %v9388_v20 }
 0x177   :  { %12695 = vst [vmem:[#allocation297_spill] sm:$0xff] %v9436_v62  ;;  %2984 = vmatpush.msra.mxu3 %v9436_v62  ;;  %v12701_v39 = vand.u32 4294901760, %v12700_v3  ;;  %v12704_v62 = vand.u32 4294901760, %v9184_v17 }
 0x178   :  { %v9455_v9 = vadd.f32 %v1719_v41, %v1675_v52  ;;  %v3006_v52 = vsub.f32 %v9432_v27, %v12703_v60  ;;  %v1609_v41 = vpop.f32.mrf.mxu1  ;;  %v3001_v24 = vand.u32 4294901760, %v3000_v16  ;;  %v12707_v60 = vld [vmem:[#allocation58_spill] sm:$0xff]  ;;  %v12709_v16 = vld [vmem:[#allocation137_spill] sm:$0xff]  ;;  %2899 = vmatpush.msra.mxu2 %v9407_v5 }
 0x179   :  { %2801 = vmatpush.msra.mxu0 %v12701_v39  ;;  %2990 = vmatpush.msra.mxu3 %v2989_v53  ;;  %v1610_v3 = vadd.f32 %v1609_v41, %v1557_v61  ;;  %v12705_v39 = vld [vmem:[#allocation249_spill] sm:$0xff]  ;;  %v1761_v61 = vadd.f32 %v1760_v49, %v12709_v16 }
 0x17a   :  { %12699 = vst [vmem:[#allocation298_spill] sm:$0xff] %v9455_v9  ;;  %2848 = vmatpush.msra.mxu1 %v12705_v39  ;;  %v12708_v9 = vld [vmem:[#allocation254_spill] sm:$0xff] }
 0x17b   :  { %2805 = vmatpush.msra.mxu0 %v12704_v62  ;;  %2996 = vmatpush.msra.mxu3 %v2995_v34  ;;  %v3007_v62 = vand.u32 4294901760, %v3006_v52  ;;  %v12712_v34 = vld [vmem:[#allocation46_spill] sm:$0xff] }
 0x17c   :  { %v1678_v37 = vpop.f32.mrf.mxu2  ;;  %2640 = vmatmul.f32.gmra.mxu1 %v12707_v60 }
 0x17d   :  { %2809 = vmatpush.msra.mxu0 %v12706_v1  ;;  %v1679_v53 = vadd.f32 %v1678_v37, %v1610_v3  ;;  %v1723_v17 = vpop.f32.mrf.mxu3  ;;  %2850 = vmatpush.msra.mxu1 %v12708_v9  ;;  %v12713_v3 = vld [vmem:[#allocation268_spill] sm:$0xff]  ;;  %v12715_v37 = vld [vmem:[#allocation139_spill] sm:$0xff] }
 0x17e   :  { %2811 = vmatmul.f32.vlgmr.msra.gmra.mxu0 %v7421_v55  ;;  %3002 = vmatpush.msra.mxu3 %v3001_v24  ;;  %v1768_v39 = vpop.f32.mrf.mxu0 }
 0x17f   :  { %v9478_v41 = vadd.f32 %v1723_v17, %v1679_v53  ;;  %3032 = vmatpush.msrb.mxu0 %v12711_v40  ;;  %2852 = vmatpush.msra.mxu1 %v9151_v35  ;;  %v1769_v1 = vadd.f32 %v1768_v39, %v12715_v37  ;;  %v12717_v17 = vld [vmem:[#allocation270_spill] sm:$0xff] }
 0x180   :  { %2905 = vmatmul.f32.vlgmr.msra.gmra.mxu2 %v12712_v34  ;;  %3008 = vmatpush.msra.mxu3 %v3007_v62  ;;  %v1865_v52 = vpop.f32.mrf.mxu1 }
 0x181   :  { %12710 = vst [vmem:[#allocation258_spill] sm:$0xff] %v9478_v41  ;;  %3147 = vmatpush.msrb.mxu2 %v12713_v3  ;;  %2854 = vmatpush.msra.mxu1 %v9167_v22  ;;  %v1866_v9 = vadd.f32 %v1865_v52, %v1761_v61  ;;  %v12714_v22 = vld [vmem:[#allocation275_spill] sm:$0xff] }
 0x182   :  { %3010 = vmatmul.f32.vlgmr.msra.gmra.mxu3 %v7421_v55  ;;  %3035 = vmatpush.msrb.mxu0 %v9233_v10  ;;  %v12757_v41 = vld [vmem:[#allocation31_spill] sm:$0xff] }
 0x183   :  { %3214 = vmatpush.msrb.mxu3 %v9174_v15  ;;  %3151 = vmatpush.msrb.mxu2 %v9266_v19  ;;  %v12748_v19 = vld [vmem:[#allocation12_spill] sm:$0xff] }
 0x184   :  { %v1923_v49 = vpop.f32.mrf.mxu2  ;;  %3092 = vmatpush.msrb.mxu1 %v9174_v15  ;;  %3038 = vmatpush.msrb.mxu0 %v12717_v17 }
 0x185   :  { %v1924_v35 = vadd.f32 %v1923_v49, %v1866_v9  ;;  %2856 = vmatmul.f32.vlgmr.msra.gmra.mxu1 %v7421_v55  ;;  %v1973_v24 = vpop.f32.mrf.mxu3  ;;  %3216 = vmatpush.msrb.mxu3 %v9201_v43  ;;  %v12718_v9 = vld [vmem:[#allocation277_spill] sm:$0xff] }
 0x186   :  { %2815 = vmatmul.f32.gmra.mxu0 %v7480_v32  ;;  %3155 = vmatpush.msrb.mxu2 %v12714_v22  ;;  %v1776_v62 = vpop.f32.mrf.mxu0 }
 0x187   :  { %v9496_v53 = vadd.f32 %v1973_v24, %v1924_v35  ;;  %3094 = vmatpush.msrb.mxu1 %v9201_v43  ;;  %3218 = vmatpush.msrb.mxu3 %v9217_v44  ;;  %v149_v24 = vld [vmem:[%s11890_s3 + $0xc0] sm:$0xff] }
 0x188   :  { %2913 = vmatmul.f32.gmra.mxu2 %v7595_v14  ;;  %3041 = vmatpush.msrb.mxu0 %v9274_v2  ;;  %v1869_v61 = vpop.f32.mrf.mxu1 }
 0x189   :  { %12716 = vst [vmem:[#allocation64_spill] sm:$0xff] %v9496_v53  ;;  %3159 = vmatpush.msrb.mxu2 %v9302_v30  ;;  %3096 = vmatpush.msrb.mxu1 %v9217_v44  ;;  %v1870_v39 = vadd.f32 %v1869_v61, %v1769_v1  ;;  %v12719_v1 = vld [vmem:[#allocation141_spill] sm:$0xff]  ;;  %v12760_v44 = vld [vmem:[#allocation20_spill] sm:$0xff] }
 0x18a   :  { %3014 = vmatmul.f32.gmra.mxu3 %v7480_v32  ;;  %3044 = vmatpush.msrb.mxu0 %v12718_v9  ;;  %v1777_v61 = vadd.f32 %v1776_v62, %v12719_v1 }
 0x18b   :  { %3220 = vmatpush.msrb.mxu3 %v9240_v45  ;;  %3163 = vmatpush.msrb.mxu2 %v9322_v6 }
 0x18c   :  { %v1928_v52 = vpop.f32.mrf.mxu2  ;;  %3098 = vmatpush.msrb.mxu1 %v9240_v45  ;;  %3047 = vmatpush.msrb.mxu0 %v9313_v63  ;;  %v12759_v45 = vld [vmem:[#allocation14_spill] sm:$0xff] }
 0x18d   :  { %v1929_v49 = vadd.f32 %v1928_v52, %v1870_v39  ;;  %2860 = vmatmul.f32.gmra.mxu1 %v7480_v32  ;;  %v1979_v35 = vpop.f32.mrf.mxu3  ;;  %3222 = vmatpush.msrb.mxu3 %v9268_v58  ;;  %v9524_v39 = vand.u32 4294901760, %v149_v24  ;;  %v141_v52 = vld [vmem:[%s11890_s3 + $0x80] sm:$0xff] }
 0x18e   :  { %2819 = vmatmul.f32.gmra.mxu0 %v7537_v28  ;;  %3167 = vmatpush.msrb.mxu2 %v9341_v48  ;;  %v1784_v62 = vpop.f32.mrf.mxu0  ;;  %v9535_v48 = vand.u32 4294901760, %v141_v52 }
 0x18f   :  { %v9518_v53 = vadd.f32 %v1979_v35, %v1929_v49  ;;  %3100 = vmatpush.msrb.mxu1 %v9268_v58  ;;  %3224 = vmatpush.msrb.mxu3 %v9282_v51 }
 0x190   :  { %2921 = vmatmul.f32.gmra.mxu2 %v12396_v47  ;;  %3050 = vmatpush.msrb.mxu0 %v9334_v29  ;;  %v1873_v49 = vpop.f32.mrf.mxu1  ;;  %v9543_v29 = vsub.f32 %v149_v24, %v9524_v39 }
 0x191   :  { %12720 = vst [vmem:[#allocation249_spill] sm:$0xff] %v9518_v53  ;;  %3171 = vmatpush.msrb.mxu2 %v9364_v18  ;;  %3102 = vmatpush.msrb.mxu1 %v9282_v51  ;;  %v1874_v35 = vadd.f32 %v1873_v49, %v1777_v61  ;;  %v133_v18 = vld [vmem:[%s11890_s3 + $0x40] sm:$0xff]  ;;  %v12756_v51 = vld [vmem:[#allocation11_spill] sm:$0xff] }
 0x192   :  { %3018 = vmatmul.f32.gmra.mxu3 %v7537_v28  ;;  %3053 = vmatpush.msrb.mxu0 %v9355_v42  ;;  %v125_v49 = vld [vmem:[%s11890_s3] sm:$0xff]  ;;  %v12721_v42 = vld [vmem:[#allocation147_spill] sm:$0xff]  ;;  %v12255_v9 = vand.u32 4294901760, %v9543_v29 }
 0x193   :  { %3226 = vmatpush.msrb.mxu3 %v9304_v23  ;;  %3175 = vmatpush.msrb.mxu2 %v9386_v26  ;;  %v9552_v26 = vand.u32 4294901760, %v133_v18  ;;  %v1785_v6 = vadd.f32 %v1784_v62, %v12721_v42  ;;  %v9566_v30 = vand.u32 4294901760, %v125_v49  ;;  %v12724_v62 = vand.u32 4294901760, %v9398_v56 }
 0x194   :  { %v1933_v53 = vpop.f32.mrf.mxu2  ;;  %3104 = vmatpush.msrb.mxu1 %v9304_v23  ;;  %3056 = vmatpush.msrb.mxu0 %v9379_v7  ;;  %v12753_v23 = vld [vmem:[#allocation7_spill] sm:$0xff] }
 0x195   :  { %v1934_v63 = vadd.f32 %v1933_v53, %v1874_v35  ;;  %2864 = vmatmul.f32.gmra.mxu1 %v7537_v28  ;;  %v1985_v61 = vpop.f32.mrf.mxu3  ;;  %3228 = vmatpush.msrb.mxu3 %v9324_v11  ;;  %v12723_v53 = vand.u32 4294901760, %v9379_v7  ;;  %v9561_v35 = vsub.f32 %v141_v52, %v9535_v48  ;;  %v9576_v52 = vsub.f32 %v133_v18, %v9552_v26 }
 0x196   :  { %2823 = vmatmul.f32.gmra.mxu0 %v12707_v60  ;;  %3106 = vmatpush.msrb.mxu1 %v9324_v11  ;;  %v9571_v7 = vpop.f32.mrf.mxu0  ;;  %v9588_v18 = vsub.f32 %v125_v49, %v9566_v30 }
 0x197   :  { %v9555_v24 = vadd.f32 %v1985_v61, %v1934_v63  ;;  %3179 = vmatpush.msrb.mxu2 %v12723_v53  ;;  %3059 = vmatpush.msrb.mxu0 %v9398_v56  ;;  %12725 = vst [vmem:[#allocation254_spill] sm:$0xff] %v9571_v7  ;;  %v12729_v56 = vand.u32 4294901760, %v9432_v27  ;;  %v12730_v49 = vand.u32 4294901760, %v9561_v35  ;;  %v12746_v7 = vld [vmem:[#allocation25_spill] sm:$0xff] }
 0x198   :  { %2929 = vmatmul.f32.gmra.mxu2 %v7719_v12  ;;  %3230 = vmatpush.msrb.mxu3 %v9348_v0  ;;  %v1877_v63 = vpop.f32.mrf.mxu1 }
 0x199   :  { %12722 = vst [vmem:[#allocation58_spill] sm:$0xff] %v9555_v24  ;;  %3183 = vmatpush.msrb.mxu2 %v12724_v62  ;;  %3062 = vmatpush.msrb.mxu0 %v9414_v4  ;;  %v1878_v61 = vadd.f32 %v1877_v63, %v1785_v6  ;;  %v12726_v62 = vand.u32 4294901760, %v9414_v4  ;;  %v3322_v24 = vsub.f32 %v9543_v29, %v12255_v9  ;;  %v12254_v4 = vand.u32 4294901760, %v9576_v52 }
 0x19a   :  { %3022 = vmatmul.f32.gmra.mxu3 %v12707_v60  ;;  %3108 = vmatpush.msrb.mxu1 %v9348_v0  ;;  %v12727_v0 = vld [vmem:[#allocation32_spill] sm:$0xff] }
 0x19b   :  { %3232 = vmatpush.msrb.mxu3 %v9366_v38  ;;  %3065 = vmatpush.msrb.mxu0 %v9432_v27 }
 0x19c   :  { %v1938_v53 = vpop.f32.mrf.mxu2  ;;  %3187 = vmatpush.msrb.mxu2 %v12726_v62  ;;  %3110 = vmatpush.msrb.mxu1 %v9366_v38  ;;  %v3323_v38 = vand.u32 4294901760, %v3322_v24 }
 0x19d   :  { %v1939_v6 = vadd.f32 %v1938_v53, %v1878_v61  ;;  %2868 = vmatmul.f32.gmra.mxu1 %v12707_v60  ;;  %v1991_v63 = vpop.f32.mrf.mxu3  ;;  %3234 = vmatpush.msrb.mxu3 %v9388_v20  ;;  %v3328_v61 = vsub.f32 %v9561_v35, %v12730_v49  ;;  %v12256_v53 = vand.u32 4294901760, %v9588_v18  ;;  %v12733_v49 = vld [vmem:[#allocation36_spill] sm:$0xff] }
 0x19e   :  { %3068 = vmatmul.f32.vlgmr.msrb.gmra.mxu0 %v12727_v0  ;;  %3191 = vmatpush.msrb.mxu2 %v12729_v56 }
 0x19f   :  { %v9595_v62 = vadd.f32 %v1991_v63, %v1939_v6  ;;  %3259 = vmatpush.msra.mxu0 %v9524_v39  ;;  %3112 = vmatpush.msrb.mxu1 %v9388_v20  ;;  %v9608_v6 = vpop.f32.mrf.mxu0  ;;  %v3334_v20 = vsub.f32 %v9576_v52, %v12254_v4  ;;  %v3329_v56 = vand.u32 4294901760, %v3328_v61 }
 0x1a0   :  { %3193 = vmatmul.f32.vlgmr.msrb.gmra.mxu2 %v7421_v55  ;;  %3236 = vmatpush.msrb.mxu3 %v9407_v5  ;;  %12731 = vst [vmem:[#allocation46_spill] sm:$0xff] %v9608_v6  ;;  %v9610_v27 = vpop.f32.mrf.mxu1  ;;  %v142_v6 = vld [vmem:[%s11890_s3 + $0x88] sm:$0xff] }
 0x1a1   :  { %12728 = vst [vmem:[#allocation137_spill] sm:$0xff] %v9595_v62  ;;  %3414 = vmatpush.msra.mxu2 %v9543_v29  ;;  %3114 = vmatpush.msrb.mxu1 %v9407_v5  ;;  %v3340_v5 = vsub.f32 %v9588_v18, %v12256_v53  ;;  %v3335_v61 = vand.u32 4294901760, %v3334_v20  ;;  %v150_v53 = vld [vmem:[%s11890_s3 + $0xc8] sm:$0xff]  ;;  %v9673_v2 = vand.u32 4294901760, %v142_v6 }
 0x1a2   :  { %12732 = vst [vmem:[#allocation139_spill] sm:$0xff] %v9610_v27  ;;  %3238 = vmatmul.f32.vlgmr.msrb.gmra.mxu3 %v7421_v55  ;;  %3261 = vmatpush.msra.mxu0 %v9535_v48  ;;  %v12738_v62 = vld [vmem:[#allocation47_spill] sm:$0xff] }
 0x1a3   :  { %3474 = vmatpush.msra.mxu3 %v9524_v39  ;;  %3417 = vmatpush.msra.mxu2 %v9561_v35 }
 0x1a4   :  { %v2142_v24 = vpop.f32.mrf.mxu2  ;;  %3324 = vmatpush.msra.mxu1 %v3323_v38  ;;  %3263 = vmatpush.msra.mxu0 %v9552_v26  ;;  %v3341_v38 = vand.u32 4294901760, %v3340_v5  ;;  %v12737_v5 = vld [vmem:[#allocation2_spill] sm:$0xff] }
 0x1a5   :  { %v2143_v63 = vadd.f32 %v2142_v24, %v12709_v16  ;;  %3118 = vmatmul.f32.vlgmr.msrb.gmra.mxu1 %v12733_v49  ;;  %v2247_v4 = vpop.f32.mrf.mxu3  ;;  %3476 = vmatpush.msra.mxu3 %v9535_v48 }
 0x1a6   :  { %3073 = vmatmul.f32.gmra.mxu0 %v12523_v21  ;;  %3420 = vmatpush.msra.mxu2 %v9576_v52 }
 0x1a7   :  { %v9626_v9 = vadd.f32 %v2247_v4, %v2143_v63  ;;  %3330 = vmatpush.msra.mxu1 %v3329_v56  ;;  %3478 = vmatpush.msra.mxu3 %v9552_v26  ;;  %v9635_v24 = vpop.f32.mrf.mxu0  ;;  %v12736_v56 = vld [vmem:[#allocation8_spill] sm:$0xff] }
 0x1a8   :  { %3197 = vmatmul.f32.gmra.mxu2 %v7480_v32  ;;  %3265 = vmatpush.msra.mxu0 %v9566_v30  ;;  %12734 = vst [vmem:[#allocation141_spill] sm:$0xff] %v9635_v24  ;;  %v9637_v4 = vpop.f32.mrf.mxu1 }
 0x1a9   :  { %3423 = vmatpush.msra.mxu2 %v9588_v18  ;;  %12735 = vst [vmem:[#allocation147_spill] sm:$0xff] %v9637_v4  ;;  %3336 = vmatpush.msra.mxu1 %v3335_v61  ;;  %v12739_v4 = vld [vmem:[#allocation9_spill] sm:$0xff] }
 0x1aa   :  { %3242 = vmatmul.f32.gmra.mxu3 %v7480_v32  ;;  %3267 = vmatpush.msra.mxu0 %v12737_v5 }
 0x1ab   :  { %3480 = vmatpush.msra.mxu3 %v9566_v30  ;;  %3426 = vmatpush.msra.mxu2 %v12736_v56  ;;  %v12740_v56 = vld [vmem:[#allocation3_spill] sm:$0xff] }
 0x1ac   :  { %v2150_v20 = vpop.f32.mrf.mxu2  ;;  %3342 = vmatpush.msra.mxu1 %v3341_v38  ;;  %3269 = vmatpush.msra.mxu0 %v12740_v56  ;;  %v12741_v38 = vld [vmem:[#allocation24_spill] sm:$0xff] }
 0x1ad   :  { %v2151_v63 = vadd.f32 %v2150_v20, %v12715_v37  ;;  %3124 = vmatmul.f32.gmra.mxu1 %v12738_v62  ;;  %v2251_v24 = vpop.f32.mrf.mxu3  ;;  %3482 = vmatpush.msra.mxu3 %v12737_v5  ;;  %v9655_v20 = vand.u32 4294901760, %v150_v53 }
 0x1ae   :  { %3078 = vmatmul.f32.gmra.mxu0 %v7567_v57  ;;  %3429 = vmatpush.msra.mxu2 %v12739_v4  ;;  %v134_v4 = vld [vmem:[%s11890_s3 + $0x48] sm:$0xff] }
 0x1af   :  { %v9649_v61 = vadd.f32 %v2251_v24, %v2151_v63  ;;  %3348 = vmatpush.msra.mxu1 %v12741_v38  ;;  %3484 = vmatpush.msra.mxu3 %v12740_v56  ;;  %v12742_v24 = vld [vmem:[#allocation10_spill] sm:$0xff]  ;;  %v12743_v63 = vld [vmem:[#allocation4_spill] sm:$0xff]  ;;  %v9667_v27 = vpop.f32.mrf.mxu0  ;;  %v9678_v22 = vsub.f32 %v150_v53, %v9655_v20 }
 0x1b0   :  { %3201 = vmatmul.f32.gmra.mxu2 %v7537_v28  ;;  %3271 = vmatpush.msra.mxu0 %v12743_v63  ;;  %12744 = vst [vmem:[#allocation32_spill] sm:$0xff] %v9667_v27  ;;  %v9669_v38 = vpop.f32.mrf.mxu1  ;;  %v12749_v27 = vld [vmem:[#allocation27_spill] sm:$0xff]  ;;  %v12750_v53 = vld [vmem:[#allocation6_spill] sm:$0xff] }
 0x1b1   :  { %3432 = vmatpush.msra.mxu2 %v12742_v24  ;;  %12745 = vst [vmem:[#allocation36_spill] sm:$0xff] %v9669_v38  ;;  %3354 = vmatpush.msra.mxu1 %v12746_v7  ;;  %v12747_v24 = vld [vmem:[#allocation5_spill] sm:$0xff]  ;;  %v9683_v38 = vand.u32 4294901760, %v134_v4  ;;  %v126_v7 = vld [vmem:[%s11890_s3 + $0x8] sm:$0xff] }
 0x1b2   :  { %3246 = vmatmul.f32.gmra.mxu3 %v7537_v28  ;;  %3273 = vmatpush.msra.mxu0 %v12747_v24  ;;  %v9700_v11 = vand.u32 4294901760, %v126_v7 }
 0x1b3   :  { %3486 = vmatpush.msra.mxu3 %v12743_v63  ;;  %3435 = vmatpush.msra.mxu2 %v12748_v19  ;;  %v9695_v19 = vsub.f32 %v142_v6, %v9673_v2 }
 0x1b4   :  { %v2158_v17 = vpop.f32.mrf.mxu2  ;;  %3360 = vmatpush.msra.mxu1 %v12749_v27  ;;  %3275 = vmatpush.msra.mxu0 %v12750_v53  ;;  %v12752_v27 = vld [vmem:[#allocation29_spill] sm:$0xff]  ;;  %v9720_v13 = vsub.f32 %v126_v7, %v9700_v11 }
 0x1b5   :  { %v2159_v10 = vadd.f32 %v2158_v17, %v12719_v1  ;;  %3130 = vmatmul.f32.gmra.mxu1 %v7598_v8  ;;  %v2255_v40 = vpop.f32.mrf.mxu3  ;;  %3488 = vmatpush.msra.mxu3 %v12747_v24  ;;  %v12751_v17 = vld [vmem:[#allocation13_spill] sm:$0xff]  ;;  %v12762_v7 = vand.u32 4294901760, %v9695_v19 }
 0x1b6   :  { %3083 = vmatmul.f32.gmra.mxu0 %v12702_v33  ;;  %3438 = vmatpush.msra.mxu2 %v12751_v17  ;;  %v3721_v15 = vand.u32 4294901760, %v9720_v13 }
 0x1b7   :  { %v9690_v3 = vadd.f32 %v2255_v40, %v2159_v10  ;;  %3366 = vmatpush.msra.mxu1 %v12752_v27  ;;  %3277 = vmatpush.msra.mxu0 %v12753_v23  ;;  %v9705_v10 = vsub.f32 %v134_v4, %v9683_v38  ;;  %v12754_v40 = vld [vmem:[#allocation15_spill] sm:$0xff]  ;;  %v2305_v17 = vpop.f32.mrf.mxu0  ;;  %v12758_v4 = vand.u32 4294901760, %v9678_v22 }
 0x1b8   :  { %3205 = vmatmul.f32.gmra.mxu2 %v12707_v60  ;;  %3490 = vmatpush.msra.mxu3 %v12750_v53  ;;  %v9709_v6 = vpop.f32.mrf.mxu1 }
 0x1b9   :  { %3441 = vmatpush.msra.mxu2 %v12754_v40  ;;  %12755 = vst [vmem:[#allocation8_spill] sm:$0xff] %v9709_v6  ;;  %3279 = vmatpush.msra.mxu0 %v12756_v51  ;;  %v3704_v40 = vsub.f32 %v9678_v22, %v12758_v4  ;;  %v12763_v4 = vld [vmem:[#allocation23_spill] sm:$0xff] }
 0x1ba   :  { %3250 = vmatmul.f32.gmra.mxu3 %v12707_v60  ;;  %3372 = vmatpush.msra.mxu1 %v12757_v41 }
 0x1bb   :  { %3492 = vmatpush.msra.mxu3 %v12753_v23  ;;  %3281 = vmatpush.msra.mxu0 %v12759_v45  ;;  %v3705_v27 = vand.u32 4294901760, %v3704_v40 }
 0x1bc   :  { %v2166_v58 = vpop.f32.mrf.mxu2  ;;  %3444 = vmatpush.msra.mxu2 %v12760_v44  ;;  %3378 = vmatpush.msra.mxu1 %v12761_v46  ;;  %v12764_v44 = vand.u32 4294901760, %v9543_v29  ;;  %v12766_v46 = vand.u32 4294901760, %v9705_v10 }
 0x1bd   :  { %v2167_v6 = vadd.f32 %v2166_v58, %v12721_v42  ;;  %3136 = vmatmul.f32.gmra.mxu1 %v7665_v25  ;;  %v2259_v41 = vpop.f32.mrf.mxu3  ;;  %3494 = vmatpush.msra.mxu3 %v12756_v51  ;;  %v3710_v58 = vsub.f32 %v9695_v19, %v12762_v7 }
 0x1be   :  { %3287 = vmatmul.f32.vlgmr.msra.gmra.mxu0 %v12712_v34  ;;  %3447 = vmatpush.msra.mxu2 %v12763_v4  ;;  %v12767_v4 = vld [vmem:[#allocation41_spill] sm:$0xff] }
 0x1bf   :  { %v9729_v43 = vadd.f32 %v2259_v41, %v2167_v6  ;;  %3529 = vmatpush.msrb.mxu0 %v12764_v44  ;;  %3384 = vmatpush.msra.mxu1 %v12765_v59  ;;  %v3716_v6 = vsub.f32 %v9705_v10, %v12766_v46  ;;  %v2306_v41 = vadd.f32 %v2305_v17, %v9626_v9  ;;  %v2310_v7 = vpop.f32.mrf.mxu0  ;;  %v3711_v40 = vand.u32 4294901760, %v3710_v58 }
 0x1c0   :  { %3450 = vmatmul.f32.vlgmr.msra.gmra.mxu2 %v12727_v0  ;;  %3496 = vmatpush.msra.mxu3 %v12759_v45  ;;  %v2355_v29 = vpop.f32.mrf.mxu1  ;;  %v3722_v9 = vsub.f32 %v9720_v13, %v3721_v15  ;;  %v12768_v17 = vand.u32 4294901760, %v9561_v35  ;;  %v2311_v35 = vadd.f32 %v2310_v7, %v9649_v61  ;;  %v12774_v7 = vld [vmem:[#allocation52_spill] sm:$0xff] }
 0x1c1   :  { %3641 = vmatpush.msrb.mxu2 %v9655_v20  ;;  %3390 = vmatpush.msra.mxu1 %v12767_v4  ;;  %v2356_v59 = vadd.f32 %v2355_v29, %v2306_v41  ;;  %v3717_v46 = vand.u32 4294901760, %v3716_v6  ;;  %v12770_v41 = vand.u32 4294901760, %v9576_v52  ;;  %v12771_v6 = vand.u32 4294901760, %v9588_v18  ;;  %v12772_v52 = vld [vmem:[#allocation30_spill] sm:$0xff] }
 0x1c2   :  { %3500 = vmatmul.f32.vlgmr.msra.gmra.mxu3 %v12733_v49  ;;  %3533 = vmatpush.msrb.mxu0 %v12768_v17  ;;  %v12779_v17 = vld [vmem:[#allocation40_spill] sm:$0xff] }
 0x1c3   :  { %3706 = vmatpush.msrb.mxu3 %v3705_v27  ;;  %3643 = vmatpush.msrb.mxu2 %v9673_v2 }
 0x1c4   :  { %v2430_v44 = vpop.f32.mrf.mxu2  ;;  %3596 = vmatpush.msrb.mxu1 %v9524_v39  ;;  %3537 = vmatpush.msrb.mxu0 %v12770_v41  ;;  %v3723_v39 = vand.u32 4294901760, %v3722_v9 }
 0x1c5   :  { %v2431_v50 = vadd.f32 %v2430_v44, %v2356_v59  ;;  %3392 = vmatmul.f32.vlgmr.msra.gmra.mxu1 %v7421_v55  ;;  %v2475_v58 = vpop.f32.mrf.mxu3  ;;  %3712 = vmatpush.msrb.mxu3 %v3711_v40  ;;  %v12773_v40 = vld [vmem:[#allocation16_spill] sm:$0xff]  ;;  %v12775_v59 = vld [vmem:[#allocation35_spill] sm:$0xff]  ;;  %v12777_v44 = vld [vmem:[#allocation17_spill] sm:$0xff] }
 0x1c6   :  { %3295 = vmatmul.f32.gmra.mxu0 %v7595_v14  ;;  %3645 = vmatpush.msrb.mxu2 %v9683_v38 }
 0x1c7   :  { %v9759_v27 = vadd.f32 %v2475_v58, %v2431_v50  ;;  %3598 = vmatpush.msrb.mxu1 %v9535_v48  ;;  %3718 = vmatpush.msrb.mxu3 %v3717_v46  ;;  %v2315_v29 = vpop.f32.mrf.mxu0  ;;  %v12780_v46 = vld [vmem:[#allocation18_spill] sm:$0xff] }
 0x1c8   :  { %3455 = vmatmul.f32.gmra.mxu2 %v12523_v21  ;;  %3541 = vmatpush.msrb.mxu0 %v12771_v6  ;;  %v2361_v4 = vpop.f32.mrf.mxu1  ;;  %v2316_v9 = vadd.f32 %v2315_v29, %v9690_v3  ;;  %v12782_v6 = vld [vmem:[#allocation19_spill] sm:$0xff] }
 0x1c9   :  { %12769 = vst [vmem:[#allocation2_spill] sm:$0xff] %v9759_v27  ;;  %3647 = vmatpush.msrb.mxu2 %v9700_v11  ;;  %3600 = vmatpush.msrb.mxu1 %v9552_v26  ;;  %v2362_v48 = vadd.f32 %v2361_v4, %v2311_v35  ;;  %v12781_v35 = vld [vmem:[#allocation59_spill] sm:$0xff] }
 0x1ca   :  { %3506 = vmatmul.f32.gmra.mxu3 %v12738_v62  ;;  %3545 = vmatpush.msrb.mxu0 %v12773_v40  ;;  %v12783_v4 = vld [vmem:[#allocation43_spill] sm:$0xff]  ;;  %v12787_v40 = vld [vmem:[#allocation50_spill] sm:$0xff] }
 0x1cb   :  { %3724 = vmatpush.msrb.mxu3 %v3723_v39  ;;  %3649 = vmatpush.msrb.mxu2 %v12772_v52 }
 0x1cc   :  { %v2434_v50 = vpop.f32.mrf.mxu2  ;;  %3602 = vmatpush.msrb.mxu1 %v9566_v30  ;;  %3549 = vmatpush.msrb.mxu0 %v12777_v44  ;;  %v12778_v30 = vld [vmem:[#allocation55_spill] sm:$0xff] }
 0x1cd   :  { %v2435_v61 = vadd.f32 %v2434_v50, %v2362_v48  ;;  %3396 = vmatmul.f32.gmra.mxu1 %v7480_v32  ;;  %v2479_v18 = vpop.f32.mrf.mxu3  ;;  %3730 = vmatpush.msrb.mxu3 %v12774_v7  ;;  %v12784_v48 = vld [vmem:[#allocation21_spill] sm:$0xff] }
 0x1ce   :  { %3303 = vmatmul.f32.gmra.mxu0 %v12396_v47  ;;  %3651 = vmatpush.msrb.mxu2 %v12775_v59  ;;  %v12785_v50 = vld [vmem:[#allocation65_spill] sm:$0xff] }
 0x1cf   :  { %v9778_v26 = vadd.f32 %v2479_v18, %v2435_v61  ;;  %3604 = vmatpush.msrb.mxu1 %v12737_v5  ;;  %3736 = vmatpush.msrb.mxu3 %v12778_v30  ;;  %v2320_v58 = vpop.f32.mrf.mxu0  ;;  %v12788_v61 = vld [vmem:[#allocation22_spill] sm:$0xff]  ;;  %v12789_v18 = vld [vmem:[#allocation51_spill] sm:$0xff]  ;;  %v12790_v7 = vld [vmem:[#allocation69_spill] sm:$0xff] }
 0x1d0   :  { %3460 = vmatmul.f32.gmra.mxu2 %v7567_v57  ;;  %3553 = vmatpush.msrb.mxu0 %v12780_v46  ;;  %v2367_v41 = vpop.f32.mrf.mxu1 }
 0x1d1   :  { %12776 = vst [vmem:[#allocation47_spill] sm:$0xff] %v9778_v26  ;;  %3653 = vmatpush.msrb.mxu2 %v12779_v17  ;;  %3606 = vmatpush.msrb.mxu1 %v12740_v56  ;;  %v2368_v39 = vadd.f32 %v2367_v41, %v2316_v9  ;;  %v12791_v9 = vld [vmem:[#allocation26_spill] sm:$0xff]  ;;  %v12847_v26 = vld [vmem:[#allocation100_spill] sm:$0xff] }
 0x1d2   :  { %3512 = vmatmul.f32.gmra.mxu3 %v7598_v8  ;;  %3557 = vmatpush.msrb.mxu0 %v12782_v6 }
 0x1d3   :  { %3742 = vmatpush.msrb.mxu3 %v12781_v35  ;;  %3655 = vmatpush.msrb.mxu2 %v12783_v4  ;;  %v12794_v35 = vld [vmem:[#allocation56_spill] sm:$0xff] }
 0x1d4   :  { %v2438_v5 = vpop.f32.mrf.mxu2  ;;  %3608 = vmatpush.msrb.mxu1 %v12743_v63  ;;  %3561 = vmatpush.msrb.mxu0 %v12784_v48  ;;  %v2321_v63 = vadd.f32 %v2320_v58, %v9729_v43  ;;  %v12799_v48 = vand.u32 4294901760, %v9678_v22 }
 0x1d5   :  { %v2439_v3 = vadd.f32 %v2438_v5, %v2368_v39  ;;  %3400 = vmatmul.f32.gmra.mxu1 %v7537_v28  ;;  %v2483_v29 = vpop.f32.mrf.mxu3  ;;  %3748 = vmatpush.msrb.mxu3 %v12785_v50  ;;  %v12793_v39 = vld [vmem:[#allocation28_spill] sm:$0xff] }
 0x1d6   :  { %3311 = vmatmul.f32.gmra.mxu0 %v7719_v12  ;;  %3657 = vmatpush.msrb.mxu2 %v12787_v40  ;;  %v12795_v5 = vld [vmem:[#allocation72_spill] sm:$0xff] }
 0x1d7   :  { %v9797_v56 = vadd.f32 %v2483_v29, %v2439_v3  ;;  %3610 = vmatpush.msrb.mxu1 %v12747_v24  ;;  %3565 = vmatpush.msrb.mxu0 %v12788_v61  ;;  %v2524_v30 = vpop.f32.mrf.mxu0  ;;  %v12792_v24 = vld [vmem:[#allocation71_spill] sm:$0xff]  ;;  %v12797_v3 = vld [vmem:[#allocation62_spill] sm:$0xff]  ;;  %v12798_v29 = vld [vmem:[#allocation73_spill] sm:$0xff] }
 0x1d8   :  { %3465 = vmatmul.f32.gmra.mxu2 %v12702_v33  ;;  %3754 = vmatpush.msrb.mxu3 %v12790_v7  ;;  %v2373_v44 = vpop.f32.mrf.mxu1  ;;  %v2525_v6 = vadd.f32 %v2524_v30, %v12709_v16  ;;  %v12800_v7 = vand.u32 4294901760, %v9695_v19 }
 0x1d9   :  { %12786 = vst [vmem:[#allocation9_spill] sm:$0xff] %v9797_v56  ;;  %3659 = vmatpush.msrb.mxu2 %v12789_v18  ;;  %3569 = vmatpush.msrb.mxu0 %v12791_v9  ;;  %v2374_v46 = vadd.f32 %v2373_v44, %v2321_v63 }
 0x1da   :  { %3518 = vmatmul.f32.gmra.mxu3 %v7665_v25  ;;  %3612 = vmatpush.msrb.mxu1 %v12750_v53 }
 0x1db   :  { %3760 = vmatpush.msrb.mxu3 %v12792_v24  ;;  %3573 = vmatpush.msrb.mxu0 %v12793_v39 }
 0x1dc   :  { %v2442_v41 = vpop.f32.mrf.mxu2  ;;  %3661 = vmatpush.msrb.mxu2 %v12794_v35  ;;  %3614 = vmatpush.msrb.mxu1 %v12753_v23 }
 0x1dd   :  { %v2443_v43 = vadd.f32 %v2442_v41, %v2374_v46  ;;  %3404 = vmatmul.f32.gmra.mxu1 %v12707_v60  ;;  %v2487_v58 = vpop.f32.mrf.mxu3  ;;  %3766 = vmatpush.msrb.mxu3 %v12795_v5  ;;  %v12804_v46 = vld [vmem:[#allocation34_spill] sm:$0xff]  ;;  %v12808_v5 = vld [vmem:[#allocation48_spill] sm:$0xff] }
 0x1de   :  { %3575 = vmatmul.f32.vlgmr.msrb.gmra.mxu0 %v7421_v55  ;;  %3663 = vmatpush.msrb.mxu2 %v12797_v3 }
 0x1df   :  { %v9817_v53 = vadd.f32 %v2487_v58, %v2443_v43  ;;  %3796 = vmatpush.msra.mxu0 %v9678_v22  ;;  %3616 = vmatpush.msrb.mxu1 %v12756_v51  ;;  %v2532_v23 = vpop.f32.mrf.mxu0  ;;  %v143_v58 = vld [vmem:[%s11890_s3 + $0x90] sm:$0xff] }
 0x1e0   :  { %3669 = vmatmul.f32.vlgmr.msrb.gmra.mxu2 %v12712_v34  ;;  %3772 = vmatpush.msrb.mxu3 %v12798_v29  ;;  %v2629_v50 = vpop.f32.mrf.mxu1  ;;  %v2533_v44 = vadd.f32 %v2532_v23, %v12715_v37 }
 0x1e1   :  { %12796 = vst [vmem:[#allocation3_spill] sm:$0xff] %v9817_v53  ;;  %3911 = vmatpush.msra.mxu2 %v12799_v48  ;;  %3618 = vmatpush.msrb.mxu1 %v12759_v45  ;;  %v2630_v61 = vadd.f32 %v2629_v50, %v2525_v6  ;;  %v12801_v45 = vand.u32 4294901760, %v9705_v10  ;;  %v12809_v6 = vld [vmem:[#allocation45_spill] sm:$0xff] }
 0x1e2   :  { %3774 = vmatmul.f32.vlgmr.msrb.gmra.mxu3 %v7421_v55  ;;  %3799 = vmatpush.msra.mxu0 %v9695_v19  ;;  %v12810_v50 = vld [vmem:[#allocation49_spill] sm:$0xff] }
 0x1e3   :  { %3978 = vmatpush.msra.mxu3 %v9655_v20  ;;  %3915 = vmatpush.msra.mxu2 %v12800_v7  ;;  %v12811_v7 = vld [vmem:[#allocation53_spill] sm:$0xff] }
 0x1e4   :  { %v2687_v63 = vpop.f32.mrf.mxu2  ;;  %3856 = vmatpush.msra.mxu1 %v9655_v20  ;;  %3802 = vmatpush.msra.mxu0 %v9705_v10  ;;  %v12803_v10 = vld [vmem:[#allocation39_spill] sm:$0xff] }
 0x1e5   :  { %v2688_v51 = vadd.f32 %v2687_v63, %v2630_v61  ;;  %3620 = vmatmul.f32.vlgmr.msrb.gmra.mxu1 %v7421_v55  ;;  %v2737_v22 = vpop.f32.mrf.mxu3  ;;  %3980 = vmatpush.msra.mxu3 %v9673_v2  ;;  %v9879_v61 = vand.u32 4294901760, %v143_v58  ;;  %v135_v63 = vld [vmem:[%s11890_s3 + $0x50] sm:$0xff] }
 0x1e6   :  { %3579 = vmatmul.f32.gmra.mxu0 %v7480_v32  ;;  %3919 = vmatpush.msra.mxu2 %v12801_v45  ;;  %v127_v45 = vld [vmem:[%s11890_s3 + $0x10] sm:$0xff] }
 0x1e7   :  { %v9839_v30 = vadd.f32 %v2737_v22, %v2688_v51  ;;  %3858 = vmatpush.msra.mxu1 %v9673_v2  ;;  %3982 = vmatpush.msra.mxu3 %v9683_v38  ;;  %v2540_v20 = vpop.f32.mrf.mxu0 }
 0x1e8   :  { %3677 = vmatmul.f32.gmra.mxu2 %v7595_v14  ;;  %3805 = vmatpush.msra.mxu0 %v9720_v13  ;;  %v2633_v19 = vpop.f32.mrf.mxu1  ;;  %v2541_v41 = vadd.f32 %v2540_v20, %v12719_v1  ;;  %v9896_v20 = vand.u32 4294901760, %v135_v63 }
 0x1e9   :  { %12802 = vst [vmem:[#allocation24_spill] sm:$0xff] %v9839_v30  ;;  %3923 = vmatpush.msra.mxu2 %v3721_v15  ;;  %3860 = vmatpush.msra.mxu1 %v9683_v38  ;;  %v2634_v9 = vadd.f32 %v2633_v19, %v2533_v44  ;;  %v151_v15 = vld [vmem:[%s11890_s3 + $0xd0] sm:$0xff]  ;;  %v12812_v44 = vld [vmem:[#allocation54_spill] sm:$0xff] }
 0x1ea   :  { %3778 = vmatmul.f32.gmra.mxu3 %v7480_v32  ;;  %3808 = vmatpush.msra.mxu0 %v12804_v46  ;;  %v12805_v38 = vld [vmem:[#allocation44_spill] sm:$0xff]  ;;  %v9868_v43 = vand.u32 4294901760, %v151_v15 }
 0x1eb   :  { %3984 = vmatpush.msra.mxu3 %v9700_v11  ;;  %3927 = vmatpush.msra.mxu2 %v12803_v10  ;;  %v12815_v10 = vld [vmem:[#allocation57_spill] sm:$0xff]  ;;  %v12855_v30 = vld [vmem:[#allocation104_spill] sm:$0xff] }
 0x1ec   :  { %v2692_v2 = vpop.f32.mrf.mxu2  ;;  %3862 = vmatpush.msra.mxu1 %v9700_v11  ;;  %v12807_v11 = vld [vmem:[#allocation38_spill] sm:$0xff]  ;;  %v9887_v51 = vsub.f32 %v151_v15, %v9868_v43 }
 0x1ed   :  { %v2693_v24 = vadd.f32 %v2692_v2, %v2634_v9  ;;  %3624 = vmatmul.f32.gmra.mxu1 %v7480_v32  ;;  %v2743_v13 = vpop.f32.mrf.mxu3  ;;  %3986 = vmatpush.msra.mxu3 %v12772_v52  ;;  %v12814_v9 = vld [vmem:[#allocation60_spill] sm:$0xff]  ;;  %v9904_v2 = vsub.f32 %v143_v58, %v9879_v61 }
 0x1ee   :  { %3583 = vmatmul.f32.gmra.mxu0 %v7537_v28  ;;  %3931 = vmatpush.msra.mxu2 %v12805_v38  ;;  %v12284_v46 = vand.u32 4294901760, %v9887_v51 }
 0x1ef   :  { %v9862_v39 = vadd.f32 %v2743_v13, %v2693_v24  ;;  %3811 = vmatpush.msra.mxu0 %v12807_v11  ;;  %3864 = vmatpush.msra.mxu1 %v12772_v52  ;;  %v2548_v29 = vpop.f32.mrf.mxu0  ;;  %v9909_v24 = vand.u32 4294901760, %v127_v45  ;;  %v12816_v13 = vld [vmem:[#allocation63_spill] sm:$0xff] }
 0x1f0   :  { %3685 = vmatmul.f32.gmra.mxu2 %v12396_v47  ;;  %3988 = vmatpush.msra.mxu3 %v12775_v59  ;;  %v2637_v48 = vpop.f32.mrf.mxu1 }
 0x1f1   :  { %12806 = vst [vmem:[#allocation10_spill] sm:$0xff] %v9862_v39  ;;  %3935 = vmatpush.msra.mxu2 %v12808_v5  ;;  %3814 = vmatpush.msra.mxu0 %v12809_v6  ;;  %v2638_v52 = vadd.f32 %v2637_v48, %v2541_v41  ;;  %v12818_v41 = vld [vmem:[#allocation61_spill] sm:$0xff]  ;;  %v12283_v5 = vand.u32 4294901760, %v9904_v2  ;;  %v12819_v6 = vld [vmem:[#allocation67_spill] sm:$0xff]  ;;  %v4086_v48 = vsub.f32 %v9887_v51, %v12284_v46 }
 0x1f2   :  { %3782 = vmatmul.f32.gmra.mxu3 %v7537_v28  ;;  %3866 = vmatpush.msra.mxu1 %v12775_v59 }
 0x1f3   :  { %3990 = vmatpush.msra.mxu3 %v12779_v17  ;;  %3817 = vmatpush.msra.mxu0 %v12810_v50 }
 0x1f4   :  { %v2697_v23 = vpop.f32.mrf.mxu2  ;;  %3939 = vmatpush.msra.mxu2 %v12811_v7  ;;  %3868 = vmatpush.msra.mxu1 %v12779_v17  ;;  %v2549_v17 = vadd.f32 %v2548_v29, %v12721_v42  ;;  %v12820_v29 = vld [vmem:[#allocation66_spill] sm:$0xff] }
 0x1f5   :  { %v2698_v59 = vadd.f32 %v2697_v23, %v2638_v52  ;;  %3628 = vmatmul.f32.gmra.mxu1 %v7537_v28  ;;  %v2749_v22 = vpop.f32.mrf.mxu3  ;;  %3820 = vmatpush.msra.mxu0 %v12812_v44  ;;  %v9929_v52 = vsub.f32 %v127_v45, %v9909_v24  ;;  %v12822_v7 = vld [vmem:[#allocation70_spill] sm:$0xff] }
 0x1f6   :  { %3587 = vmatmul.f32.gmra.mxu0 %v12707_v60  ;;  %3992 = vmatpush.msra.mxu3 %v12783_v4 }
 0x1f7   :  { %v9899_v19 = vadd.f32 %v2749_v22, %v2698_v59  ;;  %3943 = vmatpush.msra.mxu2 %v12814_v9  ;;  %3870 = vmatpush.msra.mxu1 %v12783_v4  ;;  %v9918_v4 = vsub.f32 %v135_v63, %v9896_v20  ;;  %v4092_v59 = vsub.f32 %v9904_v2, %v12283_v5  ;;  %v4087_v22 = vand.u32 4294901760, %v4086_v48  ;;  %v12827_v48 = vld [vmem:[#allocation75_spill] sm:$0xff] }
 0x1f8   :  { %3823 = vmatpush.msra.mxu0 %v12815_v10  ;;  %3693 = vmatmul.f32.gmra.mxu2 %v7719_v12  ;;  %v12839_v5 = vld [vmem:[#allocation95_spill] sm:$0xff] }
 0x1f9   :  { %12813 = vst [vmem:[#allocation4_spill] sm:$0xff] %v9899_v19  ;;  %3947 = vmatpush.msra.mxu2 %v12816_v13  ;;  %3994 = vmatpush.msra.mxu3 %v12787_v40  ;;  %v2641_v15 = vpop.f32.mrf.mxu1  ;;  %v12282_v50 = vand.u32 4294901760, %v9918_v4  ;;  %v4093_v9 = vand.u32 4294901760, %v4092_v59  ;;  %v12849_v19 = vld [vmem:[#allocation93_spill] sm:$0xff] }
 0x1fa   :  { %3826 = vmatpush.msra.mxu0 %v12818_v41  ;;  %3786 = vmatmul.f32.gmra.mxu3 %v12707_v60  ;;  %v2642_v11 = vadd.f32 %v2641_v15, %v2549_v17 }
 0x1fb   :  { %v9913_v38 = vpop.f32.mrf.mxu0  ;;  %3872 = vmatpush.msra.mxu1 %v12787_v40  ;;  %3996 = vmatpush.msra.mxu3 %v12789_v18 }
 0x1fc   :  { %12817 = vst [vmem:[#allocation25_spill] sm:$0xff] %v9913_v38  ;;  %v2702_v58 = vpop.f32.mrf.mxu2  ;;  %3829 = vmatpush.msra.mxu0 %v12819_v6  ;;  %3951 = vmatpush.msra.mxu2 %v12820_v29 }
 0x1fd   :  { %v2703_v23 = vadd.f32 %v2702_v58, %v2642_v11  ;;  %3632 = vmatmul.f32.gmra.mxu1 %v12707_v60  ;;  %v2755_v40 = vpop.f32.mrf.mxu3  ;;  %3998 = vmatpush.msra.mxu3 %v12794_v35 }
 0x1fe   :  { %3832 = vmatmul.f32.vlgmr.msra.gmra.mxu0 %v12727_v0  ;;  %3874 = vmatpush.msra.mxu1 %v12789_v18  ;;  %v12281_v18 = vand.u32 4294901760, %v9929_v52 }
 0x1ff   :  { %v9936_v63 = vadd.f32 %v2755_v40, %v2703_v23  ;;  %3955 = vmatpush.msra.mxu2 %v12822_v7  ;;  %4023 = vmatpush.msrb.mxu0 %v9868_v43  ;;  %v12828_v40 = vld [vmem:[#allocation68_spill] sm:$0xff]  ;;  %v152_v7 = vld [vmem:[%s11890_s3 + $0xd8] sm:$0xff] }
 0x200   :  { %3876 = vmatpush.msra.mxu1 %v12794_v35  ;;  %3957 = vmatmul.f32.vlgmr.msra.gmra.mxu2 %v7421_v55  ;;  %v4098_v35 = vsub.f32 %v9918_v4, %v12282_v50  ;;  %v12838_v50 = vld [vmem:[#allocation83_spill] sm:$0xff] }
 0x201   :  { %12821 = vst [vmem:[#allocation5_spill] sm:$0xff] %v9936_v63  ;;  %4000 = vmatpush.msra.mxu3 %v12797_v3  ;;  %4178 = vmatpush.msrb.mxu2 %v9887_v51  ;;  %v12846_v63 = vld [vmem:[#allocation89_spill] sm:$0xff] }
 0x202   :  { %v9950_v44 = vpop.f32.mrf.mxu1  ;;  %3878 = vmatpush.msra.mxu1 %v12797_v3  ;;  %4002 = vmatmul.f32.vlgmr.msra.gmra.mxu3 %v7421_v55  ;;  %v4104_v3 = vsub.f32 %v9929_v52, %v12281_v18  ;;  %v4099_v41 = vand.u32 4294901760, %v4098_v35  ;;  %v12829_v35 = vld [vmem:[#allocation77_spill] sm:$0xff] }
 0x203   :  { %v9948_v45 = vpop.f32.mrf.mxu0  ;;  %12824 = vst [vmem:[#allocation27_spill] sm:$0xff] %v9950_v44  ;;  %4238 = vmatpush.msrb.mxu3 %v9868_v43  ;;  %4181 = vmatpush.msrb.mxu2 %v9904_v2  ;;  %v12850_v44 = vld [vmem:[#allocation94_spill] sm:$0xff] }
 0x204   :  { %12823 = vst [vmem:[#allocation12_spill] sm:$0xff] %v9948_v45  ;;  %v2906_v17 = vpop.f32.mrf.mxu2  ;;  %4088 = vmatpush.msrb.mxu1 %v4087_v22  ;;  %4025 = vmatpush.msrb.mxu0 %v9879_v61  ;;  %v4105_v11 = vand.u32 4294901760, %v4104_v3  ;;  %v144_v3 = vld [vmem:[%s11890_s3 + $0x98] sm:$0xff]  ;;  %v12851_v45 = vld [vmem:[#allocation102_spill] sm:$0xff] }
 0x205   :  { %v2907_v10 = vadd.f32 %v2906_v17, %v12709_v16  ;;  %3882 = vmatmul.f32.vlgmr.msra.gmra.mxu1 %v12733_v49  ;;  %v3011_v13 = vpop.f32.mrf.mxu3  ;;  %4240 = vmatpush.msrb.mxu3 %v9879_v61  ;;  %v12830_v17 = vld [vmem:[#allocation74_spill] sm:$0xff] }
 0x206   :  { %3837 = vmatmul.f32.gmra.mxu0 %v12523_v21  ;;  %4184 = vmatpush.msrb.mxu2 %v9918_v4 }
 0x207   :  { %v9966_v15 = vadd.f32 %v3011_v13, %v2907_v10  ;;  %4094 = vmatpush.msrb.mxu1 %v4093_v9  ;;  %4027 = vmatpush.msrb.mxu0 %v9896_v20  ;;  %v12831_v9 = vld [vmem:[#allocation87_spill] sm:$0xff]  ;;  %v9995_v10 = vand.u32 4294901760, %v152_v7  ;;  %v12832_v13 = vld [vmem:[#allocation80_spill] sm:$0xff] }
 0x208   :  { %3961 = vmatmul.f32.gmra.mxu2 %v7480_v32  ;;  %4242 = vmatpush.msrb.mxu3 %v9896_v20 }
 0x209   :  { %4187 = vmatpush.msrb.mxu2 %v9929_v52  ;;  %4029 = vmatpush.msrb.mxu0 %v9909_v24 }
 0x20a   :  { %v9977_v6 = vpop.f32.mrf.mxu1  ;;  %4006 = vmatmul.f32.gmra.mxu3 %v7480_v32  ;;  %4100 = vmatpush.msrb.mxu1 %v4099_v41  ;;  %v12833_v41 = vld [vmem:[#allocation76_spill] sm:$0xff] }
 0x20b   :  { %v9975_v58 = vpop.f32.mrf.mxu0  ;;  %12826 = vst [vmem:[#allocation13_spill] sm:$0xff] %v9977_v6  ;;  %4244 = vmatpush.msrb.mxu3 %v9909_v24  ;;  %4190 = vmatpush.msrb.mxu2 %v12827_v48 }
 0x20c   :  { %12825 = vst [vmem:[#allocation6_spill] sm:$0xff] %v9975_v58  ;;  %v2914_v29 = vpop.f32.mrf.mxu2  ;;  %4106 = vmatpush.msrb.mxu1 %v4105_v11  ;;  %4031 = vmatpush.msrb.mxu0 %v12828_v40  ;;  %v136_v11 = vld [vmem:[%s11890_s3 + $0x58] sm:$0xff] }
 0x20d   :  { %v2915_v23 = vadd.f32 %v2914_v29, %v12715_v37  ;;  %3888 = vmatmul.f32.gmra.mxu1 %v12738_v62  ;;  %v3015_v59 = vpop.f32.mrf.mxu3  ;;  %4246 = vmatpush.msrb.mxu3 %v12828_v40  ;;  %v10023_v46 = vand.u32 4294901760, %v136_v11 }
 0x20e   :  { %3842 = vmatmul.f32.gmra.mxu0 %v7567_v57  ;;  %4193 = vmatpush.msrb.mxu2 %v12829_v35 }
 0x20f   :  { %v9989_v22 = vadd.f32 %v3015_v59, %v2915_v23  ;;  %4033 = vmatpush.msrb.mxu0 %v12830_v17  ;;  %4112 = vmatpush.msrb.mxu1 %v12831_v9  ;;  %v12836_v23 = vld [vmem:[#allocation91_spill] sm:$0xff]  ;;  %v10013_v59 = vand.u32 4294901760, %v144_v3 }
 0x210   :  { %3965 = vmatmul.f32.gmra.mxu2 %v7537_v28  ;;  %4248 = vmatpush.msrb.mxu3 %v12830_v17  ;;  %v12837_v9 = vld [vmem:[#allocation79_spill] sm:$0xff] }
 0x211   :  { %4196 = vmatpush.msrb.mxu2 %v12832_v13  ;;  %4035 = vmatpush.msrb.mxu0 %v12833_v41  ;;  %v10018_v13 = vsub.f32 %v152_v7, %v9995_v10  ;;  %v12840_v7 = vld [vmem:[#allocation82_spill] sm:$0xff] }
 0x212   :  { %v10009_v48 = vpop.f32.mrf.mxu1  ;;  %4010 = vmatmul.f32.gmra.mxu3 %v7537_v28  ;;  %4118 = vmatpush.msrb.mxu1 %v12836_v23  ;;  %v128_v23 = vld [vmem:[%s11890_s3 + $0x18] sm:$0xff] }
 0x213   :  { %v10007_v29 = vpop.f32.mrf.mxu0  ;;  %12835 = vst [vmem:[#allocation7_spill] sm:$0xff] %v10009_v48  ;;  %4250 = vmatpush.msrb.mxu3 %v12833_v41  ;;  %4037 = vmatpush.msrb.mxu0 %v12837_v9  ;;  %v10040_v48 = vand.u32 4294901760, %v128_v23 }
 0x214   :  { %12834 = vst [vmem:[#allocation29_spill] sm:$0xff] %v10007_v29  ;;  %v2922_v35 = vpop.f32.mrf.mxu2  ;;  %4199 = vmatpush.msrb.mxu2 %v12838_v50  ;;  %4124 = vmatpush.msrb.mxu1 %v12839_v5  ;;  %v10035_v50 = vsub.f32 %v144_v3, %v10013_v59  ;;  %v12841_v5 = vld [vmem:[#allocation86_spill] sm:$0xff]  ;;  %v12843_v29 = vld [vmem:[#allocation85_spill] sm:$0xff] }
 0x215   :  { %v2923_v18 = vadd.f32 %v2922_v35, %v12719_v1  ;;  %3894 = vmatmul.f32.gmra.mxu1 %v7598_v8  ;;  %v3019_v53 = vpop.f32.mrf.mxu3  ;;  %4039 = vmatpush.msrb.mxu0 %v12840_v7  ;;  %v12842_v35 = vld [vmem:[#allocation98_spill] sm:$0xff]  ;;  %v10060_v58 = vsub.f32 %v128_v23, %v10040_v48 }
 0x216   :  { %3847 = vmatmul.f32.gmra.mxu0 %v12702_v33  ;;  %4252 = vmatpush.msrb.mxu3 %v12837_v9  ;;  %v12852_v23 = vand.u32 4294901760, %v10035_v50 }
 0x217   :  { %v10030_v56 = vadd.f32 %v3019_v53, %v2923_v18  ;;  %4202 = vmatpush.msrb.mxu2 %v12841_v5  ;;  %4130 = vmatpush.msrb.mxu1 %v12842_v35  ;;  %v10045_v53 = vsub.f32 %v136_v11, %v10023_v46  ;;  %v12844_v18 = vld [vmem:[#allocation90_spill] sm:$0xff]  ;;  %v12848_v11 = vand.u32 4294901760, %v10018_v13  ;;  %v4485_v38 = vand.u32 4294901760, %v10060_v58 }
 0x218   :  { %4041 = vmatpush.msrb.mxu0 %v12843_v29  ;;  %3969 = vmatmul.f32.gmra.mxu2 %v12707_v60 }
 0x219   :  { %4205 = vmatpush.msrb.mxu2 %v12844_v18  ;;  %4254 = vmatpush.msrb.mxu3 %v12840_v7  ;;  %v4468_v18 = vsub.f32 %v10018_v13, %v12848_v11  ;;  %v12853_v11 = vld [vmem:[#allocation97_spill] sm:$0xff] }
 0x21a   :  { %v10049_v3 = vpop.f32.mrf.mxu1  ;;  %4043 = vmatpush.msrb.mxu0 %v12846_v63  ;;  %4014 = vmatmul.f32.gmra.mxu3 %v12707_v60 }
 0x21b   :  { %12845 = vst [vmem:[#allocation15_spill] sm:$0xff] %v10049_v3  ;;  %v3069_v5 = vpop.f32.mrf.mxu0  ;;  %4136 = vmatpush.msrb.mxu1 %v12847_v26  ;;  %4256 = vmatpush.msrb.mxu3 %v12843_v29  ;;  %v4469_v35 = vand.u32 4294901760, %v4468_v18 }
 0x21c   :  { %v2930_v6 = vpop.f32.mrf.mxu2  ;;  %4045 = vmatpush.msrb.mxu0 %v12849_v19  ;;  %4208 = vmatpush.msrb.mxu2 %v12850_v44  ;;  %v12854_v44 = vand.u32 4294901760, %v9887_v51 }
 0x21d   :  { %v2931_v3 = vadd.f32 %v2930_v6, %v12721_v42  ;;  %3900 = vmatmul.f32.gmra.mxu1 %v7665_v25  ;;  %v3023_v26 = vpop.f32.mrf.mxu3  ;;  %4258 = vmatpush.msrb.mxu3 %v12846_v63  ;;  %v4474_v6 = vsub.f32 %v10035_v50, %v12852_v23 }
 0x21e   :  { %4051 = vmatmul.f32.vlgmr.msrb.gmra.mxu0 %v12712_v34  ;;  %4142 = vmatpush.msrb.mxu1 %v12851_v45  ;;  %v12856_v45 = vand.u32 4294901760, %v10045_v53 }
 0x21f   :  { %v10069_v39 = vadd.f32 %v3023_v26, %v2931_v3  ;;  %4211 = vmatpush.msrb.mxu2 %v12853_v11  ;;  %4293 = vmatpush.msra.mxu0 %v12854_v44  ;;  %v3070_v26 = vadd.f32 %v3069_v5, %v9966_v15  ;;  %v12857_v11 = vld [vmem:[#allocation106_spill] sm:$0xff]  ;;  %v4475_v18 = vand.u32 4294901760, %v4474_v6  ;;  %v4486_v15 = vsub.f32 %v10060_v58, %v4485_v38 }
 0x220   :  { %4148 = vmatpush.msrb.mxu1 %v12855_v30  ;;  %4214 = vmatmul.f32.vlgmr.msrb.gmra.mxu2 %v12727_v0  ;;  %v4480_v3 = vsub.f32 %v10045_v53, %v12856_v45  ;;  %v12858_v5 = vand.u32 4294901760, %v9904_v2 }
 0x221   :  { %4260 = vmatpush.msrb.mxu3 %v12849_v19  ;;  %4405 = vmatpush.msra.mxu2 %v9995_v10 }
 0x222   :  { %v3119_v51 = vpop.f32.mrf.mxu1  ;;  %4154 = vmatpush.msrb.mxu1 %v12857_v11  ;;  %4264 = vmatmul.f32.vlgmr.msrb.gmra.mxu3 %v12733_v49  ;;  %v4481_v45 = vand.u32 4294901760, %v4480_v3  ;;  %v12861_v3 = vand.u32 4294901760, %v9929_v52 }
 0x223   :  { %v3074_v23 = vpop.f32.mrf.mxu0  ;;  %v3120_v30 = vadd.f32 %v3119_v51, %v3070_v26  ;;  %4470 = vmatpush.msra.mxu3 %v4469_v35  ;;  %4407 = vmatpush.msra.mxu2 %v10013_v59  ;;  %v12860_v26 = vand.u32 4294901760, %v9918_v4  ;;  %v12862_v4 = vld [vmem:[#allocation103_spill] sm:$0xff] }
 0x224   :  { %v3194_v44 = vpop.f32.mrf.mxu2  ;;  %4360 = vmatpush.msra.mxu1 %v9868_v43  ;;  %4297 = vmatpush.msra.mxu0 %v12858_v5  ;;  %v4487_v43 = vand.u32 4294901760, %v4486_v15  ;;  %v3075_v2 = vadd.f32 %v3074_v23, %v9989_v22  ;;  %v12864_v23 = vld [vmem:[#allocation119_spill] sm:$0xff]  ;;  %v12869_v5 = vld [vmem:[#allocation108_spill] sm:$0xff] }
 0x225   :  { %v3195_v27 = vadd.f32 %v3194_v44, %v3120_v30  ;;  %4156 = vmatmul.f32.vlgmr.msrb.gmra.mxu1 %v7421_v55  ;;  %v3239_v6 = vpop.f32.mrf.mxu3  ;;  %4476 = vmatpush.msra.mxu3 %v4475_v18  ;;  %v12863_v18 = vld [vmem:[#allocation78_spill] sm:$0xff]  ;;  %v12865_v30 = vld [vmem:[#allocation105_spill] sm:$0xff] }
 0x226   :  { %4059 = vmatmul.f32.gmra.mxu0 %v7595_v14  ;;  %4409 = vmatpush.msra.mxu2 %v10023_v46  ;;  %v12867_v44 = vld [vmem:[#allocation81_spill] sm:$0xff] }
 0x227   :  { %v10099_v35 = vadd.f32 %v3239_v6, %v3195_v27  ;;  %4362 = vmatpush.msra.mxu1 %v9879_v61  ;;  %4301 = vmatpush.msra.mxu0 %v12860_v26 }
 0x228   :  { %4219 = vmatmul.f32.gmra.mxu2 %v12523_v21  ;;  %4482 = vmatpush.msra.mxu3 %v4481_v45  ;;  %v12870_v45 = vld [vmem:[#allocation84_spill] sm:$0xff] }
 0x229   :  { %12859 = vst [vmem:[#allocation11_spill] sm:$0xff] %v10099_v35  ;;  %4411 = vmatpush.msra.mxu2 %v10040_v48  ;;  %4305 = vmatpush.msra.mxu0 %v12861_v3  ;;  %v12872_v3 = vld [vmem:[#allocation88_spill] sm:$0xff]  ;;  %v12939_v35 = vld [vmem:[#allocation162_spill] sm:$0xff] }
 0x22a   :  { %v3125_v11 = vpop.f32.mrf.mxu1  ;;  %4270 = vmatmul.f32.gmra.mxu3 %v12738_v62  ;;  %4364 = vmatpush.msra.mxu1 %v9896_v20 }
 0x22b   :  { %v3079_v51 = vpop.f32.mrf.mxu0  ;;  %v3126_v27 = vadd.f32 %v3125_v11, %v3075_v2  ;;  %4488 = vmatpush.msra.mxu3 %v4487_v43  ;;  %4413 = vmatpush.msra.mxu2 %v12862_v4  ;;  %v12871_v2 = vld [vmem:[#allocation127_spill] sm:$0xff] }
 0x22c   :  { %v3198_v61 = vpop.f32.mrf.mxu2  ;;  %4366 = vmatpush.msra.mxu1 %v9909_v24  ;;  %4309 = vmatpush.msra.mxu0 %v12863_v18  ;;  %v12868_v24 = vld [vmem:[#allocation123_spill] sm:$0xff]  ;;  %v3080_v15 = vadd.f32 %v3079_v51, %v10030_v56  ;;  %v12877_v18 = vld [vmem:[#allocation114_spill] sm:$0xff] }
 0x22d   :  { %v3199_v22 = vadd.f32 %v3198_v61, %v3126_v27  ;;  %4160 = vmatmul.f32.gmra.mxu1 %v7480_v32  ;;  %v3243_v52 = vpop.f32.mrf.mxu3  ;;  %4494 = vmatpush.msra.mxu3 %v12864_v23  ;;  %v12873_v11 = vld [vmem:[#allocation111_spill] sm:$0xff]  ;;  %v12874_v27 = vld [vmem:[#allocation92_spill] sm:$0xff]  ;;  %v12875_v61 = vld [vmem:[#allocation130_spill] sm:$0xff] }
 0x22e   :  { %4067 = vmatmul.f32.gmra.mxu0 %v12396_v47  ;;  %4415 = vmatpush.msra.mxu2 %v12865_v30  ;;  %v12880_v23 = vld [vmem:[#allocation132_spill] sm:$0xff] }
 0x22f   :  { %v10118_v20 = vadd.f32 %v3243_v52, %v3199_v22  ;;  %4313 = vmatpush.msra.mxu0 %v12867_v44  ;;  %4368 = vmatpush.msra.mxu1 %v12828_v40  ;;  %v12878_v22 = vld [vmem:[#allocation96_spill] sm:$0xff]  ;;  %v12879_v52 = vld [vmem:[#allocation117_spill] sm:$0xff] }
 0x230   :  { %4224 = vmatmul.f32.gmra.mxu2 %v7567_v57  ;;  %4500 = vmatpush.msra.mxu3 %v12868_v24 }
 0x231   :  { %12866 = vst [vmem:[#allocation31_spill] sm:$0xff] %v10118_v20  ;;  %4417 = vmatpush.msra.mxu2 %v12869_v5  ;;  %4317 = vmatpush.msra.mxu0 %v12870_v45 }
 0x232   :  { %v3131_v26 = vpop.f32.mrf.mxu1  ;;  %4276 = vmatmul.f32.gmra.mxu3 %v7598_v8  ;;  %4370 = vmatpush.msra.mxu1 %v12830_v17 }
 0x233   :  { %v3084_v6 = vpop.f32.mrf.mxu0  ;;  %v3132_v43 = vadd.f32 %v3131_v26, %v3080_v15  ;;  %4506 = vmatpush.msra.mxu3 %v12871_v2  ;;  %4321 = vmatpush.msra.mxu0 %v12872_v3  ;;  %v12881_v15 = vld [vmem:[#allocation99_spill] sm:$0xff]  ;;  %v12884_v2 = vld [vmem:[#allocation121_spill] sm:$0xff] }
 0x234   :  { %v3202_v40 = vpop.f32.mrf.mxu2  ;;  %4419 = vmatpush.msra.mxu2 %v12873_v11  ;;  %4372 = vmatpush.msra.mxu1 %v12833_v41  ;;  %v3085_v41 = vadd.f32 %v3084_v6, %v10069_v39 }
 0x235   :  { %v3203_v56 = vadd.f32 %v3202_v40, %v3132_v43  ;;  %4164 = vmatmul.f32.gmra.mxu1 %v7537_v28  ;;  %v3247_v51 = vpop.f32.mrf.mxu3  ;;  %4325 = vmatpush.msra.mxu0 %v12874_v27  ;;  %v12883_v43 = vld [vmem:[#allocation101_spill] sm:$0xff]  ;;  %v12885_v40 = vld [vmem:[#allocation135_spill] sm:$0xff]  ;;  %v12889_v27 = vand.u32 4294901760, %v10018_v13 }
 0x236   :  { %4075 = vmatmul.f32.gmra.mxu0 %v7719_v12  ;;  %4512 = vmatpush.msra.mxu3 %v12875_v61 }
 0x237   :  { %v10137_v17 = vadd.f32 %v3247_v51, %v3203_v56  ;;  %4421 = vmatpush.msra.mxu2 %v12877_v18  ;;  %4374 = vmatpush.msra.mxu1 %v12837_v9  ;;  %v12882_v9 = vld [vmem:[#allocation134_spill] sm:$0xff]  ;;  %v12887_v56 = vld [vmem:[#allocation125_spill] sm:$0xff]  ;;  %v12888_v51 = vld [vmem:[#allocation136_spill] sm:$0xff] }
 0x238   :  { %4329 = vmatpush.msra.mxu0 %v12878_v22  ;;  %4229 = vmatmul.f32.gmra.mxu2 %v12702_v33 }
 0x239   :  { %12876 = vst [vmem:[#allocation14_spill] sm:$0xff] %v10137_v17  ;;  %4423 = vmatpush.msra.mxu2 %v12879_v52  ;;  %4518 = vmatpush.msra.mxu3 %v12880_v23  ;;  %v12890_v23 = vand.u32 4294901760, %v10035_v50  ;;  %v12937_v17 = vld [vmem:[#allocation165_spill] sm:$0xff] }
 0x23a   :  { %v3137_v44 = vpop.f32.mrf.mxu1  ;;  %4333 = vmatpush.msra.mxu0 %v12881_v15  ;;  %4282 = vmatmul.f32.gmra.mxu3 %v7665_v25 }
 0x23b   :  { %v3288_v24 = vpop.f32.mrf.mxu0  ;;  %v3138_v45 = vadd.f32 %v3137_v44, %v3085_v41  ;;  %4376 = vmatpush.msra.mxu1 %v12840_v7  ;;  %4524 = vmatpush.msra.mxu3 %v12882_v9 }
 0x23c   :  { %v3206_v26 = vpop.f32.mrf.mxu2  ;;  %4337 = vmatpush.msra.mxu0 %v12883_v43  ;;  %4425 = vmatpush.msra.mxu2 %v12884_v2  ;;  %v3289_v3 = vadd.f32 %v3288_v24, %v12709_v16 }
 0x23d   :  { %v3207_v39 = vadd.f32 %v3206_v26, %v3138_v45  ;;  %4168 = vmatmul.f32.gmra.mxu1 %v12707_v60  ;;  %v3251_v6 = vpop.f32.mrf.mxu3  ;;  %4530 = vmatpush.msra.mxu3 %v12885_v40  ;;  %v12893_v45 = vld [vmem:[#allocation107_spill] sm:$0xff]  ;;  %v12896_v40 = vld [vmem:[#allocation116_spill] sm:$0xff] }
 0x23e   :  { %4339 = vmatmul.f32.vlgmr.msra.gmra.mxu0 %v7421_v55  ;;  %4378 = vmatpush.msra.mxu1 %v12843_v29 }
 0x23f   :  { %v10157_v7 = vadd.f32 %v3251_v6, %v3207_v39  ;;  %4427 = vmatpush.msra.mxu2 %v12887_v56  ;;  %4560 = vmatpush.msrb.mxu0 %v10018_v13  ;;  %v145_v6 = vld [vmem:[%s11890_s3 + $0xa0] sm:$0xff] }
 0x240   :  { %4380 = vmatpush.msra.mxu1 %v12846_v63  ;;  %4433 = vmatmul.f32.vlgmr.msra.gmra.mxu2 %v12712_v34 }
 0x241   :  { %12886 = vst [vmem:[#allocation20_spill] sm:$0xff] %v10157_v7  ;;  %4536 = vmatpush.msra.mxu3 %v12888_v51  ;;  %4675 = vmatpush.msrb.mxu2 %v12889_v27 }
 0x242   :  { %v3393_v61 = vpop.f32.mrf.mxu1  ;;  %4382 = vmatpush.msra.mxu1 %v12849_v19  ;;  %4538 = vmatmul.f32.vlgmr.msra.gmra.mxu3 %v7421_v55  ;;  %v12891_v19 = vand.u32 4294901760, %v10045_v53 }
 0x243   :  { %v3296_v29 = vpop.f32.mrf.mxu0  ;;  %v3394_v22 = vadd.f32 %v3393_v61, %v3289_v3  ;;  %4742 = vmatpush.msrb.mxu3 %v9995_v10  ;;  %4679 = vmatpush.msrb.mxu2 %v12890_v23  ;;  %v12897_v3 = vld [vmem:[#allocation112_spill] sm:$0xff]  ;;  %v12898_v61 = vld [vmem:[#allocation115_spill] sm:$0xff] }
 0x244   :  { %v3451_v41 = vpop.f32.mrf.mxu2  ;;  %4620 = vmatpush.msrb.mxu1 %v9995_v10  ;;  %4563 = vmatpush.msrb.mxu0 %v10035_v50  ;;  %v3297_v44 = vadd.f32 %v3296_v29, %v12715_v37  ;;  %v12899_v23 = vld [vmem:[#allocation120_spill] sm:$0xff] }
 0x245   :  { %v3452_v63 = vadd.f32 %v3451_v41, %v3394_v22  ;;  %4384 = vmatmul.f32.vlgmr.msra.gmra.mxu1 %v7421_v55  ;;  %v3501_v13 = vpop.f32.mrf.mxu3  ;;  %4744 = vmatpush.msrb.mxu3 %v10013_v59  ;;  %v10219_v22 = vand.u32 4294901760, %v145_v6  ;;  %v137_v41 = vld [vmem:[%s11890_s3 + $0x60] sm:$0xff] }
 0x246   :  { %4343 = vmatmul.f32.gmra.mxu0 %v7480_v32  ;;  %4683 = vmatpush.msrb.mxu2 %v12891_v19  ;;  %v129_v19 = vld [vmem:[%s11890_s3 + $0x20] sm:$0xff] }
 0x247   :  { %v10179_v24 = vadd.f32 %v3501_v13, %v3452_v63  ;;  %4622 = vmatpush.msrb.mxu1 %v10013_v59  ;;  %4566 = vmatpush.msrb.mxu0 %v10045_v53  ;;  %v12892_v53 = vld [vmem:[#allocation110_spill] sm:$0xff] }
 0x248   :  { %4441 = vmatmul.f32.gmra.mxu2 %v7595_v14  ;;  %4746 = vmatpush.msrb.mxu3 %v10023_v46 }
 0x249   :  { %4687 = vmatpush.msrb.mxu2 %v4485_v38  ;;  %4569 = vmatpush.msrb.mxu0 %v10060_v58  ;;  %v12894_v58 = vld [vmem:[#allocation113_spill] sm:$0xff] }
 0x24a   :  { %v3397_v50 = vpop.f32.mrf.mxu1  ;;  %4542 = vmatmul.f32.gmra.mxu3 %v7480_v32  ;;  %4624 = vmatpush.msrb.mxu1 %v10023_v46  ;;  %v153_v46 = vld [vmem:[%s11890_s3 + $0xe0] sm:$0xff] }
 0x24b   :  { %v3304_v10 = vpop.f32.mrf.mxu0  ;;  %v3398_v15 = vadd.f32 %v3397_v50, %v3297_v44  ;;  %4748 = vmatpush.msrb.mxu3 %v10040_v48  ;;  %4691 = vmatpush.msrb.mxu2 %v12892_v53  ;;  %v10208_v39 = vand.u32 4294901760, %v153_v46  ;;  %v12900_v44 = vld [vmem:[#allocation118_spill] sm:$0xff] }
 0x24c   :  { %v3456_v59 = vpop.f32.mrf.mxu2  ;;  %4626 = vmatpush.msrb.mxu1 %v10040_v48  ;;  %4572 = vmatpush.msrb.mxu0 %v12893_v45  ;;  %v3305_v26 = vadd.f32 %v3304_v10, %v12719_v1  ;;  %v12895_v48 = vld [vmem:[#allocation109_spill] sm:$0xff]  ;;  %v10236_v10 = vand.u32 4294901760, %v137_v41  ;;  %v12902_v53 = vld [vmem:[#allocation122_spill] sm:$0xff] }
 0x24d   :  { %v3457_v9 = vadd.f32 %v3456_v59, %v3398_v15  ;;  %4388 = vmatmul.f32.gmra.mxu1 %v7480_v32  ;;  %v3507_v38 = vpop.f32.mrf.mxu3  ;;  %4750 = vmatpush.msrb.mxu3 %v12862_v4  ;;  %v10227_v63 = vsub.f32 %v153_v46, %v10208_v39  ;;  %v12901_v15 = vld [vmem:[#allocation124_spill] sm:$0xff]  ;;  %v10244_v59 = vsub.f32 %v145_v6, %v10219_v22 }
 0x24e   :  { %4347 = vmatmul.f32.gmra.mxu0 %v7537_v28  ;;  %4695 = vmatpush.msrb.mxu2 %v12894_v58 }
 0x24f   :  { %v10202_v43 = vadd.f32 %v3507_v38, %v3457_v9  ;;  %4575 = vmatpush.msrb.mxu0 %v12895_v48  ;;  %4628 = vmatpush.msrb.mxu1 %v12862_v4  ;;  %v12288_v45 = vand.u32 4294901760, %v10227_v63  ;;  %v10249_v9 = vand.u32 4294901760, %v129_v19  ;;  %v12903_v38 = vld [vmem:[#allocation128_spill] sm:$0xff] }
 0x250   :  { %4449 = vmatmul.f32.gmra.mxu2 %v12396_v47  ;;  %4752 = vmatpush.msrb.mxu3 %v12865_v30 }
 0x251   :  { %4699 = vmatpush.msrb.mxu2 %v12896_v40  ;;  %4578 = vmatpush.msrb.mxu0 %v12897_v3  ;;  %v12287_v40 = vand.u32 4294901760, %v10244_v59  ;;  %v12905_v3 = vld [vmem:[#allocation129_spill] sm:$0xff] }
 0x252   :  { %v3401_v27 = vpop.f32.mrf.mxu1  ;;  %4546 = vmatmul.f32.gmra.mxu3 %v7537_v28  ;;  %4630 = vmatpush.msrb.mxu1 %v12865_v30 }
 0x253   :  { %v3312_v51 = vpop.f32.mrf.mxu0  ;;  %v3402_v4 = vadd.f32 %v3401_v27, %v3305_v26  ;;  %4754 = vmatpush.msrb.mxu3 %v12869_v5  ;;  %4581 = vmatpush.msrb.mxu0 %v12898_v61  ;;  %v12904_v26 = vld [vmem:[#allocation126_spill] sm:$0xff]  ;;  %v4850_v27 = vsub.f32 %v10227_v63, %v12288_v45  ;;  %v12935_v45 = vld [vmem:[#allocation184_spill] sm:$0xff] }
 0x254   :  { %v3461_v29 = vpop.f32.mrf.mxu2  ;;  %4703 = vmatpush.msrb.mxu2 %v12899_v23  ;;  %4632 = vmatpush.msrb.mxu1 %v12869_v5  ;;  %v3313_v5 = vadd.f32 %v3312_v51, %v12721_v42  ;;  %v12906_v51 = vld [vmem:[#allocation131_spill] sm:$0xff]  ;;  %v12907_v23 = vld [vmem:[#allocation133_spill] sm:$0xff] }
 0x255   :  { %v3462_v30 = vadd.f32 %v3461_v29, %v3402_v4  ;;  %4392 = vmatmul.f32.gmra.mxu1 %v7537_v28  ;;  %v3513_v13 = vpop.f32.mrf.mxu3  ;;  %4584 = vmatpush.msrb.mxu0 %v12900_v44  ;;  %v10267_v4 = vsub.f32 %v129_v19, %v10249_v9  ;;  %v12908_v19 = vld [vmem:[#allocation138_spill] sm:$0xff]  ;;  %v12909_v44 = vld [vmem:[#allocation151_spill] sm:$0xff] }
 0x256   :  { %4351 = vmatmul.f32.gmra.mxu0 %v12707_v60  ;;  %4756 = vmatpush.msrb.mxu3 %v12873_v11 }
 0x257   :  { %v10239_v50 = vadd.f32 %v3513_v13, %v3462_v30  ;;  %4707 = vmatpush.msrb.mxu2 %v12901_v15  ;;  %4634 = vmatpush.msrb.mxu1 %v12873_v11  ;;  %v10256_v11 = vsub.f32 %v137_v41, %v10236_v10  ;;  %v4856_v30 = vsub.f32 %v10244_v59, %v12287_v40  ;;  %v4851_v13 = vand.u32 4294901760, %v4850_v27  ;;  %v12934_v40 = vld [vmem:[#allocation156_spill] sm:$0xff] }
 0x258   :  { %4587 = vmatpush.msrb.mxu0 %v12902_v53  ;;  %4457 = vmatmul.f32.gmra.mxu2 %v7719_v12  ;;  %v533_v7 = vadd.f32 %v12935_v45, %v12934_v40  ;;  %v12945_v45 = vld [vmem:[#allocation180_spill] sm:$0xff] }
 0x259   :  { %4711 = vmatpush.msrb.mxu2 %v12903_v38  ;;  %4758 = vmatpush.msrb.mxu3 %v12877_v18  ;;  %v12286_v61 = vand.u32 4294901760, %v10256_v11 }
 0x25a   :  { %v3405_v46 = vpop.f32.mrf.mxu1  ;;  %4590 = vmatpush.msrb.mxu0 %v12904_v26  ;;  %4550 = vmatmul.f32.gmra.mxu3 %v12707_v60 }
 0x25b   :  { %v3576_v58 = vpop.f32.mrf.mxu0  ;;  %v3406_v48 = vadd.f32 %v3405_v46, %v3313_v5  ;;  %4636 = vmatpush.msrb.mxu1 %v12877_v18  ;;  %4760 = vmatpush.msrb.mxu3 %v12879_v52  ;;  %v521_v5 = vadd.f32 %v12909_v44, %v12908_v19  ;;  %v12910_v46 = vld [vmem:[#allocation164_spill] sm:$0xff] }
 0x25c   :  { %v3466_v6 = vpop.f32.mrf.mxu2  ;;  %4593 = vmatpush.msrb.mxu0 %v12905_v3  ;;  %4715 = vmatpush.msrb.mxu2 %v12906_v51  ;;  %v3577_v15 = vadd.f32 %v3576_v58, %v10179_v24  ;;  %v4857_v58 = vand.u32 4294901760, %v4856_v30  ;;  %v12913_v30 = vld [vmem:[#allocation163_spill] sm:$0xff] }
 0x25d   :  { %v3467_v29 = vadd.f32 %v3466_v6, %v3406_v48  ;;  %4396 = vmatmul.f32.gmra.mxu1 %v12707_v60  ;;  %v3519_v18 = vpop.f32.mrf.mxu3  ;;  %4762 = vmatpush.msrb.mxu3 %v12884_v2  ;;  %v566_v26 = vadd.f32 %v12910_v46, %v521_v5 }
 0x25e   :  { %4596 = vmatmul.f32.vlgmr.msrb.gmra.mxu0 %v12727_v0  ;;  %4638 = vmatpush.msrb.mxu1 %v12879_v52  ;;  %v12285_v52 = vand.u32 4294901760, %v10267_v4 }
 0x25f   :  { %v10274_v41 = vadd.f32 %v3519_v18, %v3467_v29  ;;  %4719 = vmatpush.msrb.mxu2 %v12907_v23  ;;  %4787 = vmatpush.msra.mxu0 %v10208_v39  ;;  %v12912_v23 = vld [vmem:[#allocation140_spill] sm:$0xff] }
 0x260   :  { %4640 = vmatpush.msrb.mxu1 %v12884_v2  ;;  %4721 = vmatmul.f32.vlgmr.msrb.gmra.mxu2 %v7421_v55  ;;  %v4862_v2 = vsub.f32 %v10256_v11, %v12286_v61  ;;  %v12929_v61 = vld [vmem:[#allocation42_spill] sm:$0xff] }
 0x261   :  { %4764 = vmatpush.msrb.mxu3 %v12887_v56  ;;  %4942 = vmatpush.msra.mxu2 %v10227_v63 }
 0x262   :  { %v3621_v38 = vpop.f32.mrf.mxu1  ;;  %4642 = vmatpush.msrb.mxu1 %v12887_v56  ;;  %4766 = vmatmul.f32.vlgmr.msrb.gmra.mxu3 %v7421_v55  ;;  %v4868_v56 = vsub.f32 %v10267_v4, %v12285_v52  ;;  %v4863_v29 = vand.u32 4294901760, %v4862_v2  ;;  %v12928_v52 = vld [vmem:[#allocation155_spill] sm:$0xff] }
 0x263   :  { %v3580_v53 = vpop.f32.mrf.mxu0  ;;  %v3622_v48 = vadd.f32 %v3621_v38, %v3577_v15  ;;  %5002 = vmatpush.msra.mxu3 %v10208_v39  ;;  %4945 = vmatpush.msra.mxu2 %v10244_v59  ;;  %v12914_v15 = vld [vmem:[#allocation176_spill] sm:$0xff] }
 0x264   :  { %v3670_v24 = vpop.f32.mrf.mxu2  ;;  %4852 = vmatpush.msra.mxu1 %v4851_v13  ;;  %4789 = vmatpush.msra.mxu0 %v10219_v22  ;;  %v4869_v18 = vand.u32 4294901760, %v4868_v56  ;;  %v525_v13 = vadd.f32 %v12913_v30, %v12912_v23  ;;  %v3581_v19 = vadd.f32 %v3580_v53, %v10202_v43  ;;  %v12916_v43 = vld [vmem:[#allocation142_spill] sm:$0xff]  ;;  %v154_v53 = vld [vmem:[%s11890_s3 + $0xe8] sm:$0xff]  ;;  %v12918_v56 = vld [vmem:[#allocation148_spill] sm:$0xff] }
 0x265   :  { %v3671_v6 = vadd.f32 %v3670_v24, %v12709_v16  ;;  %v10302_v3 = vmax.f32 %v566_v26, %v3622_v48  ;;  %4646 = vmatmul.f32.vlgmr.msrb.gmra.mxu1 %v12733_v49  ;;  %v3775_v51 = vpop.f32.mrf.mxu3  ;;  %5004 = vmatpush.msra.mxu3 %v10219_v22  ;;  %v12915_v26 = vld [vmem:[#allocation144_spill] sm:$0xff]  ;;  %v146_v23 = vld [vmem:[%s11890_s3 + $0xa8] sm:$0xff]  ;;  %v12921_v30 = vld [vmem:[#allocation145_spill] sm:$0xff] }
 0x266   :  { %4601 = vmatmul.f32.gmra.mxu0 %v12523_v21  ;;  %4948 = vmatpush.msra.mxu2 %v10256_v11  ;;  %v570_v38 = vadd.f32 %v12914_v15, %v525_v13  ;;  %v12922_v13 = vld [vmem:[#allocation175_spill] sm:$0xff]  ;;  %v12923_v15 = vld [vmem:[#allocation152_spill] sm:$0xff] }
 0x267   :  { %12911 = vst [vmem:[#allocation33_spill] sm:$0xff] %v10302_v3  ;;  %v10306_v27 = vadd.f32 %v3775_v51, %v3671_v6  ;;  %4858 = vmatpush.msra.mxu1 %v4857_v58  ;;  %4791 = vmatpush.msra.mxu0 %v10236_v10  ;;  %v12919_v51 = vld [vmem:[#allocation143_spill] sm:$0xff] }
 0x268   :  { %4725 = vmatmul.f32.gmra.mxu2 %v7480_v32  ;;  %5006 = vmatpush.msra.mxu3 %v10236_v10 }
 0x269   :  { %4951 = vmatpush.msra.mxu2 %v10267_v4  ;;  %4793 = vmatpush.msra.mxu0 %v10249_v9 }
 0x26a   :  { %v3625_v5 = vpop.f32.mrf.mxu1  ;;  %4770 = vmatmul.f32.gmra.mxu3 %v7480_v32  ;;  %4864 = vmatpush.msra.mxu1 %v4863_v29  ;;  %v12920_v29 = vld [vmem:[#allocation160_spill] sm:$0xff] }
 0x26b   :  { %v3584_v44 = vpop.f32.mrf.mxu0  ;;  %v3626_v2 = vadd.f32 %v3625_v5, %v3581_v19  ;;  %5008 = vmatpush.msra.mxu3 %v10249_v9  ;;  %4954 = vmatpush.msra.mxu2 %v12915_v26  ;;  %v529_v19 = vadd.f32 %v12922_v13, %v12921_v30 }
 0x26c   :  { %v3678_v46 = vpop.f32.mrf.mxu2  ;;  %4870 = vmatpush.msra.mxu1 %v4869_v18  ;;  %4795 = vmatpush.msra.mxu0 %v12916_v43  ;;  %v10337_v18 = vand.u32 4294901760, %v154_v53  ;;  %v3585_v5 = vadd.f32 %v3584_v44, %v10239_v50  ;;  %v12927_v44 = vld [vmem:[#allocation150_spill] sm:$0xff] }
 0x26d   :  { %v3679_v48 = vadd.f32 %v3678_v46, %v12715_v37  ;;  %v10327_v24 = vmax.f32 %v570_v38, %v3626_v2  ;;  %4652 = vmatmul.f32.gmra.mxu1 %v12738_v62  ;;  %v3779_v58 = vpop.f32.mrf.mxu3  ;;  %5010 = vmatpush.msra.mxu3 %v12916_v43  ;;  %v12924_v38 = vld [vmem:[#allocation146_spill] sm:$0xff]  ;;  %v138_v2 = vld [vmem:[%s11890_s3 + $0x68] sm:$0xff] }
 0x26e   :  { %4606 = vmatmul.f32.gmra.mxu0 %v7567_v57  ;;  %4957 = vmatpush.msra.mxu2 %v12918_v56  ;;  %v12926_v56 = vld [vmem:[#allocation185_spill] sm:$0xff]  ;;  %v10360_v13 = vsub.f32 %v154_v53, %v10337_v18 }
 0x26f   :  { %12917 = vst [vmem:[#allocation23_spill] sm:$0xff] %v10327_v24  ;;  %v10331_v6 = vadd.f32 %v3779_v58, %v3679_v48  ;;  %4797 = vmatpush.msra.mxu0 %v12919_v51  ;;  %4876 = vmatpush.msra.mxu1 %v12920_v29  ;;  %v12925_v48 = vld [vmem:[#allocation166_spill] sm:$0xff]  ;;  %v10354_v58 = vand.u32 4294901760, %v146_v23  ;;  %v574_v29 = vadd.f32 %v12926_v56, %v529_v19  ;;  %v130_v19 = vld [vmem:[%s11890_s3 + $0x28] sm:$0xff]  ;;  %v12943_v24 = vld [vmem:[#allocation169_spill] sm:$0xff] }
 0x270   :  { %4729 = vmatmul.f32.gmra.mxu2 %v7537_v28  ;;  %5012 = vmatpush.msra.mxu3 %v12919_v51  ;;  %v12931_v56 = vld [vmem:[#allocation154_spill] sm:$0xff] }
 0x271   :  { %4960 = vmatpush.msra.mxu2 %v12923_v15  ;;  %4799 = vmatpush.msra.mxu0 %v12924_v38 }
 0x272   :  { %v3629_v26 = vpop.f32.mrf.mxu1  ;;  %4774 = vmatmul.f32.gmra.mxu3 %v7537_v28  ;;  %4882 = vmatpush.msra.mxu1 %v12925_v48  ;;  %v10365_v48 = vand.u32 4294901760, %v138_v2 }
 0x273   :  { %v3588_v46 = vpop.f32.mrf.mxu0  ;;  %v3630_v30 = vadd.f32 %v3629_v26, %v3585_v5  ;;  %5014 = vmatpush.msra.mxu3 %v12924_v38  ;;  %4801 = vmatpush.msra.mxu0 %v12927_v44 }
 0x274   :  { %v3686_v50 = vpop.f32.mrf.mxu2  ;;  %4963 = vmatpush.msra.mxu2 %v12928_v52  ;;  %4888 = vmatpush.msra.mxu1 %v12929_v61  ;;  %v10379_v61 = vsub.f32 %v146_v23, %v10354_v58  ;;  %v12932_v52 = vld [vmem:[#allocation159_spill] sm:$0xff]  ;;  %v3589_v23 = vadd.f32 %v3588_v46, %v10274_v41 }
 0x275   :  { %v3687_v15 = vadd.f32 %v3686_v50, %v12719_v1  ;;  %v10370_v5 = vmax.f32 %v574_v29, %v3630_v30  ;;  %4658 = vmatmul.f32.gmra.mxu1 %v7598_v8  ;;  %v3783_v53 = vpop.f32.mrf.mxu3  ;;  %4803 = vmatpush.msra.mxu0 %v12931_v56  ;;  %v12933_v50 = vld [vmem:[#allocation173_spill] sm:$0xff]  ;;  %v10384_v30 = vand.u32 4294901760, %v130_v19 }
 0x276   :  { %4611 = vmatmul.f32.gmra.mxu0 %v12702_v33  ;;  %5016 = vmatpush.msra.mxu3 %v12927_v44 }
 0x277   :  { %12930 = vst [vmem:[#allocation37_spill] sm:$0xff] %v10370_v5  ;;  %v10374_v26 = vadd.f32 %v3783_v53, %v3687_v15  ;;  %4966 = vmatpush.msra.mxu2 %v12932_v52  ;;  %4894 = vmatpush.msra.mxu1 %v12933_v50  ;;  %v12936_v15 = vld [vmem:[#allocation158_spill] sm:$0xff]  ;;  %v10391_v53 = vsub.f32 %v138_v2, %v10365_v48 }
 0x278   :  { %4805 = vmatpush.msra.mxu0 %v12936_v15  ;;  %4733 = vmatmul.f32.gmra.mxu2 %v12707_v60  ;;  %v12938_v52 = vld [vmem:[#allocation194_spill] sm:$0xff] }
 0x279   :  { %4969 = vmatpush.msra.mxu2 %v12937_v17  ;;  %5018 = vmatpush.msra.mxu3 %v12931_v56  ;;  %v578_v50 = vadd.f32 %v12938_v52, %v533_v7  ;;  %v12940_v5 = vld [vmem:[#allocation178_spill] sm:$0xff]  ;;  %v12941_v17 = vand.u32 4294901760, %v10360_v13  ;;  %v10406_v7 = vsub.f32 %v130_v19, %v10384_v30  ;;  %v12942_v52 = vld [vmem:[#allocation168_spill] sm:$0xff]  ;;  %v12946_v19 = vand.u32 4294901760, %v10379_v61 }
 0x27a   :  { %v3633_v29 = vpop.f32.mrf.mxu1  ;;  %4807 = vmatpush.msra.mxu0 %v12939_v35  ;;  %4778 = vmatmul.f32.gmra.mxu3 %v12707_v60 }
 0x27b   :  { %v3833_v20 = vpop.f32.mrf.mxu0  ;;  %v3634_v40 = vadd.f32 %v3633_v29, %v3589_v23  ;;  %4900 = vmatpush.msra.mxu1 %v12940_v5  ;;  %5020 = vmatpush.msra.mxu3 %v12936_v15  ;;  %v5232_v2 = vsub.f32 %v10360_v13, %v12941_v17  ;;  %v5249_v29 = vand.u32 4294901760, %v10406_v7 }
 0x27c   :  { %v3694_v41 = vpop.f32.mrf.mxu2  ;;  %4809 = vmatpush.msra.mxu0 %v12942_v52  ;;  %4972 = vmatpush.msra.mxu2 %v12943_v24  ;;  %v12947_v24 = vld [vmem:[#allocation171_spill] sm:$0xff] }
 0x27d   :  { %v3695_v46 = vadd.f32 %v3694_v41, %v12721_v42  ;;  %v10412_v23 = vmax.f32 %v578_v50, %v3634_v40  ;;  %4664 = vmatmul.f32.gmra.mxu1 %v7665_v25  ;;  %v3787_v5 = vpop.f32.mrf.mxu3  ;;  %5022 = vmatpush.msra.mxu3 %v12939_v35  ;;  %v5238_v41 = vsub.f32 %v10379_v61, %v12946_v19  ;;  %v12948_v50 = vand.u32 4294901760, %v10227_v63 }
 0x27e   :  { %4815 = vmatmul.f32.vlgmr.msra.gmra.mxu0 %v12712_v34  ;;  %4906 = vmatpush.msra.mxu1 %v12945_v45  ;;  %v5233_v40 = vand.u32 4294901760, %v5232_v2  ;;  %v12950_v45 = vand.u32 4294901760, %v10391_v53 }
 0x27f   :  { %12944 = vst [vmem:[#allocation41_spill] sm:$0xff] %v10412_v23  ;;  %v10417_v17 = vadd.f32 %v3787_v5, %v3695_v46  ;;  %4975 = vmatpush.msra.mxu2 %v12947_v24  ;;  %5057 = vmatpush.msrb.mxu0 %v12948_v50  ;;  %v12949_v23 = vld [vmem:[#allocation183_spill] sm:$0xff]  ;;  %v3834_v5 = vadd.f32 %v3833_v20, %v10306_v27  ;;  %v5239_v2 = vand.u32 4294901760, %v5238_v41  ;;  %v12952_v27 = vand.u32 4294901760, %v10244_v59 }
 0x280   :  { %4912 = vmatpush.msra.mxu1 %v12949_v23  ;;  %4978 = vmatmul.f32.vlgmr.msra.gmra.mxu2 %v12727_v0  ;;  %v5244_v46 = vsub.f32 %v10391_v53, %v12950_v45  ;;  %v12951_v24 = vld [vmem:[#allocation187_spill] sm:$0xff]  ;;  %v5250_v20 = vsub.f32 %v10406_v7, %v5249_v29 }
 0x281   :  { %5024 = vmatpush.msra.mxu3 %v12942_v52  ;;  %5169 = vmatpush.msrb.mxu2 %v10337_v18 }
 0x282   :  { %v3883_v63 = vpop.f32.mrf.mxu1  ;;  %4918 = vmatpush.msra.mxu1 %v12951_v24  ;;  %5028 = vmatmul.f32.vlgmr.msra.gmra.mxu3 %v12733_v49  ;;  %v5245_v45 = vand.u32 4294901760, %v5244_v46  ;;  %v12954_v46 = vld [vmem:[#allocation212_spill] sm:$0xff]  ;;  %v12955_v24 = vand.u32 4294901760, %v10267_v4 }
 0x283   :  { %v3838_v19 = vpop.f32.mrf.mxu0  ;;  %v3884_v23 = vadd.f32 %v3883_v63, %v3834_v5  ;;  %5234 = vmatpush.msrb.mxu3 %v5233_v40  ;;  %5171 = vmatpush.msrb.mxu2 %v10354_v58  ;;  %v12953_v5 = vand.u32 4294901760, %v10256_v11 }
 0x284   :  { %v3958_v50 = vpop.f32.mrf.mxu2  ;;  %5124 = vmatpush.msrb.mxu1 %v10208_v39  ;;  %5061 = vmatpush.msrb.mxu0 %v12952_v27  ;;  %v5251_v39 = vand.u32 4294901760, %v5250_v20  ;;  %v3839_v59 = vadd.f32 %v3838_v19, %v10331_v6  ;;  %v12957_v6 = vld [vmem:[#allocation149_spill] sm:$0xff]  ;;  %v12959_v20 = vld [vmem:[#allocation186_spill] sm:$0xff] }
 0x285   :  { %v3959_v3 = vadd.f32 %v3958_v50, %v3884_v23  ;;  %4920 = vmatmul.f32.vlgmr.msra.gmra.mxu1 %v7421_v55  ;;  %v4003_v41 = vpop.f32.mrf.mxu3  ;;  %5240 = vmatpush.msrb.mxu3 %v5239_v2  ;;  %v12956_v23 = vld [vmem:[#allocation182_spill] sm:$0xff]  ;;  %v12958_v50 = vld [vmem:[#allocation201_spill] sm:$0xff] }
 0x286   :  { %4823 = vmatmul.f32.gmra.mxu0 %v7595_v14  ;;  %5173 = vmatpush.msrb.mxu2 %v10365_v48  ;;  %v12960_v27 = vld [vmem:[#allocation153_spill] sm:$0xff] }
 0x287   :  { %v4004_v40 = vadd.f32 %v4003_v41, %v3959_v3  ;;  %5126 = vmatpush.msrb.mxu1 %v10219_v22  ;;  %5065 = vmatpush.msrb.mxu0 %v12953_v5  ;;  %v12962_v41 = vld [vmem:[#allocation218_spill] sm:$0xff]  ;;  %v12963_v5 = vld [vmem:[#allocation189_spill] sm:$0xff] }
 0x288   :  { %4983 = vmatmul.f32.gmra.mxu2 %v12523_v21  ;;  %5246 = vmatpush.msrb.mxu3 %v5245_v45 }
 0x289   :  { %v10453_v63 = vmax.f32 %v12954_v46, %v4004_v40  ;;  %5175 = vmatpush.msrb.mxu2 %v10384_v30  ;;  %5069 = vmatpush.msrb.mxu0 %v12955_v24  ;;  %v12965_v24 = vld [vmem:[#allocation209_spill] sm:$0xff] }
 0x28a   :  { %v3889_v2 = vpop.f32.mrf.mxu1  ;;  %5034 = vmatmul.f32.gmra.mxu3 %v12738_v62  ;;  %5128 = vmatpush.msrb.mxu1 %v10236_v10 }
 0x28b   :  { %v3843_v3 = vpop.f32.mrf.mxu0  ;;  %v3890_v22 = vadd.f32 %v3889_v2, %v3839_v59  ;;  %5252 = vmatpush.msrb.mxu3 %v5251_v39  ;;  %5177 = vmatpush.msrb.mxu2 %v12956_v23  ;;  %v12964_v39 = vld [vmem:[#allocation157_spill] sm:$0xff]  ;;  %vm6535_vm9 = vcmp.gt.f32.partialorder %v10453_v63, -0.0625  ;;  %vm6695_vm10 = vcmp.gt.f32.partialorder %v10453_v63, 0.0 }
 0x28c   :  { %v3962_v11 = vpop.f32.mrf.mxu2  ;;  %5130 = vmatpush.msrb.mxu1 %v10249_v9  ;;  %5073 = vmatpush.msrb.mxu0 %v12957_v6  ;;  %v12961_v9 = vld [vmem:[#allocation205_spill] sm:$0xff]  ;;  %v3844_v45 = vadd.f32 %v3843_v3, %v10374_v26  ;;  %v12967_v26 = vld [vmem:[#allocation192_spill] sm:$0xff]  ;;  %v12968_v6 = vld [vmem:[#allocation167_spill] sm:$0xff] }
 0x28d   :  { %v3963_v19 = vadd.f32 %v3962_v11, %v3890_v22  ;;  %4924 = vmatmul.f32.gmra.mxu1 %v7480_v32  ;;  %v4007_v4 = vpop.f32.mrf.mxu3  ;;  %5258 = vmatpush.msrb.mxu3 %v12958_v50  ;;  %v12966_v22 = vld [vmem:[#allocation161_spill] sm:$0xff]  ;;  %v12971_v50 = vld [vmem:[#allocation170_spill] sm:$0xff] }
 0x28e   :  { %4831 = vmatmul.f32.gmra.mxu0 %v12396_v47  ;;  %5179 = vmatpush.msrb.mxu2 %v12959_v20 }
 0x28f   :  { %v4008_v10 = vadd.f32 %v4007_v4, %v3963_v19  ;;  %5077 = vmatpush.msrb.mxu0 %v12960_v27  ;;  %5132 = vmatpush.msrb.mxu1 %v12916_v43  ;;  %v12969_v19 = vld [vmem:[#allocation213_spill] sm:$0xff]  ;;  %v12970_v4 = vld [vmem:[#allocation196_spill] sm:$0xff] }
 0x290   :  { %4988 = vmatmul.f32.gmra.mxu2 %v7567_v57  ;;  %5264 = vmatpush.msrb.mxu3 %v12961_v9  ;;  %v12973_v9 = vld [vmem:[#allocation199_spill] sm:$0xff] }
 0x291   :  { %v10473_v40 = vmax.f32 %v12962_v41, %v4008_v10  ;;  %5181 = vmatpush.msrb.mxu2 %v12963_v5  ;;  %5081 = vmatpush.msrb.mxu0 %v12964_v39  ;;  %v12972_v10 = vld [vmem:[#allocation221_spill] sm:$0xff] }
 0x292   :  { %v3895_v46 = vpop.f32.mrf.mxu1  ;;  %5040 = vmatmul.f32.gmra.mxu3 %v7598_v8  ;;  %5134 = vmatpush.msrb.mxu1 %v12919_v51 }
 0x293   :  { %v3848_v59 = vpop.f32.mrf.mxu0  ;;  %v3896_v43 = vadd.f32 %v3895_v46, %v3844_v45  ;;  %5270 = vmatpush.msrb.mxu3 %v12965_v24  ;;  %5085 = vmatpush.msrb.mxu0 %v12966_v22  ;;  %v12974_v45 = vld [vmem:[#allocation215_spill] sm:$0xff]  ;;  %v12975_v46 = vld [vmem:[#allocation174_spill] sm:$0xff]  ;;  %vm6543_vm11 = vcmp.gt.f32.partialorder %v10473_v40, -0.0625  ;;  %vm6703_vm12 = vcmp.gt.f32.partialorder %v10473_v40, 0.0 }
 0x294   :  { %v3966_v2 = vpop.f32.mrf.mxu2  ;;  %5183 = vmatpush.msrb.mxu2 %v12967_v26  ;;  %5136 = vmatpush.msrb.mxu1 %v12924_v38  ;;  %v3849_v38 = vadd.f32 %v3848_v59, %v10417_v17  ;;  %v12977_v17 = vld [vmem:[#allocation179_spill] sm:$0xff] }
 0x295   :  { %v3967_v3 = vadd.f32 %v3966_v2, %v3896_v43  ;;  %4928 = vmatmul.f32.gmra.mxu1 %v7537_v28  ;;  %v4011_v11 = vpop.f32.mrf.mxu3  ;;  %5089 = vmatpush.msrb.mxu0 %v12968_v6  ;;  %v12976_v43 = vld [vmem:[#allocation217_spill] sm:$0xff]  ;;  %v12978_v59 = vld [vmem:[#allocation203_spill] sm:$0xff] }
 0x296   :  { %4839 = vmatmul.f32.gmra.mxu0 %v7719_v12  ;;  %5276 = vmatpush.msrb.mxu3 %v12969_v19  ;;  %v12980_v6 = vld [vmem:[#allocation207_spill] sm:$0xff]  ;;  %v12981_v19 = vld [vmem:[#allocation181_spill] sm:$0xff] }
 0x297   :  { %v4012_v51 = vadd.f32 %v4011_v11, %v3967_v3  ;;  %5185 = vmatpush.msrb.mxu2 %v12970_v4  ;;  %5138 = vmatpush.msrb.mxu1 %v12927_v44  ;;  %v12979_v3 = vld [vmem:[#allocation219_spill] sm:$0xff] }
 0x298   :  { %5093 = vmatpush.msrb.mxu0 %v12971_v50  ;;  %4993 = vmatmul.f32.gmra.mxu2 %v12702_v33  ;;  %v12983_v50 = vld [vmem:[#allocation220_spill] sm:$0xff] }
 0x299   :  { %v10493_v27 = vmax.f32 %v12972_v10, %v4012_v51  ;;  %5187 = vmatpush.msrb.mxu2 %v12973_v9  ;;  %5282 = vmatpush.msrb.mxu3 %v12974_v45 }
 0x29a   :  { %v3901_v41 = vpop.f32.mrf.mxu1  ;;  %5097 = vmatpush.msrb.mxu0 %v12975_v46  ;;  %5046 = vmatmul.f32.gmra.mxu3 %v7665_v25 }
 0x29b   :  { %v4052_v39 = vpop.f32.mrf.mxu0  ;;  %v3902_v44 = vadd.f32 %v3901_v41, %v3849_v38  ;;  %5140 = vmatpush.msrb.mxu1 %v12931_v56  ;;  %5288 = vmatpush.msrb.mxu3 %v12976_v43  ;;  %v12985_v41 = vand.u32 4294901760, %v10379_v61  ;;  %vm6551_vm13 = vcmp.gt.f32.partialorder %v10493_v27, -0.0625  ;;  %vm6711_vm14 = vcmp.gt.f32.partialorder %v10493_v27, 0.0 }
 0x29c   :  { %v3970_v24 = vpop.f32.mrf.mxu2  ;;  %5101 = vmatpush.msrb.mxu0 %v12977_v17  ;;  %5189 = vmatpush.msrb.mxu2 %v12978_v59  ;;  %v4053_v11 = vadd.f32 %v4052_v39, %v12709_v16 }
 0x29d   :  { %v3971_v2 = vadd.f32 %v3970_v24, %v3902_v44  ;;  %4932 = vmatmul.f32.gmra.mxu1 %v12707_v60  ;;  %v4015_v22 = vpop.f32.mrf.mxu3  ;;  %5294 = vmatpush.msrb.mxu3 %v12979_v3  ;;  %v12988_v24 = vld [vmem:[#allocation188_spill] sm:$0xff] }
 0x29e   :  { %5103 = vmatmul.f32.vlgmr.msrb.gmra.mxu0 %v7421_v55  ;;  %5142 = vmatpush.msrb.mxu1 %v12936_v15  ;;  %v12984_v15 = vand.u32 4294901760, %v10360_v13 }
 0x29f   :  { %v4016_v56 = vadd.f32 %v4015_v22, %v3971_v2  ;;  %5191 = vmatpush.msrb.mxu2 %v12980_v6  ;;  %5324 = vmatpush.msra.mxu0 %v10360_v13 }
 0x2a0   :  { %5144 = vmatpush.msrb.mxu1 %v12939_v35  ;;  %5197 = vmatmul.f32.vlgmr.msrb.gmra.mxu2 %v12712_v34 }
 0x2a1   :  { %v10513_v51 = vmax.f32 %v12981_v19, %v4016_v56  ;;  %5300 = vmatpush.msrb.mxu3 %v12983_v50  ;;  %5439 = vmatpush.msra.mxu2 %v12984_v15  ;;  %v12991_v56 = vld [vmem:[#allocation198_spill] sm:$0xff]  ;;  %v12992_v19 = vld [vmem:[#allocation193_spill] sm:$0xff] }
 0x2a2   :  { %v4157_v10 = vpop.f32.mrf.mxu1  ;;  %5146 = vmatpush.msrb.mxu1 %v12942_v52  ;;  %5302 = vmatmul.f32.vlgmr.msrb.gmra.mxu3 %v7421_v55  ;;  %v12986_v52 = vand.u32 4294901760, %v10391_v53 }
 0x2a3   :  { %12982 = vst [vmem:[#allocation30_spill] sm:$0xff] %v10513_v51  ;;  %v4060_v38 = vpop.f32.mrf.mxu0  ;;  %v4158_v45 = vadd.f32 %v4157_v10, %v4053_v11  ;;  %5506 = vmatpush.msra.mxu3 %v10337_v18  ;;  %5443 = vmatpush.msra.mxu2 %v12985_v41  ;;  %v147_v11 = vld [vmem:[%s11890_s3 + $0xb0] sm:$0xff]  ;;  %v12993_v10 = vld [vmem:[#allocation197_spill] sm:$0xff]  ;;  %v12994_v41 = vld [vmem:[#allocation202_spill] sm:$0xff] }
 0x2a4   :  { %v4215_v35 = vpop.f32.mrf.mxu2  ;;  %5384 = vmatpush.msra.mxu1 %v10337_v18  ;;  %5327 = vmatpush.msra.mxu0 %v10379_v61  ;;  %v4061_v46 = vadd.f32 %v4060_v38, %v12715_v37 }
 0x2a5   :  { %v4216_v39 = vadd.f32 %v4215_v35, %v4158_v45  ;;  %5148 = vmatmul.f32.vlgmr.msrb.gmra.mxu1 %v7421_v55  ;;  %v4265_v13 = vpop.f32.mrf.mxu3  ;;  %5508 = vmatpush.msra.mxu3 %v10354_v58  ;;  %v10571_v45 = vand.u32 4294901760, %v147_v11  ;;  %v139_v35 = vld [vmem:[%s11890_s3 + $0x70] sm:$0xff] }
 0x2a6   :  { %5107 = vmatmul.f32.gmra.mxu0 %v7480_v32  ;;  %5447 = vmatpush.msra.mxu2 %v12986_v52  ;;  %v131_v52 = vld [vmem:[%s11890_s3 + $0x30] sm:$0xff] }
 0x2a7   :  { %v10531_v44 = vadd.f32 %v4265_v13, %v4216_v39  ;;  %5386 = vmatpush.msra.mxu1 %v10354_v58  ;;  %5330 = vmatpush.msra.mxu0 %v10391_v53  ;;  %v12987_v53 = vld [vmem:[#allocation191_spill] sm:$0xff] }
 0x2a8   :  { %5205 = vmatmul.f32.gmra.mxu2 %v7595_v14  ;;  %5510 = vmatpush.msra.mxu3 %v10365_v48 }
 0x2a9   :  { %5451 = vmatpush.msra.mxu2 %v5249_v29  ;;  %5333 = vmatpush.msra.mxu0 %v10406_v7  ;;  %v12989_v29 = vld [vmem:[#allocation195_spill] sm:$0xff] }
 0x2aa   :  { %v4161_v61 = vpop.f32.mrf.mxu1  ;;  %5306 = vmatmul.f32.gmra.mxu3 %v7480_v32  ;;  %5388 = vmatpush.msra.mxu1 %v10365_v48  ;;  %v155_v48 = vld [vmem:[%s11890_s3 + $0xf0] sm:$0xff] }
 0x2ab   :  { %v4068_v18 = vpop.f32.mrf.mxu0  ;;  %v4162_v43 = vadd.f32 %v4161_v61, %v4061_v46  ;;  %5512 = vmatpush.msra.mxu3 %v10384_v30  ;;  %5455 = vmatpush.msra.mxu2 %v12987_v53  ;;  %v10560_v3 = vand.u32 4294901760, %v155_v48  ;;  %v12995_v46 = vld [vmem:[#allocation200_spill] sm:$0xff] }
 0x2ac   :  { %v4220_v58 = vpop.f32.mrf.mxu2  ;;  %5390 = vmatpush.msra.mxu1 %v10384_v30  ;;  %5336 = vmatpush.msra.mxu0 %v12988_v24  ;;  %v4069_v2 = vadd.f32 %v4068_v18, %v12719_v1  ;;  %v12990_v30 = vld [vmem:[#allocation190_spill] sm:$0xff]  ;;  %v10588_v18 = vand.u32 4294901760, %v139_v35  ;;  %v12997_v53 = vld [vmem:[#allocation204_spill] sm:$0xff] }
 0x2ad   :  { %v4221_v17 = vadd.f32 %v4220_v58, %v4162_v43  ;;  %5152 = vmatmul.f32.gmra.mxu1 %v7480_v32  ;;  %v4271_v7 = vpop.f32.mrf.mxu3  ;;  %5514 = vmatpush.msra.mxu3 %v12956_v23  ;;  %v10579_v39 = vsub.f32 %v155_v48, %v10560_v3  ;;  %v12996_v43 = vld [vmem:[#allocation206_spill] sm:$0xff]  ;;  %v10596_v58 = vsub.f32 %v147_v11, %v10571_v45 }
 0x2ae   :  { %5111 = vmatmul.f32.gmra.mxu0 %v7537_v28  ;;  %5459 = vmatpush.msra.mxu2 %v12989_v29 }
 0x2af   :  { %v10554_v22 = vadd.f32 %v4271_v7, %v4221_v17  ;;  %5339 = vmatpush.msra.mxu0 %v12990_v30  ;;  %5392 = vmatpush.msra.mxu1 %v12956_v23  ;;  %v12296_v24 = vand.u32 4294901760, %v10579_v39  ;;  %v10601_v17 = vand.u32 4294901760, %v131_v52  ;;  %v12998_v7 = vld [vmem:[#allocation210_spill] sm:$0xff] }
 0x2b0   :  { %5213 = vmatmul.f32.gmra.mxu2 %v12396_v47  ;;  %5516 = vmatpush.msra.mxu3 %v12959_v20 }
 0x2b1   :  { %5463 = vmatpush.msra.mxu2 %v12991_v56  ;;  %5342 = vmatpush.msra.mxu0 %v12992_v19  ;;  %v12295_v56 = vand.u32 4294901760, %v10596_v58  ;;  %v13000_v19 = vld [vmem:[#allocation211_spill] sm:$0xff] }
 0x2b2   :  { %v4165_v15 = vpop.f32.mrf.mxu1  ;;  %5310 = vmatmul.f32.gmra.mxu3 %v7537_v28  ;;  %5394 = vmatpush.msra.mxu1 %v12959_v20 }
 0x2b3   :  { %v4076_v50 = vpop.f32.mrf.mxu0  ;;  %v4166_v23 = vadd.f32 %v4165_v15, %v4069_v2  ;;  %5518 = vmatpush.msra.mxu3 %v12963_v5  ;;  %5345 = vmatpush.msra.mxu0 %v12993_v10  ;;  %v12999_v2 = vld [vmem:[#allocation208_spill] sm:$0xff]  ;;  %v5614_v15 = vsub.f32 %v10579_v39, %v12296_v24 }
 0x2b4   :  { %v4225_v38 = vpop.f32.mrf.mxu2  ;;  %5467 = vmatpush.msra.mxu2 %v12994_v41  ;;  %5396 = vmatpush.msra.mxu1 %v12963_v5  ;;  %v4077_v5 = vadd.f32 %v4076_v50, %v12721_v42  ;;  %v13001_v50 = vld [vmem:[#allocation214_spill] sm:$0xff]  ;;  %v13002_v41 = vld [vmem:[#allocation216_spill] sm:$0xff] }
 0x2b5   :  { %v4226_v20 = vadd.f32 %v4225_v38, %v4166_v23  ;;  %5156 = vmatmul.f32.gmra.mxu1 %v7537_v28  ;;  %v4277_v13 = vpop.f32.mrf.mxu3  ;;  %5348 = vmatpush.msra.mxu0 %v12995_v46  ;;  %v10619_v23 = vsub.f32 %v131_v52, %v10601_v17  ;;  %v13003_v52 = vld [vmem:[#allocation172_spill] sm:$0xff]  ;;  %v13004_v46 = vld [vmem:[#allocation229_spill] sm:$0xff] }
 0x2b6   :  { %5115 = vmatmul.f32.gmra.mxu0 %v12707_v60  ;;  %5520 = vmatpush.msra.mxu3 %v12967_v26 }
 0x2b7   :  { %v10591_v61 = vadd.f32 %v4277_v13, %v4226_v20  ;;  %5471 = vmatpush.msra.mxu2 %v12996_v43  ;;  %5398 = vmatpush.msra.mxu1 %v12967_v26  ;;  %v10608_v26 = vsub.f32 %v139_v35, %v10588_v18  ;;  %v5620_v20 = vsub.f32 %v10596_v58, %v12295_v56  ;;  %v5615_v13 = vand.u32 4294901760, %v5614_v15 }
 0x2b8   :  { %5351 = vmatpush.msra.mxu0 %v12997_v53  ;;  %5221 = vmatmul.f32.gmra.mxu2 %v7719_v12 }
 0x2b9   :  { %5475 = vmatpush.msra.mxu2 %v12998_v7  ;;  %5522 = vmatpush.msra.mxu3 %v12970_v4  ;;  %v12294_v10 = vand.u32 4294901760, %v10608_v26 }
 0x2ba   :  { %v4169_v48 = vpop.f32.mrf.mxu1  ;;  %5354 = vmatpush.msra.mxu0 %v12999_v2  ;;  %5314 = vmatmul.f32.gmra.mxu3 %v12707_v60 }
 0x2bb   :  { %v4340_v29 = vpop.f32.mrf.mxu0  ;;  %v4170_v30 = vadd.f32 %v4169_v48, %v4077_v5  ;;  %5400 = vmatpush.msra.mxu1 %v12970_v4  ;;  %5524 = vmatpush.msra.mxu3 %v12973_v9  ;;  %v1285_v5 = vadd.f32 %v13004_v46, %v13003_v52  ;;  %v13005_v48 = vld [vmem:[#allocation240_spill] sm:$0xff] }
 0x2bc   :  { %v4230_v11 = vpop.f32.mrf.mxu2  ;;  %5357 = vmatpush.msra.mxu0 %v13000_v19  ;;  %5479 = vmatpush.msra.mxu2 %v13001_v50  ;;  %v4341_v43 = vadd.f32 %v4340_v29, %v10531_v44  ;;  %v5621_v29 = vand.u32 4294901760, %v5620_v20  ;;  %v13008_v20 = vld [vmem:[#allocation239_spill] sm:$0xff] }
 0x2bd   :  { %v4231_v38 = vadd.f32 %v4230_v11, %v4170_v30  ;;  %5160 = vmatmul.f32.gmra.mxu1 %v12707_v60  ;;  %v4283_v4 = vpop.f32.mrf.mxu3  ;;  %5526 = vmatpush.msra.mxu3 %v12978_v59  ;;  %v1330_v2 = vadd.f32 %v13005_v48, %v1285_v5 }
 0x2be   :  { %5360 = vmatmul.f32.vlgmr.msra.gmra.mxu0 %v12727_v0  ;;  %5402 = vmatpush.msra.mxu1 %v12973_v9  ;;  %v12293_v9 = vand.u32 4294901760, %v10619_v23 }
 0x2bf   :  { %v10626_v35 = vadd.f32 %v4283_v4, %v4231_v38  ;;  %5483 = vmatpush.msra.mxu2 %v13002_v41  ;;  %5551 = vmatpush.msrb.mxu0 %v10560_v3  ;;  %v13007_v41 = vld [vmem:[#allocation177_spill] sm:$0xff] }
 0x2c0   :  { %5404 = vmatpush.msra.mxu1 %v12978_v59  ;;  %5485 = vmatmul.f32.vlgmr.msra.gmra.mxu2 %v7421_v55  ;;  %v5626_v59 = vsub.f32 %v10608_v26, %v12294_v10  ;;  %v13028_v10 = vld [vmem:[#allocation261_spill] sm:$0xff] }
 0x2c1   :  { %5528 = vmatpush.msra.mxu3 %v12980_v6  ;;  %5706 = vmatpush.msrb.mxu2 %v10579_v39 }
 0x2c2   :  { %v4385_v7 = vpop.f32.mrf.mxu1  ;;  %5406 = vmatpush.msra.mxu1 %v12980_v6  ;;  %5530 = vmatmul.f32.vlgmr.msra.gmra.mxu3 %v7421_v55  ;;  %v5632_v6 = vsub.f32 %v10619_v23, %v12293_v9  ;;  %v5627_v38 = vand.u32 4294901760, %v5626_v59  ;;  %v13023_v9 = vld [vmem:[#allocation246_spill] sm:$0xff] }
 0x2c3   :  { %v4344_v53 = vpop.f32.mrf.mxu0  ;;  %v4386_v30 = vadd.f32 %v4385_v7, %v4341_v43  ;;  %5766 = vmatpush.msrb.mxu3 %v10560_v3  ;;  %5709 = vmatpush.msrb.mxu2 %v10596_v58  ;;  %v13009_v43 = vld [vmem:[#allocation253_spill] sm:$0xff] }
 0x2c4   :  { %v4434_v44 = vpop.f32.mrf.mxu2  ;;  %5616 = vmatpush.msrb.mxu1 %v5615_v13  ;;  %5553 = vmatpush.msrb.mxu0 %v10571_v45  ;;  %v5633_v4 = vand.u32 4294901760, %v5632_v6  ;;  %v1289_v13 = vadd.f32 %v13008_v20, %v13007_v41  ;;  %v4345_v52 = vadd.f32 %v4344_v53, %v10554_v22  ;;  %v13011_v22 = vld [vmem:[#allocation222_spill] sm:$0xff]  ;;  %v156_v53 = vld [vmem:[%s11890_s3 + $0xf8] sm:$0xff]  ;;  %v13013_v6 = vld [vmem:[#allocation227_spill] sm:$0xff] }
 0x2c5   :  { %v4435_v11 = vadd.f32 %v4434_v44, %v12709_v16  ;;  %v10654_v19 = vmax.f32 %v1330_v2, %v4386_v30  ;;  %5410 = vmatmul.f32.vlgmr.msra.gmra.mxu1 %v12733_v49  ;;  %v4539_v50 = vpop.f32.mrf.mxu3  ;;  %5768 = vmatpush.msrb.mxu3 %v10571_v45  ;;  %v13010_v2 = vld [vmem:[#allocation224_spill] sm:$0xff]  ;;  %v148_v41 = vld [vmem:[%s11890_s3 + $0xb8] sm:$0xff]  ;;  %v13016_v20 = vld [vmem:[#allocation226_spill] sm:$0xff] }
 0x2c6   :  { %5365 = vmatmul.f32.gmra.mxu0 %v12523_v21  ;;  %5712 = vmatpush.msrb.mxu2 %v10608_v26  ;;  %v1334_v7 = vadd.f32 %v13009_v43, %v1289_v13  ;;  %v13017_v13 = vld [vmem:[#allocation252_spill] sm:$0xff]  ;;  %v13018_v43 = vld [vmem:[#allocation230_spill] sm:$0xff] }
 0x2c7   :  { %13006 = vst [vmem:[#allocation16_spill] sm:$0xff] %v10654_v19  ;;  %v10658_v15 = vadd.f32 %v4539_v50, %v4435_v11  ;;  %5622 = vmatpush.msrb.mxu1 %v5621_v29  ;;  %5555 = vmatpush.msrb.mxu0 %v10588_v18  ;;  %v13014_v50 = vld [vmem:[#allocation223_spill] sm:$0xff]  ;;  %v13035_v19 = vld [vmem:[#allocation245_spill] sm:$0xff] }
 0x2c8   :  { %5489 = vmatmul.f32.gmra.mxu2 %v7480_v32  ;;  %5770 = vmatpush.msrb.mxu3 %v10588_v18 }
 0x2c9   :  { %5715 = vmatpush.msrb.mxu2 %v10619_v23  ;;  %5557 = vmatpush.msrb.mxu0 %v10601_v17 }
 0x2ca   :  { %v4389_v5 = vpop.f32.mrf.mxu1  ;;  %5534 = vmatmul.f32.gmra.mxu3 %v7480_v32  ;;  %5628 = vmatpush.msrb.mxu1 %v5627_v38  ;;  %v13015_v38 = vld [vmem:[#allocation236_spill] sm:$0xff] }
 0x2cb   :  { %v4348_v46 = vpop.f32.mrf.mxu0  ;;  %v4390_v59 = vadd.f32 %v4389_v5, %v4345_v52  ;;  %5772 = vmatpush.msrb.mxu3 %v10601_v17  ;;  %5718 = vmatpush.msrb.mxu2 %v13010_v2  ;;  %v1293_v52 = vadd.f32 %v13017_v13, %v13016_v20 }
 0x2cc   :  { %v4442_v48 = vpop.f32.mrf.mxu2  ;;  %5634 = vmatpush.msrb.mxu1 %v5633_v4  ;;  %5559 = vmatpush.msrb.mxu0 %v13011_v22  ;;  %v10689_v4 = vand.u32 4294901760, %v156_v53  ;;  %v4349_v5 = vadd.f32 %v4348_v46, %v10591_v61 }
 0x2cd   :  { %v4443_v30 = vadd.f32 %v4442_v48, %v12715_v37  ;;  %v10679_v44 = vmax.f32 %v1334_v7, %v4390_v59  ;;  %5416 = vmatmul.f32.gmra.mxu1 %v12738_v62  ;;  %v4543_v29 = vpop.f32.mrf.mxu3  ;;  %5774 = vmatpush.msrb.mxu3 %v13011_v22  ;;  %v13019_v7 = vld [vmem:[#allocation225_spill] sm:$0xff] }
 0x2ce   :  { %5370 = vmatmul.f32.gmra.mxu0 %v7567_v57  ;;  %5721 = vmatpush.msrb.mxu2 %v13013_v6  ;;  %v140_v59 = vld [vmem:[%s11890_s3 + $0x78] sm:$0xff]  ;;  %v13021_v6 = vld [vmem:[#allocation262_spill] sm:$0xff]  ;;  %v10712_v46 = vsub.f32 %v156_v53, %v10689_v4 }
 0x2cf   :  { %13012 = vst [vmem:[#allocation52_spill] sm:$0xff] %v10679_v44  ;;  %v10683_v11 = vadd.f32 %v4543_v29, %v4443_v30  ;;  %5561 = vmatpush.msrb.mxu0 %v13014_v50  ;;  %5640 = vmatpush.msrb.mxu1 %v13015_v38  ;;  %v13020_v30 = vld [vmem:[#allocation242_spill] sm:$0xff]  ;;  %v10706_v29 = vand.u32 4294901760, %v148_v41  ;;  %v1338_v38 = vadd.f32 %v13021_v6, %v1293_v52  ;;  %v132_v52 = vld [vmem:[%s11890_s3 + $0x38] sm:$0xff]  ;;  %v13025_v6 = vld [vmem:[#allocation235_spill] sm:$0xff] }
 0x2d0   :  { %5493 = vmatmul.f32.gmra.mxu2 %v7537_v28  ;;  %5776 = vmatpush.msrb.mxu3 %v13014_v50  ;;  %v13032_v44 = vld [vmem:[#allocation255_spill] sm:$0xff] }
 0x2d1   :  { %5724 = vmatpush.msrb.mxu2 %v13018_v43  ;;  %5563 = vmatpush.msrb.mxu0 %v13019_v7  ;;  %v13022_v43 = vld [vmem:[#allocation232_spill] sm:$0xff] }
 0x2d2   :  { %v4393_v2 = vpop.f32.mrf.mxu1  ;;  %5538 = vmatmul.f32.gmra.mxu3 %v7537_v28  ;;  %5646 = vmatpush.msrb.mxu1 %v13020_v30  ;;  %v10717_v30 = vand.u32 4294901760, %v140_v59 }
 0x2d3   :  { %v4352_v48 = vpop.f32.mrf.mxu0  ;;  %v4394_v20 = vadd.f32 %v4393_v2, %v4349_v5  ;;  %5778 = vmatpush.msrb.mxu3 %v13019_v7  ;;  %5565 = vmatpush.msrb.mxu0 %v8988_v36 }
 0x2d4   :  { %v4450_v61 = vpop.f32.mrf.mxu2  ;;  %5727 = vmatpush.msrb.mxu2 %v13022_v43  ;;  %5652 = vmatpush.msrb.mxu1 %v13023_v9  ;;  %v10731_v9 = vsub.f32 %v148_v41, %v10706_v29  ;;  %v13027_v43 = vld [vmem:[#allocation234_spill] sm:$0xff]  ;;  %v4353_v41 = vadd.f32 %v4352_v48, %v10626_v35 }
 0x2d5   :  { %v4451_v13 = vadd.f32 %v4450_v61, %v12719_v1  ;;  %v10722_v5 = vmax.f32 %v1338_v38, %v4394_v20  ;;  %5422 = vmatmul.f32.gmra.mxu1 %v7598_v8  ;;  %v4547_v53 = vpop.f32.mrf.mxu3  ;;  %5567 = vmatpush.msrb.mxu0 %v9008_v31  ;;  %v13026_v61 = vld [vmem:[#allocation250_spill] sm:$0xff]  ;;  %v10736_v20 = vand.u32 4294901760, %v132_v52  ;;  %v1297_v56 = vadd.f32 %v13028_v10, %v13027_v43  ;;  %v13037_v10 = vld [vmem:[#allocation257_spill] sm:$0xff] }
 0x2d6   :  { %5375 = vmatmul.f32.gmra.mxu0 %v12702_v33  ;;  %5780 = vmatpush.msrb.mxu3 %v8988_v36 }
 0x2d7   :  { %13024 = vst [vmem:[#allocation35_spill] sm:$0xff] %v10722_v5  ;;  %v10726_v2 = vadd.f32 %v4547_v53, %v4451_v13  ;;  %5730 = vmatpush.msrb.mxu2 %v13025_v6  ;;  %5658 = vmatpush.msrb.mxu1 %v13026_v61  ;;  %v10743_v13 = vsub.f32 %v140_v59, %v10717_v30  ;;  %v13029_v53 = vld [vmem:[#allocation241_spill] sm:$0xff]  ;;  %v13030_v6 = vld [vmem:[#allocation271_spill] sm:$0xff]  ;;  %v13031_v5 = vld [vmem:[#allocation238_spill] sm:$0xff]  ;;  %v13033_v59 = vand.u32 4294901760, %v10712_v46 }
 0x2d8   :  { %5569 = vmatpush.msrb.mxu0 %v9031_v54  ;;  %5497 = vmatmul.f32.gmra.mxu2 %v12707_v60  ;;  %v1342_v61 = vadd.f32 %v13030_v6, %v1297_v56  ;;  %v10758_v56 = vsub.f32 %v132_v52, %v10736_v20  ;;  %v13034_v6 = vld [vmem:[#allocation244_spill] sm:$0xff]  ;;  %v13038_v52 = vand.u32 4294901760, %v10731_v9 }
 0x2d9   :  { %5733 = vmatpush.msrb.mxu2 %v13029_v53  ;;  %5782 = vmatpush.msrb.mxu3 %v9008_v31  ;;  %v5996_v48 = vsub.f32 %v10712_v46, %v13033_v59 }
 0x2da   :  { %v4397_v24 = vpop.f32.mrf.mxu1  ;;  %5571 = vmatpush.msrb.mxu0 %v13031_v5  ;;  %5542 = vmatmul.f32.gmra.mxu3 %v12707_v60 }
 0x2db   :  { %v4597_v38 = vpop.f32.mrf.mxu0  ;;  %v4398_v43 = vadd.f32 %v4397_v24, %v4353_v41  ;;  %5664 = vmatpush.msrb.mxu1 %v13032_v44  ;;  %5784 = vmatpush.msrb.mxu3 %v9031_v54  ;;  %v6013_v24 = vand.u32 4294901760, %v10758_v56 }
 0x2dc   :  { %v4458_v35 = vpop.f32.mrf.mxu2  ;;  %5573 = vmatpush.msrb.mxu0 %v13034_v6  ;;  %5736 = vmatpush.msrb.mxu2 %v13035_v19  ;;  %v13039_v19 = vld [vmem:[#allocation248_spill] sm:$0xff] }
 0x2dd   :  { %v4459_v53 = vadd.f32 %v4458_v35, %v12721_v42  ;;  %v10764_v41 = vmax.f32 %v1342_v61, %v4398_v43  ;;  %5428 = vmatmul.f32.gmra.mxu1 %v7665_v25  ;;  %v4551_v44 = vpop.f32.mrf.mxu3  ;;  %5786 = vmatpush.msrb.mxu3 %v13031_v5  ;;  %v6002_v35 = vsub.f32 %v10731_v9, %v13038_v52  ;;  %v13040_v61 = vand.u32 4294901760, %v10579_v39 }
 0x2de   :  { %5579 = vmatmul.f32.vlgmr.msrb.gmra.mxu0 %v12712_v34  ;;  %5670 = vmatpush.msrb.mxu1 %v13037_v10  ;;  %v5997_v43 = vand.u32 4294901760, %v5996_v48  ;;  %v13042_v10 = vand.u32 4294901760, %v10743_v13 }
 0x2df   :  { %13036 = vst [vmem:[#allocation17_spill] sm:$0xff] %v10764_v41  ;;  %v10769_v59 = vadd.f32 %v4551_v44, %v4459_v53  ;;  %5739 = vmatpush.msrb.mxu2 %v13039_v19  ;;  %5821 = vmatpush.msra.mxu0 %v13040_v61  ;;  %v13041_v41 = vld [vmem:[#allocation260_spill] sm:$0xff]  ;;  %v4598_v44 = vadd.f32 %v4597_v38, %v10658_v15  ;;  %v6003_v48 = vand.u32 4294901760, %v6002_v35  ;;  %v13044_v38 = vand.u32 4294901760, %v10596_v58 }
 0x2e0   :  { %5676 = vmatpush.msrb.mxu1 %v13041_v41  ;;  %5742 = vmatmul.f32.vlgmr.msrb.gmra.mxu2 %v12727_v0  ;;  %v6008_v53 = vsub.f32 %v10743_v13, %v13042_v10  ;;  %v13043_v19 = vld [vmem:[#allocation264_spill] sm:$0xff]  ;;  %v6014_v15 = vsub.f32 %v10758_v56, %v6013_v24 }
 0x2e1   :  { %5788 = vmatpush.msrb.mxu3 %v13034_v6  ;;  %5933 = vmatpush.msra.mxu2 %v10689_v4 }
 0x2e2   :  { %v4647_v39 = vpop.f32.mrf.mxu1  ;;  %5682 = vmatpush.msrb.mxu1 %v13043_v19  ;;  %5792 = vmatmul.f32.vlgmr.msrb.gmra.mxu3 %v12733_v49  ;;  %v6009_v10 = vand.u32 4294901760, %v6008_v53  ;;  %v13046_v53 = vld [vmem:[#allocation289_spill] sm:$0xff]  ;;  %v13047_v19 = vand.u32 4294901760, %v10619_v23 }
 0x2e3   :  { %v4602_v52 = vpop.f32.mrf.mxu0  ;;  %v4648_v41 = vadd.f32 %v4647_v39, %v4598_v44  ;;  %5998 = vmatpush.msra.mxu3 %v5997_v43  ;;  %5935 = vmatpush.msra.mxu2 %v10706_v29  ;;  %v13045_v44 = vand.u32 4294901760, %v10608_v26 }
 0x2e4   :  { %v4722_v61 = vpop.f32.mrf.mxu2  ;;  %5888 = vmatpush.msra.mxu1 %v10560_v3  ;;  %5825 = vmatpush.msra.mxu0 %v13044_v38  ;;  %v6015_v3 = vand.u32 4294901760, %v6014_v15  ;;  %v4603_v58 = vadd.f32 %v4602_v52, %v10683_v11  ;;  %v13049_v11 = vld [vmem:[#allocation228_spill] sm:$0xff]  ;;  %v13051_v15 = vld [vmem:[#allocation263_spill] sm:$0xff] }
 0x2e5   :  { %v4723_v51 = vadd.f32 %v4722_v61, %v4648_v41  ;;  %5684 = vmatmul.f32.vlgmr.msrb.gmra.mxu1 %v7421_v55  ;;  %v4767_v35 = vpop.f32.mrf.mxu3  ;;  %6004 = vmatpush.msra.mxu3 %v6003_v48  ;;  %v13048_v41 = vld [vmem:[#allocation259_spill] sm:$0xff]  ;;  %v13050_v61 = vld [vmem:[#allocation278_spill] sm:$0xff] }
 0x2e6   :  { %5587 = vmatmul.f32.gmra.mxu0 %v7595_v14  ;;  %5937 = vmatpush.msra.mxu2 %v10717_v30  ;;  %v13052_v38 = vld [vmem:[#allocation231_spill] sm:$0xff] }
 0x2e7   :  { %v4768_v43 = vadd.f32 %v4767_v35, %v4723_v51  ;;  %5890 = vmatpush.msra.mxu1 %v10571_v45  ;;  %5829 = vmatpush.msra.mxu0 %v13045_v44  ;;  %v13054_v35 = vld [vmem:[#allocation295_spill] sm:$0xff]  ;;  %v13055_v44 = vld [vmem:[#allocation266_spill] sm:$0xff] }
 0x2e8   :  { %5747 = vmatmul.f32.gmra.mxu2 %v12523_v21  ;;  %6010 = vmatpush.msra.mxu3 %v6009_v10 }
 0x2e9   :  { %v10805_v39 = vmax.f32 %v13046_v53, %v4768_v43  ;;  %5939 = vmatpush.msra.mxu2 %v10736_v20  ;;  %5833 = vmatpush.msra.mxu0 %v13047_v19  ;;  %v13057_v19 = vld [vmem:[#allocation286_spill] sm:$0xff] }
 0x2ea   :  { %v4653_v48 = vpop.f32.mrf.mxu1  ;;  %5798 = vmatmul.f32.gmra.mxu3 %v12738_v62  ;;  %5892 = vmatpush.msra.mxu1 %v10588_v18 }
 0x2eb   :  { %v4607_v51 = vpop.f32.mrf.mxu0  ;;  %v4654_v45 = vadd.f32 %v4653_v48, %v4603_v58  ;;  %6016 = vmatpush.msra.mxu3 %v6015_v3  ;;  %5941 = vmatpush.msra.mxu2 %v13048_v41  ;;  %v13056_v3 = vld [vmem:[#allocation233_spill] sm:$0xff] }
 0x2ec   :  { %v4726_v26 = vpop.f32.mrf.mxu2  ;;  %5894 = vmatpush.msra.mxu1 %v10601_v17  ;;  %5837 = vmatpush.msra.mxu0 %v13049_v11  ;;  %v13053_v17 = vld [vmem:[#allocation282_spill] sm:$0xff]  ;;  %v4608_v10 = vadd.f32 %v4607_v51, %v10726_v2  ;;  %v13059_v2 = vld [vmem:[#allocation269_spill] sm:$0xff]  ;;  %v13060_v11 = vld [vmem:[#allocation243_spill] sm:$0xff] }
 0x2ed   :  { %v4727_v52 = vadd.f32 %v4726_v26, %v4654_v45  ;;  %5688 = vmatmul.f32.gmra.mxu1 %v7480_v32  ;;  %v4771_v23 = vpop.f32.mrf.mxu3  ;;  %6022 = vmatpush.msra.mxu3 %v13050_v61  ;;  %v13058_v45 = vld [vmem:[#allocation237_spill] sm:$0xff]  ;;  %v13063_v61 = vld [vmem:[#allocation247_spill] sm:$0xff] }
 0x2ee   :  { %5595 = vmatmul.f32.gmra.mxu0 %v12396_v47  ;;  %5943 = vmatpush.msra.mxu2 %v13051_v15 }
 0x2ef   :  { %v4772_v18 = vadd.f32 %v4771_v23, %v4727_v52  ;;  %5841 = vmatpush.msra.mxu0 %v13052_v38  ;;  %5896 = vmatpush.msra.mxu1 %v13011_v22  ;;  %v13061_v52 = vld [vmem:[#allocation290_spill] sm:$0xff]  ;;  %v13062_v23 = vld [vmem:[#allocation273_spill] sm:$0xff] }
 0x2f0   :  { %5752 = vmatmul.f32.gmra.mxu2 %v7567_v57  ;;  %6028 = vmatpush.msra.mxu3 %v13053_v17  ;;  %v13065_v17 = vld [vmem:[#allocation276_spill] sm:$0xff] }
 0x2f1   :  { %v10825_v43 = vmax.f32 %v13054_v35, %v4772_v18  ;;  %5945 = vmatpush.msra.mxu2 %v13055_v44  ;;  %5845 = vmatpush.msra.mxu0 %v13056_v3  ;;  %v13064_v18 = vld [vmem:[#allocation298_spill] sm:$0xff] }
 0x2f2   :  { %v4659_v53 = vpop.f32.mrf.mxu1  ;;  %5804 = vmatmul.f32.gmra.mxu3 %v7598_v8  ;;  %5898 = vmatpush.msra.mxu1 %v13014_v50 }
 0x2f3   :  { %v4612_v58 = vpop.f32.mrf.mxu0  ;;  %v4660_v22 = vadd.f32 %v4659_v53, %v4608_v10  ;;  %6034 = vmatpush.msra.mxu3 %v13057_v19  ;;  %5849 = vmatpush.msra.mxu0 %v13058_v45  ;;  %v13066_v10 = vld [vmem:[#allocation292_spill] sm:$0xff]  ;;  %v13067_v53 = vld [vmem:[#allocation251_spill] sm:$0xff] }
 0x2f4   :  { %v4730_v48 = vpop.f32.mrf.mxu2  ;;  %5947 = vmatpush.msra.mxu2 %v13059_v2  ;;  %5900 = vmatpush.msra.mxu1 %v13019_v7  ;;  %v4613_v7 = vadd.f32 %v4612_v58, %v10769_v59  ;;  %v13069_v59 = vld [vmem:[#allocation256_spill] sm:$0xff] }
 0x2f5   :  { %v4731_v51 = vadd.f32 %v4730_v48, %v4660_v22  ;;  %5692 = vmatmul.f32.gmra.mxu1 %v7537_v28  ;;  %v4775_v26 = vpop.f32.mrf.mxu3  ;;  %5853 = vmatpush.msra.mxu0 %v13060_v11  ;;  %v13068_v22 = vld [vmem:[#allocation294_spill] sm:$0xff]  ;;  %v13070_v58 = vld [vmem:[#allocation280_spill] sm:$0xff] }
 0x2f6   :  { %5603 = vmatmul.f32.gmra.mxu0 %v7719_v12  ;;  %6040 = vmatpush.msra.mxu3 %v13061_v52  ;;  %v13072_v11 = vld [vmem:[#allocation284_spill] sm:$0xff]  ;;  %v13073_v52 = vld [vmem:[#allocation258_spill] sm:$0xff] }
 0x2f7   :  { %v4776_v50 = vadd.f32 %v4775_v26, %v4731_v51  ;;  %5949 = vmatpush.msra.mxu2 %v13062_v23  ;;  %5902 = vmatpush.msra.mxu1 %v8988_v36  ;;  %v13071_v51 = vld [vmem:[#allocation296_spill] sm:$0xff] }
 0x2f8   :  { %5857 = vmatpush.msra.mxu0 %v13063_v61  ;;  %5757 = vmatmul.f32.gmra.mxu2 %v12702_v33  ;;  %v13074_v61 = vld [vmem:[#allocation297_spill] sm:$0xff] }
 0x2f9   :  { %v10845_v38 = vmax.f32 %v13064_v18, %v4776_v50  ;;  %5951 = vmatpush.msra.mxu2 %v13065_v17  ;;  %6046 = vmatpush.msra.mxu3 %v13066_v10 }
 0x2fa   :  { %v4665_v35 = vpop.f32.mrf.mxu1  ;;  %5861 = vmatpush.msra.mxu0 %v13067_v53  ;;  %5810 = vmatmul.f32.gmra.mxu3 %v7665_v25 }
 0x2fb   :  { %v4816_v3 = vpop.f32.mrf.mxu0  ;;  %v4666_v36 = vadd.f32 %v4665_v35, %v4613_v7  ;;  %5904 = vmatpush.msra.mxu1 %v9008_v31  ;;  %6052 = vmatpush.msra.mxu3 %v13068_v22 }
 0x2fc   :  { %v4734_v19 = vpop.f32.mrf.mxu2  ;;  %5865 = vmatpush.msra.mxu0 %v13069_v59  ;;  %5953 = vmatpush.msra.mxu2 %v13070_v58  ;;  %v4817_v26 = vadd.f32 %v4816_v3, %v12709_v16  ;;  %v13081_v59 = vld [vmem:[#allocation267_spill] sm:$0xff] }
 0x2fd   :  { %v4735_v48 = vadd.f32 %v4734_v19, %v4666_v36  ;;  %5696 = vmatmul.f32.gmra.mxu1 %v12707_v60  ;;  %v4779_v45 = vpop.f32.mrf.mxu3  ;;  %6058 = vmatpush.msra.mxu3 %v13071_v51 }
 0x2fe   :  { %5867 = vmatmul.f32.vlgmr.msra.gmra.mxu0 %v7421_v55  ;;  %5906 = vmatpush.msra.mxu1 %v9031_v54  ;;  %v13075_v54 = vand.u32 4294901760, %v10712_v46 }
 0x2ff   :  { %v4780_v31 = vadd.f32 %v4779_v45, %v4735_v48  ;;  %5955 = vmatpush.msra.mxu2 %v13072_v11  ;;  %6088 = vmatpush.msrb.mxu0 %v10712_v46  ;;  %v13083_v48 = vld [vmem:[#allocation270_spill] sm:$0xff] }
 0x300   :  { %5908 = vmatpush.msra.mxu1 %v13031_v5  ;;  %5961 = vmatmul.f32.vlgmr.msra.gmra.mxu2 %v12712_v34  ;;  %v13076_v34 = vand.u32 4294901760, %v10731_v9 }
 0x301   :  { %v10865_v50 = vmax.f32 %v13073_v52, %v4780_v31  ;;  %6064 = vmatpush.msra.mxu3 %v13074_v61  ;;  %6203 = vmatpush.msrb.mxu2 %v13075_v54  ;;  %v13084_v52 = vld [vmem:[#allocation274_spill] sm:$0xff]  ;;  %v13086_v54 = vld [vmem:[#allocation277_spill] sm:$0xff] }
 0x302   :  { %v4921_v18 = vpop.f32.mrf.mxu1  ;;  %5910 = vmatpush.msra.mxu1 %v13034_v6  ;;  %6066 = vmatmul.f32.vlgmr.msra.gmra.mxu3 %v7421_v55  ;;  %v13077_v6 = vand.u32 4294901760, %v10743_v13 }
 0x303   :  { %v4824_v7 = vpop.f32.mrf.mxu0  ;;  %v4922_v10 = vadd.f32 %v4921_v18, %v4817_v26  ;;  %6270 = vmatpush.msrb.mxu3 %v10689_v4  ;;  %6207 = vmatpush.msrb.mxu2 %v13076_v34  ;;  %v13087_v18 = vld [vmem:[#allocation283_spill] sm:$0xff] }
 0x304   :  { %v4979_v5 = vpop.f32.mrf.mxu2  ;;  %6148 = vmatpush.msrb.mxu1 %v10689_v4  ;;  %6091 = vmatpush.msrb.mxu0 %v10731_v9  ;;  %v4825_v3 = vadd.f32 %v4824_v7, %v12715_v37 }
 0x305   :  { %v4980_v35 = vadd.f32 %v4979_v5, %v4922_v10  ;;  %5912 = vmatmul.f32.vlgmr.msra.gmra.mxu1 %v7421_v55  ;;  %v5029_v46 = vpop.f32.mrf.mxu3  ;;  %6272 = vmatpush.msrb.mxu3 %v10706_v29  ;;  %v13088_v10 = vld [vmem:[#allocation281_spill] sm:$0xff] }
 0x306   :  { %5871 = vmatmul.f32.gmra.mxu0 %v7480_v32  ;;  %6211 = vmatpush.msrb.mxu2 %v13077_v6 }
 0x307   :  { %v5030_v53 = vadd.f32 %v5029_v46, %v4980_v35  ;;  %6150 = vmatpush.msrb.mxu1 %v10706_v29  ;;  %6094 = vmatpush.msrb.mxu0 %v10743_v13  ;;  %v13078_v13 = vld [vmem:[#allocation268_spill] sm:$0xff]  ;;  %v13090_v35 = vld [vmem:[#allocation285_spill] sm:$0xff] }
 0x308   :  { %5969 = vmatmul.f32.gmra.mxu2 %v7595_v14  ;;  %6274 = vmatpush.msrb.mxu3 %v10717_v30  ;;  %v13079_v14 = vld [vmem:[#allocation265_spill] sm:$0xff] }
 0x309   :  { %6215 = vmatpush.msrb.mxu2 %v6013_v24  ;;  %6097 = vmatpush.msrb.mxu0 %v10758_v56  ;;  %v13080_v24 = vld [vmem:[#allocation272_spill] sm:$0xff] }
 0x30a   :  { %v4925_v9 = vpop.f32.mrf.mxu1  ;;  %6070 = vmatmul.f32.gmra.mxu3 %v7480_v32  ;;  %6152 = vmatpush.msrb.mxu1 %v10717_v30 }
 0x30b   :  { %v4832_v4 = vpop.f32.mrf.mxu0  ;;  %v4926_v36 = vadd.f32 %v4925_v9, %v4825_v3  ;;  %6276 = vmatpush.msrb.mxu3 %v10736_v20  ;;  %6219 = vmatpush.msrb.mxu2 %v13078_v13  ;;  %v13091_v3 = vld [vmem:[#allocation288_spill] sm:$0xff]  ;;  %v13096_v13 = vld [vmem:[#allocation254_spill] sm:$0xff] }
 0x30c   :  { %v4984_v29 = vpop.f32.mrf.mxu2  ;;  %6154 = vmatpush.msrb.mxu1 %v10736_v20  ;;  %6100 = vmatpush.msrb.mxu0 %v13079_v14  ;;  %v4833_v30 = vadd.f32 %v4832_v4, %v12719_v1  ;;  %v13082_v20 = vld [vmem:[#allocation275_spill] sm:$0xff] }
 0x30d   :  { %v4985_v22 = vadd.f32 %v4984_v29, %v4926_v36  ;;  %5916 = vmatmul.f32.gmra.mxu1 %v7480_v32  ;;  %v5035_v56 = vpop.f32.mrf.mxu3  ;;  %6278 = vmatpush.msrb.mxu3 %v13048_v41  ;;  %v13093_v36 = vld [vmem:[#allocation293_spill] sm:$0xff]  ;;  %v13095_v29 = vld [vmem:[#allocation64_spill] sm:$0xff] }
 0x30e   :  { %5875 = vmatmul.f32.gmra.mxu0 %v7537_v28  ;;  %6223 = vmatpush.msrb.mxu2 %v13080_v24  ;;  %v2049_v14 = vadd.f32 %v13096_v13, %v13095_v29 }
 0x30f   :  { %v5036_v19 = vadd.f32 %v5035_v56, %v4985_v22  ;;  %6103 = vmatpush.msrb.mxu0 %v13081_v59  ;;  %6156 = vmatpush.msrb.mxu1 %v13048_v41  ;;  %v13085_v41 = vld [vmem:[#allocation279_spill] sm:$0xff] }
 0x310   :  { %5977 = vmatmul.f32.gmra.mxu2 %v12396_v47  ;;  %6280 = vmatpush.msrb.mxu3 %v13051_v15 }
 0x311   :  { %6227 = vmatpush.msrb.mxu2 %v13082_v20  ;;  %6106 = vmatpush.msrb.mxu0 %v13083_v48 }
 0x312   :  { %v4929_v51 = vpop.f32.mrf.mxu1  ;;  %6074 = vmatmul.f32.gmra.mxu3 %v7537_v28  ;;  %6158 = vmatpush.msrb.mxu1 %v13051_v15 }
 0x313   :  { %v4840_v45 = vpop.f32.mrf.mxu0  ;;  %v4930_v26 = vadd.f32 %v4929_v51, %v4833_v30  ;;  %6282 = vmatpush.msrb.mxu3 %v13055_v44  ;;  %6109 = vmatpush.msrb.mxu0 %v13084_v52  ;;  %v13099_v51 = vld [vmem:[#allocation46_spill] sm:$0xff] }
 0x314   :  { %v4989_v31 = vpop.f32.mrf.mxu2  ;;  %6231 = vmatpush.msrb.mxu2 %v13085_v41  ;;  %6160 = vmatpush.msrb.mxu1 %v13055_v44  ;;  %v4841_v15 = vadd.f32 %v4840_v45, %v12721_v42  ;;  %v13089_v44 = vld [vmem:[#allocation287_spill] sm:$0xff] }
 0x315   :  { %v4990_v47 = vadd.f32 %v4989_v31, %v4930_v26  ;;  %5920 = vmatmul.f32.gmra.mxu1 %v7537_v28  ;;  %v5041_v61 = vpop.f32.mrf.mxu3  ;;  %6112 = vmatpush.msrb.mxu0 %v13086_v54 }
 0x316   :  { %5879 = vmatmul.f32.gmra.mxu0 %v12707_v60  ;;  %6284 = vmatpush.msrb.mxu3 %v13059_v2 }
 0x317   :  { %v5042_v7 = vadd.f32 %v5041_v61, %v4990_v47  ;;  %6235 = vmatpush.msrb.mxu2 %v13087_v18  ;;  %6162 = vmatpush.msrb.mxu1 %v13059_v2  ;;  %v13101_v18 = vld [vmem:[#allocation58_spill] sm:$0xff] }
 0x318   :  { %6115 = vmatpush.msrb.mxu0 %v13088_v10  ;;  %5985 = vmatmul.f32.gmra.mxu2 %v7719_v12  ;;  %v13092_v12 = vld [vmem:[#allocation291_spill] sm:$0xff]  ;;  %v13102_v10 = vld [vmem:[#allocation141_spill] sm:$0xff] }
 0x319   :  { %6239 = vmatpush.msrb.mxu2 %v13089_v44  ;;  %6286 = vmatpush.msrb.mxu3 %v13062_v23 }
 0x31a   :  { %v4933_v5 = vpop.f32.mrf.mxu1  ;;  %6118 = vmatpush.msrb.mxu0 %v13090_v35  ;;  %6078 = vmatmul.f32.gmra.mxu3 %v12707_v60 }
 0x31b   :  { %v5104_v34 = vpop.f32.mrf.mxu0  ;;  %v4934_v46 = vadd.f32 %v4933_v5, %v4841_v15  ;;  %6164 = vmatpush.msrb.mxu1 %v13062_v23  ;;  %6288 = vmatpush.msrb.mxu3 %v13065_v17  ;;  %v13094_v23 = vmov 0  }
 0x31c   :  { %v5105_v6 = vadd.f32 %v5104_v34, %v5030_v53  ;;  %v4994_v2 = vpop.f32.mrf.mxu2  ;;  %6121 = vmatpush.msrb.mxu0 %v13091_v3  ;;  %6243 = vmatpush.msrb.mxu2 %v13092_v12  ;;  %v13104_v12 = vld [vmem:[#allocation137_spill] sm:$0xff] }
 0x31d   :  { %v4995_v4 = vadd.f32 %v4994_v2, %v4934_v46  ;;  %5924 = vmatmul.f32.gmra.mxu1 %v12707_v60  ;;  %v5047_v9 = vpop.f32.mrf.mxu3  ;;  %6290 = vmatpush.msrb.mxu3 %v13070_v58 }
 0x31e   :  { %6124 = vmatmul.f32.vlgmr.msrb.gmra.mxu0 %v12727_v0  ;;  %6166 = vmatpush.msrb.mxu1 %v13065_v17  ;;  %v13097_v17 = vld [vmem:[#allocation139_spill] sm:$0xff] }
 0x31f   :  { %v5048_v53 = vadd.f32 %v5047_v9, %v4995_v4  ;;  %6247 = vmatpush.msrb.mxu2 %v13093_v36  ;;  %7141 = vset.pattern.permute.xlu2 %v13094_v23  ;;  %v2094_v56 = vadd.f32 %v13097_v17, %v2049_v14  ;;  %v13105_v4 = vld [vmem:[#allocation32_spill] sm:$0xff] }
 0x320   :  { %6168 = vmatpush.msrb.mxu1 %v13070_v58  ;;  %6249 = vmatmul.f32.vlgmr.msrb.gmra.mxu2 %v7421_v55 }
 0x321   :  { %6292 = vmatpush.msrb.mxu3 %v13072_v11 }
 0x322   :  { %v5149_v22 = vpop.f32.mrf.mxu1  ;;  %6170 = vmatpush.msrb.mxu1 %v13072_v11  ;;  %6294 = vmatmul.f32.vlgmr.msrb.gmra.mxu3 %v7421_v55  ;;  %v13098_v11 = vld [vmem:[#allocation249_spill] sm:$0xff] }
 0x323   :  { %v5108_v0 = vpop.f32.mrf.mxu0  ;;  %v5150_v30 = vadd.f32 %v5149_v22, %v5105_v6  ;;  %v2053_v55 = vadd.f32 %v13099_v51, %v13098_v11 }
 0x324   :  { %v5109_v24 = vadd.f32 %v5108_v0, %v5036_v19  ;;  %v5198_v59 = vpop.f32.mrf.mxu2  ;;  %v13100_v19 = vld [vmem:[#allocation147_spill] sm:$0xff] }
 0x325   :  { %v5199_v58 = vadd.f32 %v5198_v59, %v12709_v16  ;;  %v10945_v20 = vmax.f32 %v2094_v56, %v5150_v30  ;;  %6174 = vmatmul.f32.vlgmr.msrb.gmra.mxu1 %v12733_v49  ;;  %v5303_v48 = vpop.f32.mrf.mxu3  ;;  %v2098_v52 = vadd.f32 %v13100_v19, %v2053_v55  ;;  %v13108_v55 = vld [vmem:[#allocation2_spill] sm:$0xff] }
 0x326   :  { %6129 = vmatmul.f32.gmra.mxu0 %v12523_v21 }
 0x327   :  { %v5304_v45 = vadd.f32 %v5303_v48, %v5199_v58  ;;  %v13107_v48 = vld [vmem:[#allocation33_spill] sm:$0xff] }
 0x328   :  { %6253 = vmatmul.f32.gmra.mxu2 %v7480_v32  ;;  %v6566_v11 = vmul.f32 1.442695, %v13107_v48  ;;  %vm6534_vm1 = vcmp.gt.f32.partialorder %v13107_v48, -0.0625  ;;  %vm6694_vm2 = vcmp.gt.f32.partialorder %v13107_v48, 0.0 }
 0x32a   :  { %v5153_v31 = vpop.f32.mrf.mxu1  ;;  %6298 = vmatmul.f32.gmra.mxu3 %v7480_v32  ;;  %v2057_v32 = vadd.f32 %v13102_v10, %v13101_v18  ;;  %7142 = vpow2.f32 %v6566_v11 }
 0x32b   :  { %v5112_v26 = vpop.f32.mrf.mxu0  ;;  %v5154_v47 = vadd.f32 %v5153_v31, %v5109_v24 }
 0x32c   :  { %v5113_v41 = vadd.f32 %v5112_v26, %v5042_v7  ;;  %v5206_v61 = vpop.f32.mrf.mxu2  ;;  %v13103_v7 = vld [vmem:[#allocation36_spill] sm:$0xff] }
 0x32d   :  { %v5207_v21 = vadd.f32 %v5206_v61, %v12715_v37  ;;  %v10955_v54 = vmax.f32 %v2098_v52, %v5154_v47  ;;  %6180 = vmatmul.f32.gmra.mxu1 %v12738_v62  ;;  %v5307_v49 = vpop.f32.mrf.mxu3  ;;  %v2102_v34 = vadd.f32 %v13103_v7, %v2057_v32  ;;  %v13112_v32 = vld [vmem:[#allocation37_spill] sm:$0xff]  ;;  %v13114_v7 = vld [vmem:[#allocation12_spill] sm:$0xff] }
 0x32e   :  { %6134 = vmatmul.f32.gmra.mxu0 %v7567_v57  ;;  %vm6550_vm5 = vcmp.gt.f32.partialorder %v13112_v32, -0.0625  ;;  %vm6710_vm6 = vcmp.gt.f32.partialorder %v13112_v32, 0.0 }
 0x32f   :  { %v5308_v15 = vadd.f32 %v5307_v49, %v5207_v21  ;;  %v13110_v21 = vld [vmem:[#allocation24_spill] sm:$0xff]  ;;  %v13111_v49 = vld [vmem:[#allocation25_spill] sm:$0xff] }
 0x330   :  { %6257 = vmatmul.f32.gmra.mxu2 %v7537_v28 }
 0x332   :  { %v5157_v5 = vpop.f32.mrf.mxu1  ;;  %6302 = vmatmul.f32.gmra.mxu3 %v7537_v28  ;;  %v2061_v28 = vadd.f32 %v13105_v4, %v13104_v12  ;;  %v13116_v4 = vld [vmem:[#allocation4_spill] sm:$0xff] }
 0x333   :  { %v5116_v44 = vpop.f32.mrf.mxu0  ;;  %v5158_v46 = vadd.f32 %v5157_v5, %v5113_v41  ;;  %v13113_v5 = vld [vmem:[#allocation10_spill] sm:$0xff] }
 0x334   :  { %v5117_v35 = vadd.f32 %v5116_v44, %v5048_v53  ;;  %v5214_v6 = vpop.f32.mrf.mxu2  ;;  %v13106_v53 = vld [vmem:[#allocation8_spill] sm:$0xff]  ;;  %v6598_v44 = vmul.f32 1.442695, %v13112_v32 }
 0x335   :  { %v5215_v57 = vadd.f32 %v5214_v6, %v12719_v1  ;;  %v10965_v2 = vmax.f32 %v2102_v34, %v5158_v46  ;;  %6186 = vmatmul.f32.gmra.mxu1 %v7598_v8  ;;  %v5311_v62 = vpop.f32.mrf.mxu3  ;;  %v2106_v23 = vadd.f32 %v13106_v53, %v2061_v28  ;;  %v2817_v34 = vadd.f32 %v13114_v7, %v13113_v5  ;;  %v13117_v28 = vld [vmem:[#allocation6_spill] sm:$0xff] }
 0x336   :  { %6139 = vmatmul.f32.gmra.mxu0 %v12702_v33 }
 0x337   :  { %v5312_v3 = vadd.f32 %v5311_v62, %v5215_v57  ;;  %v6358_v57 = vmul.f32 %v13112_v32, %v13112_v32  ;;  %v7143_v62 = vpop.eup %7142 }
 0x338   :  { %6261 = vmatmul.f32.gmra.mxu2 %v12707_v60 }
 0x33a   :  { %v5161_v9 = vpop.f32.mrf.mxu1  ;;  %6306 = vmatmul.f32.gmra.mxu3 %v12707_v60 }
 0x33b   :  { %v5361_v36 = vpop.f32.mrf.mxu0  ;;  %v5162_v29 = vadd.f32 %v5161_v9, %v5117_v35  ;;  %v2821_v9 = vadd.f32 %v13117_v28, %v13116_v4 }
 0x33c   :  { %v5362_v13 = vadd.f32 %v5361_v36, %v5304_v45  ;;  %v5222_v14 = vpop.f32.mrf.mxu2  ;;  %v6342_v45 = vmul.f32 %v13107_v48, %v13107_v48  ;;  %v13118_v36 = vld [vmem:[#allocation13_spill] sm:$0xff] }
 0x33d   :  { %v5223_v33 = vadd.f32 %v5222_v14, %v12721_v42  ;;  %v10975_v0 = vmax.f32 %v2106_v23, %v5162_v29  ;;  %6192 = vmatmul.f32.gmra.mxu1 %v7665_v25  ;;  %v5315_v8 = vpop.f32.mrf.mxu3  ;;  %v13109_v25 = vld [vmem:[#allocation23_spill] sm:$0xff]  ;;  %v11000_v53 = vadd.f32 %v13118_v36, %v2817_v34  ;;  %v13119_v29 = vld [vmem:[#allocation5_spill] sm:$0xff] }
 0x33e   :  { %v6582_v31 = vmul.f32 1.442695, %v13109_v25  ;;  %v6374_v18 = vmul.f32 0.5, %v6342_v45  ;;  %v6438_v10 = vmul.f32 0.16666667, %v6342_v45  ;;  %v6350_v6 = vmul.f32 %v13109_v25, %v13109_v25  ;;  %v13127_v36 = vld [vmem:[#allocation9_spill] sm:$0xff] }
 0x33f   :  { %v5316_v22 = vadd.f32 %v5315_v8, %v5223_v33  ;;  %vm6542_vm3 = vcmp.gt.f32.partialorder %v13109_v25, -0.0625  ;;  %vm6702_vm4 = vcmp.gt.f32.partialorder %v13109_v25, 0.0 }
 0x340   :  { %7144 = vpow2.f32 %v6582_v31  ;;  %v6406_v33 = vadd.f32 %v6374_v18, %v13107_v48  ;;  %v6470_v8 = vmul.f32 %v6438_v10, %v13107_v48  ;;  %v6390_v31 = vmul.f32 0.5, %v6358_v57  ;;  %v13126_v18 = vld [vmem:[#allocation41_spill] sm:$0xff] }
 0x341   :  { %7146 = vpow2.f32 %v6598_v44  ;;  %v6366_v10 = vmul.f32 %v13126_v18, %v13126_v18  ;;  %v6614_v44 = vmul.f32 1.442695, %v13126_v18  ;;  %vm6558_vm7 = vcmp.gt.f32.partialorder %v13126_v18, -0.0625 }
 0x342   :  { %v5411_v56 = vpop.f32.mrf.mxu1  ;;  %vm6718_vm8 = vcmp.gt.f32.partialorder %v13126_v18, 0.0 }
 0x343   :  { %v5366_v17 = vpop.f32.mrf.mxu0  ;;  %v5412_v30 = vadd.f32 %v5411_v56, %v5362_v13  ;;  %v13120_v13 = vld [vmem:[#allocation29_spill] sm:$0xff]  ;;  %v6398_v28 = vmul.f32 0.5, %v6366_v10 }
 0x344   :  { %v5367_v24 = vadd.f32 %v5366_v17, %v5308_v15  ;;  %v5486_v59 = vpop.f32.mrf.mxu2  ;;  %v2813_v15 = vadd.f32 %v13111_v49, %v13110_v21  ;;  %v2825_v14 = vadd.f32 %v13120_v13, %v13119_v29  ;;  %v13121_v17 = vld [vmem:[#allocation7_spill] sm:$0xff]  ;;  %v6568_v21 = vmul.f32 1.442695, %v10453_v63 }
 0x345   :  { %v5487_v58 = vadd.f32 %v5486_v59, %v5412_v30  ;;  %v5531_v60 = vpop.f32.mrf.mxu3  ;;  %v11007_v56 = vadd.f32 %v13121_v17, %v2821_v9  ;;  %v6382_v59 = vmul.f32 0.5, %v6350_v6  ;;  %v6454_v49 = vmul.f32 0.16666667, %v6358_v57 }
 0x346   :  { %7148 = vpow2.f32 %v6568_v21  ;;  %v6462_v9 = vmul.f32 0.16666667, %v6366_v10  ;;  %v6351_v29 = vmul.f32 %v10473_v40, %v10473_v40 }
 0x347   :  { %v5532_v51 = vadd.f32 %v5531_v60, %v5487_v58  ;;  %13122 = vst [vmem:[#allocation55_spill] sm:$0xff] %v11007_v56  ;;  %v6446_v58 = vmul.f32 0.16666667, %v6350_v6  ;;  %v13124_v60 = vld [vmem:[#allocation15_spill] sm:$0xff]  ;;  %v6414_v34 = vadd.f32 %v6382_v59, %v13109_v25  ;;  %v6584_v6 = vmul.f32 1.442695, %v10473_v40 }
 0x348   :  { %v11013_v11 = vadd.f32 %v13124_v60, %v2825_v14  ;;  %v6486_v4 = vmul.f32 %v6454_v49, %v13112_v32  ;;  %7150 = vpow2.f32 %v6614_v44  ;;  %v6383_v21 = vmul.f32 0.5, %v6351_v29 }
 0x349   :  { %v10982_v26 = vmax.f32 %v13108_v55, %v5532_v51  ;;  %v7105_v55 = vadd.f32 -1.0, %v7143_v62  ;;  %7152 = vpow2.f32 %v6584_v6 }
 0x34a   :  { %v5417_v52 = vpop.f32.mrf.mxu1  ;;  %13125 = vst [vmem:[#allocation40_spill] sm:$0xff] %v11013_v11 }
 0x34b   :  { %v5371_v19 = vpop.f32.mrf.mxu0  ;;  %v5418_v47 = vadd.f32 %v5417_v52, %v5367_v24  ;;  %v13123_v24 = vld [vmem:[#allocation47_spill] sm:$0xff] }
 0x34c   :  { %v5372_v41 = vadd.f32 %v5371_v19, %v5312_v3  ;;  %v5490_v61 = vpop.f32.mrf.mxu2  ;;  %v13115_v3 = vld [vmem:[#allocation27_spill] sm:$0xff]  ;;  %v7145_v19 = vpop.eup %7144 }
 0x34d   :  { %v5491_v35 = vadd.f32 %v5490_v61, %v5418_v47  ;;  %v5535_v46 = vpop.f32.mrf.mxu3  ;;  %v10995_v12 = vadd.f32 %v13115_v3, %v2813_v15  ;;  %v6502_v15 = vadd.f32 %v6470_v8, %v6406_v33  ;;  %v7113_v57 = vadd.f32 -1.0, %v7145_v19 }
 0x34e   :  { %v6422_v3 = vadd.f32 %v6390_v31, %v13112_v32  ;;  %v6430_v31 = vadd.f32 %v6398_v28, %v13126_v18  ;;  %v6494_v19 = vmul.f32 %v6462_v9, %v13126_v18 }
 0x34f   :  { %v5536_v23 = vadd.f32 %v5535_v46, %v5491_v35  ;;  %v6478_v35 = vmul.f32 %v6446_v58, %v13109_v25  ;;  %v6662_v46 = vsel %vm6534_vm1, %v6502_v15, %v7105_v55  ;;  %v6600_v55 = vmul.f32 1.442695, %v10493_v27 }
 0x350   :  { %v11042_v59 = vsel %vm6694_vm2, %v13107_v48, %v6662_v46 }
 0x351   :  { %v11010_v30 = vmax.f32 %v13123_v24, %v5536_v23  ;;  %v6510_v13 = vadd.f32 %v6478_v35, %v6414_v34  ;;  %13128 = vst [vmem:[#allocation18_spill] sm:$0xff] %v11042_v59  ;;  %7154 = vpow2.f32 %v6600_v55  ;;  %v13130_v35 = vld [vmem:[#allocation30_spill] sm:$0xff] }
 0x352   :  { %v5423_v45 = vpop.f32.mrf.mxu1  ;;  %vm6559_vm15 = vcmp.gt.f32.partialorder %v13130_v35, -0.0625  ;;  %vm6719_vm2 = vcmp.gt.f32.partialorder %v13130_v35, 0.0 }
 0x353   :  { %v5376_v51 = vpop.f32.mrf.mxu0  ;;  %v5424_v47 = vadd.f32 %v5423_v45, %v5372_v41  ;;  %v6343_v41 = vmul.f32 %v10453_v63, %v10453_v63  ;;  %v6518_v45 = vadd.f32 %v6486_v4, %v6422_v3  ;;  %v6415_v4 = vadd.f32 %v6383_v21, %v10473_v40 }
 0x354   :  { %v5377_v52 = vadd.f32 %v5376_v51, %v5316_v22  ;;  %v5494_v61 = vpop.f32.mrf.mxu2  ;;  %v7147_v22 = vpop.eup %7146  ;;  %v6670_v51 = vsel %vm6542_vm3, %v6510_v13, %v7113_v57  ;;  %v6526_v57 = vadd.f32 %v6494_v19, %v6430_v31  ;;  %v13134_v13 = vld [vmem:[#allocation16_spill] sm:$0xff] }
 0x355   :  { %v5495_v5 = vadd.f32 %v5494_v61, %v5424_v47  ;;  %v5539_v7 = vpop.f32.mrf.mxu3  ;;  %v7121_v14 = vadd.f32 -1.0, %v7147_v22  ;;  %v6375_v17 = vmul.f32 0.5, %v6343_v41  ;;  %v6439_v24 = vmul.f32 0.16666667, %v6343_v41  ;;  %v7149_v47 = vpop.eup %7148 }
 0x356   :  { %v7151_v15 = vpop.eup %7150  ;;  %v6616_v22 = vmul.f32 1.442695, %v13130_v35  ;;  %v7106_v46 = vadd.f32 -1.0, %v7149_v47  ;;  %vm6536_vm0 = vcmp.gt.f32.partialorder %v13134_v13, -0.0625  ;;  %vm6696_vm3 = vcmp.gt.f32.partialorder %v13134_v13, 0.0 }
 0x357   :  { %v5540_v62 = vadd.f32 %v5539_v7, %v5495_v5  ;;  %v6678_v49 = vsel %vm6550_vm5, %v6518_v45, %v7121_v14  ;;  %v6407_v10 = vadd.f32 %v6375_v17, %v10453_v63  ;;  %v6471_v44 = vmul.f32 %v6439_v24, %v10453_v63  ;;  %v7153_v41 = vpop.eup %7152 }
 0x358   :  { %v11056_v5 = vsel %vm6702_vm4, %v13109_v25, %v6670_v51  ;;  %v6359_v7 = vmul.f32 %v10493_v27, %v10493_v27  ;;  %v11065_v6 = vsel %vm6710_vm6, %v13112_v32, %v6678_v49  ;;  %v6367_v25 = vmul.f32 %v13130_v35, %v13130_v35  ;;  %v7155_v47 = vpop.eup %7154 }
 0x359   :  { %v11033_v23 = vmax.f32 %v13127_v36, %v5540_v62  ;;  %13129 = vst [vmem:[#allocation59_spill] sm:$0xff] %v11056_v5  ;;  %v13132_v62 = vld [vmem:[#allocation3_spill] sm:$0xff]  ;;  %v7129_v9 = vadd.f32 -1.0, %v7151_v15  ;;  %v6503_v32 = vadd.f32 %v6471_v44, %v6407_v10  ;;  %v6570_v14 = vmul.f32 1.442695, %v13134_v13 }
 0x35a   :  { %v5429_v33 = vpop.f32.mrf.mxu1  ;;  %13131 = vst [vmem:[#allocation19_spill] sm:$0xff] %v11065_v6  ;;  %v6455_v17 = vmul.f32 0.16666667, %v6359_v7  ;;  %v7114_v51 = vadd.f32 -1.0, %v7153_v41  ;;  %7156 = vpow2.f32 %v6616_v22  ;;  %v6344_v45 = vmul.f32 %v13134_v13, %v13134_v13 }
 0x35b   :  { %v11037_v8 = vpop.f32.mrf.mxu0  ;;  %v5430_v58 = vadd.f32 %v5429_v33, %v5377_v52  ;;  %v6447_v52 = vmul.f32 0.16666667, %v6351_v29  ;;  %v6391_v33 = vmul.f32 0.5, %v6359_v7  ;;  %v6663_v55 = vsel %vm6535_vm9, %v6503_v32, %v7106_v46  ;;  %v13137_v7 = vld [vmem:[#allocation35_spill] sm:$0xff] }
 0x35c   :  { %v5498_v60 = vpop.f32.mrf.mxu2  ;;  %v6399_v31 = vmul.f32 0.5, %v6367_v25  ;;  %v6463_v19 = vmul.f32 0.16666667, %v6367_v25  ;;  %7158 = vpow2.f32 %v6570_v14  ;;  %v6487_v15 = vmul.f32 %v6455_v17, %v10493_v27  ;;  %v13139_v17 = vld [vmem:[#allocation17_spill] sm:$0xff] }
 0x35d   :  { %v5499_v48 = vadd.f32 %v5498_v60, %v5430_v58  ;;  %v5543_v61 = vpop.f32.mrf.mxu3  ;;  %v6479_v28 = vmul.f32 %v6447_v52, %v10473_v40  ;;  %v13135_v58 = vld [vmem:[#allocation52_spill] sm:$0xff]  ;;  %v6686_v52 = vsel %vm6558_vm7, %v6526_v57, %v7129_v9  ;;  %v6423_v49 = vadd.f32 %v6391_v33, %v10493_v27 }
 0x35e   :  { %v6586_v60 = vmul.f32 1.442695, %v13135_v58  ;;  %v11097_v10 = vsel %vm6695_vm10, %v10453_v63, %v6663_v55  ;;  %v6376_v22 = vmul.f32 0.5, %v6344_v45  ;;  %v7122_v41 = vadd.f32 -1.0, %v7155_v47 }
 0x35f   :  { %v5544_v34 = vadd.f32 %v5543_v61, %v5499_v48  ;;  %v6352_v61 = vmul.f32 %v13135_v58, %v13135_v58  ;;  %v6511_v21 = vadd.f32 %v6479_v28, %v6415_v4  ;;  %13136 = vst [vmem:[#allocation21_spill] sm:$0xff] %v11097_v10  ;;  %v6431_v46 = vadd.f32 %v6399_v31, %v13130_v35 }
 0x360   :  { %7160 = vpow2.f32 %v6586_v60  ;;  %v6495_v25 = vmul.f32 %v6463_v19, %v13130_v35  ;;  %v7157_v57 = vpop.eup %7156  ;;  %v11105_v9 = vsel %vm6718_vm8, %v13126_v18, %v6686_v52  ;;  %v6360_v14 = vmul.f32 %v13137_v7, %v13137_v7 }
 0x361   :  { %v11071_v3 = vmax.f32 %v13132_v62, %v5544_v34  ;;  %v6671_v44 = vsel %vm6543_vm11, %v6511_v21, %v7114_v51  ;;  %v6602_v34 = vmul.f32 1.442695, %v13137_v7  ;;  %v6440_v62 = vmul.f32 0.16666667, %v6344_v45  ;;  %13138 = vst [vmem:[#allocation65_spill] sm:$0xff] %v11105_v9 }
 0x362   :  { %v11077_v29 = vpop.f32.mrf.mxu1  ;;  %v6384_v4 = vmul.f32 0.5, %v6352_v61  ;;  %v6448_v28 = vmul.f32 0.16666667, %v6352_v61  ;;  %v6519_v33 = vadd.f32 %v6487_v15, %v6423_v49  ;;  %v6618_v60 = vmul.f32 1.442695, %v13139_v17  ;;  %v7159_v55 = vpop.eup %7158 }
 0x363   :  { %13133 = vst [vmem:[#allocation43_spill] sm:$0xff] %v11071_v3  ;;  %v11075_v36 = vpop.f32.mrf.mxu0  ;;  %v11119_v45 = vadd.f32 %v11097_v10, %v11042_v59  ;;  %v11122_v18 = vsel %vm6703_vm12, %v10473_v40, %v6671_v44  ;;  %7162 = vpow2.f32 %v6602_v34  ;;  %v6408_v31 = vadd.f32 %v6376_v22, %v13134_v13 }
 0x364   :  { %v11080_v24 = vpop.f32.mrf.mxu2  ;;  %13140 = vst [vmem:[#allocation50_spill] sm:$0xff] %v11122_v18  ;;  %v6679_v19 = vsel %vm6551_vm13, %v6519_v33, %v7122_v41  ;;  %v6527_v47 = vadd.f32 %v6495_v25, %v6431_v46  ;;  %v7130_v61 = vadd.f32 -1.0, %v7157_v57  ;;  %v6472_v49 = vmul.f32 %v6440_v62, %v13134_v13 }
 0x365   :  { %v11086_v48 = vpop.f32.mrf.mxu3  ;;  %v6416_v15 = vadd.f32 %v6384_v4, %v13135_v58  ;;  %v6480_v10 = vmul.f32 %v6448_v28, %v13135_v58  ;;  %v6368_v40 = vmul.f32 %v13139_v17, %v13139_v17  ;;  %v6572_v44 = vmul.f32 1.442695, %v10805_v39 }
 0x366   :  { %v7161_v21 = vpop.eup %7160  ;;  %v6392_v34 = vmul.f32 0.5, %v6360_v14  ;;  %v6456_v59 = vmul.f32 0.16666667, %v6360_v14  ;;  %7164 = vpow2.f32 %v6618_v60  ;;  %v7107_v22 = vadd.f32 -1.0, %v7159_v55 }
 0x367   :  { %v6767_v41 = vadd.f32 %v11122_v18, %v11056_v5  ;;  %v7115_v46 = vadd.f32 -1.0, %v7161_v21  ;;  %v11140_v25 = vsel %vm6711_vm14, %v10493_v27, %v6679_v19  ;;  %v6687_v57 = vsel %vm6559_vm15, %v6527_v47, %v7130_v61 }
 0x368   :  { %13141 = vst [vmem:[#allocation22_spill] sm:$0xff] %v11140_v25  ;;  %v6345_v4 = vmul.f32 %v10805_v39, %v10805_v39  ;;  %v6504_v28 = vadd.f32 %v6472_v49, %v6408_v31  ;;  %v6400_v14 = vmul.f32 0.5, %v6368_v40  ;;  %v6464_v33 = vmul.f32 0.16666667, %v6368_v40 }
 0x369   :  { %v7163_v62 = vpop.eup %7162  ;;  %7166 = vpow2.f32 %v6572_v44  ;;  %v6512_v18 = vadd.f32 %v6480_v10, %v6416_v15  ;;  %v6424_v5 = vadd.f32 %v6392_v34, %v13137_v7  ;;  %v6488_v21 = vmul.f32 %v6456_v59, %v13137_v7 }
 0x36a   :  { %v11109_v32 = vpop.f32.mrf.mxu1  ;;  %v6664_v19 = vsel %vm6536_vm0, %v6504_v28, %v7107_v22  ;;  %vm6544_vm1 = vcmp.gt.f32.partialorder %v13135_v58, -0.0625  ;;  %v6776_v31 = vadd.f32 %v11140_v25, %v11065_v6  ;;  %v7123_v61 = vadd.f32 -1.0, %v7163_v62 }
 0x36b   :  { %v11107_v63 = vpop.f32.mrf.mxu0  ;;  %v6672_v10 = vsel %vm6544_vm1, %v6512_v18, %v7115_v46  ;;  %v11160_v49 = vsel %vm6719_vm2, %v13130_v35, %v6687_v57  ;;  %v6377_v15 = vmul.f32 0.5, %v6345_v4  ;;  %v6441_v40 = vmul.f32 0.16666667, %v6345_v4 }
 0x36c   :  { %v11115_v51 = vpop.f32.mrf.mxu2  ;;  %v7165_v47 = vpop.eup %7164  ;;  %13142 = vst [vmem:[#allocation51_spill] sm:$0xff] %v11160_v49  ;;  %v6432_v44 = vadd.f32 %v6400_v14, %v13139_v17  ;;  %v6496_v34 = vmul.f32 %v6464_v33, %v13139_v17  ;;  %v11167_v22 = vsel %vm6696_vm3, %v13134_v13, %v6664_v19  ;;  %v6588_v28 = vmul.f32 1.442695, %v10825_v43 }
 0x36d   :  { %v11126_v52 = vpop.f32.mrf.mxu3  ;;  %13144 = vst [vmem:[#allocation26_spill] sm:$0xff] %v11167_v22  ;;  %vm6704_vm4 = vcmp.gt.f32.partialorder %v13135_v58, 0.0  ;;  %v6520_v18 = vadd.f32 %v6488_v21, %v6424_v5  ;;  %vm6552_vm5 = vcmp.gt.f32.partialorder %v13137_v7, -0.0625  ;;  %v6604_v35 = vmul.f32 1.442695, %v10845_v38 }
 0x36e   :  { %v11172_v46 = vsel %vm6704_vm4, %v13135_v58, %v6672_v10  ;;  %v7131_v57 = vadd.f32 -1.0, %v7165_v47  ;;  %v6353_v4 = vmul.f32 %v10825_v43, %v10825_v43  ;;  %v6361_v13 = vmul.f32 %v10845_v38, %v10845_v38 }
 0x36f   :  { %13145 = vst [vmem:[#allocation71_spill] sm:$0xff] %v11172_v46  ;;  %v7167_v62 = vpop.eup %7166  ;;  %v6680_v14 = vsel %vm6552_vm5, %v6520_v18, %v7123_v61  ;;  %v6785_v33 = vadd.f32 %v11160_v49, %v11105_v9  ;;  %v6409_v5 = vadd.f32 %v6377_v15, %v10805_v39  ;;  %v6473_v58 = vmul.f32 %v6441_v40, %v10805_v39 }
 0x370   :  { %v11186_v21 = vadd.f32 %v11119_v45, %v11167_v22  ;;  %v6528_v19 = vadd.f32 %v6496_v34, %v6432_v44  ;;  %7168 = vpow2.f32 %v6588_v28  ;;  %v11193_v25 = vadd.f32 %v6767_v41, %v11172_v46 }
 0x371   :  { %vm6712_vm6 = vcmp.gt.f32.partialorder %v13137_v7, 0.0  ;;  %vm6560_vm7 = vcmp.gt.f32.partialorder %v13139_v17, -0.0625  ;;  %v7108_v15 = vadd.f32 -1.0, %v7167_v62  ;;  %7170 = vpow2.f32 %v6604_v35 }
 0x372   :  { %v11146_v55 = vpop.f32.mrf.mxu1  ;;  %v11200_v45 = vsel %vm6712_vm6, %v13137_v7, %v6680_v14  ;;  %v6688_v40 = vsel %vm6560_vm7, %v6528_v19, %v7131_v57  ;;  %v6385_v44 = vmul.f32 0.5, %v6353_v4  ;;  %v6449_v34 = vmul.f32 0.16666667, %v6353_v4 }
 0x373   :  { %v11144_v60 = vpop.f32.mrf.mxu0  ;;  %13148 = vst [vmem:[#allocation72_spill] sm:$0xff] %v11200_v45  ;;  %v6393_v18 = vmul.f32 0.5, %v6361_v13  ;;  %v6620_v28 = vmul.f32 1.442695, %v10865_v50  ;;  %v6505_v41 = vadd.f32 %v6473_v58, %v6409_v5  ;;  %v6574_v9 = vmul.f32 1.442695, %v10945_v20 }
 0x374   :  { %v11150_v27 = vpop.f32.mrf.mxu2  ;;  %v6457_v6 = vmul.f32 0.16666667, %v6361_v13  ;;  %vm6720_vm8 = vcmp.gt.f32.partialorder %v13139_v17, 0.0  ;;  %vm6537_vm9 = vcmp.gt.f32.partialorder %v10805_v39, -0.0625  ;;  %vm6697_vm10 = vcmp.gt.f32.partialorder %v10805_v39, 0.0 }
 0x375   :  { %v11162_v59 = vpop.f32.mrf.mxu3  ;;  %v6590_v7 = vmul.f32 1.442695, %v10955_v54  ;;  %v11211_v35 = vadd.f32 %v6776_v31, %v11200_v45  ;;  %v6665_v57 = vsel %vm6537_vm9, %v6505_v41, %v7108_v15  ;;  %v6606_v62 = vmul.f32 1.442695, %v10965_v2 }
 0x376   :  { %13143 = vst [vmem:[#allocation69_spill] sm:$0xff] %v11162_v59  ;;  %v6369_v4 = vmul.f32 %v10865_v50, %v10865_v50  ;;  %v11217_v14 = vsel %vm6720_vm8, %v13139_v17, %v6688_v40  ;;  %v7169_v13 = vpop.eup %7168  ;;  %v6417_v5 = vadd.f32 %v6385_v44, %v10825_v43  ;;  %v6481_v58 = vmul.f32 %v6449_v34, %v10825_v43 }
 0x377   :  { %13150 = vst [vmem:[#allocation73_spill] sm:$0xff] %v11217_v14  ;;  %v6425_v19 = vadd.f32 %v6393_v18, %v10845_v38  ;;  %7172 = vpow2.f32 %v6620_v28  ;;  %v7171_v46 = vpop.eup %7170  ;;  %v5581_v31 = vadd.f32 %v11037_v8, %v12709_v16  ;;  %v6346_v15 = vmul.f32 %v10945_v20, %v10945_v20 }
 0x378   :  { %7174 = vpow2.f32 %v6574_v9  ;;  %v6489_v41 = vmul.f32 %v6457_v6, %v10845_v38  ;;  %v6354_v44 = vmul.f32 %v10955_v54, %v10955_v54  ;;  %v6362_v34 = vmul.f32 %v10965_v2, %v10965_v2 }
 0x379   :  { %7176 = vpow2.f32 %v6590_v7  ;;  %v11236_v18 = vadd.f32 %v6785_v33, %v11217_v14  ;;  %vm6545_vm11 = vcmp.gt.f32.partialorder %v10825_v43, -0.0625  ;;  %v6401_v6 = vmul.f32 0.5, %v6369_v4 }
 0x37a   :  { %v11188_v47 = vpop.f32.mrf.mxu1  ;;  %7178 = vpow2.f32 %v6606_v62  ;;  %v6465_v9 = vmul.f32 0.16666667, %v6369_v4  ;;  %v11244_v28 = vsel %vm6697_vm10, %v10805_v39, %v6665_v57  ;;  %v6513_v45 = vadd.f32 %v6481_v58, %v6417_v5 }
 0x37b   :  { %13146 = vst [vmem:[#allocation28_spill] sm:$0xff] %v11188_v47  ;;  %v11190_v10 = vpop.f32.mrf.mxu0  ;;  %v7116_v7 = vadd.f32 -1.0, %v7169_v13  ;;  %v7124_v22 = vadd.f32 -1.0, %v7171_v46  ;;  %v5686_v11 = vadd.f32 %v11077_v29, %v5581_v31  ;;  %v6378_v33 = vmul.f32 0.5, %v6346_v15 }
 0x37c   :  { %v11197_v61 = vpop.f32.mrf.mxu2  ;;  %v6442_v14 = vmul.f32 0.16666667, %v6346_v15  ;;  %v6386_v3 = vmul.f32 0.5, %v6354_v44  ;;  %v6450_v62 = vmul.f32 0.16666667, %v6354_v44  ;;  %v6394_v59 = vmul.f32 0.5, %v6362_v34 }
 0x37d   :  { %13147 = vst [vmem:[#allocation56_spill] sm:$0xff] %v11197_v61  ;;  %v11203_v49 = vpop.f32.mrf.mxu3  ;;  %v7173_v61 = vpop.eup %7172  ;;  %v6458_v4 = vmul.f32 0.16666667, %v6362_v34  ;;  %vm6705_vm12 = vcmp.gt.f32.partialorder %v10825_v43, 0.0  ;;  %vm6553_vm13 = vcmp.gt.f32.partialorder %v10845_v38, -0.0625  ;;  %v6433_v39 = vadd.f32 %v6401_v6, %v10865_v50 }
 0x37e   :  { %13149 = vst [vmem:[#allocation62_spill] sm:$0xff] %v11203_v49  ;;  %v6521_v49 = vadd.f32 %v6489_v41, %v6425_v19  ;;  %v7175_v47 = vpop.eup %7174  ;;  %v6497_v46 = vmul.f32 %v6465_v9, %v10865_v50  ;;  %v11255_v57 = vadd.f32 %v11186_v21, %v11244_v28  ;;  %v6673_v13 = vsel %vm6545_vm11, %v6513_v45, %v7116_v7 }
 0x37f   :  { %v7177_v29 = vpop.eup %7176  ;;  %vm6713_vm14 = vcmp.gt.f32.partialorder %v10845_v38, 0.0  ;;  %v5744_v19 = vadd.f32 %v11080_v24, %v5686_v11  ;;  %v6410_v31 = vadd.f32 %v6378_v33, %v10945_v20  ;;  %v6474_v15 = vmul.f32 %v6442_v14, %v10945_v20 }
 0x380   :  { %v6681_v5 = vsel %vm6553_vm13, %v6521_v49, %v7124_v22  ;;  %v7179_v58 = vpop.eup %7178  ;;  %v7132_v41 = vadd.f32 -1.0, %v7173_v61  ;;  %v6418_v21 = vadd.f32 %v6386_v3, %v10955_v54  ;;  %v6482_v6 = vmul.f32 %v6450_v62, %v10955_v54 }
 0x381   :  { %v6426_v49 = vadd.f32 %v6394_v59, %v10965_v2  ;;  %v6490_v22 = vmul.f32 %v6458_v4, %v10965_v2  ;;  %v11276_v11 = vsel %vm6705_vm12, %v10825_v43, %v6673_v13  ;;  %v6529_v24 = vadd.f32 %v6497_v46, %v6433_v39 }
 0x382   :  { %v11229_v40 = vpop.f32.mrf.mxu1  ;;  %vm6561_vm15 = vcmp.gt.f32.partialorder %v10865_v50, -0.0625  ;;  %vm6721_vm0 = vcmp.gt.f32.partialorder %v10865_v50, 0.0  ;;  %v7109_v61 = vadd.f32 -1.0, %v7175_v47  ;;  %v7117_v3 = vadd.f32 -1.0, %v7177_v29 }
 0x383   :  { %v11227_v17 = vpop.f32.mrf.mxu0  ;;  %v7125_v14 = vadd.f32 -1.0, %v7179_v58  ;;  %v11283_v59 = vsel %vm6713_vm14, %v10845_v38, %v6681_v5  ;;  %v5589_v9 = vadd.f32 %v11075_v36, %v12715_v37  ;;  %v5794_v7 = vadd.f32 %v11086_v48, %v5744_v19 }
 0x384   :  { %v11238_v8 = vpop.f32.mrf.mxu2  ;;  %v6576_v33 = vmul.f32 1.442695, %v10982_v26  ;;  %v6689_v62 = vsel %vm6561_vm15, %v6529_v24, %v7132_v41  ;;  %v6506_v4 = vadd.f32 %v6474_v15, %v6410_v31  ;;  %vm6538_vm1 = vcmp.gt.f32.partialorder %v10945_v20, -0.0625 }
 0x385   :  { %v11247_v56 = vpop.f32.mrf.mxu3  ;;  %v6514_v47 = vadd.f32 %v6482_v6, %v6418_v21  ;;  %v6522_v39 = vadd.f32 %v6490_v22, %v6426_v49  ;;  %v5869_v46 = vadd.f32 %v11190_v10, %v5794_v7  ;;  %vm6546_vm2 = vcmp.gt.f32.partialorder %v10955_v54, -0.0625 }
 0x386   :  { %v6592_v38 = vmul.f32 1.442695, %v11010_v30  ;;  %vm6554_vm3 = vcmp.gt.f32.partialorder %v10965_v2, -0.0625  ;;  %v6666_v36 = vsel %vm6538_vm1, %v6506_v4, %v7109_v61  ;;  %v6370_v13 = vmul.f32 %v10975_v0, %v10975_v0 }
 0x387   :  { %v6674_v48 = vsel %vm6546_vm2, %v6514_v47, %v7117_v3  ;;  %v6682_v29 = vsel %vm6554_vm3, %v6522_v39, %v7125_v14  ;;  %v5690_v5 = vadd.f32 %v11109_v32, %v5589_v9  ;;  %v5914_v58 = vadd.f32 %v11229_v40, %v5869_v46 }
 0x388   :  { %v6347_v19 = vmul.f32 %v10982_v26, %v10982_v26  ;;  %7180 = vpow2.f32 %v6576_v33  ;;  %vm6698_vm4 = vcmp.gt.f32.partialorder %v10945_v20, 0.0  ;;  %v6355_v15 = vmul.f32 %v11010_v30, %v11010_v30 }
 0x389   :  { %vm6706_vm5 = vcmp.gt.f32.partialorder %v10955_v54, 0.0  ;;  %v11313_v32 = vsel %vm6721_vm0, %v10865_v50, %v6689_v62  ;;  %v11318_v41 = vsel %vm6698_vm4, %v10945_v20, %v6666_v36  ;;  %7182 = vpow2.f32 %v6592_v38 }
 0x38a   :  { %v11265_v34 = vpop.f32.mrf.mxu1  ;;  %vm6714_vm6 = vcmp.gt.f32.partialorder %v10965_v2, 0.0  ;;  %v6622_v21 = vmul.f32 1.442695, %v10975_v0  ;;  %v11323_v6 = vsel %vm6706_vm5, %v10955_v54, %v6674_v48  ;;  %v6402_v22 = vmul.f32 0.5, %v6370_v13 }
 0x38b   :  { %v11263_v44 = vpop.f32.mrf.mxu0  ;;  %v11326_v49 = vsel %vm6714_vm6, %v10965_v2, %v6682_v29  ;;  %v6466_v24 = vmul.f32 0.16666667, %v6370_v13  ;;  %v5749_v50 = vadd.f32 %v11115_v51, %v5690_v5  ;;  %v11330_v61 = vmax.f32 %v10995_v12, %v5914_v58 }
 0x38c   :  { %v11271_v45 = vpop.f32.mrf.mxu2  ;;  %v6379_v3 = vmul.f32 0.5, %v6347_v19  ;;  %v6443_v14 = vmul.f32 0.16666667, %v6347_v19  ;;  %v6387_v9 = vmul.f32 0.5, %v6355_v15  ;;  %v6451_v7 = vmul.f32 0.16666667, %v6355_v15 }
 0x38d   :  { %v11288_v43 = vpop.f32.mrf.mxu3  ;;  %v6769_v54 = vadd.f32 %v11193_v25, %v11276_v11  ;;  %v6778_v2 = vadd.f32 %v11211_v35, %v11283_v59  ;;  %v5597_v62 = vadd.f32 %v11107_v63, %v12719_v1  ;;  %v11342_v12 = vadd.f32 %v11255_v57, %v11318_v41 }
 0x38e   :  { %v7181_v33 = vpop.eup %7180  ;;  %7184 = vpow2.f32 %v6622_v21  ;;  %v11346_v51 = vadd.f32 %v11236_v18, %v11313_v32  ;;  %v6434_v35 = vadd.f32 %v6402_v22, %v10975_v0  ;;  %v6498_v47 = vmul.f32 %v6466_v24, %v10975_v0 }
 0x38f   :  { %v11349_v4 = vadd.f32 %v6769_v54, %v11323_v6  ;;  %v11352_v25 = vadd.f32 %v6778_v2, %v11326_v49  ;;  %v7183_v63 = vpop.eup %7182  ;;  %v5800_v39 = vadd.f32 %v11126_v52, %v5749_v50  ;;  %v6411_v57 = vadd.f32 %v6379_v3, %v10982_v26 }
 0x390   :  { %v6475_v46 = vmul.f32 %v6443_v14, %v10982_v26  ;;  %v6578_v18 = vmul.f32 1.442695, %v11330_v61  ;;  %v7110_v48 = vadd.f32 -1.0, %v7181_v33  ;;  %v6419_v29 = vadd.f32 %v6387_v9, %v11010_v30 }
 0x391   :  { %v6483_v13 = vmul.f32 %v6451_v7, %v11010_v30  ;;  %v6363_v5 = vmul.f32 %v11033_v23, %v11033_v23  ;;  %v5694_v58 = vadd.f32 %v11146_v55, %v5597_v62  ;;  %v5873_v52 = vadd.f32 %v11227_v17, %v5800_v39 }
 0x392   :  { %v11304_v31 = vpop.f32.mrf.mxu1  ;;  %v5963_v19 = vadd.f32 %v11238_v8, %v12709_v16  ;;  %v6608_v21 = vmul.f32 1.442695, %v11033_v23  ;;  %vm6562_vm7 = vcmp.gt.f32.partialorder %v10975_v0, -0.0625  ;;  %v6348_v22 = vmul.f32 %v11330_v61, %v11330_v61 }
 0x393   :  { %v11302_v10 = vpop.f32.mrf.mxu0  ;;  %vm6539_vm8 = vcmp.gt.f32.partialorder %v10982_v26, -0.0625  ;;  %v7118_v24 = vadd.f32 -1.0, %v7183_v63  ;;  %v6530_v50 = vadd.f32 %v6498_v47, %v6434_v35  ;;  %v5918_v55 = vadd.f32 %v11265_v34, %v5873_v52 }
 0x394   :  { %v11315_v40 = vpop.f32.mrf.mxu2  ;;  %v7185_v3 = vpop.eup %7184  ;;  %v6507_v14 = vadd.f32 %v6475_v46, %v6411_v57  ;;  %7186 = vpow2.f32 %v6578_v18  ;;  %vm6547_vm9 = vcmp.gt.f32.partialorder %v11010_v30, -0.0625  ;;  %v5605_v16 = vadd.f32 %v11144_v60, %v12721_v42  ;;  %v13151_v60 = vld [vmem:[#allocation28_spill] sm:$0xff] }
 0x395   :  { %v11332_v20 = vpop.f32.mrf.mxu3  ;;  %v6515_v8 = vadd.f32 %v6483_v13, %v6419_v29  ;;  %v6395_v9 = vmul.f32 0.5, %v6363_v5  ;;  %v6459_v7 = vmul.f32 0.16666667, %v6363_v5  ;;  %v5754_v54 = vadd.f32 %v11150_v27, %v5694_v58  ;;  %v13152_v13 = vld [vmem:[#allocation69_spill] sm:$0xff] }
 0x396   :  { %v6068_v2 = vadd.f32 %v11247_v56, %v5963_v19  ;;  %v6667_v33 = vsel %vm6539_vm8, %v6507_v14, %v7110_v48  ;;  %7188 = vpow2.f32 %v6608_v21  ;;  %v6380_v62 = vmul.f32 0.5, %v6348_v22  ;;  %v13153_v21 = vld [vmem:[#allocation43_spill] sm:$0xff] }
 0x397   :  { %v6444_v34 = vmul.f32 0.16666667, %v6348_v22  ;;  %v6675_v35 = vsel %vm6547_vm9, %v6515_v8, %v7118_v24  ;;  %v7133_v47 = vadd.f32 -1.0, %v7185_v3  ;;  %v11386_v63 = vmax.f32 %v11000_v53, %v5918_v55 }
 0x398   :  { %vm6699_vm10 = vcmp.gt.f32.partialorder %v10982_v26, 0.0  ;;  %vm6707_vm11 = vcmp.gt.f32.partialorder %v11010_v30, 0.0  ;;  %v5698_v57 = vadd.f32 %v13151_v60, %v5605_v16  ;;  %v6427_v18 = vadd.f32 %v6395_v9, %v11033_v23  ;;  %v13154_v16 = vld [vmem:[#allocation56_spill] sm:$0xff] }
 0x399   :  { %v11392_v56 = vsel %vm6699_vm10, %v10982_v26, %v6667_v33  ;;  %v6491_v48 = vmul.f32 %v6459_v7, %v11033_v23  ;;  %v5806_v53 = vadd.f32 %v13152_v13, %v5754_v54  ;;  %v11400_v52 = vsel %vm6707_vm11, %v11010_v30, %v6675_v35 }
 0x39a   :  { %v11360_v38 = vpop.f32.mrf.mxu1  ;;  %v7187_v29 = vpop.eup %7186  ;;  %v6412_v19 = vadd.f32 %v6380_v62, %v11330_v61  ;;  %v6476_v26 = vmul.f32 %v6444_v34, %v11330_v61  ;;  %v6371_v22 = vmul.f32 %v13153_v21, %v13153_v21  ;;  %v11408_v24 = vsel %vm6562_vm7, %v6530_v50, %v7133_v47 }
 0x39b   :  { %v6125_v36 = vpop.f32.mrf.mxu0  ;;  %v5877_v55 = vadd.f32 %v11263_v44, %v5806_v53  ;;  %v6762_v30 = vadd.f32 %v11342_v12, %v11392_v56  ;;  %v6594_v14 = vmul.f32 1.442695, %v11386_v63  ;;  %v5759_v8 = vadd.f32 %v13154_v16, %v5698_v57 }
 0x39c   :  { %v11370_v15 = vpop.f32.mrf.mxu2  ;;  %v6126_v39 = vadd.f32 %v6125_v36, %v6068_v2  ;;  %v5971_v36 = vadd.f32 %v11271_v45, %v12715_v37  ;;  %v7189_v3 = vpop.eup %7188  ;;  %v7111_v9 = vadd.f32 -1.0, %v7187_v29  ;;  %v6356_v7 = vmul.f32 %v11386_v63, %v11386_v63 }
 0x39d   :  { %v11378_v17 = vpop.f32.mrf.mxu3  ;;  %v11419_v50 = vadd.f32 %v11349_v4, %v11400_v52  ;;  %v5922_v44 = vadd.f32 %v11304_v31, %v5877_v55  ;;  %v6523_v33 = vadd.f32 %v6491_v48, %v6427_v18  ;;  %vm6555_vm12 = vcmp.gt.f32.partialorder %v11033_v23, -0.0625  ;;  %v13156_v4 = vld [vmem:[#allocation62_spill] sm:$0xff]  ;;  %v13157_v48 = vld [vmem:[#allocation55_spill] sm:$0xff] }
 0x39e   :  { %v6072_v54 = vadd.f32 %v11288_v43, %v5971_v36  ;;  %v6508_v12 = vadd.f32 %v6476_v26, %v6412_v19  ;;  %v7126_v62 = vadd.f32 -1.0, %v7189_v3  ;;  %v6403_v34 = vmul.f32 0.5, %v6371_v22 }
 0x39f   :  { %v6624_v35 = vmul.f32 1.442695, %v13153_v21  ;;  %vm6540_vm13 = vcmp.gt.f32.partialorder %v11330_v61, -0.0625  ;;  %7190 = vpow2.f32 %v6594_v14  ;;  %v5812_v43 = vadd.f32 %v13156_v4, %v5759_v8 }
 0x3a0   :  { %v6668_v31 = vsel %vm6540_vm13, %v6508_v12, %v7111_v9  ;;  %v6452_v18 = vmul.f32 0.16666667, %v6356_v7  ;;  %v11431_v29 = vmax.f32 %v13157_v48, %v5922_v44  ;;  %v5979_v13 = vadd.f32 %v11315_v40, %v12719_v1  ;;  %v13158_v12 = vld [vmem:[#allocation31_spill] sm:$0xff] }
 0x3a1   :  { %vm6700_vm14 = vcmp.gt.f32.partialorder %v11330_v61, 0.0  ;;  %v11439_v19 = vmul.f32 0.16666667, %v6371_v22  ;;  %7192 = vpow2.f32 %v6624_v35  ;;  %v5881_v26 = vadd.f32 %v11302_v10, %v5812_v43 }
 0x3a2   :  { %v6175_v27 = vpop.f32.mrf.mxu1  ;;  %v11443_v1 = vsel %vm6700_vm14, %v11330_v61, %v6668_v31  ;;  %v6484_v14 = vmul.f32 %v6452_v18, %v11386_v63  ;;  %v6076_v8 = vadd.f32 %v11332_v20, %v5979_v13  ;;  %v6610_v10 = vmul.f32 1.442695, %v11431_v29 }
 0x3a3   :  { %v6130_v46 = vpop.f32.mrf.mxu0  ;;  %v6176_v5 = vadd.f32 %v6175_v27, %v6126_v39  ;;  %v13155_v39 = vld [vmem:[#allocation11_spill] sm:$0xff]  ;;  %v6388_v27 = vmul.f32 0.5, %v6356_v7  ;;  %v5926_v22 = vadd.f32 %v11360_v38, %v5881_v26  ;;  %v6364_v61 = vmul.f32 %v11431_v29, %v11431_v29 }
 0x3a4   :  { %v6250_v58 = vpop.f32.mrf.mxu2  ;;  %v6131_v47 = vadd.f32 %v6130_v46, %v6072_v54  ;;  %v6683_v44 = vsel %vm6555_vm12, %v6523_v33, %v7126_v62  ;;  %vm6548_vm15 = vcmp.gt.f32.partialorder %v11386_v63, -0.0625  ;;  %v11461_v20 = vadd.f32 %v6403_v34, %v13153_v21  ;;  %v13159_v33 = vld [vmem:[#allocation40_spill] sm:$0xff] }
 0x3a5   :  { %v6251_v37 = vadd.f32 %v6250_v58, %v6176_v5  ;;  %v6295_v45 = vpop.f32.mrf.mxu3  ;;  %v6420_v40 = vadd.f32 %v6388_v27, %v11386_v63  ;;  %v7191_v16 = vpop.eup %7190  ;;  %v6763_v4 = vadd.f32 %v6762_v30, %v11443_v1  ;;  %v11469_v62 = vmax.f32 %v13159_v33, %v5926_v22  ;;  %v13160_v22 = vld [vmem:[#allocation14_spill] sm:$0xff] }
 0x3a6   :  { %vm6715_vm0 = vcmp.gt.f32.partialorder %v11033_v23, 0.0  ;;  %v6460_v13 = vmul.f32 0.16666667, %v6364_v61  ;;  %vm6708_vm3 = vcmp.gt.f32.partialorder %v11386_v63, 0.0  ;;  %vm6722_vm4 = vcmp.gt.f32.partialorder %v10975_v0, 0.0 }
 0x3a7   :  { %v6296_v2 = vadd.f32 %v6295_v45, %v6251_v37  ;;  %v11463_v38 = vpop.eup %7192  ;;  %v6516_v43 = vadd.f32 %v6484_v14, %v6420_v40  ;;  %vm6556_vm7 = vcmp.gt.f32.partialorder %v11431_v29, -0.0625  ;;  %vm6563_vm8 = vcmp.gt.f32.partialorder %v13153_v21, -0.0625 }
 0x3a8   :  { %vm6716_vm9 = vcmp.gt.f32.partialorder %v11431_v29, 0.0  ;;  %vm6723_vm11 = vcmp.gt.f32.partialorder %v13153_v21, 0.0  ;;  %vm6564_vm13 = vcmp.gt.f32.partialorder %v11469_v62, -0.0625  ;;  %vm6724_vm14 = vcmp.gt.f32.partialorder %v11469_v62, 0.0 }
 0x3a9   :  { %v11426_v60 = vmax.f32 %v13155_v39, %v6296_v2 }
 0x3aa   :  { %v6181_v57 = vpop.f32.mrf.mxu1 }
 0x3ab   :  { %v6182_v53 = vadd.f32 %v6181_v57, %v6131_v47  ;;  %v6349_v36 = vmul.f32 %v11426_v60, %v11426_v60  ;;  %v6135_v5 = vpop.f32.mrf.mxu0  ;;  %v6580_v58 = vmul.f32 1.442695, %v11426_v60  ;;  %v5987_v47 = vadd.f32 %v11370_v15, %v12721_v42 }
 0x3ac   :  { %v6254_v46 = vpop.f32.mrf.mxu2  ;;  %v6136_v2 = vadd.f32 %v6135_v5, %v6076_v8  ;;  %v7119_v57 = vadd.f32 -1.0, %v7191_v16  ;;  %v6396_v15 = vmul.f32 0.5, %v6364_v61  ;;  %vm6541_vm1 = vcmp.gt.f32.partialorder %v11426_v60, -0.0625 }
 0x3ad   :  { %v6255_v3 = vadd.f32 %v6254_v46, %v6182_v53  ;;  %v6299_v55 = vpop.f32.mrf.mxu3  ;;  %v6381_v37 = vmul.f32 0.5, %v6349_v36  ;;  %v6445_v45 = vmul.f32 0.16666667, %v6349_v36  ;;  %7194 = vpow2.f32 %v6580_v58 }
 0x3ae   :  { %7196 = vpow2.f32 %v6610_v10  ;;  %v6080_v58 = vadd.f32 %v11378_v17, %v5987_v47  ;;  %vm6701_vm2 = vcmp.gt.f32.partialorder %v11426_v60, 0.0  ;;  %v6492_v61 = vmul.f32 %v6460_v13, %v11431_v29 }
 0x3af   :  { %v6300_v9 = vadd.f32 %v6299_v55, %v6255_v3  ;;  %v6413_v7 = vadd.f32 %v6381_v37, %v11426_v60  ;;  %v6477_v54 = vmul.f32 %v6445_v45, %v11426_v60  ;;  %v6676_v3 = vsel %vm6548_vm15, %v6516_v43, %v7119_v57 }
 0x3b0   :  { %v6626_v45 = vmul.f32 1.442695, %v11469_v62 }
 0x3b1   :  { %v11457_v35 = vmax.f32 %v13158_v12, %v6300_v9  ;;  %v6509_v48 = vadd.f32 %v6477_v54, %v6413_v7  ;;  %v11493_v7 = vsel %vm6708_vm3, %v11386_v63, %v6676_v3  ;;  %v6428_v54 = vadd.f32 %v6396_v15, %v11431_v29 }
 0x3b2   :  { %v6187_v39 = vpop.f32.mrf.mxu1  ;;  %v6499_v12 = vmul.f32 %v11439_v19, %v13153_v21  ;;  %v6772_v33 = vadd.f32 %v11419_v50, %v11493_v7 }
 0x3b3   :  { %v6188_v31 = vadd.f32 %v6187_v39, %v6136_v2  ;;  %v6357_v18 = vmul.f32 %v11457_v35, %v11457_v35  ;;  %v7195_v34 = vpop.eup %7194  ;;  %v6596_v42 = vmul.f32 1.442695, %v11457_v35  ;;  %v6140_v26 = vpop.f32.mrf.mxu0  ;;  %v6372_v2 = vmul.f32 %v11469_v62, %v11469_v62 }
 0x3b4   :  { %v6258_v27 = vpop.f32.mrf.mxu2  ;;  %v7112_v46 = vadd.f32 -1.0, %v7195_v34  ;;  %v7197_v16 = vpop.eup %7196  ;;  %v6141_v8 = vadd.f32 %v6140_v26, %v6080_v58  ;;  %vm6549_vm5 = vcmp.gt.f32.partialorder %v11457_v35, -0.0625  ;;  %vm6709_vm6 = vcmp.gt.f32.partialorder %v11457_v35, 0.0 }
 0x3b5   :  { %v6259_v30 = vadd.f32 %v6258_v27, %v6188_v31  ;;  %v6303_v53 = vpop.f32.mrf.mxu3  ;;  %v6389_v36 = vmul.f32 0.5, %v6357_v18  ;;  %v6453_v5 = vmul.f32 0.16666667, %v6357_v18  ;;  %7198 = vpow2.f32 %v6596_v42 }
 0x3b6   :  { %v6669_v37 = vsel %vm6541_vm1, %v6509_v48, %v7112_v46  ;;  %7200 = vpow2.f32 %v6626_v45  ;;  %v7127_v31 = vadd.f32 -1.0, %v7197_v16  ;;  %v11509_v27 = vsel %vm6715_vm0, %v11033_v23, %v6683_v44 }
 0x3b7   :  { %v6304_v55 = vadd.f32 %v6303_v53, %v6259_v30  ;;  %v11482_v40 = vsel %vm6701_vm2, %v11426_v60, %v6669_v37  ;;  %v6421_v14 = vadd.f32 %v6389_v36, %v11457_v35  ;;  %v6485_v17 = vmul.f32 %v6453_v5, %v11457_v35  ;;  %v13161_v5 = vld [vmem:[#allocation20_spill] sm:$0xff] }
 0x3b8   :  { %v6764_v10 = vadd.f32 %v6763_v4, %v11482_v40  ;;  %v6404_v15 = vmul.f32 0.5, %v6372_v2  ;;  %v6468_v13 = vmul.f32 0.16666667, %v6372_v2  ;;  %v6524_v50 = vadd.f32 %v6492_v61, %v6428_v54 }
 0x3b9   :  { %v11489_v9 = vmax.f32 %v13160_v22, %v6304_v55  ;;  %v6517_v57 = vadd.f32 %v6485_v17, %v6421_v14  ;;  %v11525_v55 = vsel %vm6722_vm4, %v10975_v0, %v11408_v24  ;;  %v7134_v45 = vadd.f32 -1.0, %v11463_v38 }
 0x3ba   :  { %v6193_v60 = vpop.f32.mrf.mxu1  ;;  %6765 = vadd.xlane.f32.xlu2 %v6764_v10  ;;  %v6684_v3 = vsel %vm6556_vm7, %v6524_v50, %v7127_v31  ;;  %v6500_v37 = vmul.f32 %v6468_v13, %v11469_v62  ;;  %v6780_v14 = vadd.f32 %v11352_v25, %v11509_v27  ;;  %v6531_v24 = vadd.f32 %v6499_v12, %v11461_v20 }
 0x3bb   :  { %v6194_v47 = vadd.f32 %v6193_v60, %v6141_v8  ;;  %v6365_v4 = vmul.f32 %v11489_v9, %v11489_v9  ;;  %v6612_v63 = vmul.f32 1.442695, %v11489_v9  ;;  %v7199_v43 = vpop.eup %7198  ;;  %v11535_v0 = vsel %vm6716_vm9, %v11431_v29, %v6684_v3  ;;  %v13164_v3 = vld [vmem:[#allocation26_spill] sm:$0xff] }
 0x3bc   :  { %v6262_v39 = vpop.f32.mrf.mxu2  ;;  %v7120_v34 = vadd.f32 -1.0, %v7199_v43  ;;  %v7201_v36 = vpop.eup %7200  ;;  %vm6557_vm10 = vcmp.gt.f32.partialorder %v11489_v9, -0.0625  ;;  %v6691_v25 = vsel %vm6563_vm8, %v6531_v24, %v7134_v45  ;;  %vm6717_vm12 = vcmp.gt.f32.partialorder %v11489_v9, 0.0 }
 0x3bd   :  { %v6263_v19 = vadd.f32 %v6262_v39, %v6194_v47  ;;  %v6307_v18 = vpop.f32.mrf.mxu3  ;;  %v6397_v48 = vmul.f32 0.5, %v6365_v4  ;;  %v6461_v42 = vmul.f32 0.16666667, %v6365_v4  ;;  %7202 = vpow2.f32 %v6612_v63 }
 0x3be   :  { %v6677_v53 = vsel %vm6549_vm5, %v6517_v57, %v7120_v34  ;;  %v7135_v10 = vadd.f32 -1.0, %v7201_v36  ;;  %v6781_v29 = vadd.f32 %v6780_v14, %v11535_v0  ;;  %v11550_v63 = vsel %vm6723_vm11, %v13153_v21, %v6691_v25  ;;  %v13162_v36 = vld [vmem:[#allocation18_spill] sm:$0xff] }
 0x3bf   :  { %v6308_v30 = vadd.f32 %v6307_v18, %v6263_v19  ;;  %v11514_v46 = vsel %vm6709_vm6, %v11457_v35, %v6677_v53  ;;  %v6429_v23 = vadd.f32 %v6397_v48, %v11489_v9  ;;  %v6493_v44 = vmul.f32 %v6461_v42, %v11489_v9 }
 0x3c0   :  { %v6773_v26 = vadd.f32 %v6772_v33, %v11514_v46  ;;  %v6436_v35 = vadd.f32 %v6404_v15, %v11469_v62  ;;  %v6788_v43 = vadd.f32 %v11346_v51, %v11525_v55  ;;  %v7013_v51 = vld [vmem:[%s11891_s7] sm:$0xff] }
 0x3c1   :  { %v6341_v58 = vmax.f32 %v13161_v5, %v6308_v30  ;;  %v6525_v22 = vadd.f32 %v6493_v44, %v6429_v23 }
 0x3c2   :  { %6774 = vadd.xlane.f32.xlu2 %v6773_v26  ;;  %v6532_v38 = vadd.f32 %v6500_v37, %v6436_v35  ;;  %v6789_v19 = vadd.f32 %v6788_v43, %v11550_v63 }
 0x3c3   :  { %v6373_v17 = vmul.f32 %v6341_v58, %v6341_v58  ;;  %v6628_v16 = vmul.f32 1.442695, %v6341_v58  ;;  %v7203_v8 = vpop.eup %7202  ;;  %vm6565_vm15 = vcmp.gt.f32.partialorder %v6341_v58, -0.0625  ;;  %vm6725_vm0 = vcmp.gt.f32.partialorder %v6341_v58, 0.0 }
 0x3c4   :  { %v7128_v60 = vadd.f32 -1.0, %v7203_v8  ;;  %v6692_v39 = vsel %vm6564_vm13, %v6532_v38, %v7135_v10  ;;  %v13165_v38 = vld [vmem:[#allocation59_spill] sm:$0xff] }
 0x3c5   :  { %v6405_v54 = vmul.f32 0.5, %v6373_v17  ;;  %v6469_v61 = vmul.f32 0.16666667, %v6373_v17  ;;  %7204 = vpow2.f32 %v6628_v16  ;;  %v11556_v33 = vsel %vm6724_vm14, %v11469_v62, %v6692_v39 }
 0x3c6   :  { %v6685_v2 = vsel %vm6557_vm10, %v6525_v22, %v7128_v60  ;;  %v6790_v21 = vadd.f32 %v6789_v19, %v11556_v33  ;;  %v7217_v62 = vmov 1024.0  }
 0x3c7   :  { %v11546_v20 = vsel %vm6717_vm12, %v11489_v9, %v6685_v2  ;;  %v6437_v12 = vadd.f32 %v6405_v54, %v6341_v58  ;;  %v6501_v47 = vmul.f32 %v6469_v61, %v6341_v58  ;;  %7206 = vrcp.f32 %v7217_v62  ;;  %v13166_v2 = vld [vmem:[#allocation50_spill] sm:$0xff] }
 0x3c8   :  { %v6782_v4 = vadd.f32 %v6781_v29, %v11546_v20 }
 0x3c9   :  { %v6533_v9 = vadd.f32 %v6501_v47, %v6437_v12 }
 0x3ca   :  { %6783 = vadd.xlane.f32.xlu0 %v6782_v4 }
 0x3cb   :  { %v7205_v57 = vpop.eup %7204 }
 0x3cc   :  { %v7136_v31 = vadd.f32 -1.0, %v7205_v57 }
 0x3cd   :  { %v7207_v42 = vpop.eup %7206 }
 0x3ce   :  { %v6693_v18 = vsel %vm6565_vm15, %v6533_v9, %v7136_v31  ;;  %v6795_v15 = vmul.f32 1024.0, %v7207_v42  ;;  %vm6799_vm1 = vweird.f32 %v7207_v42 }
 0x3cf   :  { %v11560_v34 = vsel %vm6725_vm0, %v6341_v58, %v6693_v18  ;;  %v13163_v58 = vld [vmem:[#allocation21_spill] sm:$0xff] }
 0x3d0   :  { %v6791_v48 = vadd.f32 %v6790_v21, %v11560_v34  ;;  %v6796_v13 = vsub.f32 1.0, %v6795_v15 }
 0x3d2   :  { %6792 = vadd.xlane.f32.xlu1 %v6791_v48  ;;  %v6797_v30 = vmul.f32 %v7207_v42, %v6796_v13 }
 0x3d4   :  { %v6798_v53 = vadd.f32 %v7207_v42, %v6797_v30 }
 0x3d6   :  { %v11566_v50 = vsel %vm6799_vm1, %v7207_v42, %v6798_v53 }
 0x3de   :  { %7019 = vperm.xlu0 %7139, %v7013_v51  }
 0x42d   :  { %v6766_v23 = vpop.xlane.xlu2 %6765 }
 0x42e   :  { %v6801_v44 = vmul.f32 %v11566_v50, %v6766_v23  ;;  %v13168_v23 = vld [vmem:[#allocation19_spill] sm:$0xff] }
 0x430   :  { %v11570_v5 = vsub.f32 %v13162_v36, %v6801_v44  ;;  %v11573_v26 = vsub.f32 %v13163_v58, %v6801_v44  ;;  %v11576_v35 = vsub.f32 %v13164_v3, %v6801_v44  ;;  %v11579_v37 = vsub.f32 %v11244_v28, %v6801_v44  ;;  %v13170_v58 = vld [vmem:[#allocation72_spill] sm:$0xff] }
 0x431   :  { %v11586_v17 = vsub.f32 %v11318_v41, %v6801_v44  ;;  %v11591_v24 = vsub.f32 %v11392_v56, %v6801_v44  ;;  %v11597_v54 = vsub.f32 %v11443_v1, %v6801_v44  ;;  %v13167_v56 = vld [vmem:[#allocation71_spill] sm:$0xff]  ;;  %v11611_v47 = vsub.f32 %v11482_v40, %v6801_v44 }
 0x432   :  { %v6837_v45 = vmul.f32 %v11570_v5, %v11570_v5  ;;  %v6838_v14 = vmul.f32 %v11573_v26, %v11573_v26  ;;  %v6839_v16 = vmul.f32 %v11576_v35, %v11576_v35  ;;  %v6840_v10 = vmul.f32 %v11579_v37, %v11579_v37 }
 0x433   :  { %v6841_v41 = vmul.f32 %v11586_v17, %v11586_v17  ;;  %v6842_v1 = vmul.f32 %v11591_v24, %v11591_v24  ;;  %v6843_v40 = vmul.f32 %v11597_v54, %v11597_v54 }
 0x434   :  { %v6869_v8 = vadd.f32 %v6838_v14, %v6837_v45 }
 0x435   :  { %v6775_v22 = vpop.xlane.xlu2 %6774 }
 0x436   :  { %v6802_v28 = vmul.f32 %v11566_v50, %v6775_v22  ;;  %v6870_v60 = vadd.f32 %v6869_v8, %v6839_v16 }
 0x438   :  { %v6871_v61 = vadd.f32 %v6870_v60, %v6840_v10  ;;  %v11602_v25 = vsub.f32 %v13165_v38, %v6802_v28  ;;  %v11605_v29 = vsub.f32 %v13166_v2, %v6802_v28  ;;  %v11608_v12 = vsub.f32 %v13167_v56, %v6802_v28 }
 0x439   :  { %v11616_v4 = vsub.f32 %v11276_v11, %v6802_v28  ;;  %v11623_v9 = vsub.f32 %v11323_v6, %v6802_v28  ;;  %v6844_v11 = vmul.f32 %v11611_v47, %v11611_v47  ;;  %v11632_v48 = vsub.f32 %v11400_v52, %v6802_v28  ;;  %v13169_v52 = vld [vmem:[#allocation22_spill] sm:$0xff] }
 0x43a   :  { %v6872_v39 = vadd.f32 %v6871_v61, %v6841_v41  ;;  %v6845_v43 = vmul.f32 %v11602_v25, %v11602_v25  ;;  %v6846_v57 = vmul.f32 %v11605_v29, %v11605_v29  ;;  %v6847_v19 = vmul.f32 %v11608_v12, %v11608_v12 }
 0x43b   :  { %v6848_v6 = vmul.f32 %v11616_v4, %v11616_v4  ;;  %v11638_v15 = vsub.f32 %v11493_v7, %v6802_v28  ;;  %v6849_v13 = vmul.f32 %v11623_v9, %v11623_v9  ;;  %v11652_v45 = vsub.f32 %v11514_v46, %v6802_v28 }
 0x43c   :  { %v6873_v31 = vadd.f32 %v6872_v39, %v6842_v1  ;;  %v6878_v18 = vadd.f32 %v6846_v57, %v6845_v43  ;;  %v6850_v7 = vmul.f32 %v11632_v48, %v11632_v48  ;;  %v13171_v43 = vld [vmem:[#allocation65_spill] sm:$0xff] }
 0x43d   :  { %v6784_v21 = vpop.xlane.xlu0 %6783  ;;  %v6851_v60 = vmul.f32 %v11638_v15, %v11638_v15 }
 0x43e   :  { %v6803_v51 = vmul.f32 %v11566_v50, %v6784_v21  ;;  %v6874_v62 = vadd.f32 %v6873_v31, %v6843_v40  ;;  %v6879_v42 = vadd.f32 %v6878_v18, %v6847_v19  ;;  %v13173_v19 = vld [vmem:[#allocation73_spill] sm:$0xff] }
 0x440   :  { %v6875_v30 = vadd.f32 %v6874_v62, %v6844_v11  ;;  %v6880_v53 = vadd.f32 %v6879_v42, %v6848_v6  ;;  %v11643_v44 = vsub.f32 %v13168_v23, %v6803_v51  ;;  %v11646_v36 = vsub.f32 %v13169_v52, %v6803_v51 }
 0x441   :  { %v11649_v3 = vsub.f32 %v13170_v58, %v6803_v51  ;;  %v11659_v8 = vsub.f32 %v11283_v59, %v6803_v51  ;;  %v11667_v28 = vsub.f32 %v11326_v49, %v6803_v51  ;;  %v6852_v59 = vmul.f32 %v11652_v45, %v11652_v45  ;;  %v13172_v49 = vld [vmem:[#allocation51_spill] sm:$0xff] }
 0x442   :  { %6876 = vadd.xlane.f32.xlu2 %v6875_v30  ;;  %v6881_v14 = vadd.f32 %v6880_v53, %v6849_v13  ;;  %v6853_v16 = vmul.f32 %v11643_v44, %v11643_v44  ;;  %v6854_v22 = vmul.f32 %v11646_v36, %v11646_v36  ;;  %v11674_v56 = vsub.f32 %v11509_v27, %v6803_v51 }
 0x443   :  { %v6855_v61 = vmul.f32 %v11649_v3, %v11649_v3  ;;  %v6856_v1 = vmul.f32 %v11659_v8, %v11659_v8  ;;  %v11688_v21 = vsub.f32 %v11535_v0, %v6803_v51  ;;  %v6857_v27 = vmul.f32 %v11667_v28, %v11667_v28 }
 0x444   :  { %v6882_v41 = vadd.f32 %v6881_v14, %v6850_v7  ;;  %v6887_v38 = vadd.f32 %v6854_v22, %v6853_v16  ;;  %v11700_v13 = vsub.f32 %v11546_v20, %v6803_v51  ;;  %v6858_v0 = vmul.f32 %v11674_v56, %v11674_v56 }
 0x445   :  { %v6793_v10 = vpop.xlane.xlu1 %6792 }
 0x446   :  { %v6804_v46 = vmul.f32 %v11566_v50, %v6793_v10  ;;  %v6883_v2 = vadd.f32 %v6882_v41, %v6851_v60  ;;  %v6888_v39 = vadd.f32 %v6887_v38, %v6855_v61  ;;  %v6860_v14 = vmul.f32 %v11700_v13, %v11700_v13 }
 0x448   :  { %v11679_v57 = vsub.f32 %v13171_v43, %v6804_v46  ;;  %v11682_v40 = vsub.f32 %v13172_v49, %v6804_v46  ;;  %v6884_v31 = vadd.f32 %v6883_v2, %v6852_v59  ;;  %v11685_v18 = vsub.f32 %v13173_v19, %v6804_v46 }
 0x449   :  { %v6889_v11 = vadd.f32 %v6888_v39, %v6856_v1  ;;  %v11695_v6 = vsub.f32 %v11313_v32, %v6804_v46  ;;  %v11705_v53 = vsub.f32 %v11525_v55, %v6804_v46  ;;  %v6859_v32 = vmul.f32 %v11688_v21, %v11688_v21 }
 0x44a   :  { %v6861_v62 = vmul.f32 %v11679_v57, %v11679_v57  ;;  %6885 = vadd.xlane.f32.xlu2 %v6884_v31  ;;  %v6862_v42 = vmul.f32 %v11682_v40, %v11682_v40  ;;  %v6863_v23 = vmul.f32 %v11685_v18, %v11685_v18  ;;  %v11712_v7 = vsub.f32 %v11550_v63, %v6804_v46 }
 0x44b   :  { %v6890_v30 = vadd.f32 %v6889_v11, %v6857_v27  ;;  %v6864_v20 = vmul.f32 %v11695_v6, %v11695_v6  ;;  %v11719_v16 = vsub.f32 %v11556_v33, %v6804_v46  ;;  %v6865_v22 = vmul.f32 %v11705_v53, %v11705_v53 }
 0x44c   :  { %v6896_v52 = vadd.f32 %v6862_v42, %v6861_v62  ;;  %v11724_v41 = vsub.f32 %v11560_v34, %v6804_v46  ;;  %v6866_v63 = vmul.f32 %v11712_v7, %v11712_v7 }
 0x44d   :  { %v6891_v58 = vadd.f32 %v6890_v30, %v6858_v0  ;;  %v6867_v38 = vmul.f32 %v11719_v16, %v11719_v16 }
 0x44e   :  { %v6897_v51 = vadd.f32 %v6896_v52, %v6863_v23  ;;  %v6868_v33 = vmul.f32 %v11724_v41, %v11724_v41 }
 0x44f   :  { %v6892_v55 = vadd.f32 %v6891_v58, %v6859_v32  ;;  %v6909_v58 = vld [vmem:[%s11892_s6] sm:$0xff] }
 0x450   :  { %v6898_v10 = vadd.f32 %v6897_v51, %v6864_v20 }
 0x451   :  { %v6893_v60 = vadd.f32 %v6892_v55, %v6860_v14 }
 0x452   :  { %v6899_v61 = vadd.f32 %v6898_v10, %v6865_v22 }
 0x453   :  { %6894 = vadd.xlane.f32.xlu2 %v6893_v60 }
 0x454   :  { %v6900_v59 = vadd.f32 %v6899_v61, %v6866_v63 }
 0x456   :  { %v6901_v2 = vadd.f32 %v6900_v59, %v6867_v38  ;;  %v6910_v59 = vld [vmem:[%s11892_s6 + $0x8] sm:$0xff] }
 0x458   :  { %v6902_v1 = vadd.f32 %v6901_v2, %v6868_v33 }
 0x45b   :  { %6903 = vadd.xlane.f32.xlu2 %v6902_v1 }
 0x4b5   :  { %v6877_v39 = vpop.xlane.xlu2 %6876 }
 0x4b6   :  { %v6905_v43 = vmul.f32 %v6877_v39, %v11566_v50 }
 0x4b8   :  { %v6913_v34 = vadd.f32 1e-05, %v6905_v43 }
 0x4ba   :  { %7208 = vrsqrt.f32 %v6913_v34  ;;  %vm6923_vm3 = vweird.f32 %v6913_v34 }
 0x4bd   :  { %v6886_v46 = vpop.xlane.xlu2 %6885 }
 0x4be   :  { %v6906_v49 = vmul.f32 %v6886_v46, %v11566_v50 }
 0x4c0   :  { %v7209_v31 = vpop.eup %7208  ;;  %v6914_v19 = vadd.f32 1e-05, %v6906_v49 }
 0x4c1   :  { %v6918_v27 = vmul.f32 %v7209_v31, %v6913_v34  ;;  %vm6924_vm2 = vweird.f32 %v7209_v31 }
 0x4c2   :  { %7210 = vrsqrt.f32 %v6914_v19  ;;  %vm6925_vm4 = vmor %vm6923_vm3, %vm6924_vm2  ;;  %vm6933_vm6 = vweird.f32 %v6914_v19 }
 0x4c3   :  { %v6919_v11 = vmul.f32 %v7209_v31, %v6918_v27  ;;  %v7016_v27 = vld [vmem:[%s11891_s7 + $0x18] sm:$0xff] }
 0x4c5   :  { %v6920_v62 = vmul.f32 0.5, %v6919_v11 }
 0x4c6   :  { %v6895_v42 = vpop.xlane.xlu2 %6894 }
 0x4c7   :  { %v6921_v0 = vsub.f32 1.5, %v6920_v62  ;;  %v6907_v30 = vmul.f32 %v6895_v42, %v11566_v50 }
 0x4c8   :  { %v7211_v23 = vpop.eup %7210 }
 0x4c9   :  { %v6928_v52 = vmul.f32 %v7211_v23, %v6914_v19  ;;  %v6915_v32 = vadd.f32 1e-05, %v6907_v30  ;;  %v6922_v20 = vmul.f32 %v7209_v31, %v6921_v0  ;;  %vm6934_vm5 = vweird.f32 %v7211_v23 }
 0x4ca   :  { %vm6935_vm7 = vmor %vm6933_vm6, %vm6934_vm5 }
 0x4cb   :  { %v6929_v51 = vmul.f32 %v7211_v23, %v6928_v52  ;;  %7212 = vrsqrt.f32 %v6915_v32  ;;  %v6926_v14 = vsel %vm6925_vm4, %v7209_v31, %v6922_v20  ;;  %vm6943_vm9 = vweird.f32 %v6915_v32  ;;  %v6911_v31 = vld [vmem:[%s11892_s6 + $0x10] sm:$0xff] }
 0x4cc   :  { %v6957_v55 = vmul.f32 %v6926_v14, %v6909_v58 }
 0x4cd   :  { %v6930_v22 = vmul.f32 0.5, %v6929_v51  ;;  %v7014_v51 = vld [vmem:[%s11891_s7 + $0x8] sm:$0xff] }
 0x4ce   :  { %v6904_v10 = vpop.xlane.xlu2 %6903  ;;  %6963 = vperm.xlu2 %7141, %v6957_v55  }
 0x4cf   :  { %v6931_v60 = vsub.f32 1.5, %v6930_v22  ;;  %v6908_v63 = vmul.f32 %v6904_v10, %v11566_v50 }
 0x4d1   :  { %v7213_v61 = vpop.eup %7212  ;;  %v6916_v38 = vadd.f32 1e-05, %v6908_v63  ;;  %v6932_v33 = vmul.f32 %v7211_v23, %v6931_v60  ;;  %v7020_v63 = vpop.permute.xlu0 %7019 }
 0x4d2   :  { %v6938_v2 = vmul.f32 %v7213_v61, %v6915_v32  ;;  %vm6944_vm8 = vweird.f32 %v7213_v61  ;;  %v7015_v32 = vld [vmem:[%s11891_s7 + $0x10] sm:$0xff] }
 0x4d3   :  { %7214 = vrsqrt.f32 %v6916_v38  ;;  %v6936_v1 = vsel %vm6935_vm7, %v7211_v23, %v6932_v33  ;;  %vm6945_vm10 = vmor %vm6943_vm9, %vm6944_vm8  ;;  %vm6953_vm12 = vweird.f32 %v6916_v38  ;;  %v6912_v23 = vld [vmem:[%s11892_s6 + $0x18] sm:$0xff] }
 0x4d4   :  { %v6939_v39 = vmul.f32 %v7213_v61, %v6938_v2  ;;  %v6958_v43 = vmul.f32 %v6936_v1, %v6910_v59 }
 0x4d6   :  { %v6940_v34 = vmul.f32 0.5, %v6939_v39  ;;  %6968 = vperm.xlu0 %7139, %v6958_v43  }
 0x4d8   :  { %v6941_v46 = vsub.f32 1.5, %v6940_v34 }
 0x4d9   :  { %v7215_v49 = vpop.eup %7214 }
 0x4da   :  { %v6948_v50 = vmul.f32 %v7215_v49, %v6916_v38  ;;  %v6942_v19 = vmul.f32 %v7213_v61, %v6941_v46  ;;  %vm6954_vm11 = vweird.f32 %v7215_v49 }
 0x4db   :  { %vm6955_vm13 = vmor %vm6953_vm12, %vm6954_vm11 }
 0x4dc   :  { %v6949_v11 = vmul.f32 %v7215_v49, %v6948_v50  ;;  %v6946_v62 = vsel %vm6945_vm10, %v7213_v61, %v6942_v19 }
 0x4dd   :  { %v6959_v42 = vmul.f32 %v6946_v62, %v6911_v31 }
 0x4de   :  { %v6950_v0 = vmul.f32 0.5, %v6949_v11  ;;  %7034 = vperm.xlu0 %7139, %v7016_v27  }
 0x4df   :  { %6973 = vperm.xlu1 %7140, %v6959_v42  }
 0x4e0   :  { %v6951_v30 = vsub.f32 1.5, %v6950_v0 }
 0x4e2   :  { %v6952_v52 = vmul.f32 %v7215_v49, %v6951_v30 }
 0x4e4   :  { %v6956_v58 = vsel %vm6955_vm13, %v7215_v49, %v6952_v52 }
 0x4e5   :  { %v6960_v20 = vmul.f32 %v6956_v58, %v6912_v23 }
 0x4e7   :  { %7029 = vperm.xlu1 %7140, %v7015_v32   ;;  %6978 = vperm.xlu2 %7141, %v6960_v20  }
 0x4ef   :  { %7024 = vperm.xlu2 %7141, %v7014_v51  }
 0x528   :  { %v6964_v14 = vpop.permute.xlu2 %6963 }
 0x529   :  { %v6981_v55 = vmul.f32 %v6964_v14, %v11570_v5  ;;  %v6982_v22 = vmul.f32 %v6964_v14, %v11573_v26  ;;  %v6983_v10 = vmul.f32 %v6964_v14, %v11576_v35  ;;  %v6984_v60 = vmul.f32 %v6964_v14, %v11579_v37 }
 0x52a   :  { %v6985_v61 = vmul.f32 %v6964_v14, %v11586_v17  ;;  %v6986_v38 = vmul.f32 %v6964_v14, %v11591_v24  ;;  %v6987_v59 = vmul.f32 %v6964_v14, %v11597_v54  ;;  %v6988_v39 = vmul.f32 %v6964_v14, %v11611_v47 }
 0x52b   :  { %v7037_v33 = vadd.f32 %v7020_v63, %v6981_v55  ;;  %v7038_v2 = vadd.f32 %v7020_v63, %v6982_v22  ;;  %v7039_v1 = vadd.f32 %v7020_v63, %v6983_v10  ;;  %v7040_v43 = vadd.f32 %v7020_v63, %v6984_v60 }
 0x52c   :  { %v7041_v5 = vadd.f32 %v7020_v63, %v6985_v61  ;;  %v7042_v26 = vadd.f32 %v7020_v63, %v6986_v38  ;;  %v7043_v35 = vadd.f32 %v7020_v63, %v6987_v59  ;;  %v7044_v37 = vadd.f32 %v7020_v63, %v6988_v39 }
 0x52d   :  { %7069 = vst [vmem:[%s11893_s8] sm:$0xff] %v7037_v33 }
 0x52e   :  { %7070 = vst [vmem:[%s11893_s8 + $0x8] sm:$0xff] %v7038_v2 }
 0x52f   :  { %7071 = vst [vmem:[%s11893_s8 + $0x10] sm:$0xff] %v7039_v1 }
 0x530   :  { %7072 = vst [vmem:[%s11893_s8 + $0x18] sm:$0xff] %v7040_v43 }
 0x531   :  { %7073 = vst [vmem:[%s11893_s8 + $0x20] sm:$0xff] %v7041_v5 }
 0x532   :  { %7074 = vst [vmem:[%s11893_s8 + $0x28] sm:$0xff] %v7042_v26 }
 0x533   :  { %7075 = vst [vmem:[%s11893_s8 + $0x30] sm:$0xff] %v7043_v35 }
 0x534   :  { %7076 = vst [vmem:[%s11893_s8 + $0x38] sm:$0xff] %v7044_v37 }
 0x541   :  { %v6979_v17 = vpop.permute.xlu2 %6978 }
 0x542   :  { %v7011_v20 = vmul.f32 %v6979_v17, %v11719_v16 }
 0x548   :  { %v6969_v24 = vpop.permute.xlu0 %6968 }
 0x549   :  { %v6989_v54 = vmul.f32 %v6969_v24, %v11602_v25  ;;  %v6990_v47 = vmul.f32 %v6969_v24, %v11605_v29  ;;  %v6991_v34 = vmul.f32 %v6969_v24, %v11608_v12  ;;  %v6992_v46 = vmul.f32 %v6969_v24, %v11616_v4  ;;  %v7025_v31 = vpop.permute.xlu2 %7024 }
 0x54a   :  { %v6993_v49 = vmul.f32 %v6969_v24, %v11623_v9  ;;  %v6994_v50 = vmul.f32 %v6969_v24, %v11632_v48  ;;  %v6995_v19 = vmul.f32 %v6969_v24, %v11638_v15  ;;  %v6996_v42 = vmul.f32 %v6969_v24, %v11652_v45 }
 0x54b   :  { %v7045_v27 = vadd.f32 %v7025_v31, %v6989_v54  ;;  %v7046_v11 = vadd.f32 %v7025_v31, %v6990_v47  ;;  %v7047_v62 = vadd.f32 %v7025_v31, %v6991_v34  ;;  %v7048_v0 = vadd.f32 %v7025_v31, %v6992_v46 }
 0x54c   :  { %v7049_v25 = vadd.f32 %v7025_v31, %v6993_v49  ;;  %v7050_v29 = vadd.f32 %v7025_v31, %v6994_v50  ;;  %v7051_v12 = vadd.f32 %v7025_v31, %v6995_v19  ;;  %v7005_v4 = vmul.f32 %v6979_v17, %v11679_v57 }
 0x54d   :  { %7077 = vst [vmem:[%s11893_s8 + $0x40] sm:$0xff] %v7045_v27  ;;  %v7052_v9 = vadd.f32 %v7025_v31, %v6996_v42  ;;  %v7006_v15 = vmul.f32 %v6979_v17, %v11682_v40  ;;  %v7007_v45 = vmul.f32 %v6979_v17, %v11685_v18  ;;  %v7008_v57 = vmul.f32 %v6979_v17, %v11695_v6 }
 0x54e   :  { %7078 = vst [vmem:[%s11893_s8 + $0x48] sm:$0xff] %v7046_v11  ;;  %v7009_v40 = vmul.f32 %v6979_v17, %v11705_v53  ;;  %v7010_v18 = vmul.f32 %v6979_v17, %v11712_v7  ;;  %v7012_v6 = vmul.f32 %v6979_v17, %v11724_v41 }
 0x54f   :  { %7079 = vst [vmem:[%s11893_s8 + $0x50] sm:$0xff] %v7047_v62 }
 0x550   :  { %7080 = vst [vmem:[%s11893_s8 + $0x58] sm:$0xff] %v7048_v0  ;;  %v7035_v48 = vpop.permute.xlu0 %7034 }
 0x551   :  { %7081 = vst [vmem:[%s11893_s8 + $0x60] sm:$0xff] %v7049_v25  ;;  %v7061_v30 = vadd.f32 %v7035_v48, %v7005_v4  ;;  %v6974_v23 = vpop.permute.xlu1 %6973  ;;  %v7062_v52 = vadd.f32 %v7035_v48, %v7006_v15  ;;  %v7063_v32 = vadd.f32 %v7035_v48, %v7007_v45  ;;  %v7064_v58 = vadd.f32 %v7035_v48, %v7008_v57 }
 0x552   :  { %7082 = vst [vmem:[%s11893_s8 + $0x68] sm:$0xff] %v7050_v29  ;;  %v7065_v51 = vadd.f32 %v7035_v48, %v7009_v40  ;;  %v7066_v14 = vadd.f32 %v7035_v48, %v7010_v18  ;;  %v7067_v53 = vadd.f32 %v7035_v48, %v7011_v20  ;;  %v7068_v7 = vadd.f32 %v7035_v48, %v7012_v6 }
 0x553   :  { %7083 = vst [vmem:[%s11893_s8 + $0x70] sm:$0xff] %v7051_v12  ;;  %v6997_v16 = vmul.f32 %v6974_v23, %v11643_v44  ;;  %v6998_v55 = vmul.f32 %v6974_v23, %v11646_v36  ;;  %v6999_v41 = vmul.f32 %v6974_v23, %v11649_v3  ;;  %v7000_v10 = vmul.f32 %v6974_v23, %v11659_v8 }
 0x554   :  { %7084 = vst [vmem:[%s11893_s8 + $0x78] sm:$0xff] %v7052_v9  ;;  %v7001_v44 = vmul.f32 %v6974_v23, %v11667_v28  ;;  %v7002_v3 = vmul.f32 %v6974_v23, %v11674_v56  ;;  %v7003_v38 = vmul.f32 %v6974_v23, %v11688_v21  ;;  %v7004_v8 = vmul.f32 %v6974_v23, %v11700_v13 }
 0x555   :  { %7093 = vst [vmem:[%s11893_s8 + $0xc0] sm:$0xff] %v7061_v30 }
 0x556   :  { %7094 = vst [vmem:[%s11893_s8 + $0xc8] sm:$0xff] %v7062_v52 }
 0x557   :  { %7095 = vst [vmem:[%s11893_s8 + $0xd0] sm:$0xff] %v7063_v32 }
 0x558   :  { %7096 = vst [vmem:[%s11893_s8 + $0xd8] sm:$0xff] %v7064_v58 }
 0x559   :  { %7097 = vst [vmem:[%s11893_s8 + $0xe0] sm:$0xff] %v7065_v51  ;;  %v7030_v22 = vpop.permute.xlu1 %7029 }
 0x55a   :  { %7098 = vst [vmem:[%s11893_s8 + $0xe8] sm:$0xff] %v7066_v14  ;;  %v7053_v60 = vadd.f32 %v7030_v22, %v6997_v16  ;;  %v7054_v63 = vadd.f32 %v7030_v22, %v6998_v55  ;;  %v7055_v36 = vadd.f32 %v7030_v22, %v6999_v41  ;;  %v7056_v61 = vadd.f32 %v7030_v22, %v7000_v10 }
 0x55b   :  { %7099 = vst [vmem:[%s11893_s8 + $0xf0] sm:$0xff] %v7067_v53  ;;  %v7057_v59 = vadd.f32 %v7030_v22, %v7001_v44  ;;  %v7058_v33 = vadd.f32 %v7030_v22, %v7002_v3  ;;  %v7059_v28 = vadd.f32 %v7030_v22, %v7003_v38  ;;  %v7060_v56 = vadd.f32 %v7030_v22, %v7004_v8 }
 0x55c   :  { %7100 = vst [vmem:[%s11893_s8 + $0xf8] sm:$0xff] %v7068_v7 }
 0x55d   :  { %7085 = vst [vmem:[%s11893_s8 + $0x80] sm:$0xff] %v7053_v60 }
 0x55e   :  { %7086 = vst [vmem:[%s11893_s8 + $0x88] sm:$0xff] %v7054_v63 }
 0x55f   :  { %7087 = vst [vmem:[%s11893_s8 + $0x90] sm:$0xff] %v7055_v36 }
 0x560   :  { %7088 = vst [vmem:[%s11893_s8 + $0x98] sm:$0xff] %v7056_v61 }
 0x561   :  { %7089 = vst [vmem:[%s11893_s8 + $0xa0] sm:$0xff] %v7057_v59 }
 0x562   :  { %7090 = vst [vmem:[%s11893_s8 + $0xa8] sm:$0xff] %v7058_v33 }
 0x563   :  { %7091 = vst [vmem:[%s11893_s8 + $0xb0] sm:$0xff] %v7059_v28 }
 0x564   :  { %7092 = vst [vmem:[%s11893_s8 + $0xb8] sm:$0xff] %v7060_v56 }

</bundles_post_ra>
